<compile_context>
chip_gen: v6e
topology: v6e:2x2x1
jax: 0.10.0
libtpu: 0.0.40
codegen_flags: <defaults>
</compile_context>

<pallas_src>
import functools

import numpy as np

import jax
import jax.numpy as jnp
from jax.experimental import pallas as pl
from jax.experimental.pallas import tpu as pltpu


# Whole fused working set (weights + selection matrices + activations) is
# < 2 MiB, so 32 MiB is generous yet safely under every generation's VMEM.
VMEM_LIMIT = 32 * 1024 * 1024


def _round8(n):
    return ((n + 7) // 8) * 8


# ----------------------------------------------------------------------------
# Host-side geometry: 0/1 selection matrices (zero padding baked in)
# ----------------------------------------------------------------------------
def _conv_selection(hin, win, kh, kw, stride, pad, m_in_pad):
    """S[t*m_out + o, r] = 1 iff output position o of tap t reads input row r
    (row-major spatial flattening).  Taps falling into padding stay zero.
    Returns (S, ho, wo, m_out_pad)."""
    ho = (hin + 2 * pad - kh) // stride + 1
    wo = (win + 2 * pad - kw) // stride + 1
    m_out = _round8(ho * wo)
    S = np.zeros((kh * kw * m_out, m_in_pad), np.float32)
    for ki in range(kh):
        for kj in range(kw):
            t = ki * kw + kj
            for oi in range(ho):
                for oj in range(wo):
                    ii = oi * stride + ki - pad
                    jj = oj * stride + kj - pad
                    if 0 <= ii < hin and 0 <= jj < win:
                        S[t * m_out + oi * wo + oj, ii * win + jj] = 1.0
    return S, ho, wo, m_out


# ----------------------------------------------------------------------------
# In-kernel building blocks (pure values, register accumulation)
# ----------------------------------------------------------------------------
def _conv(x, s_ref, w_ref, shift_ref, relu, identity=None):
    """x: [m_in, cin] bf16.  s_ref: [T*m_out, m_in] bf16 selection matrix.
    w_ref: [T, cin, cout] bf16 (BN scale folded in).  shift_ref: [1, cout] f32.
    Returns [m_out, cout] f32 (register accumulation, fused epilogue)."""
    taps = w_ref.shape[0]
    m_out = s_ref.shape[0] // taps
    # One stacked gather GEMM for all taps (exact: 0/1 selection of bf16).
    g = jnp.dot(s_ref[...], x, preferred_element_type=jnp.float32)
    g = g.astype(jnp.bfloat16)
    acc = None
    for t in range(taps):                               # static, unrolled
        gt = g[t * m_out:(t + 1) * m_out, :]            # sublane-aligned slice
        c = jnp.dot(gt, w_ref[t], preferred_element_type=jnp.float32)
        acc = c if acc is None else acc + c
    y = acc + shift_ref[...]
    if identity is not None:
        y = y + identity                                # fused residual add
    if relu:
        y = jnp.maximum(y, 0.0)
    return y


def _maxpool(x, s_ref, taps):
    """3x3/2 max pool via tap-wise selection GEMMs.  Zero padding is valid
    because x is post-ReLU (>= 0)."""
    m_out = s_ref.shape[0] // taps
    g = jnp.dot(s_ref[...], x, preferred_element_type=jnp.float32)
    m = None
    for t in range(taps):
        gt = g[t * m_out:(t + 1) * m_out, :]
        m = gt if m is None else jnp.maximum(m, gt)
    return m


def _basic_block(x, refs, has_down):
    s1, w1, b1 = refs[0], refs[1], refs[2]
    if has_down:
        sd, wd, bd = refs[3], refs[4], refs[5]
        s2, w2, b2 = refs[6], refs[7], refs[8]
    else:
        s2, w2, b2 = refs[3], refs[4], refs[5]
    out1 = _conv(x, s1, w1, b1, relu=True).astype(jnp.bfloat16)
    if has_down:
        idn = _conv(x, sd, wd, bd, relu=False)          # fused 1x1/s2 downsample
    else:
        idn = x.astype(jnp.float32)
    # residual add + ReLU fused into conv2's epilogue
    return _conv(out1, s2, w2, b2, relu=True, identity=idn)


def _resnet_kernel(*refs, has_down):
    """Whole network for one image.  Ref layout:
      [0] patches [1, M_stem, Kp] bf16   (stem im2col, per image)
      [1] stem_w  [Kp, C0]  bf16
      [2] stem_b  [1, C0]   f32
      [3] s_mp    [9*M_mp, M_stem] bf16  (maxpool selection)
      per stage : s1, w1, b1, (sd, wd, bd,) s2, w2, b2
      [-2] gap_w  [M_last, 1] f32        (masked 1/(Ho*Wo) GAP weights)
      [-1] out    [1, 1, C_last] f32
    """
    pat_ref, stem_w_ref, stem_b_ref, s_mp_ref = refs[0], refs[1], refs[2], refs[3]
    gap_ref, out_ref = refs[-2], refs[-1]

    # Stem: one GEMM + BN shift + ReLU.
    x = jnp.dot(pat_ref[0], stem_w_ref[...], preferred_element_type=jnp.float32)
    x = jnp.maximum(x + stem_b_ref[...], 0.0).astype(jnp.bfloat16)

    # Fused 3x3/2 max pool.
    x = _maxpool(x, s_mp_ref, taps=9).astype(jnp.bfloat16)

    # Stages (all activations stay on-chip).
    idx = 4
    y = None
    for hd in has_down:
        n = 9 if hd else 6
        y = _basic_block(x, refs[idx:idx + n], hd)      # f32
        x = y.astype(jnp.bfloat16)
        idx += n

    # Fused, masked global average pool (padded rows weighted 0).
    out_ref[0] = jnp.sum(y * gap_ref[...], axis=0,
                         keepdims=True).astype(out_ref.dtype)


# ----------------------------------------------------------------------------
# Wrapper: stem im2col + selection-matrix plan + single pallas_call
# ----------------------------------------------------------------------------
def _bcast_spec(shape):
    shape = tuple(int(d) for d in shape)
    nd = len(shape)

    def index_map(b):
        return (0,) * nd

    return pl.BlockSpec(shape, index_map)


def resnet_forward(x_nchw, params, enc_dim=64):
    B, cin, H, W = x_nchw.shape
    x = jnp.transpose(x_nchw, (0, 2, 3, 1)).astype(jnp.bfloat16)   # NHWC

    stem_w3 = params["stem"]["w"]                    # [49, cin, c0]
    c0 = stem_w3.shape[-1]

    # --- stem 7x7/2 pad3: im2col in the wrapper (only K=3-channel layer) ---
    KH = KW = 7
    ST, PD = 2, 3
    ho = (H + 2 * PD - KH) // ST + 1
    wo = (W + 2 * PD - KW) // ST + 1
    m_stem = ho * wo
    xp = jnp.pad(x, ((0, 0), (PD, PD), (PD, PD), (0, 0)))
    cols = [xp[:, ki:ki + ST * ho:ST, kj:kj + ST * wo:ST, :]
            for ki in range(KH) for kj in range(KW)]
    patches = jnp.stack(cols, axis=3).reshape(B, m_stem, KH * KW * cin)
    k_real = KH * KW * cin
    k_pad = _round8(k_real)
    patches = jnp.pad(patches, ((0, 0), (0, 0), (0, k_pad - k_real)))
    stem_w = jnp.pad(stem_w3.reshape(k_real, c0), ((0, k_pad - k_real), (0, 0)))

    arrays = [patches, stem_w, params["stem"]["shift"]]
    flops = 2 * B * m_stem * k_pad * c0

    # --- fused 3x3/2 pad1 max pool selection ---
    s_mp, h_cur, w_cur, m_cur = _conv_selection(ho, wo, 3, 3, 2, 1, m_stem)
    arrays.append(jnp.asarray(s_mp, jnp.bfloat16))
    flops += 2 * B * s_mp.shape[0] * s_mp.shape[1] * c0

    # --- stages ---
    has_down = []
    c_cur = c0
    for i, st in enumerate(params["stages"]):
        stride = 1 if i == 0 else 2
        hd = "down" in st
        has_down.append(hd)
        c1 = st["conv1"]["w"].shape[-1]

        s1, h1, w1, m1 = _conv_selection(h_cur, w_cur, 3, 3, stride, 1, m_cur)
        arrays += [jnp.asarray(s1, jnp.bfloat16), st["conv1"]["w"],
                   st["conv1"]["shift"]]
        flops += 2 * B * s1.shape[0] * (s1.shape[1] * c_cur + c_cur * c1)

        if hd:
            sd, _, _, _ = _conv_selection(h_cur, w_cur, 1, 1, stride, 0, m_cur)
            arrays += [jnp.asarray(sd, jnp.bfloat16), st["down"]["w"],
                       st["down"]["shift"]]
            flops += 2 * B * sd.shape[0] * (sd.shape[1] * c_cur + c_cur * c1)

        s2, h2, w2, m2 = _conv_selection(h1, w1, 3, 3, 1, 1, m1)
        arrays += [jnp.asarray(s2, jnp.bfloat16), st["conv2"]["w"],
                   st["conv2"]["shift"]]
        flops += 2 * B * s2.shape[0] * (s2.shape[1] * c1 + c1 * c1)

        h_cur, w_cur, m_cur, c_cur = h2, w2, m2, c1

    # --- masked GAP weights (padded rows contribute exactly zero) ---
    gap = np.zeros((m_cur, 1), np.float32)
    gap[:h_cur * w_cur, 0] = 1.0 / float(h_cur * w_cur)
    arrays.append(jnp.asarray(gap))

    in_specs = [pl.BlockSpec((1, m_stem, k_pad), lambda b: (b, 0, 0))]
    in_specs += [_bcast_spec(a.shape) for a in arrays[1:]]

    bytes_accessed = int(sum(int(np.prod(a.shape)) * a.dtype.itemsize
                             for a in arrays) + B * c_cur * 4)

    out = pl.pallas_call(
        functools.partial(_resnet_kernel, has_down=tuple(has_down)),
        out_shape=jax.ShapeDtypeStruct((B, 1, c_cur), jnp.float32),
        grid=(B,),
        in_specs=in_specs,
        out_specs=pl.BlockSpec((1, 1, c_cur), lambda b: (b, 0, 0)),
        compiler_params=pltpu.CompilerParams(
            dimension_semantics=("parallel",),
            vmem_limit_bytes=VMEM_LIMIT),
        cost_estimate=pl.CostEstimate(flops=int(flops), transcendentals=0,
                                      bytes_accessed=bytes_accessed),
    )(*arrays)

    return out[:, 0, :enc_dim]


# ----------------------------------------------------------------------------
# Deterministic parameters (inference BN folded: scale into w, shift separate)
# ----------------------------------------------------------------------------
def make_conv_bn(key, cin, cout, kh, kw):
    k1, k2, k3, k4, k5 = jax.random.split(key, 5)
    fan_in = kh * kw * cin
    w = jax.random.normal(k1, (kh * kw, cin, cout), jnp.float32) / jnp.sqrt(
        float(fan_in))
    gamma = 1.0 + 0.1 * jax.random.normal(k2, (cout,), jnp.float32)
    beta = 0.1 * jax.random.normal(k3, (cout,), jnp.float32)
    mean = 0.1 * jax.random.normal(k4, (cout,), jnp.float32)
    var = jnp.abs(jax.random.normal(k5, (cout,), jnp.float32)) + 0.5
    scale = gamma / jnp.sqrt(var + 1e-5)
    shift = beta - mean * scale
    w = w * scale[None, None, :]                    # fold BN scale into conv
    return {"w": w.astype(jnp.bfloat16), "shift": shift.reshape(1, cout)}


def make_stage(key, cin, cout, stride):
    ks = jax.random.split(key, 3)
    p = {"conv1": make_conv_bn(ks[0], cin, cout, 3, 3),
         "conv2": make_conv_bn(ks[1], cout, cout, 3, 3)}
    if stride != 1 or cin != cout:
        p["down"] = make_conv_bn(ks[2], cin, cout, 1, 1)
    return p


def make_resnet_params(key, widths=(8, 16, 32, 64)):
    keys = jax.random.split(key, 1 + len(widths))
    params = {"stem": make_conv_bn(keys[0], 3, widths[0], 7, 7),
              "stages": []}
    cin = widths[0]
    for i, cout in enumerate(widths):
        stride = 1 if i == 0 else 2
        params["stages"].append(make_stage(keys[1 + i], cin, cout, stride))
        cin = cout
    return params


# ----------------------------------------------------------------------------
if __name__ == "__main__":
    key = jax.random.PRNGKey(0)
    kx, kp = jax.random.split(key)
    # NCHW like the PyTorch module's input.
    x = jax.random.normal(kx, (2, 3, 32, 32), jnp.float32)
    params = make_resnet_params(kp)

    fwd = jax.jit(resnet_forward)
    feats = jax.block_until_ready(fwd(x, params))

    enc_dim = 64
    assert feats.shape == (2, enc_dim), feats.shape
    assert feats.dtype == jnp.float32
    assert bool(jnp.all(jnp.isfinite(feats)))
    print("KERNEL_OK")
</pallas_src>

<mosaic_0001>
module attributes {stable_mosaic.version = 11 : i64} {
  func.func @_resnet_kernel(%arg0: i32, %arg1: memref<1x256x152xbf16, #tpu.memory_space<vmem>>, %arg2: memref<152x8xbf16, #tpu.memory_space<vmem>>, %arg3: memref<1x8xf32, #tpu.memory_space<vmem>>, %arg4: memref<576x256xbf16, #tpu.memory_space<vmem>>, %arg5: memref<576x64xbf16, #tpu.memory_space<vmem>>, %arg6: memref<9x8x8xbf16, #tpu.memory_space<vmem>>, %arg7: memref<1x8xf32, #tpu.memory_space<vmem>>, %arg8: memref<576x64xbf16, #tpu.memory_space<vmem>>, %arg9: memref<9x8x8xbf16, #tpu.memory_space<vmem>>, %arg10: memref<1x8xf32, #tpu.memory_space<vmem>>, %arg11: memref<144x64xbf16, #tpu.memory_space<vmem>>, %arg12: memref<9x8x16xbf16, #tpu.memory_space<vmem>>, %arg13: memref<1x16xf32, #tpu.memory_space<vmem>>, %arg14: memref<16x64xbf16, #tpu.memory_space<vmem>>, %arg15: memref<1x8x16xbf16, #tpu.memory_space<vmem>>, %arg16: memref<1x16xf32, #tpu.memory_space<vmem>>, %arg17: memref<144x16xbf16, #tpu.memory_space<vmem>>, %arg18: memref<9x16x16xbf16, #tpu.memory_space<vmem>>, %arg19: memref<1x16xf32, #tpu.memory_space<vmem>>, %arg20: memref<72x16xbf16, #tpu.memory_space<vmem>>, %arg21: memref<9x16x32xbf16, #tpu.memory_space<vmem>>, %arg22: memref<1x32xf32, #tpu.memory_space<vmem>>, %arg23: memref<8x16xbf16, #tpu.memory_space<vmem>>, %arg24: memref<1x16x32xbf16, #tpu.memory_space<vmem>>, %arg25: memref<1x32xf32, #tpu.memory_space<vmem>>, %arg26: memref<72x8xbf16, #tpu.memory_space<vmem>>, %arg27: memref<9x32x32xbf16, #tpu.memory_space<vmem>>, %arg28: memref<1x32xf32, #tpu.memory_space<vmem>>, %arg29: memref<72x8xbf16, #tpu.memory_space<vmem>>, %arg30: memref<9x32x64xbf16, #tpu.memory_space<vmem>>, %arg31: memref<1x64xf32, #tpu.memory_space<vmem>>, %arg32: memref<8x8xbf16, #tpu.memory_space<vmem>>, %arg33: memref<1x32x64xbf16, #tpu.memory_space<vmem>>, %arg34: memref<1x64xf32, #tpu.memory_space<vmem>>, %arg35: memref<72x8xbf16, #tpu.memory_space<vmem>>, %arg36: memref<9x64x64xbf16, #tpu.memory_space<vmem>>, %arg37: memref<1x64xf32, #tpu.memory_space<vmem>>, %arg38: memref<8x1xf32, #tpu.memory_space<vmem>>, %arg39: memref<1x1x64xf32, #tpu.memory_space<vmem>>) attributes {dimension_semantics = [#tpu.dimension_semantics<parallel>], iteration_bounds = array<i64: 2>, scalar_prefetch = 0 : i64, scratch_operands = 0 : i64, tpu.core_type = #tpu.core_type<tc>, window_params = [{transform_indices = @transform_0, window_bounds = array<i64: 1, 256, 152>}, {pipeline_mode = #tpu.pipeline_mode<synchronous>, transform_indices = @transform_1, window_bounds = array<i64: 152, 8>}, {pipeline_mode = #tpu.pipeline_mode<synchronous>, transform_indices = @transform_2, window_bounds = array<i64: 1, 8>}, {pipeline_mode = #tpu.pipeline_mode<synchronous>, transform_indices = @transform_3, window_bounds = array<i64: 576, 256>}, {pipeline_mode = #tpu.pipeline_mode<synchronous>, transform_indices = @transform_4, window_bounds = array<i64: 576, 64>}, {pipeline_mode = #tpu.pipeline_mode<synchronous>, transform_indices = @transform_5, window_bounds = array<i64: 9, 8, 8>}, {pipeline_mode = #tpu.pipeline_mode<synchronous>, transform_indices = @transform_6, window_bounds = array<i64: 1, 8>}, {pipeline_mode = #tpu.pipeline_mode<synchronous>, transform_indices = @transform_7, window_bounds = array<i64: 576, 64>}, {pipeline_mode = #tpu.pipeline_mode<synchronous>, transform_indices = @transform_8, window_bounds = array<i64: 9, 8, 8>}, {pipeline_mode = #tpu.pipeline_mode<synchronous>, transform_indices = @transform_9, window_bounds = array<i64: 1, 8>}, {pipeline_mode = #tpu.pipeline_mode<synchronous>, transform_indices = @transform_10, window_bounds = array<i64: 144, 64>}, {pipeline_mode = #tpu.pipeline_mode<synchronous>, transform_indices = @transform_11, window_bounds = array<i64: 9, 8, 16>}, {pipeline_mode = #tpu.pipeline_mode<synchronous>, transform_indices = @transform_12, window_bounds = array<i64: 1, 16>}, {pipeline_mode = #tpu.pipeline_mode<synchronous>, transform_indices = @transform_13, window_bounds = array<i64: 16, 64>}, {pipeline_mode = #tpu.pipeline_mode<synchronous>, transform_indices = @transform_14, window_bounds = array<i64: 1, 8, 16>}, {pipeline_mode = #tpu.pipeline_mode<synchronous>, transform_indices = @transform_15, window_bounds = array<i64: 1, 16>}, {pipeline_mode = #tpu.pipeline_mode<synchronous>, transform_indices = @transform_16, window_bounds = array<i64: 144, 16>}, {pipeline_mode = #tpu.pipeline_mode<synchronous>, transform_indices = @transform_17, window_bounds = array<i64: 9, 16, 16>}, {pipeline_mode = #tpu.pipeline_mode<synchronous>, transform_indices = @transform_18, window_bounds = array<i64: 1, 16>}, {pipeline_mode = #tpu.pipeline_mode<synchronous>, transform_indices = @transform_19, window_bounds = array<i64: 72, 16>}, {pipeline_mode = #tpu.pipeline_mode<synchronous>, transform_indices = @transform_20, window_bounds = array<i64: 9, 16, 32>}, {pipeline_mode = #tpu.pipeline_mode<synchronous>, transform_indices = @transform_21, window_bounds = array<i64: 1, 32>}, {pipeline_mode = #tpu.pipeline_mode<synchronous>, transform_indices = @transform_22, window_bounds = array<i64: 8, 16>}, {pipeline_mode = #tpu.pipeline_mode<synchronous>, transform_indices = @transform_23, window_bounds = array<i64: 1, 16, 32>}, {pipeline_mode = #tpu.pipeline_mode<synchronous>, transform_indices = @transform_24, window_bounds = array<i64: 1, 32>}, {pipeline_mode = #tpu.pipeline_mode<synchronous>, transform_indices = @transform_25, window_bounds = array<i64: 72, 8>}, {pipeline_mode = #tpu.pipeline_mode<synchronous>, transform_indices = @transform_26, window_bounds = array<i64: 9, 32, 32>}, {pipeline_mode = #tpu.pipeline_mode<synchronous>, transform_indices = @transform_27, window_bounds = array<i64: 1, 32>}, {pipeline_mode = #tpu.pipeline_mode<synchronous>, transform_indices = @transform_28, window_bounds = array<i64: 72, 8>}, {pipeline_mode = #tpu.pipeline_mode<synchronous>, transform_indices = @transform_29, window_bounds = array<i64: 9, 32, 64>}, {pipeline_mode = #tpu.pipeline_mode<synchronous>, transform_indices = @transform_30, window_bounds = array<i64: 1, 64>}, {pipeline_mode = #tpu.pipeline_mode<synchronous>, transform_indices = @transform_31, window_bounds = array<i64: 8, 8>}, {pipeline_mode = #tpu.pipeline_mode<synchronous>, transform_indices = @transform_32, window_bounds = array<i64: 1, 32, 64>}, {pipeline_mode = #tpu.pipeline_mode<synchronous>, transform_indices = @transform_33, window_bounds = array<i64: 1, 64>}, {pipeline_mode = #tpu.pipeline_mode<synchronous>, transform_indices = @transform_34, window_bounds = array<i64: 72, 8>}, {pipeline_mode = #tpu.pipeline_mode<synchronous>, transform_indices = @transform_35, window_bounds = array<i64: 9, 64, 64>}, {pipeline_mode = #tpu.pipeline_mode<synchronous>, transform_indices = @transform_36, window_bounds = array<i64: 1, 64>}, {pipeline_mode = #tpu.pipeline_mode<synchronous>, transform_indices = @transform_37, window_bounds = array<i64: 8, 1>}, {transform_indices = @transform_38, window_bounds = array<i64: 1, 1, 64>}]} {
    %c0 = arith.constant 0 : index
    %c0_0 = arith.constant 0 : index
    %c0_1 = arith.constant 0 : index
    %0 = vector.load %arg1[%c0, %c0_0, %c0_1] : memref<1x256x152xbf16, #tpu.memory_space<vmem>>, vector<1x256x152xbf16>
    %1 = vector.shape_cast %0 : vector<1x256x152xbf16> to vector<256x152xbf16>
    %c0_2 = arith.constant 0 : index
    %c0_3 = arith.constant 0 : index
    %2 = vector.load %arg2[%c0_2, %c0_3] : memref<152x8xbf16, #tpu.memory_space<vmem>>, vector<152x8xbf16>
    %cst = arith.constant dense<0.000000e+00> : vector<256x8xf32>
    %3 = tpu.matmul %1, %2, %cst {dimension_numbers = #tpu.dot_dimension_numbers<[1], [0], [0], [1], [0, 0, 1, 1], [], []>} : vector<256x152xbf16>, vector<152x8xbf16>, vector<256x8xf32> -> vector<256x8xf32>
    %c0_4 = arith.constant 0 : index
    %c0_5 = arith.constant 0 : index
    %4 = vector.load %arg3[%c0_4, %c0_5] : memref<1x8xf32, #tpu.memory_space<vmem>>, vector<1x8xf32>
    %5 = vector.broadcast %4 : vector<1x8xf32> to vector<256x8xf32>
    %6 = arith.addf %3, %5 : vector<256x8xf32>
    %cst_6 = arith.constant 0.000000e+00 : f32
    %7 = vector.broadcast %cst_6 : f32 to vector<256x8xf32>
    %8 = arith.maximumf %6, %7 : vector<256x8xf32>
    %9 = arith.truncf %8 : vector<256x8xf32> to vector<256x8xbf16>
    %c0_7 = arith.constant 0 : index
    %c0_8 = arith.constant 0 : index
    %10 = vector.load %arg4[%c0_7, %c0_8] : memref<576x256xbf16, #tpu.memory_space<vmem>>, vector<576x256xbf16>
    %cst_9 = arith.constant dense<0.000000e+00> : vector<576x8xf32>
    %11 = tpu.matmul %10, %9, %cst_9 {dimension_numbers = #tpu.dot_dimension_numbers<[1], [0], [0], [1], [0, 0, 1, 1], [], []>} : vector<576x256xbf16>, vector<256x8xbf16>, vector<576x8xf32> -> vector<576x8xf32>
    %12 = vector.extract_strided_slice %11 {offsets = [0, 0], sizes = [64, 8], strides = [1, 1]} : vector<576x8xf32> to vector<64x8xf32>
    %13 = vector.extract_strided_slice %11 {offsets = [64, 0], sizes = [64, 8], strides = [1, 1]} : vector<576x8xf32> to vector<64x8xf32>
    %14 = arith.maximumf %12, %13 : vector<64x8xf32>
    %15 = vector.extract_strided_slice %11 {offsets = [128, 0], sizes = [64, 8], strides = [1, 1]} : vector<576x8xf32> to vector<64x8xf32>
    %16 = arith.maximumf %14, %15 : vector<64x8xf32>
    %17 = vector.extract_strided_slice %11 {offsets = [192, 0], sizes = [64, 8], strides = [1, 1]} : vector<576x8xf32> to vector<64x8xf32>
    %18 = arith.maximumf %16, %17 : vector<64x8xf32>
    %19 = vector.extract_strided_slice %11 {offsets = [256, 0], sizes = [64, 8], strides = [1, 1]} : vector<576x8xf32> to vector<64x8xf32>
    %20 = arith.maximumf %18, %19 : vector<64x8xf32>
    %21 = vector.extract_strided_slice %11 {offsets = [320, 0], sizes = [64, 8], strides = [1, 1]} : vector<576x8xf32> to vector<64x8xf32>
    %22 = arith.maximumf %20, %21 : vector<64x8xf32>
    %23 = vector.extract_strided_slice %11 {offsets = [384, 0], sizes = [64, 8], strides = [1, 1]} : vector<576x8xf32> to vector<64x8xf32>
    %24 = arith.maximumf %22, %23 : vector<64x8xf32>
    %25 = vector.extract_strided_slice %11 {offsets = [448, 0], sizes = [64, 8], strides = [1, 1]} : vector<576x8xf32> to vector<64x8xf32>
    %26 = arith.maximumf %24, %25 : vector<64x8xf32>
    %27 = vector.extract_strided_slice %11 {offsets = [512, 0], sizes = [64, 8], strides = [1, 1]} : vector<576x8xf32> to vector<64x8xf32>
    %28 = arith.maximumf %26, %27 : vector<64x8xf32>
    %29 = arith.truncf %28 : vector<64x8xf32> to vector<64x8xbf16>
    %c0_10 = arith.constant 0 : index
    %c0_11 = arith.constant 0 : index
    %30 = vector.load %arg5[%c0_10, %c0_11] : memref<576x64xbf16, #tpu.memory_space<vmem>>, vector<576x64xbf16>
    %cst_12 = arith.constant dense<0.000000e+00> : vector<576x8xf32>
    %31 = tpu.matmul %30, %29, %cst_12 {dimension_numbers = #tpu.dot_dimension_numbers<[1], [0], [0], [1], [0, 0, 1, 1], [], []>} : vector<576x64xbf16>, vector<64x8xbf16>, vector<576x8xf32> -> vector<576x8xf32>
    %32 = arith.truncf %31 : vector<576x8xf32> to vector<576x8xbf16>
    %33 = vector.extract_strided_slice %32 {offsets = [0, 0], sizes = [64, 8], strides = [1, 1]} : vector<576x8xbf16> to vector<64x8xbf16>
    %c0_13 = arith.constant 0 : index
    %c0_14 = arith.constant 0 : index
    %c0_15 = arith.constant 0 : index
    %34 = vector.load %arg6[%c0_13, %c0_14, %c0_15] : memref<9x8x8xbf16, #tpu.memory_space<vmem>>, vector<1x8x8xbf16>
    %35 = vector.shape_cast %34 : vector<1x8x8xbf16> to vector<8x8xbf16>
    %cst_16 = arith.constant dense<0.000000e+00> : vector<64x8xf32>
    %36 = tpu.matmul %33, %35, %cst_16 {dimension_numbers = #tpu.dot_dimension_numbers<[1], [0], [0], [1], [0, 0, 1, 1], [], []>} : vector<64x8xbf16>, vector<8x8xbf16>, vector<64x8xf32> -> vector<64x8xf32>
    %37 = vector.extract_strided_slice %32 {offsets = [64, 0], sizes = [64, 8], strides = [1, 1]} : vector<576x8xbf16> to vector<64x8xbf16>
    %c1 = arith.constant 1 : index
    %c0_17 = arith.constant 0 : index
    %c0_18 = arith.constant 0 : index
    %38 = vector.load %arg6[%c1, %c0_17, %c0_18] : memref<9x8x8xbf16, #tpu.memory_space<vmem>>, vector<1x8x8xbf16>
    %39 = vector.shape_cast %38 : vector<1x8x8xbf16> to vector<8x8xbf16>
    %cst_19 = arith.constant dense<0.000000e+00> : vector<64x8xf32>
    %40 = tpu.matmul %37, %39, %cst_19 {dimension_numbers = #tpu.dot_dimension_numbers<[1], [0], [0], [1], [0, 0, 1, 1], [], []>} : vector<64x8xbf16>, vector<8x8xbf16>, vector<64x8xf32> -> vector<64x8xf32>
    %41 = arith.addf %36, %40 : vector<64x8xf32>
    %42 = vector.extract_strided_slice %32 {offsets = [128, 0], sizes = [64, 8], strides = [1, 1]} : vector<576x8xbf16> to vector<64x8xbf16>
    %c2 = arith.constant 2 : index
    %c0_20 = arith.constant 0 : index
    %c0_21 = arith.constant 0 : index
    %43 = vector.load %arg6[%c2, %c0_20, %c0_21] : memref<9x8x8xbf16, #tpu.memory_space<vmem>>, vector<1x8x8xbf16>
    %44 = vector.shape_cast %43 : vector<1x8x8xbf16> to vector<8x8xbf16>
    %cst_22 = arith.constant dense<0.000000e+00> : vector<64x8xf32>
    %45 = tpu.matmul %42, %44, %cst_22 {dimension_numbers = #tpu.dot_dimension_numbers<[1], [0], [0], [1], [0, 0, 1, 1], [], []>} : vector<64x8xbf16>, vector<8x8xbf16>, vector<64x8xf32> -> vector<64x8xf32>
    %46 = arith.addf %41, %45 : vector<64x8xf32>
    %47 = vector.extract_strided_slice %32 {offsets = [192, 0], sizes = [64, 8], strides = [1, 1]} : vector<576x8xbf16> to vector<64x8xbf16>
    %c3 = arith.constant 3 : index
    %c0_23 = arith.constant 0 : index
    %c0_24 = arith.constant 0 : index
    %48 = vector.load %arg6[%c3, %c0_23, %c0_24] : memref<9x8x8xbf16, #tpu.memory_space<vmem>>, vector<1x8x8xbf16>
    %49 = vector.shape_cast %48 : vector<1x8x8xbf16> to vector<8x8xbf16>
    %cst_25 = arith.constant dense<0.000000e+00> : vector<64x8xf32>
    %50 = tpu.matmul %47, %49, %cst_25 {dimension_numbers = #tpu.dot_dimension_numbers<[1], [0], [0], [1], [0, 0, 1, 1], [], []>} : vector<64x8xbf16>, vector<8x8xbf16>, vector<64x8xf32> -> vector<64x8xf32>
    %51 = arith.addf %46, %50 : vector<64x8xf32>
    %52 = vector.extract_strided_slice %32 {offsets = [256, 0], sizes = [64, 8], strides = [1, 1]} : vector<576x8xbf16> to vector<64x8xbf16>
    %c4 = arith.constant 4 : index
    %c0_26 = arith.constant 0 : index
    %c0_27 = arith.constant 0 : index
    %53 = vector.load %arg6[%c4, %c0_26, %c0_27] : memref<9x8x8xbf16, #tpu.memory_space<vmem>>, vector<1x8x8xbf16>
    %54 = vector.shape_cast %53 : vector<1x8x8xbf16> to vector<8x8xbf16>
    %cst_28 = arith.constant dense<0.000000e+00> : vector<64x8xf32>
    %55 = tpu.matmul %52, %54, %cst_28 {dimension_numbers = #tpu.dot_dimension_numbers<[1], [0], [0], [1], [0, 0, 1, 1], [], []>} : vector<64x8xbf16>, vector<8x8xbf16>, vector<64x8xf32> -> vector<64x8xf32>
    %56 = arith.addf %51, %55 : vector<64x8xf32>
    %57 = vector.extract_strided_slice %32 {offsets = [320, 0], sizes = [64, 8], strides = [1, 1]} : vector<576x8xbf16> to vector<64x8xbf16>
    %c5 = arith.constant 5 : index
    %c0_29 = arith.constant 0 : index
    %c0_30 = arith.constant 0 : index
    %58 = vector.load %arg6[%c5, %c0_29, %c0_30] : memref<9x8x8xbf16, #tpu.memory_space<vmem>>, vector<1x8x8xbf16>
    %59 = vector.shape_cast %58 : vector<1x8x8xbf16> to vector<8x8xbf16>
    %cst_31 = arith.constant dense<0.000000e+00> : vector<64x8xf32>
    %60 = tpu.matmul %57, %59, %cst_31 {dimension_numbers = #tpu.dot_dimension_numbers<[1], [0], [0], [1], [0, 0, 1, 1], [], []>} : vector<64x8xbf16>, vector<8x8xbf16>, vector<64x8xf32> -> vector<64x8xf32>
    %61 = arith.addf %56, %60 : vector<64x8xf32>
    %62 = vector.extract_strided_slice %32 {offsets = [384, 0], sizes = [64, 8], strides = [1, 1]} : vector<576x8xbf16> to vector<64x8xbf16>
    %c6 = arith.constant 6 : index
    %c0_32 = arith.constant 0 : index
    %c0_33 = arith.constant 0 : index
    %63 = vector.load %arg6[%c6, %c0_32, %c0_33] : memref<9x8x8xbf16, #tpu.memory_space<vmem>>, vector<1x8x8xbf16>
    %64 = vector.shape_cast %63 : vector<1x8x8xbf16> to vector<8x8xbf16>
    %cst_34 = arith.constant dense<0.000000e+00> : vector<64x8xf32>
    %65 = tpu.matmul %62, %64, %cst_34 {dimension_numbers = #tpu.dot_dimension_numbers<[1], [0], [0], [1], [0, 0, 1, 1], [], []>} : vector<64x8xbf16>, vector<8x8xbf16>, vector<64x8xf32> -> vector<64x8xf32>
    %66 = arith.addf %61, %65 : vector<64x8xf32>
    %67 = vector.extract_strided_slice %32 {offsets = [448, 0], sizes = [64, 8], strides = [1, 1]} : vector<576x8xbf16> to vector<64x8xbf16>
    %c7 = arith.constant 7 : index
    %c0_35 = arith.constant 0 : index
    %c0_36 = arith.constant 0 : index
    %68 = vector.load %arg6[%c7, %c0_35, %c0_36] : memref<9x8x8xbf16, #tpu.memory_space<vmem>>, vector<1x8x8xbf16>
    %69 = vector.shape_cast %68 : vector<1x8x8xbf16> to vector<8x8xbf16>
    %cst_37 = arith.constant dense<0.000000e+00> : vector<64x8xf32>
    %70 = tpu.matmul %67, %69, %cst_37 {dimension_numbers = #tpu.dot_dimension_numbers<[1], [0], [0], [1], [0, 0, 1, 1], [], []>} : vector<64x8xbf16>, vector<8x8xbf16>, vector<64x8xf32> -> vector<64x8xf32>
    %71 = arith.addf %66, %70 : vector<64x8xf32>
    %72 = vector.extract_strided_slice %32 {offsets = [512, 0], sizes = [64, 8], strides = [1, 1]} : vector<576x8xbf16> to vector<64x8xbf16>
    %c8 = arith.constant 8 : index
    %c0_38 = arith.constant 0 : index
    %c0_39 = arith.constant 0 : index
    %73 = vector.load %arg6[%c8, %c0_38, %c0_39] : memref<9x8x8xbf16, #tpu.memory_space<vmem>>, vector<1x8x8xbf16>
    %74 = vector.shape_cast %73 : vector<1x8x8xbf16> to vector<8x8xbf16>
    %cst_40 = arith.constant dense<0.000000e+00> : vector<64x8xf32>
    %75 = tpu.matmul %72, %74, %cst_40 {dimension_numbers = #tpu.dot_dimension_numbers<[1], [0], [0], [1], [0, 0, 1, 1], [], []>} : vector<64x8xbf16>, vector<8x8xbf16>, vector<64x8xf32> -> vector<64x8xf32>
    %76 = arith.addf %71, %75 : vector<64x8xf32>
    %c0_41 = arith.constant 0 : index
    %c0_42 = arith.constant 0 : index
    %77 = vector.load %arg7[%c0_41, %c0_42] : memref<1x8xf32, #tpu.memory_space<vmem>>, vector<1x8xf32>
    %78 = vector.broadcast %77 : vector<1x8xf32> to vector<64x8xf32>
    %79 = arith.addf %76, %78 : vector<64x8xf32>
    %cst_43 = arith.constant 0.000000e+00 : f32
    %80 = vector.broadcast %cst_43 : f32 to vector<64x8xf32>
    %81 = arith.maximumf %79, %80 : vector<64x8xf32>
    %82 = arith.truncf %81 : vector<64x8xf32> to vector<64x8xbf16>
    %83 = arith.extf %29 : vector<64x8xbf16> to vector<64x8xf32>
    %c0_44 = arith.constant 0 : index
    %c0_45 = arith.constant 0 : index
    %84 = vector.load %arg8[%c0_44, %c0_45] : memref<576x64xbf16, #tpu.memory_space<vmem>>, vector<576x64xbf16>
    %cst_46 = arith.constant dense<0.000000e+00> : vector<576x8xf32>
    %85 = tpu.matmul %84, %82, %cst_46 {dimension_numbers = #tpu.dot_dimension_numbers<[1], [0], [0], [1], [0, 0, 1, 1], [], []>} : vector<576x64xbf16>, vector<64x8xbf16>, vector<576x8xf32> -> vector<576x8xf32>
    %86 = arith.truncf %85 : vector<576x8xf32> to vector<576x8xbf16>
    %87 = vector.extract_strided_slice %86 {offsets = [0, 0], sizes = [64, 8], strides = [1, 1]} : vector<576x8xbf16> to vector<64x8xbf16>
    %c0_47 = arith.constant 0 : index
    %c0_48 = arith.constant 0 : index
    %c0_49 = arith.constant 0 : index
    %88 = vector.load %arg9[%c0_47, %c0_48, %c0_49] : memref<9x8x8xbf16, #tpu.memory_space<vmem>>, vector<1x8x8xbf16>
    %89 = vector.shape_cast %88 : vector<1x8x8xbf16> to vector<8x8xbf16>
    %cst_50 = arith.constant dense<0.000000e+00> : vector<64x8xf32>
    %90 = tpu.matmul %87, %89, %cst_50 {dimension_numbers = #tpu.dot_dimension_numbers<[1], [0], [0], [1], [0, 0, 1, 1], [], []>} : vector<64x8xbf16>, vector<8x8xbf16>, vector<64x8xf32> -> vector<64x8xf32>
    %91 = vector.extract_strided_slice %86 {offsets = [64, 0], sizes = [64, 8], strides = [1, 1]} : vector<576x8xbf16> to vector<64x8xbf16>
    %c1_51 = arith.constant 1 : index
    %c0_52 = arith.constant 0 : index
    %c0_53 = arith.constant 0 : index
    %92 = vector.load %arg9[%c1_51, %c0_52, %c0_53] : memref<9x8x8xbf16, #tpu.memory_space<vmem>>, vector<1x8x8xbf16>
    %93 = vector.shape_cast %92 : vector<1x8x8xbf16> to vector<8x8xbf16>
    %cst_54 = arith.constant dense<0.000000e+00> : vector<64x8xf32>
    %94 = tpu.matmul %91, %93, %cst_54 {dimension_numbers = #tpu.dot_dimension_numbers<[1], [0], [0], [1], [0, 0, 1, 1], [], []>} : vector<64x8xbf16>, vector<8x8xbf16>, vector<64x8xf32> -> vector<64x8xf32>
    %95 = arith.addf %90, %94 : vector<64x8xf32>
    %96 = vector.extract_strided_slice %86 {offsets = [128, 0], sizes = [64, 8], strides = [1, 1]} : vector<576x8xbf16> to vector<64x8xbf16>
    %c2_55 = arith.constant 2 : index
    %c0_56 = arith.constant 0 : index
    %c0_57 = arith.constant 0 : index
    %97 = vector.load %arg9[%c2_55, %c0_56, %c0_57] : memref<9x8x8xbf16, #tpu.memory_space<vmem>>, vector<1x8x8xbf16>
    %98 = vector.shape_cast %97 : vector<1x8x8xbf16> to vector<8x8xbf16>
    %cst_58 = arith.constant dense<0.000000e+00> : vector<64x8xf32>
    %99 = tpu.matmul %96, %98, %cst_58 {dimension_numbers = #tpu.dot_dimension_numbers<[1], [0], [0], [1], [0, 0, 1, 1], [], []>} : vector<64x8xbf16>, vector<8x8xbf16>, vector<64x8xf32> -> vector<64x8xf32>
    %100 = arith.addf %95, %99 : vector<64x8xf32>
    %101 = vector.extract_strided_slice %86 {offsets = [192, 0], sizes = [64, 8], strides = [1, 1]} : vector<576x8xbf16> to vector<64x8xbf16>
    %c3_59 = arith.constant 3 : index
    %c0_60 = arith.constant 0 : index
    %c0_61 = arith.constant 0 : index
    %102 = vector.load %arg9[%c3_59, %c0_60, %c0_61] : memref<9x8x8xbf16, #tpu.memory_space<vmem>>, vector<1x8x8xbf16>
    %103 = vector.shape_cast %102 : vector<1x8x8xbf16> to vector<8x8xbf16>
    %cst_62 = arith.constant dense<0.000000e+00> : vector<64x8xf32>
    %104 = tpu.matmul %101, %103, %cst_62 {dimension_numbers = #tpu.dot_dimension_numbers<[1], [0], [0], [1], [0, 0, 1, 1], [], []>} : vector<64x8xbf16>, vector<8x8xbf16>, vector<64x8xf32> -> vector<64x8xf32>
    %105 = arith.addf %100, %104 : vector<64x8xf32>
    %106 = vector.extract_strided_slice %86 {offsets = [256, 0], sizes = [64, 8], strides = [1, 1]} : vector<576x8xbf16> to vector<64x8xbf16>
    %c4_63 = arith.constant 4 : index
    %c0_64 = arith.constant 0 : index
    %c0_65 = arith.constant 0 : index
    %107 = vector.load %arg9[%c4_63, %c0_64, %c0_65] : memref<9x8x8xbf16, #tpu.memory_space<vmem>>, vector<1x8x8xbf16>
    %108 = vector.shape_cast %107 : vector<1x8x8xbf16> to vector<8x8xbf16>
    %cst_66 = arith.constant dense<0.000000e+00> : vector<64x8xf32>
    %109 = tpu.matmul %106, %108, %cst_66 {dimension_numbers = #tpu.dot_dimension_numbers<[1], [0], [0], [1], [0, 0, 1, 1], [], []>} : vector<64x8xbf16>, vector<8x8xbf16>, vector<64x8xf32> -> vector<64x8xf32>
    %110 = arith.addf %105, %109 : vector<64x8xf32>
    %111 = vector.extract_strided_slice %86 {offsets = [320, 0], sizes = [64, 8], strides = [1, 1]} : vector<576x8xbf16> to vector<64x8xbf16>
    %c5_67 = arith.constant 5 : index
    %c0_68 = arith.constant 0 : index
    %c0_69 = arith.constant 0 : index
    %112 = vector.load %arg9[%c5_67, %c0_68, %c0_69] : memref<9x8x8xbf16, #tpu.memory_space<vmem>>, vector<1x8x8xbf16>
    %113 = vector.shape_cast %112 : vector<1x8x8xbf16> to vector<8x8xbf16>
    %cst_70 = arith.constant dense<0.000000e+00> : vector<64x8xf32>
    %114 = tpu.matmul %111, %113, %cst_70 {dimension_numbers = #tpu.dot_dimension_numbers<[1], [0], [0], [1], [0, 0, 1, 1], [], []>} : vector<64x8xbf16>, vector<8x8xbf16>, vector<64x8xf32> -> vector<64x8xf32>
    %115 = arith.addf %110, %114 : vector<64x8xf32>
    %116 = vector.extract_strided_slice %86 {offsets = [384, 0], sizes = [64, 8], strides = [1, 1]} : vector<576x8xbf16> to vector<64x8xbf16>
    %c6_71 = arith.constant 6 : index
    %c0_72 = arith.constant 0 : index
    %c0_73 = arith.constant 0 : index
    %117 = vector.load %arg9[%c6_71, %c0_72, %c0_73] : memref<9x8x8xbf16, #tpu.memory_space<vmem>>, vector<1x8x8xbf16>
    %118 = vector.shape_cast %117 : vector<1x8x8xbf16> to vector<8x8xbf16>
    %cst_74 = arith.constant dense<0.000000e+00> : vector<64x8xf32>
    %119 = tpu.matmul %116, %118, %cst_74 {dimension_numbers = #tpu.dot_dimension_numbers<[1], [0], [0], [1], [0, 0, 1, 1], [], []>} : vector<64x8xbf16>, vector<8x8xbf16>, vector<64x8xf32> -> vector<64x8xf32>
    %120 = arith.addf %115, %119 : vector<64x8xf32>
    %121 = vector.extract_strided_slice %86 {offsets = [448, 0], sizes = [64, 8], strides = [1, 1]} : vector<576x8xbf16> to vector<64x8xbf16>
    %c7_75 = arith.constant 7 : index
    %c0_76 = arith.constant 0 : index
    %c0_77 = arith.constant 0 : index
    %122 = vector.load %arg9[%c7_75, %c0_76, %c0_77] : memref<9x8x8xbf16, #tpu.memory_space<vmem>>, vector<1x8x8xbf16>
    %123 = vector.shape_cast %122 : vector<1x8x8xbf16> to vector<8x8xbf16>
    %cst_78 = arith.constant dense<0.000000e+00> : vector<64x8xf32>
    %124 = tpu.matmul %121, %123, %cst_78 {dimension_numbers = #tpu.dot_dimension_numbers<[1], [0], [0], [1], [0, 0, 1, 1], [], []>} : vector<64x8xbf16>, vector<8x8xbf16>, vector<64x8xf32> -> vector<64x8xf32>
    %125 = arith.addf %120, %124 : vector<64x8xf32>
    %126 = vector.extract_strided_slice %86 {offsets = [512, 0], sizes = [64, 8], strides = [1, 1]} : vector<576x8xbf16> to vector<64x8xbf16>
    %c8_79 = arith.constant 8 : index
    %c0_80 = arith.constant 0 : index
    %c0_81 = arith.constant 0 : index
    %127 = vector.load %arg9[%c8_79, %c0_80, %c0_81] : memref<9x8x8xbf16, #tpu.memory_space<vmem>>, vector<1x8x8xbf16>
    %128 = vector.shape_cast %127 : vector<1x8x8xbf16> to vector<8x8xbf16>
    %cst_82 = arith.constant dense<0.000000e+00> : vector<64x8xf32>
    %129 = tpu.matmul %126, %128, %cst_82 {dimension_numbers = #tpu.dot_dimension_numbers<[1], [0], [0], [1], [0, 0, 1, 1], [], []>} : vector<64x8xbf16>, vector<8x8xbf16>, vector<64x8xf32> -> vector<64x8xf32>
    %130 = arith.addf %125, %129 : vector<64x8xf32>
    %c0_83 = arith.constant 0 : index
    %c0_84 = arith.constant 0 : index
    %131 = vector.load %arg10[%c0_83, %c0_84] : memref<1x8xf32, #tpu.memory_space<vmem>>, vector<1x8xf32>
    %132 = vector.broadcast %131 : vector<1x8xf32> to vector<64x8xf32>
    %133 = arith.addf %130, %132 : vector<64x8xf32>
    %134 = arith.addf %133, %83 : vector<64x8xf32>
    %cst_85 = arith.constant 0.000000e+00 : f32
    %135 = vector.broadcast %cst_85 : f32 to vector<64x8xf32>
    %136 = arith.maximumf %134, %135 : vector<64x8xf32>
    %137 = arith.truncf %136 : vector<64x8xf32> to vector<64x8xbf16>
    %c0_86 = arith.constant 0 : index
    %c0_87 = arith.constant 0 : index
    %138 = vector.load %arg11[%c0_86, %c0_87] : memref<144x64xbf16, #tpu.memory_space<vmem>>, vector<144x64xbf16>
    %cst_88 = arith.constant dense<0.000000e+00> : vector<144x8xf32>
    %139 = tpu.matmul %138, %137, %cst_88 {dimension_numbers = #tpu.dot_dimension_numbers<[1], [0], [0], [1], [0, 0, 1, 1], [], []>} : vector<144x64xbf16>, vector<64x8xbf16>, vector<144x8xf32> -> vector<144x8xf32>
    %140 = arith.truncf %139 : vector<144x8xf32> to vector<144x8xbf16>
    %141 = vector.extract_strided_slice %140 {offsets = [0, 0], sizes = [16, 8], strides = [1, 1]} : vector<144x8xbf16> to vector<16x8xbf16>
    %c0_89 = arith.constant 0 : index
    %c0_90 = arith.constant 0 : index
    %c0_91 = arith.constant 0 : index
    %142 = vector.load %arg12[%c0_89, %c0_90, %c0_91] : memref<9x8x16xbf16, #tpu.memory_space<vmem>>, vector<1x8x16xbf16>
    %143 = vector.shape_cast %142 : vector<1x8x16xbf16> to vector<8x16xbf16>
    %cst_92 = arith.constant dense<0.000000e+00> : vector<16x16xf32>
    %144 = tpu.matmul %141, %143, %cst_92 {dimension_numbers = #tpu.dot_dimension_numbers<[1], [0], [0], [1], [0, 0, 1, 1], [], []>} : vector<16x8xbf16>, vector<8x16xbf16>, vector<16x16xf32> -> vector<16x16xf32>
    %145 = vector.extract_strided_slice %140 {offsets = [16, 0], sizes = [16, 8], strides = [1, 1]} : vector<144x8xbf16> to vector<16x8xbf16>
    %c1_93 = arith.constant 1 : index
    %c0_94 = arith.constant 0 : index
    %c0_95 = arith.constant 0 : index
    %146 = vector.load %arg12[%c1_93, %c0_94, %c0_95] : memref<9x8x16xbf16, #tpu.memory_space<vmem>>, vector<1x8x16xbf16>
    %147 = vector.shape_cast %146 : vector<1x8x16xbf16> to vector<8x16xbf16>
    %cst_96 = arith.constant dense<0.000000e+00> : vector<16x16xf32>
    %148 = tpu.matmul %145, %147, %cst_96 {dimension_numbers = #tpu.dot_dimension_numbers<[1], [0], [0], [1], [0, 0, 1, 1], [], []>} : vector<16x8xbf16>, vector<8x16xbf16>, vector<16x16xf32> -> vector<16x16xf32>
    %149 = arith.addf %144, %148 : vector<16x16xf32>
    %150 = vector.extract_strided_slice %140 {offsets = [32, 0], sizes = [16, 8], strides = [1, 1]} : vector<144x8xbf16> to vector<16x8xbf16>
    %c2_97 = arith.constant 2 : index
    %c0_98 = arith.constant 0 : index
    %c0_99 = arith.constant 0 : index
    %151 = vector.load %arg12[%c2_97, %c0_98, %c0_99] : memref<9x8x16xbf16, #tpu.memory_space<vmem>>, vector<1x8x16xbf16>
    %152 = vector.shape_cast %151 : vector<1x8x16xbf16> to vector<8x16xbf16>
    %cst_100 = arith.constant dense<0.000000e+00> : vector<16x16xf32>
    %153 = tpu.matmul %150, %152, %cst_100 {dimension_numbers = #tpu.dot_dimension_numbers<[1], [0], [0], [1], [0, 0, 1, 1], [], []>} : vector<16x8xbf16>, vector<8x16xbf16>, vector<16x16xf32> -> vector<16x16xf32>
    %154 = arith.addf %149, %153 : vector<16x16xf32>
    %155 = vector.extract_strided_slice %140 {offsets = [48, 0], sizes = [16, 8], strides = [1, 1]} : vector<144x8xbf16> to vector<16x8xbf16>
    %c3_101 = arith.constant 3 : index
    %c0_102 = arith.constant 0 : index
    %c0_103 = arith.constant 0 : index
    %156 = vector.load %arg12[%c3_101, %c0_102, %c0_103] : memref<9x8x16xbf16, #tpu.memory_space<vmem>>, vector<1x8x16xbf16>
    %157 = vector.shape_cast %156 : vector<1x8x16xbf16> to vector<8x16xbf16>
    %cst_104 = arith.constant dense<0.000000e+00> : vector<16x16xf32>
    %158 = tpu.matmul %155, %157, %cst_104 {dimension_numbers = #tpu.dot_dimension_numbers<[1], [0], [0], [1], [0, 0, 1, 1], [], []>} : vector<16x8xbf16>, vector<8x16xbf16>, vector<16x16xf32> -> vector<16x16xf32>
    %159 = arith.addf %154, %158 : vector<16x16xf32>
    %160 = vector.extract_strided_slice %140 {offsets = [64, 0], sizes = [16, 8], strides = [1, 1]} : vector<144x8xbf16> to vector<16x8xbf16>
    %c4_105 = arith.constant 4 : index
    %c0_106 = arith.constant 0 : index
    %c0_107 = arith.constant 0 : index
    %161 = vector.load %arg12[%c4_105, %c0_106, %c0_107] : memref<9x8x16xbf16, #tpu.memory_space<vmem>>, vector<1x8x16xbf16>
    %162 = vector.shape_cast %161 : vector<1x8x16xbf16> to vector<8x16xbf16>
    %cst_108 = arith.constant dense<0.000000e+00> : vector<16x16xf32>
    %163 = tpu.matmul %160, %162, %cst_108 {dimension_numbers = #tpu.dot_dimension_numbers<[1], [0], [0], [1], [0, 0, 1, 1], [], []>} : vector<16x8xbf16>, vector<8x16xbf16>, vector<16x16xf32> -> vector<16x16xf32>
    %164 = arith.addf %159, %163 : vector<16x16xf32>
    %165 = vector.extract_strided_slice %140 {offsets = [80, 0], sizes = [16, 8], strides = [1, 1]} : vector<144x8xbf16> to vector<16x8xbf16>
    %c5_109 = arith.constant 5 : index
    %c0_110 = arith.constant 0 : index
    %c0_111 = arith.constant 0 : index
    %166 = vector.load %arg12[%c5_109, %c0_110, %c0_111] : memref<9x8x16xbf16, #tpu.memory_space<vmem>>, vector<1x8x16xbf16>
    %167 = vector.shape_cast %166 : vector<1x8x16xbf16> to vector<8x16xbf16>
    %cst_112 = arith.constant dense<0.000000e+00> : vector<16x16xf32>
    %168 = tpu.matmul %165, %167, %cst_112 {dimension_numbers = #tpu.dot_dimension_numbers<[1], [0], [0], [1], [0, 0, 1, 1], [], []>} : vector<16x8xbf16>, vector<8x16xbf16>, vector<16x16xf32> -> vector<16x16xf32>
    %169 = arith.addf %164, %168 : vector<16x16xf32>
    %170 = vector.extract_strided_slice %140 {offsets = [96, 0], sizes = [16, 8], strides = [1, 1]} : vector<144x8xbf16> to vector<16x8xbf16>
    %c6_113 = arith.constant 6 : index
    %c0_114 = arith.constant 0 : index
    %c0_115 = arith.constant 0 : index
    %171 = vector.load %arg12[%c6_113, %c0_114, %c0_115] : memref<9x8x16xbf16, #tpu.memory_space<vmem>>, vector<1x8x16xbf16>
    %172 = vector.shape_cast %171 : vector<1x8x16xbf16> to vector<8x16xbf16>
    %cst_116 = arith.constant dense<0.000000e+00> : vector<16x16xf32>
    %173 = tpu.matmul %170, %172, %cst_116 {dimension_numbers = #tpu.dot_dimension_numbers<[1], [0], [0], [1], [0, 0, 1, 1], [], []>} : vector<16x8xbf16>, vector<8x16xbf16>, vector<16x16xf32> -> vector<16x16xf32>
    %174 = arith.addf %169, %173 : vector<16x16xf32>
    %175 = vector.extract_strided_slice %140 {offsets = [112, 0], sizes = [16, 8], strides = [1, 1]} : vector<144x8xbf16> to vector<16x8xbf16>
    %c7_117 = arith.constant 7 : index
    %c0_118 = arith.constant 0 : index
    %c0_119 = arith.constant 0 : index
    %176 = vector.load %arg12[%c7_117, %c0_118, %c0_119] : memref<9x8x16xbf16, #tpu.memory_space<vmem>>, vector<1x8x16xbf16>
    %177 = vector.shape_cast %176 : vector<1x8x16xbf16> to vector<8x16xbf16>
    %cst_120 = arith.constant dense<0.000000e+00> : vector<16x16xf32>
    %178 = tpu.matmul %175, %177, %cst_120 {dimension_numbers = #tpu.dot_dimension_numbers<[1], [0], [0], [1], [0, 0, 1, 1], [], []>} : vector<16x8xbf16>, vector<8x16xbf16>, vector<16x16xf32> -> vector<16x16xf32>
    %179 = arith.addf %174, %178 : vector<16x16xf32>
    %180 = vector.extract_strided_slice %140 {offsets = [128, 0], sizes = [16, 8], strides = [1, 1]} : vector<144x8xbf16> to vector<16x8xbf16>
    %c8_121 = arith.constant 8 : index
    %c0_122 = arith.constant 0 : index
    %c0_123 = arith.constant 0 : index
    %181 = vector.load %arg12[%c8_121, %c0_122, %c0_123] : memref<9x8x16xbf16, #tpu.memory_space<vmem>>, vector<1x8x16xbf16>
    %182 = vector.shape_cast %181 : vector<1x8x16xbf16> to vector<8x16xbf16>
    %cst_124 = arith.constant dense<0.000000e+00> : vector<16x16xf32>
    %183 = tpu.matmul %180, %182, %cst_124 {dimension_numbers = #tpu.dot_dimension_numbers<[1], [0], [0], [1], [0, 0, 1, 1], [], []>} : vector<16x8xbf16>, vector<8x16xbf16>, vector<16x16xf32> -> vector<16x16xf32>
    %184 = arith.addf %179, %183 : vector<16x16xf32>
    %c0_125 = arith.constant 0 : index
    %c0_126 = arith.constant 0 : index
    %185 = vector.load %arg13[%c0_125, %c0_126] : memref<1x16xf32, #tpu.memory_space<vmem>>, vector<1x16xf32>
    %186 = vector.broadcast %185 : vector<1x16xf32> to vector<16x16xf32>
    %187 = arith.addf %184, %186 : vector<16x16xf32>
    %cst_127 = arith.constant 0.000000e+00 : f32
    %188 = vector.broadcast %cst_127 : f32 to vector<16x16xf32>
    %189 = arith.maximumf %187, %188 : vector<16x16xf32>
    %190 = arith.truncf %189 : vector<16x16xf32> to vector<16x16xbf16>
    %c0_128 = arith.constant 0 : index
    %c0_129 = arith.constant 0 : index
    %191 = vector.load %arg14[%c0_128, %c0_129] : memref<16x64xbf16, #tpu.memory_space<vmem>>, vector<16x64xbf16>
    %cst_130 = arith.constant dense<0.000000e+00> : vector<16x8xf32>
    %192 = tpu.matmul %191, %137, %cst_130 {dimension_numbers = #tpu.dot_dimension_numbers<[1], [0], [0], [1], [0, 0, 1, 1], [], []>} : vector<16x64xbf16>, vector<64x8xbf16>, vector<16x8xf32> -> vector<16x8xf32>
    %193 = arith.truncf %192 : vector<16x8xf32> to vector<16x8xbf16>
    %c0_131 = arith.constant 0 : index
    %c0_132 = arith.constant 0 : index
    %c0_133 = arith.constant 0 : index
    %194 = vector.load %arg15[%c0_131, %c0_132, %c0_133] : memref<1x8x16xbf16, #tpu.memory_space<vmem>>, vector<1x8x16xbf16>
    %195 = vector.shape_cast %194 : vector<1x8x16xbf16> to vector<8x16xbf16>
    %cst_134 = arith.constant dense<0.000000e+00> : vector<16x16xf32>
    %196 = tpu.matmul %193, %195, %cst_134 {dimension_numbers = #tpu.dot_dimension_numbers<[1], [0], [0], [1], [0, 0, 1, 1], [], []>} : vector<16x8xbf16>, vector<8x16xbf16>, vector<16x16xf32> -> vector<16x16xf32>
    %c0_135 = arith.constant 0 : index
    %c0_136 = arith.constant 0 : index
    %197 = vector.load %arg16[%c0_135, %c0_136] : memref<1x16xf32, #tpu.memory_space<vmem>>, vector<1x16xf32>
    %198 = vector.broadcast %197 : vector<1x16xf32> to vector<16x16xf32>
    %199 = arith.addf %196, %198 : vector<16x16xf32>
    %c0_137 = arith.constant 0 : index
    %c0_138 = arith.constant 0 : index
    %200 = vector.load %arg17[%c0_137, %c0_138] : memref<144x16xbf16, #tpu.memory_space<vmem>>, vector<144x16xbf16>
    %cst_139 = arith.constant dense<0.000000e+00> : vector<144x16xf32>
    %201 = tpu.matmul %200, %190, %cst_139 {dimension_numbers = #tpu.dot_dimension_numbers<[1], [0], [0], [1], [0, 0, 1, 1], [], []>} : vector<144x16xbf16>, vector<16x16xbf16>, vector<144x16xf32> -> vector<144x16xf32>
    %202 = arith.truncf %201 : vector<144x16xf32> to vector<144x16xbf16>
    %203 = vector.extract_strided_slice %202 {offsets = [0, 0], sizes = [16, 16], strides = [1, 1]} : vector<144x16xbf16> to vector<16x16xbf16>
    %c0_140 = arith.constant 0 : index
    %c0_141 = arith.constant 0 : index
    %c0_142 = arith.constant 0 : index
    %204 = vector.load %arg18[%c0_140, %c0_141, %c0_142] : memref<9x16x16xbf16, #tpu.memory_space<vmem>>, vector<1x16x16xbf16>
    %205 = vector.shape_cast %204 : vector<1x16x16xbf16> to vector<16x16xbf16>
    %cst_143 = arith.constant dense<0.000000e+00> : vector<16x16xf32>
    %206 = tpu.matmul %203, %205, %cst_143 {dimension_numbers = #tpu.dot_dimension_numbers<[1], [0], [0], [1], [0, 0, 1, 1], [], []>} : vector<16x16xbf16>, vector<16x16xbf16>, vector<16x16xf32> -> vector<16x16xf32>
    %207 = vector.extract_strided_slice %202 {offsets = [16, 0], sizes = [16, 16], strides = [1, 1]} : vector<144x16xbf16> to vector<16x16xbf16>
    %c1_144 = arith.constant 1 : index
    %c0_145 = arith.constant 0 : index
    %c0_146 = arith.constant 0 : index
    %208 = vector.load %arg18[%c1_144, %c0_145, %c0_146] : memref<9x16x16xbf16, #tpu.memory_space<vmem>>, vector<1x16x16xbf16>
    %209 = vector.shape_cast %208 : vector<1x16x16xbf16> to vector<16x16xbf16>
    %cst_147 = arith.constant dense<0.000000e+00> : vector<16x16xf32>
    %210 = tpu.matmul %207, %209, %cst_147 {dimension_numbers = #tpu.dot_dimension_numbers<[1], [0], [0], [1], [0, 0, 1, 1], [], []>} : vector<16x16xbf16>, vector<16x16xbf16>, vector<16x16xf32> -> vector<16x16xf32>
    %211 = arith.addf %206, %210 : vector<16x16xf32>
    %212 = vector.extract_strided_slice %202 {offsets = [32, 0], sizes = [16, 16], strides = [1, 1]} : vector<144x16xbf16> to vector<16x16xbf16>
    %c2_148 = arith.constant 2 : index
    %c0_149 = arith.constant 0 : index
    %c0_150 = arith.constant 0 : index
    %213 = vector.load %arg18[%c2_148, %c0_149, %c0_150] : memref<9x16x16xbf16, #tpu.memory_space<vmem>>, vector<1x16x16xbf16>
    %214 = vector.shape_cast %213 : vector<1x16x16xbf16> to vector<16x16xbf16>
    %cst_151 = arith.constant dense<0.000000e+00> : vector<16x16xf32>
    %215 = tpu.matmul %212, %214, %cst_151 {dimension_numbers = #tpu.dot_dimension_numbers<[1], [0], [0], [1], [0, 0, 1, 1], [], []>} : vector<16x16xbf16>, vector<16x16xbf16>, vector<16x16xf32> -> vector<16x16xf32>
    %216 = arith.addf %211, %215 : vector<16x16xf32>
    %217 = vector.extract_strided_slice %202 {offsets = [48, 0], sizes = [16, 16], strides = [1, 1]} : vector<144x16xbf16> to vector<16x16xbf16>
    %c3_152 = arith.constant 3 : index
    %c0_153 = arith.constant 0 : index
    %c0_154 = arith.constant 0 : index
    %218 = vector.load %arg18[%c3_152, %c0_153, %c0_154] : memref<9x16x16xbf16, #tpu.memory_space<vmem>>, vector<1x16x16xbf16>
    %219 = vector.shape_cast %218 : vector<1x16x16xbf16> to vector<16x16xbf16>
    %cst_155 = arith.constant dense<0.000000e+00> : vector<16x16xf32>
    %220 = tpu.matmul %217, %219, %cst_155 {dimension_numbers = #tpu.dot_dimension_numbers<[1], [0], [0], [1], [0, 0, 1, 1], [], []>} : vector<16x16xbf16>, vector<16x16xbf16>, vector<16x16xf32> -> vector<16x16xf32>
    %221 = arith.addf %216, %220 : vector<16x16xf32>
    %222 = vector.extract_strided_slice %202 {offsets = [64, 0], sizes = [16, 16], strides = [1, 1]} : vector<144x16xbf16> to vector<16x16xbf16>
    %c4_156 = arith.constant 4 : index
    %c0_157 = arith.constant 0 : index
    %c0_158 = arith.constant 0 : index
    %223 = vector.load %arg18[%c4_156, %c0_157, %c0_158] : memref<9x16x16xbf16, #tpu.memory_space<vmem>>, vector<1x16x16xbf16>
    %224 = vector.shape_cast %223 : vector<1x16x16xbf16> to vector<16x16xbf16>
    %cst_159 = arith.constant dense<0.000000e+00> : vector<16x16xf32>
    %225 = tpu.matmul %222, %224, %cst_159 {dimension_numbers = #tpu.dot_dimension_numbers<[1], [0], [0], [1], [0, 0, 1, 1], [], []>} : vector<16x16xbf16>, vector<16x16xbf16>, vector<16x16xf32> -> vector<16x16xf32>
    %226 = arith.addf %221, %225 : vector<16x16xf32>
    %227 = vector.extract_strided_slice %202 {offsets = [80, 0], sizes = [16, 16], strides = [1, 1]} : vector<144x16xbf16> to vector<16x16xbf16>
    %c5_160 = arith.constant 5 : index
    %c0_161 = arith.constant 0 : index
    %c0_162 = arith.constant 0 : index
    %228 = vector.load %arg18[%c5_160, %c0_161, %c0_162] : memref<9x16x16xbf16, #tpu.memory_space<vmem>>, vector<1x16x16xbf16>
    %229 = vector.shape_cast %228 : vector<1x16x16xbf16> to vector<16x16xbf16>
    %cst_163 = arith.constant dense<0.000000e+00> : vector<16x16xf32>
    %230 = tpu.matmul %227, %229, %cst_163 {dimension_numbers = #tpu.dot_dimension_numbers<[1], [0], [0], [1], [0, 0, 1, 1], [], []>} : vector<16x16xbf16>, vector<16x16xbf16>, vector<16x16xf32> -> vector<16x16xf32>
    %231 = arith.addf %226, %230 : vector<16x16xf32>
    %232 = vector.extract_strided_slice %202 {offsets = [96, 0], sizes = [16, 16], strides = [1, 1]} : vector<144x16xbf16> to vector<16x16xbf16>
    %c6_164 = arith.constant 6 : index
    %c0_165 = arith.constant 0 : index
    %c0_166 = arith.constant 0 : index
    %233 = vector.load %arg18[%c6_164, %c0_165, %c0_166] : memref<9x16x16xbf16, #tpu.memory_space<vmem>>, vector<1x16x16xbf16>
    %234 = vector.shape_cast %233 : vector<1x16x16xbf16> to vector<16x16xbf16>
    %cst_167 = arith.constant dense<0.000000e+00> : vector<16x16xf32>
    %235 = tpu.matmul %232, %234, %cst_167 {dimension_numbers = #tpu.dot_dimension_numbers<[1], [0], [0], [1], [0, 0, 1, 1], [], []>} : vector<16x16xbf16>, vector<16x16xbf16>, vector<16x16xf32> -> vector<16x16xf32>
    %236 = arith.addf %231, %235 : vector<16x16xf32>
    %237 = vector.extract_strided_slice %202 {offsets = [112, 0], sizes = [16, 16], strides = [1, 1]} : vector<144x16xbf16> to vector<16x16xbf16>
    %c7_168 = arith.constant 7 : index
    %c0_169 = arith.constant 0 : index
    %c0_170 = arith.constant 0 : index
    %238 = vector.load %arg18[%c7_168, %c0_169, %c0_170] : memref<9x16x16xbf16, #tpu.memory_space<vmem>>, vector<1x16x16xbf16>
    %239 = vector.shape_cast %238 : vector<1x16x16xbf16> to vector<16x16xbf16>
    %cst_171 = arith.constant dense<0.000000e+00> : vector<16x16xf32>
    %240 = tpu.matmul %237, %239, %cst_171 {dimension_numbers = #tpu.dot_dimension_numbers<[1], [0], [0], [1], [0, 0, 1, 1], [], []>} : vector<16x16xbf16>, vector<16x16xbf16>, vector<16x16xf32> -> vector<16x16xf32>
    %241 = arith.addf %236, %240 : vector<16x16xf32>
    %242 = vector.extract_strided_slice %202 {offsets = [128, 0], sizes = [16, 16], strides = [1, 1]} : vector<144x16xbf16> to vector<16x16xbf16>
    %c8_172 = arith.constant 8 : index
    %c0_173 = arith.constant 0 : index
    %c0_174 = arith.constant 0 : index
    %243 = vector.load %arg18[%c8_172, %c0_173, %c0_174] : memref<9x16x16xbf16, #tpu.memory_space<vmem>>, vector<1x16x16xbf16>
    %244 = vector.shape_cast %243 : vector<1x16x16xbf16> to vector<16x16xbf16>
    %cst_175 = arith.constant dense<0.000000e+00> : vector<16x16xf32>
    %245 = tpu.matmul %242, %244, %cst_175 {dimension_numbers = #tpu.dot_dimension_numbers<[1], [0], [0], [1], [0, 0, 1, 1], [], []>} : vector<16x16xbf16>, vector<16x16xbf16>, vector<16x16xf32> -> vector<16x16xf32>
    %246 = arith.addf %241, %245 : vector<16x16xf32>
    %c0_176 = arith.constant 0 : index
    %c0_177 = arith.constant 0 : index
    %247 = vector.load %arg19[%c0_176, %c0_177] : memref<1x16xf32, #tpu.memory_space<vmem>>, vector<1x16xf32>
    %248 = vector.broadcast %247 : vector<1x16xf32> to vector<16x16xf32>
    %249 = arith.addf %246, %248 : vector<16x16xf32>
    %250 = arith.addf %249, %199 : vector<16x16xf32>
    %cst_178 = arith.constant 0.000000e+00 : f32
    %251 = vector.broadcast %cst_178 : f32 to vector<16x16xf32>
    %252 = arith.maximumf %250, %251 : vector<16x16xf32>
    %253 = arith.truncf %252 : vector<16x16xf32> to vector<16x16xbf16>
    %c0_179 = arith.constant 0 : index
    %c0_180 = arith.constant 0 : index
    %254 = vector.load %arg20[%c0_179, %c0_180] : memref<72x16xbf16, #tpu.memory_space<vmem>>, vector<72x16xbf16>
    %cst_181 = arith.constant dense<0.000000e+00> : vector<72x16xf32>
    %255 = tpu.matmul %254, %253, %cst_181 {dimension_numbers = #tpu.dot_dimension_numbers<[1], [0], [0], [1], [0, 0, 1, 1], [], []>} : vector<72x16xbf16>, vector<16x16xbf16>, vector<72x16xf32> -> vector<72x16xf32>
    %256 = arith.truncf %255 : vector<72x16xf32> to vector<72x16xbf16>
    %257 = vector.extract_strided_slice %256 {offsets = [0, 0], sizes = [8, 16], strides = [1, 1]} : vector<72x16xbf16> to vector<8x16xbf16>
    %c0_182 = arith.constant 0 : index
    %c0_183 = arith.constant 0 : index
    %c0_184 = arith.constant 0 : index
    %258 = vector.load %arg21[%c0_182, %c0_183, %c0_184] : memref<9x16x32xbf16, #tpu.memory_space<vmem>>, vector<1x16x32xbf16>
    %259 = vector.shape_cast %258 : vector<1x16x32xbf16> to vector<16x32xbf16>
    %cst_185 = arith.constant dense<0.000000e+00> : vector<8x32xf32>
    %260 = tpu.matmul %257, %259, %cst_185 {dimension_numbers = #tpu.dot_dimension_numbers<[1], [0], [0], [1], [0, 0, 1, 1], [], []>} : vector<8x16xbf16>, vector<16x32xbf16>, vector<8x32xf32> -> vector<8x32xf32>
    %261 = vector.extract_strided_slice %256 {offsets = [8, 0], sizes = [8, 16], strides = [1, 1]} : vector<72x16xbf16> to vector<8x16xbf16>
    %c1_186 = arith.constant 1 : index
    %c0_187 = arith.constant 0 : index
    %c0_188 = arith.constant 0 : index
    %262 = vector.load %arg21[%c1_186, %c0_187, %c0_188] : memref<9x16x32xbf16, #tpu.memory_space<vmem>>, vector<1x16x32xbf16>
    %263 = vector.shape_cast %262 : vector<1x16x32xbf16> to vector<16x32xbf16>
    %cst_189 = arith.constant dense<0.000000e+00> : vector<8x32xf32>
    %264 = tpu.matmul %261, %263, %cst_189 {dimension_numbers = #tpu.dot_dimension_numbers<[1], [0], [0], [1], [0, 0, 1, 1], [], []>} : vector<8x16xbf16>, vector<16x32xbf16>, vector<8x32xf32> -> vector<8x32xf32>
    %265 = arith.addf %260, %264 : vector<8x32xf32>
    %266 = vector.extract_strided_slice %256 {offsets = [16, 0], sizes = [8, 16], strides = [1, 1]} : vector<72x16xbf16> to vector<8x16xbf16>
    %c2_190 = arith.constant 2 : index
    %c0_191 = arith.constant 0 : index
    %c0_192 = arith.constant 0 : index
    %267 = vector.load %arg21[%c2_190, %c0_191, %c0_192] : memref<9x16x32xbf16, #tpu.memory_space<vmem>>, vector<1x16x32xbf16>
    %268 = vector.shape_cast %267 : vector<1x16x32xbf16> to vector<16x32xbf16>
    %cst_193 = arith.constant dense<0.000000e+00> : vector<8x32xf32>
    %269 = tpu.matmul %266, %268, %cst_193 {dimension_numbers = #tpu.dot_dimension_numbers<[1], [0], [0], [1], [0, 0, 1, 1], [], []>} : vector<8x16xbf16>, vector<16x32xbf16>, vector<8x32xf32> -> vector<8x32xf32>
    %270 = arith.addf %265, %269 : vector<8x32xf32>
    %271 = vector.extract_strided_slice %256 {offsets = [24, 0], sizes = [8, 16], strides = [1, 1]} : vector<72x16xbf16> to vector<8x16xbf16>
    %c3_194 = arith.constant 3 : index
    %c0_195 = arith.constant 0 : index
    %c0_196 = arith.constant 0 : index
    %272 = vector.load %arg21[%c3_194, %c0_195, %c0_196] : memref<9x16x32xbf16, #tpu.memory_space<vmem>>, vector<1x16x32xbf16>
    %273 = vector.shape_cast %272 : vector<1x16x32xbf16> to vector<16x32xbf16>
    %cst_197 = arith.constant dense<0.000000e+00> : vector<8x32xf32>
    %274 = tpu.matmul %271, %273, %cst_197 {dimension_numbers = #tpu.dot_dimension_numbers<[1], [0], [0], [1], [0, 0, 1, 1], [], []>} : vector<8x16xbf16>, vector<16x32xbf16>, vector<8x32xf32> -> vector<8x32xf32>
    %275 = arith.addf %270, %274 : vector<8x32xf32>
    %276 = vector.extract_strided_slice %256 {offsets = [32, 0], sizes = [8, 16], strides = [1, 1]} : vector<72x16xbf16> to vector<8x16xbf16>
    %c4_198 = arith.constant 4 : index
    %c0_199 = arith.constant 0 : index
    %c0_200 = arith.constant 0 : index
    %277 = vector.load %arg21[%c4_198, %c0_199, %c0_200] : memref<9x16x32xbf16, #tpu.memory_space<vmem>>, vector<1x16x32xbf16>
    %278 = vector.shape_cast %277 : vector<1x16x32xbf16> to vector<16x32xbf16>
    %cst_201 = arith.constant dense<0.000000e+00> : vector<8x32xf32>
    %279 = tpu.matmul %276, %278, %cst_201 {dimension_numbers = #tpu.dot_dimension_numbers<[1], [0], [0], [1], [0, 0, 1, 1], [], []>} : vector<8x16xbf16>, vector<16x32xbf16>, vector<8x32xf32> -> vector<8x32xf32>
    %280 = arith.addf %275, %279 : vector<8x32xf32>
    %281 = vector.extract_strided_slice %256 {offsets = [40, 0], sizes = [8, 16], strides = [1, 1]} : vector<72x16xbf16> to vector<8x16xbf16>
    %c5_202 = arith.constant 5 : index
    %c0_203 = arith.constant 0 : index
    %c0_204 = arith.constant 0 : index
    %282 = vector.load %arg21[%c5_202, %c0_203, %c0_204] : memref<9x16x32xbf16, #tpu.memory_space<vmem>>, vector<1x16x32xbf16>
    %283 = vector.shape_cast %282 : vector<1x16x32xbf16> to vector<16x32xbf16>
    %cst_205 = arith.constant dense<0.000000e+00> : vector<8x32xf32>
    %284 = tpu.matmul %281, %283, %cst_205 {dimension_numbers = #tpu.dot_dimension_numbers<[1], [0], [0], [1], [0, 0, 1, 1], [], []>} : vector<8x16xbf16>, vector<16x32xbf16>, vector<8x32xf32> -> vector<8x32xf32>
    %285 = arith.addf %280, %284 : vector<8x32xf32>
    %286 = vector.extract_strided_slice %256 {offsets = [48, 0], sizes = [8, 16], strides = [1, 1]} : vector<72x16xbf16> to vector<8x16xbf16>
    %c6_206 = arith.constant 6 : index
    %c0_207 = arith.constant 0 : index
    %c0_208 = arith.constant 0 : index
    %287 = vector.load %arg21[%c6_206, %c0_207, %c0_208] : memref<9x16x32xbf16, #tpu.memory_space<vmem>>, vector<1x16x32xbf16>
    %288 = vector.shape_cast %287 : vector<1x16x32xbf16> to vector<16x32xbf16>
    %cst_209 = arith.constant dense<0.000000e+00> : vector<8x32xf32>
    %289 = tpu.matmul %286, %288, %cst_209 {dimension_numbers = #tpu.dot_dimension_numbers<[1], [0], [0], [1], [0, 0, 1, 1], [], []>} : vector<8x16xbf16>, vector<16x32xbf16>, vector<8x32xf32> -> vector<8x32xf32>
    %290 = arith.addf %285, %289 : vector<8x32xf32>
    %291 = vector.extract_strided_slice %256 {offsets = [56, 0], sizes = [8, 16], strides = [1, 1]} : vector<72x16xbf16> to vector<8x16xbf16>
    %c7_210 = arith.constant 7 : index
    %c0_211 = arith.constant 0 : index
    %c0_212 = arith.constant 0 : index
    %292 = vector.load %arg21[%c7_210, %c0_211, %c0_212] : memref<9x16x32xbf16, #tpu.memory_space<vmem>>, vector<1x16x32xbf16>
    %293 = vector.shape_cast %292 : vector<1x16x32xbf16> to vector<16x32xbf16>
    %cst_213 = arith.constant dense<0.000000e+00> : vector<8x32xf32>
    %294 = tpu.matmul %291, %293, %cst_213 {dimension_numbers = #tpu.dot_dimension_numbers<[1], [0], [0], [1], [0, 0, 1, 1], [], []>} : vector<8x16xbf16>, vector<16x32xbf16>, vector<8x32xf32> -> vector<8x32xf32>
    %295 = arith.addf %290, %294 : vector<8x32xf32>
    %296 = vector.extract_strided_slice %256 {offsets = [64, 0], sizes = [8, 16], strides = [1, 1]} : vector<72x16xbf16> to vector<8x16xbf16>
    %c8_214 = arith.constant 8 : index
    %c0_215 = arith.constant 0 : index
    %c0_216 = arith.constant 0 : index
    %297 = vector.load %arg21[%c8_214, %c0_215, %c0_216] : memref<9x16x32xbf16, #tpu.memory_space<vmem>>, vector<1x16x32xbf16>
    %298 = vector.shape_cast %297 : vector<1x16x32xbf16> to vector<16x32xbf16>
    %cst_217 = arith.constant dense<0.000000e+00> : vector<8x32xf32>
    %299 = tpu.matmul %296, %298, %cst_217 {dimension_numbers = #tpu.dot_dimension_numbers<[1], [0], [0], [1], [0, 0, 1, 1], [], []>} : vector<8x16xbf16>, vector<16x32xbf16>, vector<8x32xf32> -> vector<8x32xf32>
    %300 = arith.addf %295, %299 : vector<8x32xf32>
    %c0_218 = arith.constant 0 : index
    %c0_219 = arith.constant 0 : index
    %301 = vector.load %arg22[%c0_218, %c0_219] : memref<1x32xf32, #tpu.memory_space<vmem>>, vector<1x32xf32>
    %302 = vector.broadcast %301 : vector<1x32xf32> to vector<8x32xf32>
    %303 = arith.addf %300, %302 : vector<8x32xf32>
    %cst_220 = arith.constant 0.000000e+00 : f32
    %304 = vector.broadcast %cst_220 : f32 to vector<8x32xf32>
    %305 = arith.maximumf %303, %304 : vector<8x32xf32>
    %306 = arith.truncf %305 : vector<8x32xf32> to vector<8x32xbf16>
    %c0_221 = arith.constant 0 : index
    %c0_222 = arith.constant 0 : index
    %307 = vector.load %arg23[%c0_221, %c0_222] : memref<8x16xbf16, #tpu.memory_space<vmem>>, vector<8x16xbf16>
    %cst_223 = arith.constant dense<0.000000e+00> : vector<8x16xf32>
    %308 = tpu.matmul %307, %253, %cst_223 {dimension_numbers = #tpu.dot_dimension_numbers<[1], [0], [0], [1], [0, 0, 1, 1], [], []>} : vector<8x16xbf16>, vector<16x16xbf16>, vector<8x16xf32> -> vector<8x16xf32>
    %309 = arith.truncf %308 : vector<8x16xf32> to vector<8x16xbf16>
    %c0_224 = arith.constant 0 : index
    %c0_225 = arith.constant 0 : index
    %c0_226 = arith.constant 0 : index
    %310 = vector.load %arg24[%c0_224, %c0_225, %c0_226] : memref<1x16x32xbf16, #tpu.memory_space<vmem>>, vector<1x16x32xbf16>
    %311 = vector.shape_cast %310 : vector<1x16x32xbf16> to vector<16x32xbf16>
    %cst_227 = arith.constant dense<0.000000e+00> : vector<8x32xf32>
    %312 = tpu.matmul %309, %311, %cst_227 {dimension_numbers = #tpu.dot_dimension_numbers<[1], [0], [0], [1], [0, 0, 1, 1], [], []>} : vector<8x16xbf16>, vector<16x32xbf16>, vector<8x32xf32> -> vector<8x32xf32>
    %c0_228 = arith.constant 0 : index
    %c0_229 = arith.constant 0 : index
    %313 = vector.load %arg25[%c0_228, %c0_229] : memref<1x32xf32, #tpu.memory_space<vmem>>, vector<1x32xf32>
    %314 = vector.broadcast %313 : vector<1x32xf32> to vector<8x32xf32>
    %315 = arith.addf %312, %314 : vector<8x32xf32>
    %c0_230 = arith.constant 0 : index
    %c0_231 = arith.constant 0 : index
    %316 = vector.load %arg26[%c0_230, %c0_231] : memref<72x8xbf16, #tpu.memory_space<vmem>>, vector<72x8xbf16>
    %cst_232 = arith.constant dense<0.000000e+00> : vector<72x32xf32>
    %317 = tpu.matmul %316, %306, %cst_232 {dimension_numbers = #tpu.dot_dimension_numbers<[1], [0], [0], [1], [0, 0, 1, 1], [], []>} : vector<72x8xbf16>, vector<8x32xbf16>, vector<72x32xf32> -> vector<72x32xf32>
    %318 = arith.truncf %317 : vector<72x32xf32> to vector<72x32xbf16>
    %319 = vector.extract_strided_slice %318 {offsets = [0, 0], sizes = [8, 32], strides = [1, 1]} : vector<72x32xbf16> to vector<8x32xbf16>
    %c0_233 = arith.constant 0 : index
    %c0_234 = arith.constant 0 : index
    %c0_235 = arith.constant 0 : index
    %320 = vector.load %arg27[%c0_233, %c0_234, %c0_235] : memref<9x32x32xbf16, #tpu.memory_space<vmem>>, vector<1x32x32xbf16>
    %321 = vector.shape_cast %320 : vector<1x32x32xbf16> to vector<32x32xbf16>
    %cst_236 = arith.constant dense<0.000000e+00> : vector<8x32xf32>
    %322 = tpu.matmul %319, %321, %cst_236 {dimension_numbers = #tpu.dot_dimension_numbers<[1], [0], [0], [1], [0, 0, 1, 1], [], []>} : vector<8x32xbf16>, vector<32x32xbf16>, vector<8x32xf32> -> vector<8x32xf32>
    %323 = vector.extract_strided_slice %318 {offsets = [8, 0], sizes = [8, 32], strides = [1, 1]} : vector<72x32xbf16> to vector<8x32xbf16>
    %c1_237 = arith.constant 1 : index
    %c0_238 = arith.constant 0 : index
    %c0_239 = arith.constant 0 : index
    %324 = vector.load %arg27[%c1_237, %c0_238, %c0_239] : memref<9x32x32xbf16, #tpu.memory_space<vmem>>, vector<1x32x32xbf16>
    %325 = vector.shape_cast %324 : vector<1x32x32xbf16> to vector<32x32xbf16>
    %cst_240 = arith.constant dense<0.000000e+00> : vector<8x32xf32>
    %326 = tpu.matmul %323, %325, %cst_240 {dimension_numbers = #tpu.dot_dimension_numbers<[1], [0], [0], [1], [0, 0, 1, 1], [], []>} : vector<8x32xbf16>, vector<32x32xbf16>, vector<8x32xf32> -> vector<8x32xf32>
    %327 = arith.addf %322, %326 : vector<8x32xf32>
    %328 = vector.extract_strided_slice %318 {offsets = [16, 0], sizes = [8, 32], strides = [1, 1]} : vector<72x32xbf16> to vector<8x32xbf16>
    %c2_241 = arith.constant 2 : index
    %c0_242 = arith.constant 0 : index
    %c0_243 = arith.constant 0 : index
    %329 = vector.load %arg27[%c2_241, %c0_242, %c0_243] : memref<9x32x32xbf16, #tpu.memory_space<vmem>>, vector<1x32x32xbf16>
    %330 = vector.shape_cast %329 : vector<1x32x32xbf16> to vector<32x32xbf16>
    %cst_244 = arith.constant dense<0.000000e+00> : vector<8x32xf32>
    %331 = tpu.matmul %328, %330, %cst_244 {dimension_numbers = #tpu.dot_dimension_numbers<[1], [0], [0], [1], [0, 0, 1, 1], [], []>} : vector<8x32xbf16>, vector<32x32xbf16>, vector<8x32xf32> -> vector<8x32xf32>
    %332 = arith.addf %327, %331 : vector<8x32xf32>
    %333 = vector.extract_strided_slice %318 {offsets = [24, 0], sizes = [8, 32], strides = [1, 1]} : vector<72x32xbf16> to vector<8x32xbf16>
    %c3_245 = arith.constant 3 : index
    %c0_246 = arith.constant 0 : index
    %c0_247 = arith.constant 0 : index
    %334 = vector.load %arg27[%c3_245, %c0_246, %c0_247] : memref<9x32x32xbf16, #tpu.memory_space<vmem>>, vector<1x32x32xbf16>
    %335 = vector.shape_cast %334 : vector<1x32x32xbf16> to vector<32x32xbf16>
    %cst_248 = arith.constant dense<0.000000e+00> : vector<8x32xf32>
    %336 = tpu.matmul %333, %335, %cst_248 {dimension_numbers = #tpu.dot_dimension_numbers<[1], [0], [0], [1], [0, 0, 1, 1], [], []>} : vector<8x32xbf16>, vector<32x32xbf16>, vector<8x32xf32> -> vector<8x32xf32>
    %337 = arith.addf %332, %336 : vector<8x32xf32>
    %338 = vector.extract_strided_slice %318 {offsets = [32, 0], sizes = [8, 32], strides = [1, 1]} : vector<72x32xbf16> to vector<8x32xbf16>
    %c4_249 = arith.constant 4 : index
    %c0_250 = arith.constant 0 : index
    %c0_251 = arith.constant 0 : index
    %339 = vector.load %arg27[%c4_249, %c0_250, %c0_251] : memref<9x32x32xbf16, #tpu.memory_space<vmem>>, vector<1x32x32xbf16>
    %340 = vector.shape_cast %339 : vector<1x32x32xbf16> to vector<32x32xbf16>
    %cst_252 = arith.constant dense<0.000000e+00> : vector<8x32xf32>
    %341 = tpu.matmul %338, %340, %cst_252 {dimension_numbers = #tpu.dot_dimension_numbers<[1], [0], [0], [1], [0, 0, 1, 1], [], []>} : vector<8x32xbf16>, vector<32x32xbf16>, vector<8x32xf32> -> vector<8x32xf32>
    %342 = arith.addf %337, %341 : vector<8x32xf32>
    %343 = vector.extract_strided_slice %318 {offsets = [40, 0], sizes = [8, 32], strides = [1, 1]} : vector<72x32xbf16> to vector<8x32xbf16>
    %c5_253 = arith.constant 5 : index
    %c0_254 = arith.constant 0 : index
    %c0_255 = arith.constant 0 : index
    %344 = vector.load %arg27[%c5_253, %c0_254, %c0_255] : memref<9x32x32xbf16, #tpu.memory_space<vmem>>, vector<1x32x32xbf16>
    %345 = vector.shape_cast %344 : vector<1x32x32xbf16> to vector<32x32xbf16>
    %cst_256 = arith.constant dense<0.000000e+00> : vector<8x32xf32>
    %346 = tpu.matmul %343, %345, %cst_256 {dimension_numbers = #tpu.dot_dimension_numbers<[1], [0], [0], [1], [0, 0, 1, 1], [], []>} : vector<8x32xbf16>, vector<32x32xbf16>, vector<8x32xf32> -> vector<8x32xf32>
    %347 = arith.addf %342, %346 : vector<8x32xf32>
    %348 = vector.extract_strided_slice %318 {offsets = [48, 0], sizes = [8, 32], strides = [1, 1]} : vector<72x32xbf16> to vector<8x32xbf16>
    %c6_257 = arith.constant 6 : index
    %c0_258 = arith.constant 0 : index
    %c0_259 = arith.constant 0 : index
    %349 = vector.load %arg27[%c6_257, %c0_258, %c0_259] : memref<9x32x32xbf16, #tpu.memory_space<vmem>>, vector<1x32x32xbf16>
    %350 = vector.shape_cast %349 : vector<1x32x32xbf16> to vector<32x32xbf16>
    %cst_260 = arith.constant dense<0.000000e+00> : vector<8x32xf32>
    %351 = tpu.matmul %348, %350, %cst_260 {dimension_numbers = #tpu.dot_dimension_numbers<[1], [0], [0], [1], [0, 0, 1, 1], [], []>} : vector<8x32xbf16>, vector<32x32xbf16>, vector<8x32xf32> -> vector<8x32xf32>
    %352 = arith.addf %347, %351 : vector<8x32xf32>
    %353 = vector.extract_strided_slice %318 {offsets = [56, 0], sizes = [8, 32], strides = [1, 1]} : vector<72x32xbf16> to vector<8x32xbf16>
    %c7_261 = arith.constant 7 : index
    %c0_262 = arith.constant 0 : index
    %c0_263 = arith.constant 0 : index
    %354 = vector.load %arg27[%c7_261, %c0_262, %c0_263] : memref<9x32x32xbf16, #tpu.memory_space<vmem>>, vector<1x32x32xbf16>
    %355 = vector.shape_cast %354 : vector<1x32x32xbf16> to vector<32x32xbf16>
    %cst_264 = arith.constant dense<0.000000e+00> : vector<8x32xf32>
    %356 = tpu.matmul %353, %355, %cst_264 {dimension_numbers = #tpu.dot_dimension_numbers<[1], [0], [0], [1], [0, 0, 1, 1], [], []>} : vector<8x32xbf16>, vector<32x32xbf16>, vector<8x32xf32> -> vector<8x32xf32>
    %357 = arith.addf %352, %356 : vector<8x32xf32>
    %358 = vector.extract_strided_slice %318 {offsets = [64, 0], sizes = [8, 32], strides = [1, 1]} : vector<72x32xbf16> to vector<8x32xbf16>
    %c8_265 = arith.constant 8 : index
    %c0_266 = arith.constant 0 : index
    %c0_267 = arith.constant 0 : index
    %359 = vector.load %arg27[%c8_265, %c0_266, %c0_267] : memref<9x32x32xbf16, #tpu.memory_space<vmem>>, vector<1x32x32xbf16>
    %360 = vector.shape_cast %359 : vector<1x32x32xbf16> to vector<32x32xbf16>
    %cst_268 = arith.constant dense<0.000000e+00> : vector<8x32xf32>
    %361 = tpu.matmul %358, %360, %cst_268 {dimension_numbers = #tpu.dot_dimension_numbers<[1], [0], [0], [1], [0, 0, 1, 1], [], []>} : vector<8x32xbf16>, vector<32x32xbf16>, vector<8x32xf32> -> vector<8x32xf32>
    %362 = arith.addf %357, %361 : vector<8x32xf32>
    %c0_269 = arith.constant 0 : index
    %c0_270 = arith.constant 0 : index
    %363 = vector.load %arg28[%c0_269, %c0_270] : memref<1x32xf32, #tpu.memory_space<vmem>>, vector<1x32xf32>
    %364 = vector.broadcast %363 : vector<1x32xf32> to vector<8x32xf32>
    %365 = arith.addf %362, %364 : vector<8x32xf32>
    %366 = arith.addf %365, %315 : vector<8x32xf32>
    %cst_271 = arith.constant 0.000000e+00 : f32
    %367 = vector.broadcast %cst_271 : f32 to vector<8x32xf32>
    %368 = arith.maximumf %366, %367 : vector<8x32xf32>
    %369 = arith.truncf %368 : vector<8x32xf32> to vector<8x32xbf16>
    %c0_272 = arith.constant 0 : index
    %c0_273 = arith.constant 0 : index
    %370 = vector.load %arg29[%c0_272, %c0_273] : memref<72x8xbf16, #tpu.memory_space<vmem>>, vector<72x8xbf16>
    %cst_274 = arith.constant dense<0.000000e+00> : vector<72x32xf32>
    %371 = tpu.matmul %370, %369, %cst_274 {dimension_numbers = #tpu.dot_dimension_numbers<[1], [0], [0], [1], [0, 0, 1, 1], [], []>} : vector<72x8xbf16>, vector<8x32xbf16>, vector<72x32xf32> -> vector<72x32xf32>
    %372 = arith.truncf %371 : vector<72x32xf32> to vector<72x32xbf16>
    %373 = vector.extract_strided_slice %372 {offsets = [0, 0], sizes = [8, 32], strides = [1, 1]} : vector<72x32xbf16> to vector<8x32xbf16>
    %c0_275 = arith.constant 0 : index
    %c0_276 = arith.constant 0 : index
    %c0_277 = arith.constant 0 : index
    %374 = vector.load %arg30[%c0_275, %c0_276, %c0_277] : memref<9x32x64xbf16, #tpu.memory_space<vmem>>, vector<1x32x64xbf16>
    %375 = vector.shape_cast %374 : vector<1x32x64xbf16> to vector<32x64xbf16>
    %cst_278 = arith.constant dense<0.000000e+00> : vector<8x64xf32>
    %376 = tpu.matmul %373, %375, %cst_278 {dimension_numbers = #tpu.dot_dimension_numbers<[1], [0], [0], [1], [0, 0, 1, 1], [], []>} : vector<8x32xbf16>, vector<32x64xbf16>, vector<8x64xf32> -> vector<8x64xf32>
    %377 = vector.extract_strided_slice %372 {offsets = [8, 0], sizes = [8, 32], strides = [1, 1]} : vector<72x32xbf16> to vector<8x32xbf16>
    %c1_279 = arith.constant 1 : index
    %c0_280 = arith.constant 0 : index
    %c0_281 = arith.constant 0 : index
    %378 = vector.load %arg30[%c1_279, %c0_280, %c0_281] : memref<9x32x64xbf16, #tpu.memory_space<vmem>>, vector<1x32x64xbf16>
    %379 = vector.shape_cast %378 : vector<1x32x64xbf16> to vector<32x64xbf16>
    %cst_282 = arith.constant dense<0.000000e+00> : vector<8x64xf32>
    %380 = tpu.matmul %377, %379, %cst_282 {dimension_numbers = #tpu.dot_dimension_numbers<[1], [0], [0], [1], [0, 0, 1, 1], [], []>} : vector<8x32xbf16>, vector<32x64xbf16>, vector<8x64xf32> -> vector<8x64xf32>
    %381 = arith.addf %376, %380 : vector<8x64xf32>
    %382 = vector.extract_strided_slice %372 {offsets = [16, 0], sizes = [8, 32], strides = [1, 1]} : vector<72x32xbf16> to vector<8x32xbf16>
    %c2_283 = arith.constant 2 : index
    %c0_284 = arith.constant 0 : index
    %c0_285 = arith.constant 0 : index
    %383 = vector.load %arg30[%c2_283, %c0_284, %c0_285] : memref<9x32x64xbf16, #tpu.memory_space<vmem>>, vector<1x32x64xbf16>
    %384 = vector.shape_cast %383 : vector<1x32x64xbf16> to vector<32x64xbf16>
    %cst_286 = arith.constant dense<0.000000e+00> : vector<8x64xf32>
    %385 = tpu.matmul %382, %384, %cst_286 {dimension_numbers = #tpu.dot_dimension_numbers<[1], [0], [0], [1], [0, 0, 1, 1], [], []>} : vector<8x32xbf16>, vector<32x64xbf16>, vector<8x64xf32> -> vector<8x64xf32>
    %386 = arith.addf %381, %385 : vector<8x64xf32>
    %387 = vector.extract_strided_slice %372 {offsets = [24, 0], sizes = [8, 32], strides = [1, 1]} : vector<72x32xbf16> to vector<8x32xbf16>
    %c3_287 = arith.constant 3 : index
    %c0_288 = arith.constant 0 : index
    %c0_289 = arith.constant 0 : index
    %388 = vector.load %arg30[%c3_287, %c0_288, %c0_289] : memref<9x32x64xbf16, #tpu.memory_space<vmem>>, vector<1x32x64xbf16>
    %389 = vector.shape_cast %388 : vector<1x32x64xbf16> to vector<32x64xbf16>
    %cst_290 = arith.constant dense<0.000000e+00> : vector<8x64xf32>
    %390 = tpu.matmul %387, %389, %cst_290 {dimension_numbers = #tpu.dot_dimension_numbers<[1], [0], [0], [1], [0, 0, 1, 1], [], []>} : vector<8x32xbf16>, vector<32x64xbf16>, vector<8x64xf32> -> vector<8x64xf32>
    %391 = arith.addf %386, %390 : vector<8x64xf32>
    %392 = vector.extract_strided_slice %372 {offsets = [32, 0], sizes = [8, 32], strides = [1, 1]} : vector<72x32xbf16> to vector<8x32xbf16>
    %c4_291 = arith.constant 4 : index
    %c0_292 = arith.constant 0 : index
    %c0_293 = arith.constant 0 : index
    %393 = vector.load %arg30[%c4_291, %c0_292, %c0_293] : memref<9x32x64xbf16, #tpu.memory_space<vmem>>, vector<1x32x64xbf16>
    %394 = vector.shape_cast %393 : vector<1x32x64xbf16> to vector<32x64xbf16>
    %cst_294 = arith.constant dense<0.000000e+00> : vector<8x64xf32>
    %395 = tpu.matmul %392, %394, %cst_294 {dimension_numbers = #tpu.dot_dimension_numbers<[1], [0], [0], [1], [0, 0, 1, 1], [], []>} : vector<8x32xbf16>, vector<32x64xbf16>, vector<8x64xf32> -> vector<8x64xf32>
    %396 = arith.addf %391, %395 : vector<8x64xf32>
    %397 = vector.extract_strided_slice %372 {offsets = [40, 0], sizes = [8, 32], strides = [1, 1]} : vector<72x32xbf16> to vector<8x32xbf16>
    %c5_295 = arith.constant 5 : index
    %c0_296 = arith.constant 0 : index
    %c0_297 = arith.constant 0 : index
    %398 = vector.load %arg30[%c5_295, %c0_296, %c0_297] : memref<9x32x64xbf16, #tpu.memory_space<vmem>>, vector<1x32x64xbf16>
    %399 = vector.shape_cast %398 : vector<1x32x64xbf16> to vector<32x64xbf16>
    %cst_298 = arith.constant dense<0.000000e+00> : vector<8x64xf32>
    %400 = tpu.matmul %397, %399, %cst_298 {dimension_numbers = #tpu.dot_dimension_numbers<[1], [0], [0], [1], [0, 0, 1, 1], [], []>} : vector<8x32xbf16>, vector<32x64xbf16>, vector<8x64xf32> -> vector<8x64xf32>
    %401 = arith.addf %396, %400 : vector<8x64xf32>
    %402 = vector.extract_strided_slice %372 {offsets = [48, 0], sizes = [8, 32], strides = [1, 1]} : vector<72x32xbf16> to vector<8x32xbf16>
    %c6_299 = arith.constant 6 : index
    %c0_300 = arith.constant 0 : index
    %c0_301 = arith.constant 0 : index
    %403 = vector.load %arg30[%c6_299, %c0_300, %c0_301] : memref<9x32x64xbf16, #tpu.memory_space<vmem>>, vector<1x32x64xbf16>
    %404 = vector.shape_cast %403 : vector<1x32x64xbf16> to vector<32x64xbf16>
    %cst_302 = arith.constant dense<0.000000e+00> : vector<8x64xf32>
    %405 = tpu.matmul %402, %404, %cst_302 {dimension_numbers = #tpu.dot_dimension_numbers<[1], [0], [0], [1], [0, 0, 1, 1], [], []>} : vector<8x32xbf16>, vector<32x64xbf16>, vector<8x64xf32> -> vector<8x64xf32>
    %406 = arith.addf %401, %405 : vector<8x64xf32>
    %407 = vector.extract_strided_slice %372 {offsets = [56, 0], sizes = [8, 32], strides = [1, 1]} : vector<72x32xbf16> to vector<8x32xbf16>
    %c7_303 = arith.constant 7 : index
    %c0_304 = arith.constant 0 : index
    %c0_305 = arith.constant 0 : index
    %408 = vector.load %arg30[%c7_303, %c0_304, %c0_305] : memref<9x32x64xbf16, #tpu.memory_space<vmem>>, vector<1x32x64xbf16>
    %409 = vector.shape_cast %408 : vector<1x32x64xbf16> to vector<32x64xbf16>
    %cst_306 = arith.constant dense<0.000000e+00> : vector<8x64xf32>
    %410 = tpu.matmul %407, %409, %cst_306 {dimension_numbers = #tpu.dot_dimension_numbers<[1], [0], [0], [1], [0, 0, 1, 1], [], []>} : vector<8x32xbf16>, vector<32x64xbf16>, vector<8x64xf32> -> vector<8x64xf32>
    %411 = arith.addf %406, %410 : vector<8x64xf32>
    %412 = vector.extract_strided_slice %372 {offsets = [64, 0], sizes = [8, 32], strides = [1, 1]} : vector<72x32xbf16> to vector<8x32xbf16>
    %c8_307 = arith.constant 8 : index
    %c0_308 = arith.constant 0 : index
    %c0_309 = arith.constant 0 : index
    %413 = vector.load %arg30[%c8_307, %c0_308, %c0_309] : memref<9x32x64xbf16, #tpu.memory_space<vmem>>, vector<1x32x64xbf16>
    %414 = vector.shape_cast %413 : vector<1x32x64xbf16> to vector<32x64xbf16>
    %cst_310 = arith.constant dense<0.000000e+00> : vector<8x64xf32>
    %415 = tpu.matmul %412, %414, %cst_310 {dimension_numbers = #tpu.dot_dimension_numbers<[1], [0], [0], [1], [0, 0, 1, 1], [], []>} : vector<8x32xbf16>, vector<32x64xbf16>, vector<8x64xf32> -> vector<8x64xf32>
    %416 = arith.addf %411, %415 : vector<8x64xf32>
    %c0_311 = arith.constant 0 : index
    %c0_312 = arith.constant 0 : index
    %417 = vector.load %arg31[%c0_311, %c0_312] : memref<1x64xf32, #tpu.memory_space<vmem>>, vector<1x64xf32>
    %418 = vector.broadcast %417 : vector<1x64xf32> to vector<8x64xf32>
    %419 = arith.addf %416, %418 : vector<8x64xf32>
    %cst_313 = arith.constant 0.000000e+00 : f32
    %420 = vector.broadcast %cst_313 : f32 to vector<8x64xf32>
    %421 = arith.maximumf %419, %420 : vector<8x64xf32>
    %422 = arith.truncf %421 : vector<8x64xf32> to vector<8x64xbf16>
    %c0_314 = arith.constant 0 : index
    %c0_315 = arith.constant 0 : index
    %423 = vector.load %arg32[%c0_314, %c0_315] : memref<8x8xbf16, #tpu.memory_space<vmem>>, vector<8x8xbf16>
    %cst_316 = arith.constant dense<0.000000e+00> : vector<8x32xf32>
    %424 = tpu.matmul %423, %369, %cst_316 {dimension_numbers = #tpu.dot_dimension_numbers<[1], [0], [0], [1], [0, 0, 1, 1], [], []>} : vector<8x8xbf16>, vector<8x32xbf16>, vector<8x32xf32> -> vector<8x32xf32>
    %425 = arith.truncf %424 : vector<8x32xf32> to vector<8x32xbf16>
    %c0_317 = arith.constant 0 : index
    %c0_318 = arith.constant 0 : index
    %c0_319 = arith.constant 0 : index
    %426 = vector.load %arg33[%c0_317, %c0_318, %c0_319] : memref<1x32x64xbf16, #tpu.memory_space<vmem>>, vector<1x32x64xbf16>
    %427 = vector.shape_cast %426 : vector<1x32x64xbf16> to vector<32x64xbf16>
    %cst_320 = arith.constant dense<0.000000e+00> : vector<8x64xf32>
    %428 = tpu.matmul %425, %427, %cst_320 {dimension_numbers = #tpu.dot_dimension_numbers<[1], [0], [0], [1], [0, 0, 1, 1], [], []>} : vector<8x32xbf16>, vector<32x64xbf16>, vector<8x64xf32> -> vector<8x64xf32>
    %c0_321 = arith.constant 0 : index
    %c0_322 = arith.constant 0 : index
    %429 = vector.load %arg34[%c0_321, %c0_322] : memref<1x64xf32, #tpu.memory_space<vmem>>, vector<1x64xf32>
    %430 = vector.broadcast %429 : vector<1x64xf32> to vector<8x64xf32>
    %431 = arith.addf %428, %430 : vector<8x64xf32>
    %c0_323 = arith.constant 0 : index
    %c0_324 = arith.constant 0 : index
    %432 = vector.load %arg35[%c0_323, %c0_324] : memref<72x8xbf16, #tpu.memory_space<vmem>>, vector<72x8xbf16>
    %cst_325 = arith.constant dense<0.000000e+00> : vector<72x64xf32>
    %433 = tpu.matmul %432, %422, %cst_325 {dimension_numbers = #tpu.dot_dimension_numbers<[1], [0], [0], [1], [0, 0, 1, 1], [], []>} : vector<72x8xbf16>, vector<8x64xbf16>, vector<72x64xf32> -> vector<72x64xf32>
    %434 = arith.truncf %433 : vector<72x64xf32> to vector<72x64xbf16>
    %435 = vector.extract_strided_slice %434 {offsets = [0, 0], sizes = [8, 64], strides = [1, 1]} : vector<72x64xbf16> to vector<8x64xbf16>
    %c0_326 = arith.constant 0 : index
    %c0_327 = arith.constant 0 : index
    %c0_328 = arith.constant 0 : index
    %436 = vector.load %arg36[%c0_326, %c0_327, %c0_328] : memref<9x64x64xbf16, #tpu.memory_space<vmem>>, vector<1x64x64xbf16>
    %437 = vector.shape_cast %436 : vector<1x64x64xbf16> to vector<64x64xbf16>
    %cst_329 = arith.constant dense<0.000000e+00> : vector<8x64xf32>
    %438 = tpu.matmul %435, %437, %cst_329 {dimension_numbers = #tpu.dot_dimension_numbers<[1], [0], [0], [1], [0, 0, 1, 1], [], []>} : vector<8x64xbf16>, vector<64x64xbf16>, vector<8x64xf32> -> vector<8x64xf32>
    %439 = vector.extract_strided_slice %434 {offsets = [8, 0], sizes = [8, 64], strides = [1, 1]} : vector<72x64xbf16> to vector<8x64xbf16>
    %c1_330 = arith.constant 1 : index
    %c0_331 = arith.constant 0 : index
    %c0_332 = arith.constant 0 : index
    %440 = vector.load %arg36[%c1_330, %c0_331, %c0_332] : memref<9x64x64xbf16, #tpu.memory_space<vmem>>, vector<1x64x64xbf16>
    %441 = vector.shape_cast %440 : vector<1x64x64xbf16> to vector<64x64xbf16>
    %cst_333 = arith.constant dense<0.000000e+00> : vector<8x64xf32>
    %442 = tpu.matmul %439, %441, %cst_333 {dimension_numbers = #tpu.dot_dimension_numbers<[1], [0], [0], [1], [0, 0, 1, 1], [], []>} : vector<8x64xbf16>, vector<64x64xbf16>, vector<8x64xf32> -> vector<8x64xf32>
    %443 = arith.addf %438, %442 : vector<8x64xf32>
    %444 = vector.extract_strided_slice %434 {offsets = [16, 0], sizes = [8, 64], strides = [1, 1]} : vector<72x64xbf16> to vector<8x64xbf16>
    %c2_334 = arith.constant 2 : index
    %c0_335 = arith.constant 0 : index
    %c0_336 = arith.constant 0 : index
    %445 = vector.load %arg36[%c2_334, %c0_335, %c0_336] : memref<9x64x64xbf16, #tpu.memory_space<vmem>>, vector<1x64x64xbf16>
    %446 = vector.shape_cast %445 : vector<1x64x64xbf16> to vector<64x64xbf16>
    %cst_337 = arith.constant dense<0.000000e+00> : vector<8x64xf32>
    %447 = tpu.matmul %444, %446, %cst_337 {dimension_numbers = #tpu.dot_dimension_numbers<[1], [0], [0], [1], [0, 0, 1, 1], [], []>} : vector<8x64xbf16>, vector<64x64xbf16>, vector<8x64xf32> -> vector<8x64xf32>
    %448 = arith.addf %443, %447 : vector<8x64xf32>
    %449 = vector.extract_strided_slice %434 {offsets = [24, 0], sizes = [8, 64], strides = [1, 1]} : vector<72x64xbf16> to vector<8x64xbf16>
    %c3_338 = arith.constant 3 : index
    %c0_339 = arith.constant 0 : index
    %c0_340 = arith.constant 0 : index
    %450 = vector.load %arg36[%c3_338, %c0_339, %c0_340] : memref<9x64x64xbf16, #tpu.memory_space<vmem>>, vector<1x64x64xbf16>
    %451 = vector.shape_cast %450 : vector<1x64x64xbf16> to vector<64x64xbf16>
    %cst_341 = arith.constant dense<0.000000e+00> : vector<8x64xf32>
    %452 = tpu.matmul %449, %451, %cst_341 {dimension_numbers = #tpu.dot_dimension_numbers<[1], [0], [0], [1], [0, 0, 1, 1], [], []>} : vector<8x64xbf16>, vector<64x64xbf16>, vector<8x64xf32> -> vector<8x64xf32>
    %453 = arith.addf %448, %452 : vector<8x64xf32>
    %454 = vector.extract_strided_slice %434 {offsets = [32, 0], sizes = [8, 64], strides = [1, 1]} : vector<72x64xbf16> to vector<8x64xbf16>
    %c4_342 = arith.constant 4 : index
    %c0_343 = arith.constant 0 : index
    %c0_344 = arith.constant 0 : index
    %455 = vector.load %arg36[%c4_342, %c0_343, %c0_344] : memref<9x64x64xbf16, #tpu.memory_space<vmem>>, vector<1x64x64xbf16>
    %456 = vector.shape_cast %455 : vector<1x64x64xbf16> to vector<64x64xbf16>
    %cst_345 = arith.constant dense<0.000000e+00> : vector<8x64xf32>
    %457 = tpu.matmul %454, %456, %cst_345 {dimension_numbers = #tpu.dot_dimension_numbers<[1], [0], [0], [1], [0, 0, 1, 1], [], []>} : vector<8x64xbf16>, vector<64x64xbf16>, vector<8x64xf32> -> vector<8x64xf32>
    %458 = arith.addf %453, %457 : vector<8x64xf32>
    %459 = vector.extract_strided_slice %434 {offsets = [40, 0], sizes = [8, 64], strides = [1, 1]} : vector<72x64xbf16> to vector<8x64xbf16>
    %c5_346 = arith.constant 5 : index
    %c0_347 = arith.constant 0 : index
    %c0_348 = arith.constant 0 : index
    %460 = vector.load %arg36[%c5_346, %c0_347, %c0_348] : memref<9x64x64xbf16, #tpu.memory_space<vmem>>, vector<1x64x64xbf16>
    %461 = vector.shape_cast %460 : vector<1x64x64xbf16> to vector<64x64xbf16>
    %cst_349 = arith.constant dense<0.000000e+00> : vector<8x64xf32>
    %462 = tpu.matmul %459, %461, %cst_349 {dimension_numbers = #tpu.dot_dimension_numbers<[1], [0], [0], [1], [0, 0, 1, 1], [], []>} : vector<8x64xbf16>, vector<64x64xbf16>, vector<8x64xf32> -> vector<8x64xf32>
    %463 = arith.addf %458, %462 : vector<8x64xf32>
    %464 = vector.extract_strided_slice %434 {offsets = [48, 0], sizes = [8, 64], strides = [1, 1]} : vector<72x64xbf16> to vector<8x64xbf16>
    %c6_350 = arith.constant 6 : index
    %c0_351 = arith.constant 0 : index
    %c0_352 = arith.constant 0 : index
    %465 = vector.load %arg36[%c6_350, %c0_351, %c0_352] : memref<9x64x64xbf16, #tpu.memory_space<vmem>>, vector<1x64x64xbf16>
    %466 = vector.shape_cast %465 : vector<1x64x64xbf16> to vector<64x64xbf16>
    %cst_353 = arith.constant dense<0.000000e+00> : vector<8x64xf32>
    %467 = tpu.matmul %464, %466, %cst_353 {dimension_numbers = #tpu.dot_dimension_numbers<[1], [0], [0], [1], [0, 0, 1, 1], [], []>} : vector<8x64xbf16>, vector<64x64xbf16>, vector<8x64xf32> -> vector<8x64xf32>
    %468 = arith.addf %463, %467 : vector<8x64xf32>
    %469 = vector.extract_strided_slice %434 {offsets = [56, 0], sizes = [8, 64], strides = [1, 1]} : vector<72x64xbf16> to vector<8x64xbf16>
    %c7_354 = arith.constant 7 : index
    %c0_355 = arith.constant 0 : index
    %c0_356 = arith.constant 0 : index
    %470 = vector.load %arg36[%c7_354, %c0_355, %c0_356] : memref<9x64x64xbf16, #tpu.memory_space<vmem>>, vector<1x64x64xbf16>
    %471 = vector.shape_cast %470 : vector<1x64x64xbf16> to vector<64x64xbf16>
    %cst_357 = arith.constant dense<0.000000e+00> : vector<8x64xf32>
    %472 = tpu.matmul %469, %471, %cst_357 {dimension_numbers = #tpu.dot_dimension_numbers<[1], [0], [0], [1], [0, 0, 1, 1], [], []>} : vector<8x64xbf16>, vector<64x64xbf16>, vector<8x64xf32> -> vector<8x64xf32>
    %473 = arith.addf %468, %472 : vector<8x64xf32>
    %474 = vector.extract_strided_slice %434 {offsets = [64, 0], sizes = [8, 64], strides = [1, 1]} : vector<72x64xbf16> to vector<8x64xbf16>
    %c8_358 = arith.constant 8 : index
    %c0_359 = arith.constant 0 : index
    %c0_360 = arith.constant 0 : index
    %475 = vector.load %arg36[%c8_358, %c0_359, %c0_360] : memref<9x64x64xbf16, #tpu.memory_space<vmem>>, vector<1x64x64xbf16>
    %476 = vector.shape_cast %475 : vector<1x64x64xbf16> to vector<64x64xbf16>
    %cst_361 = arith.constant dense<0.000000e+00> : vector<8x64xf32>
    %477 = tpu.matmul %474, %476, %cst_361 {dimension_numbers = #tpu.dot_dimension_numbers<[1], [0], [0], [1], [0, 0, 1, 1], [], []>} : vector<8x64xbf16>, vector<64x64xbf16>, vector<8x64xf32> -> vector<8x64xf32>
    %478 = arith.addf %473, %477 : vector<8x64xf32>
    %c0_362 = arith.constant 0 : index
    %c0_363 = arith.constant 0 : index
    %479 = vector.load %arg37[%c0_362, %c0_363] : memref<1x64xf32, #tpu.memory_space<vmem>>, vector<1x64xf32>
    %480 = vector.broadcast %479 : vector<1x64xf32> to vector<8x64xf32>
    %481 = arith.addf %478, %480 : vector<8x64xf32>
    %482 = arith.addf %481, %431 : vector<8x64xf32>
    %cst_364 = arith.constant 0.000000e+00 : f32
    %483 = vector.broadcast %cst_364 : f32 to vector<8x64xf32>
    %484 = arith.maximumf %482, %483 : vector<8x64xf32>
    %c0_365 = arith.constant 0 : index
    %c0_366 = arith.constant 0 : index
    %485 = vector.load %arg38[%c0_365, %c0_366] : memref<8x1xf32, #tpu.memory_space<vmem>>, vector<8x1xf32>
    %486 = vector.broadcast %485 : vector<8x1xf32> to vector<8x64xf32>
    %487 = arith.mulf %484, %486 : vector<8x64xf32>
    %cst_367 = arith.constant dense<0.000000e+00> : vector<64xf32>
    %488 = vector.multi_reduction <add>, %487, %cst_367 [0] : vector<8x64xf32> to vector<64xf32>
    %489 = vector.shape_cast %488 : vector<64xf32> to vector<1x64xf32>
    %c0_368 = arith.constant 0 : index
    %c0_369 = arith.constant 0 : index
    %c0_370 = arith.constant 0 : index
    %490 = vector.load %arg39[%c0_368, %c0_369, %c0_370] : memref<1x1x64xf32, #tpu.memory_space<vmem>>, vector<1x1x64xf32>
    %491 = vector.shape_cast %490 : vector<1x1x64xf32> to vector<1x64xf32>
    %492 = vector.shape_cast %489 : vector<1x64xf32> to vector<1x1x64xf32>
    tpu.vector_store %arg39[%c0_368, %c0_369, %c0_370], %492 {strides = array<i32>} : memref<1x1x64xf32, #tpu.memory_space<vmem>>, vector<1x1x64xf32>,
    return
  }
  func.func @transform_0(%arg0: i32) -> (i32, i32, i32) {
    %c0_i32 = arith.constant 0 : i32
    %c0_i32_0 = arith.constant 0 : i32
    %c0_i32_1 = arith.constant 0 : i32
    return %arg0, %c0_i32, %c0_i32_0 : i32, i32, i32
  }
  func.func @transform_1(%arg0: i32) -> (i32, i32) {
    %c0_i32 = arith.constant 0 : i32
    %c0_i32_0 = arith.constant 0 : i32
    %c0_i32_1 = arith.constant 0 : i32
    return %c0_i32, %c0_i32_0 : i32, i32
  }
  func.func @transform_2(%arg0: i32) -> (i32, i32) {
    %c0_i32 = arith.constant 0 : i32
    %c0_i32_0 = arith.constant 0 : i32
    %c0_i32_1 = arith.constant 0 : i32
    return %c0_i32, %c0_i32_0 : i32, i32
  }
  func.func @transform_3(%arg0: i32) -> (i32, i32) {
    %c0_i32 = arith.constant 0 : i32
    %c0_i32_0 = arith.constant 0 : i32
    %c0_i32_1 = arith.constant 0 : i32
    return %c0_i32, %c0_i32_0 : i32, i32
  }
  func.func @transform_4(%arg0: i32) -> (i32, i32) {
    %c0_i32 = arith.constant 0 : i32
    %c0_i32_0 = arith.constant 0 : i32
    %c0_i32_1 = arith.constant 0 : i32
    return %c0_i32, %c0_i32_0 : i32, i32
  }
  func.func @transform_5(%arg0: i32) -> (i32, i32, i32) {
    %c0_i32 = arith.constant 0 : i32
    %c0_i32_0 = arith.constant 0 : i32
    %c0_i32_1 = arith.constant 0 : i32
    %c0_i32_2 = arith.constant 0 : i32
    return %c0_i32, %c0_i32_0, %c0_i32_1 : i32, i32, i32
  }
  func.func @transform_6(%arg0: i32) -> (i32, i32) {
    %c0_i32 = arith.constant 0 : i32
    %c0_i32_0 = arith.constant 0 : i32
    %c0_i32_1 = arith.constant 0 : i32
    return %c0_i32, %c0_i32_0 : i32, i32
  }
  func.func @transform_7(%arg0: i32) -> (i32, i32) {
    %c0_i32 = arith.constant 0 : i32
    %c0_i32_0 = arith.constant 0 : i32
    %c0_i32_1 = arith.constant 0 : i32
    return %c0_i32, %c0_i32_0 : i32, i32
  }
  func.func @transform_8(%arg0: i32) -> (i32, i32, i32) {
    %c0_i32 = arith.constant 0 : i32
    %c0_i32_0 = arith.constant 0 : i32
    %c0_i32_1 = arith.constant 0 : i32
    %c0_i32_2 = arith.constant 0 : i32
    return %c0_i32, %c0_i32_0, %c0_i32_1 : i32, i32, i32
  }
  func.func @transform_9(%arg0: i32) -> (i32, i32) {
    %c0_i32 = arith.constant 0 : i32
    %c0_i32_0 = arith.constant 0 : i32
    %c0_i32_1 = arith.constant 0 : i32
    return %c0_i32, %c0_i32_0 : i32, i32
  }
  func.func @transform_10(%arg0: i32) -> (i32, i32) {
    %c0_i32 = arith.constant 0 : i32
    %c0_i32_0 = arith.constant 0 : i32
    %c0_i32_1 = arith.constant 0 : i32
    return %c0_i32, %c0_i32_0 : i32, i32
  }
  func.func @transform_11(%arg0: i32) -> (i32, i32, i32) {
    %c0_i32 = arith.constant 0 : i32
    %c0_i32_0 = arith.constant 0 : i32
    %c0_i32_1 = arith.constant 0 : i32
    %c0_i32_2 = arith.constant 0 : i32
    return %c0_i32, %c0_i32_0, %c0_i32_1 : i32, i32, i32
  }
  func.func @transform_12(%arg0: i32) -> (i32, i32) {
    %c0_i32 = arith.constant 0 : i32
    %c0_i32_0 = arith.constant 0 : i32
    %c0_i32_1 = arith.constant 0 : i32
    return %c0_i32, %c0_i32_0 : i32, i32
  }
  func.func @transform_13(%arg0: i32) -> (i32, i32) {
    %c0_i32 = arith.constant 0 : i32
    %c0_i32_0 = arith.constant 0 : i32
    %c0_i32_1 = arith.constant 0 : i32
    return %c0_i32, %c0_i32_0 : i32, i32
  }
  func.func @transform_14(%arg0: i32) -> (i32, i32, i32) {
    %c0_i32 = arith.constant 0 : i32
    %c0_i32_0 = arith.constant 0 : i32
    %c0_i32_1 = arith.constant 0 : i32
    %c0_i32_2 = arith.constant 0 : i32
    return %c0_i32, %c0_i32_0, %c0_i32_1 : i32, i32, i32
  }
  func.func @transform_15(%arg0: i32) -> (i32, i32) {
    %c0_i32 = arith.constant 0 : i32
    %c0_i32_0 = arith.constant 0 : i32
    %c0_i32_1 = arith.constant 0 : i32
    return %c0_i32, %c0_i32_0 : i32, i32
  }
  func.func @transform_16(%arg0: i32) -> (i32, i32) {
    %c0_i32 = arith.constant 0 : i32
    %c0_i32_0 = arith.constant 0 : i32
    %c0_i32_1 = arith.constant 0 : i32
    return %c0_i32, %c0_i32_0 : i32, i32
  }
  func.func @transform_17(%arg0: i32) -> (i32, i32, i32) {
    %c0_i32 = arith.constant 0 : i32
    %c0_i32_0 = arith.constant 0 : i32
    %c0_i32_1 = arith.constant 0 : i32
    %c0_i32_2 = arith.constant 0 : i32
    return %c0_i32, %c0_i32_0, %c0_i32_1 : i32, i32, i32
  }
  func.func @transform_18(%arg0: i32) -> (i32, i32) {
    %c0_i32 = arith.constant 0 : i32
    %c0_i32_0 = arith.constant 0 : i32
    %c0_i32_1 = arith.constant 0 : i32
    return %c0_i32, %c0_i32_0 : i32, i32
  }
  func.func @transform_19(%arg0: i32) -> (i32, i32) {
    %c0_i32 = arith.constant 0 : i32
    %c0_i32_0 = arith.constant 0 : i32
    %c0_i32_1 = arith.constant 0 : i32
    return %c0_i32, %c0_i32_0 : i32, i32
  }
  func.func @transform_20(%arg0: i32) -> (i32, i32, i32) {
    %c0_i32 = arith.constant 0 : i32
    %c0_i32_0 = arith.constant 0 : i32
    %c0_i32_1 = arith.constant 0 : i32
    %c0_i32_2 = arith.constant 0 : i32
    return %c0_i32, %c0_i32_0, %c0_i32_1 : i32, i32, i32
  }
  func.func @transform_21(%arg0: i32) -> (i32, i32) {
    %c0_i32 = arith.constant 0 : i32
    %c0_i32_0 = arith.constant 0 : i32
    %c0_i32_1 = arith.constant 0 : i32
    return %c0_i32, %c0_i32_0 : i32, i32
  }
  func.func @transform_22(%arg0: i32) -> (i32, i32) {
    %c0_i32 = arith.constant 0 : i32
    %c0_i32_0 = arith.constant 0 : i32
    %c0_i32_1 = arith.constant 0 : i32
    return %c0_i32, %c0_i32_0 : i32, i32
  }
  func.func @transform_23(%arg0: i32) -> (i32, i32, i32) {
    %c0_i32 = arith.constant 0 : i32
    %c0_i32_0 = arith.constant 0 : i32
    %c0_i32_1 = arith.constant 0 : i32
    %c0_i32_2 = arith.constant 0 : i32
    return %c0_i32, %c0_i32_0, %c0_i32_1 : i32, i32, i32
  }
  func.func @transform_24(%arg0: i32) -> (i32, i32) {
    %c0_i32 = arith.constant 0 : i32
    %c0_i32_0 = arith.constant 0 : i32
    %c0_i32_1 = arith.constant 0 : i32
    return %c0_i32, %c0_i32_0 : i32, i32
  }
  func.func @transform_25(%arg0: i32) -> (i32, i32) {
    %c0_i32 = arith.constant 0 : i32
    %c0_i32_0 = arith.constant 0 : i32
    %c0_i32_1 = arith.constant 0 : i32
    return %c0_i32, %c0_i32_0 : i32, i32
  }
  func.func @transform_26(%arg0: i32) -> (i32, i32, i32) {
    %c0_i32 = arith.constant 0 : i32
    %c0_i32_0 = arith.constant 0 : i32
    %c0_i32_1 = arith.constant 0 : i32
    %c0_i32_2 = arith.constant 0 : i32
    return %c0_i32, %c0_i32_0, %c0_i32_1 : i32, i32, i32
  }
  func.func @transform_27(%arg0: i32) -> (i32, i32) {
    %c0_i32 = arith.constant 0 : i32
    %c0_i32_0 = arith.constant 0 : i32
    %c0_i32_1 = arith.constant 0 : i32
    return %c0_i32, %c0_i32_0 : i32, i32
  }
  func.func @transform_28(%arg0: i32) -> (i32, i32) {
    %c0_i32 = arith.constant 0 : i32
    %c0_i32_0 = arith.constant 0 : i32
    %c0_i32_1 = arith.constant 0 : i32
    return %c0_i32, %c0_i32_0 : i32, i32
  }
  func.func @transform_29(%arg0: i32) -> (i32, i32, i32) {
    %c0_i32 = arith.constant 0 : i32
    %c0_i32_0 = arith.constant 0 : i32
    %c0_i32_1 = arith.constant 0 : i32
    %c0_i32_2 = arith.constant 0 : i32
    return %c0_i32, %c0_i32_0, %c0_i32_1 : i32, i32, i32
  }
  func.func @transform_30(%arg0: i32) -> (i32, i32) {
    %c0_i32 = arith.constant 0 : i32
    %c0_i32_0 = arith.constant 0 : i32
    %c0_i32_1 = arith.constant 0 : i32
    return %c0_i32, %c0_i32_0 : i32, i32
  }
  func.func @transform_31(%arg0: i32) -> (i32, i32) {
    %c0_i32 = arith.constant 0 : i32
    %c0_i32_0 = arith.constant 0 : i32
    %c0_i32_1 = arith.constant 0 : i32
    return %c0_i32, %c0_i32_0 : i32, i32
  }
  func.func @transform_32(%arg0: i32) -> (i32, i32, i32) {
    %c0_i32 = arith.constant 0 : i32
    %c0_i32_0 = arith.constant 0 : i32
    %c0_i32_1 = arith.constant 0 : i32
    %c0_i32_2 = arith.constant 0 : i32
    return %c0_i32, %c0_i32_0, %c0_i32_1 : i32, i32, i32
  }
  func.func @transform_33(%arg0: i32) -> (i32, i32) {
    %c0_i32 = arith.constant 0 : i32
    %c0_i32_0 = arith.constant 0 : i32
    %c0_i32_1 = arith.constant 0 : i32
    return %c0_i32, %c0_i32_0 : i32, i32
  }
  func.func @transform_34(%arg0: i32) -> (i32, i32) {
    %c0_i32 = arith.constant 0 : i32
    %c0_i32_0 = arith.constant 0 : i32
    %c0_i32_1 = arith.constant 0 : i32
    return %c0_i32, %c0_i32_0 : i32, i32
  }
  func.func @transform_35(%arg0: i32) -> (i32, i32, i32) {
    %c0_i32 = arith.constant 0 : i32
    %c0_i32_0 = arith.constant 0 : i32
    %c0_i32_1 = arith.constant 0 : i32
    %c0_i32_2 = arith.constant 0 : i32
    return %c0_i32, %c0_i32_0, %c0_i32_1 : i32, i32, i32
  }
  func.func @transform_36(%arg0: i32) -> (i32, i32) {
    %c0_i32 = arith.constant 0 : i32
    %c0_i32_0 = arith.constant 0 : i32
    %c0_i32_1 = arith.constant 0 : i32
    return %c0_i32, %c0_i32_0 : i32, i32
  }
  func.func @transform_37(%arg0: i32) -> (i32, i32) {
    %c0_i32 = arith.constant 0 : i32
    %c0_i32_0 = arith.constant 0 : i32
    %c0_i32_1 = arith.constant 0 : i32
    return %c0_i32, %c0_i32_0 : i32, i32
  }
  func.func @transform_38(%arg0: i32) -> (i32, i32, i32) {
    %c0_i32 = arith.constant 0 : i32
    %c0_i32_0 = arith.constant 0 : i32
    %c0_i32_1 = arith.constant 0 : i32
    return %arg0, %c0_i32, %c0_i32_0 : i32, i32, i32
  }
}

</mosaic_0001>

<bundles_post_ra>
// kernel: resnet_forward.1
= control target key start
LH: loop header
LB: loop body
LE: loop exit
PB: predicated region body
PF: predicated region fallthrough
CT: control target
= control target key end

     0   :  { %s12911_s6 = smov 1   ;;  %s12912_s10 = smov 2   ;;  %s14485_s0 = inlined_call_operand.smem [shape: u32[39], index: -1, kind: input, shape index: {}] }
   0x1   :  { %s12961_s5 = sld [smem:[%s14485_s0]]   ;;  %s12913_s14 = smov 3  }
   0x2   :  { %s12966_s9 = sld [smem:[%s14485_s0 + %s12911_s6]]   ;;  %s12914_s18 = smov 4  }
   0x3   :  { %s12971_s13 = sld [smem:[%s14485_s0 + %s12912_s10]]   ;;  %s12915_s22 = smov 5  }
   0x4   :  { %s12976_s17 = sld [smem:[%s14485_s0 + %s12913_s14]]   ;;  %s12916_s26 = smov 6  }
   0x5   :  { %s12981_s21 = sld [smem:[%s14485_s0 + %s12914_s18]]   ;;  %s12917_s30 = smov 7  }
   0x6   :  { %s12986_s25 = sld [smem:[%s14485_s0 + %s12915_s22]]   ;;  %s12918_s4 = smov 8  }
   0x7   :  { %14515 = sst [smem:[#allocation5_spill]] %s12961_s5  ;;  %s12919_s10 = smov 9  }
   0x8   :  { %14516 = sst [smem:[#allocation6_spill]] %s12966_s9  ;;  %s12920_s15 = smov 10  }
   0x9   :  { %14517 = sst [smem:[#allocation7_spill]] %s12971_s13  ;;  %s12921_s20 = smov 11  }
   0xa   :  { %s12991_s29 = sld [smem:[%s14485_s0 + %s12916_s26]]   ;;  %s12922_s26 = smov 12  }
   0xb   :  { %s12996_s3 = sld [smem:[%s14485_s0 + %s12917_s30]]   ;;  %s12923_s1 = smov 13  }
   0xc   :  { %s13001_s8 = sld [smem:[%s14485_s0 + %s12918_s4]]   ;;  %s12924_s7 = smov 14  }
   0xd   :  { %s13006_s14 = sld [smem:[%s14485_s0 + %s12919_s10]]   ;;  %s12926_s22 = smov 16  }
   0xe   :  { %s13011_s19 = sld [smem:[%s14485_s0 + %s12920_s15]]   ;;  %s12925_s15 = smov 15  }
   0xf   :  { %s13016_s24 = sld [smem:[%s14485_s0 + %s12921_s20]]   ;;  %s12927_s28 = smov 17  }
  0x10   :  { %s13021_s30 = sld [smem:[%s14485_s0 + %s12922_s26]]  }
  0x11   :  { %14518 = sst [smem:[#allocation8_spill]] %s12996_s3 }
  0x12   :  { %14519 = sst [smem:[#allocation9_spill]] %s13001_s8 }
  0x13   :  { %14520 = sst [smem:[#allocation10_spill]] %s13006_s14 }
  0x14   :  { %s13026_s6 = sld [smem:[%s14485_s0 + %s12923_s1]]  }
  0x15   :  { %s13031_s12 = sld [smem:[%s14485_s0 + %s12924_s7]]   ;;  %s12928_s7 = smov 18  }
  0x16   :  { %s13036_s20 = sld [smem:[%s14485_s0 + %s12925_s15]]   ;;  %s12929_s15 = smov 19  }
  0x17   :  { %s13041_s27 = sld [smem:[%s14485_s0 + %s12926_s22]]   ;;  %s12930_s22 = smov 20  }
  0x18   :  { %s13046_s4 = sld [smem:[%s14485_s0 + %s12927_s28]]   ;;  %s12931_s28 = smov 21  }
  0x1a   :  { %14521 = sst [smem:[#allocation11_spill]] %s13026_s6 }
  0x1b   :  { %14522 = sst [smem:[#allocation12_spill]] %s13031_s12 }
  0x1c   :  { %14523 = sst [smem:[#allocation13_spill]] %s13036_s20 }
  0x1d   :  { %14524 = sst [smem:[#allocation14_spill]] %s13041_s27 }
  0x1e   :  { %14525 = sst [smem:[#allocation15_spill]] %s13046_s4 }
  0x1f   :  { %s13051_s12 = sld [smem:[%s14485_s0 + %s12928_s7]]   ;;  %s12932_s7 = smov 22  }
  0x20   :  { %s13056_s20 = sld [smem:[%s14485_s0 + %s12929_s15]]   ;;  %s12933_s15 = smov 23  }
  0x21   :  { %s13061_s27 = sld [smem:[%s14485_s0 + %s12930_s22]]   ;;  %s12934_s22 = smov 24  }
  0x22   :  { %s13066_s4 = sld [smem:[%s14485_s0 + %s12931_s28]]   ;;  %s12935_s28 = smov 25  }
  0x25   :  { %14526 = sst [smem:[#allocation16_spill]] %s13051_s12 }
  0x26   :  { %14527 = sst [smem:[#allocation17_spill]] %s13056_s20 }
  0x27   :  { %14528 = sst [smem:[#allocation18_spill]] %s13061_s27 }
  0x28   :  { %14529 = sst [smem:[#allocation19_spill]] %s13066_s4 }
  0x29   :  { %s13071_s12 = sld [smem:[%s14485_s0 + %s12932_s7]]   ;;  %s12936_s7 = smov 26  }
  0x2a   :  { %s13076_s20 = sld [smem:[%s14485_s0 + %s12933_s15]]   ;;  %s12937_s15 = smov 27  }
  0x2b   :  { %s13081_s27 = sld [smem:[%s14485_s0 + %s12934_s22]]   ;;  %s12938_s22 = smov 28  }
  0x2c   :  { %s13086_s4 = sld [smem:[%s14485_s0 + %s12935_s28]]   ;;  %s12939_s28 = smov 29  }
  0x2f   :  { %14530 = sst [smem:[#allocation20_spill]] %s13071_s12 }
  0x30   :  { %14531 = sst [smem:[#allocation21_spill]] %s13076_s20 }
  0x31   :  { %14532 = sst [smem:[#allocation22_spill]] %s13081_s27 }
  0x32   :  { %14533 = sst [smem:[#allocation23_spill]] %s13086_s4 }
  0x33   :  { %s13091_s12 = sld [smem:[%s14485_s0 + %s12936_s7]]   ;;  %s12940_s7 = smov 30  }
  0x34   :  { %s13096_s20 = sld [smem:[%s14485_s0 + %s12937_s15]]   ;;  %s12941_s15 = smov 31  }
  0x35   :  { %s13101_s27 = sld [smem:[%s14485_s0 + %s12938_s22]]   ;;  %s12942_s22 = smov 32  }
  0x36   :  { %s13106_s4 = sld [smem:[%s14485_s0 + %s12939_s28]]   ;;  %s12943_s28 = smov 33  }
  0x39   :  { %14534 = sst [smem:[#allocation24_spill]] %s13091_s12 }
  0x3a   :  { %14535 = sst [smem:[#allocation25_spill]] %s13096_s20 }
  0x3b   :  { %14536 = sst [smem:[#allocation26_spill]] %s13101_s27 }
  0x3c   :  { %14537 = sst [smem:[#allocation27_spill]] %s13106_s4 }
  0x3d   :  { %s13111_s12 = sld [smem:[%s14485_s0 + %s12940_s7]]   ;;  %s12944_s7 = smov 34  }
  0x3e   :  { %s13116_s20 = sld [smem:[%s14485_s0 + %s12941_s15]]   ;;  %s12945_s15 = smov 35  }
  0x3f   :  { %s13121_s27 = sld [smem:[%s14485_s0 + %s12942_s22]]   ;;  %s12946_s22 = smov 36  }
  0x40   :  { %s13126_s4 = sld [smem:[%s14485_s0 + %s12943_s28]]   ;;  %s12947_s28 = smov 37  }
  0x43   :  { %14538 = sst [smem:[#allocation28_spill]] %s13111_s12 }
  0x44   :  { %14539 = sst [smem:[#allocation29_spill]] %s13116_s20 }
  0x45   :  { %14540 = sst [smem:[#allocation30_spill]] %s13121_s27 }
  0x46   :  { %14541 = sst [smem:[#allocation31_spill]] %s13126_s4 }
  0x47   :  { %s13131_s12 = sld [smem:[%s14485_s0 + %s12944_s7]]   ;;  %s12948_s7 = smov 38  }
  0x48   :  { %s13136_s20 = sld [smem:[%s14485_s0 + %s12945_s15]]  }
  0x49   :  { %s13141_s27 = sld [smem:[%s14485_s0 + %s12946_s22]]  }
  0x4a   :  { %s13146_s4 = sld [smem:[%s14485_s0 + %s12947_s28]]  }
  0x4d   :  { %14542 = sst [smem:[#allocation32_spill]] %s13131_s12 }
  0x4e   :  { %s13151_s12 = sld [smem:[%s14485_s0 + %s12948_s7]]  }
  0x50   :  { %14543 = sst [smem:[#allocation33_spill]] %s13146_s4 }
  0x51   :  { %82 = vsyncpa [#allocation3], 0 }
  0x52   :  { %84 = vsyncpa [#allocation3 + $0x1], 0  ;;  %s13153_s15 = smov 0   ;;  %s13155_s16 = smov 0  }
  0x53   :  { %s13157_s18 = smov 0   ;;  %s13159_s22 = smov 0  }
  0x54 LB: > { %s14544_s9 = sld [smem:[#allocation6_spill]]  ;;  %s13174_s0 = sadd.s32 4294967295, %s12909_s22   ;;  %s12905_s18 = sphi %s13157_s18, %s14595_s18   ;;  %s12901_s16 = sphi %s13155_s16, %s14594_s16   ;;  %s12897_s15 = sphi %s13153_s15, %s14593_s15   ;;  %s12909_s22 = sphi %s13159_s22, %s14596_s22  }
  0x55   : > { %s14545_s8 = sld [smem:[#allocation9_spill]]  ;;  %s10244_s23 = sadd.s32 4294967294, %s12909_s22  }
  0x56   : > { %s14546_s3 = sld [smem:[#allocation8_spill]]  ;;  %s13178_s26 = sadd.s32 1, %s12909_s22  }
  0x57   : > { %s900_s28 = sadd.s32 1, %s12905_s18  ;;  %s897_s1 = ssub.s32 %s12909_s22, %s13178_s26 }
  0x58   : > { %p910_p0 = scmp.ne.s32.totalorder %s12905_s18, %s12901_s16  ;;  %p898_p1 = scmp.eq.s32.totalorder %s897_s1, 0 }
  0x59   : > { %p911_p2 = scmp.eq.s32.totalorder %s13174_s0, 1  ;;  %p916_p3 = scmp.ne.s32.totalorder %s12901_s16, %s12897_s15 }
  0x5a   : > { %p917_p4 = scmp.eq.s32.totalorder %s10244_s23, 1  ;;  %p10247_p7 = scmp.ge.s32.totalorder %s12909_s22, 1 }
  0x5b   : > { %s13189_s2 = scalar_select %p898_p1, %s12905_s18, %s900_s28  }
  0x5c   : > { %p13191_p5 = por %p911_p2, %p910_p0  ;;  %p13195_p6 = por %p917_p4, %p916_p3 }
  0x5d   : > { %p1054_p8 = scmp.lt.s32.totalorder %s12909_s22, 3 }
  0x5f   : > { %p1055_p9 = pnand %p10247_p7, %p1054_p8 }
  0x61   : > { %1058 = sbr.rel (%p1055_p9) target bundleno = 4951 (0x1357), region = 172 }
  0x66   : > { %s14549_s5 = sld [smem:[#allocation5_spill]]  ;;  %v12479_v0 = vld [vmem:[%s14544_s9 + $0x38] sm:$0xff]   ;;  %v12949_v1 = vmov 0   ;;  %v12480_v2 = vld [vmem:[%s14544_s9 + $0x30] sm:$0xff]   ;;  %p1147_p10 = scmp.lt.s32.totalorder %s13174_s0, 1  ;;  %v12481_v3 = vld [vmem:[%s14544_s9 + $0x28] sm:$0xff]  }
  0x67   : > { %1465 = vmatprep.subr.bf16.mxu0 %v12949_v1  ;;  %2106 = vmatprep.subr.bf16.mxu1 %v12949_v1  ;;  %vm1412_vm0 = vcmask 195584   ;;  %v12482_v4 = vld [vmem:[%s14544_s9 + $0x20] sm:$0xff]   ;;  %v12483_v6 = vld [vmem:[%s14544_s9 + $0x18] sm:$0xff]   ;;  %v12484_v7 = vld [vmem:[%s14544_s9 + $0x10] sm:$0xff]   ;;  %vm1461_vm1 = vcmask 1043456   ;;  %s14550_s13 = sld [smem:[#allocation7_spill]] }
  0x68   : > { %1466 = vmatpush1.bf16.msra.mxu0 %v12479_v0  ;;  %12478 = vset.pattern.permute.xlu0 %v12949_v1  ;;  %s1148_s11 = scalar_select %p1147_p10, %s13174_s0, 1  ;;  %v12485_v8 = vld [vmem:[%s14544_s9 + $0x8] sm:$0xff]   ;;  %v12486_v9 = vld [vmem:[%s14544_s9] sm:$0xff]   ;;  %vm2747_vm2 = vcmask 523264   ;;  %vm3216_vm3 = vcmask 64512   ;;  %vm12951_vm4 = vmmov 0  }
  0x69   : > { %1467 = vmatprep.subr.bf16.mxu0 %v12949_v1  ;;  %v12487_v10 = vld [vmem:[%s14544_s9 + $0x48] ss:$0 sps:$4 sm:$0xff]   ;;  %v12488_v12 = vld [vmem:[%s14544_s9 + $0x40] sm:$0xff]   ;;  %s14565_s14 = sld [smem:[#allocation10_spill]]  ;;  %vm6427_vm5 = vcmask 130048   ;;  %vm7942_vm6 = vcmask 261120  }
  0x6a   : > { %s11025_s23 = sshll.u32 %s1148_s11, 8  ;;  %v1463_v11 = vsel %vm1461_vm1, %v12487_v10, 0  ;;  %s14570_s6 = sld [smem:[#allocation11_spill]]  ;;  %vm10136_vm7 = vcmask 516096  }
  0x6b   : > { %s14571_s1 = sld [smem:[#allocation14_spill]] }
  0x6c   : > { %1468 = vmatpush1.bf16.msra.mxu0 %v12480_v2  ;;  %s13212_s28 = scalar_lea.vmem %s14549_s5, %s11025_s23  ;;  %s14572_s11 = sld [smem:[#allocation12_spill]] }
  0x6d   : > { %1469 = vmatprep.subr.bf16.mxu0 %v12949_v1  ;;  %v12491_v5 = vld [vmem:[%s13212_s28 + $0x4] ss:$8 sps:$4 sm:$0xff]   ;;  %v12489_v13 = vld [vmem:[%s13212_s28] ss:$8 sps:$4 sm:$0xff]   ;;  %v12492_v14 = vld [vmem:[%s13212_s28 + $0x14] ss:$8 sps:$4 sm:$0xff]  }
  0x6e   : > { %10293 = vmatprep.mubr.msk.bf16.mxu0 %vm1412_vm0, %v12491_v5  ;;  %v12494_v15 = vld [vmem:[%s13212_s28 + $0x10] ss:$8 sps:$4 sm:$0xff]   ;;  %v12495_v16 = vld [vmem:[%s13212_s28 + $0x24] ss:$8 sps:$4 sm:$0xff]   ;;  %v12497_v17 = vld [vmem:[%s13212_s28 + $0x20] ss:$8 sps:$4 sm:$0xff]  }
  0x6f   : > { %v12498_v18 = vld [vmem:[%s13212_s28 + $0x34] ss:$8 sps:$4 sm:$0xff]   ;;  %v12500_v19 = vld [vmem:[%s13212_s28 + $0x30] ss:$8 sps:$4 sm:$0xff]   ;;  %v12501_v20 = vld [vmem:[%s13212_s28 + $0x44] ss:$8 sps:$4 sm:$0xff]  }
  0x70   : > { %1470 = vmatpush1.bf16.msra.mxu0 %v12481_v3  ;;  %v12503_v21 = vld [vmem:[%s13212_s28 + $0x40] ss:$8 sps:$4 sm:$0xff]   ;;  %v12504_v22 = vld [vmem:[%s13212_s28 + $0x54] ss:$8 sps:$4 sm:$0xff]   ;;  %v12506_v23 = vld [vmem:[%s13212_s28 + $0x50] ss:$8 sps:$4 sm:$0xff]  }
  0x71   : > { %1471 = vmatprep.subr.bf16.mxu0 %v12949_v1  ;;  %v12507_v24 = vld [vmem:[%s13212_s28 + $0x64] ss:$8 sps:$4 sm:$0xff]   ;;  %v12509_v25 = vld [vmem:[%s13212_s28 + $0x60] ss:$8 sps:$4 sm:$0xff]   ;;  %v12510_v26 = vld [vmem:[%s13212_s28 + $0x74] ss:$8 sps:$4 sm:$0xff]  }
  0x72   : > { %v12512_v27 = vld [vmem:[%s13212_s28 + $0x70] ss:$8 sps:$4 sm:$0xff]   ;;  %v12513_v28 = vld [vmem:[%s13212_s28 + $0x84] ss:$8 sps:$4 sm:$0xff]   ;;  %v12515_v29 = vld [vmem:[%s13212_s28 + $0x80] ss:$8 sps:$4 sm:$0xff]  }
  0x73   : > { %v12516_v30 = vld [vmem:[%s13212_s28 + $0x94] ss:$8 sps:$4 sm:$0xff]   ;;  %v12518_v31 = vld [vmem:[%s13212_s28 + $0x90] ss:$8 sps:$4 sm:$0xff]   ;;  %v12519_v32 = vld [vmem:[%s13212_s28 + $0xa4] ss:$8 sps:$4 sm:$0xff]  }
  0x74   : > { %1472 = vmatpush1.bf16.msra.mxu0 %v12482_v4  ;;  %v12521_v33 = vld [vmem:[%s13212_s28 + $0xa0] ss:$8 sps:$4 sm:$0xff]   ;;  %v12522_v34 = vld [vmem:[%s13212_s28 + $0xb4] ss:$8 sps:$4 sm:$0xff]   ;;  %v12524_v35 = vld [vmem:[%s13212_s28 + $0xb0] ss:$8 sps:$4 sm:$0xff]  }
  0x75   : > { %1473 = vmatprep.subr.bf16.mxu0 %v12949_v1  ;;  %v12525_v36 = vld [vmem:[%s13212_s28 + $0xc4] ss:$8 sps:$4 sm:$0xff]   ;;  %v12527_v37 = vld [vmem:[%s13212_s28 + $0xc0] ss:$8 sps:$4 sm:$0xff]   ;;  %v12528_v38 = vld [vmem:[%s13212_s28 + $0xd4] ss:$8 sps:$4 sm:$0xff]  }
  0x76   : > { %v12530_v39 = vld [vmem:[%s13212_s28 + $0xd0] ss:$8 sps:$4 sm:$0xff]   ;;  %v12531_v40 = vld [vmem:[%s13212_s28 + $0xe4] ss:$8 sps:$4 sm:$0xff]   ;;  %v12533_v41 = vld [vmem:[%s13212_s28 + $0xe0] ss:$8 sps:$4 sm:$0xff]  }
  0x77   : > { %v12534_v42 = vld [vmem:[%s13212_s28 + $0xf4] ss:$8 sps:$4 sm:$0xff]   ;;  %v12536_v43 = vld [vmem:[%s13212_s28 + $0xf0] ss:$8 sps:$4 sm:$0xff]   ;;  %v13278_v44 = vld [vmem:[%s14550_s13] ss:$0 sm:$0xff] }
  0x78   : > { %1474 = vmatpush1.bf16.msra.mxu0 %v12483_v6  ;;  %s14573_s23 = sld [smem:[#allocation15_spill]] }
  0x79   : > { %1475 = vmatprep.subr.bf16.mxu0 %v12949_v1  ;;  %s14574_s28 = sld [smem:[#allocation16_spill]] }
  0x7a   : > { %s14585_s5 = sld [smem:[#allocation26_spill]] }
  0x7b   : > { %s14591_s4 = sld [smem:[#allocation33_spill]] }
  0x7c   : > { %1476 = vmatpush1.bf16.msra.mxu0 %v12484_v7 }
  0x7d   : > { %1477 = vmatprep.subr.bf16.mxu0 %v12949_v1 }
  0x80   : > { %1478 = vmatpush1.bf16.msra.mxu0 %v12485_v8  ;;  %v12539_v8 = vld [vmem:[%s12976_s17 + $0x4] ss:$8 sps:$4 sm:$0xff]  }
  0x81   : > { %1479 = vmatprep.subr.bf16.mxu0 %v12949_v1  ;;  %2138 = vmatprep.mubr.bf16.mxu1 %v12539_v8 }
  0x84   : > { %1480 = vmatpush1.bf16.msra.mxu0 %v12486_v9 }
  0x85   : > { %1493 = vmatprep.subr.bf16.mxu0 %v12949_v1 }
  0x88   : > { %1494 = vmatpush2.bf16.msra.mxu0 %v1463_v11 }
  0x89   : > { %1495 = vmatprep.subr.bf16.mxu0 %v12949_v1 }
  0x8c   : > { %1496 = vmatpush2.bf16.msra.mxu0 %v12488_v12 }
  0x8f   : > { %1498 = vmatmul.mubr.bf16.vlgmr.msra.gmra.mxu0 %v12489_v13 }
  0x90   : > { %10294 = vmatprep.mubr.msk.bf16.mxu0 %vm1412_vm0, %v12492_v14 }
  0x97   : > { %1506 = vmatmul.mubr.bf16.gmra.mxu0 %v12494_v15 }
  0x98   : > { %10295 = vmatprep.mubr.msk.bf16.mxu0 %vm1412_vm0, %v12495_v16 }
  0x9f   : > { %1514 = vmatmul.mubr.bf16.gmra.mxu0 %v12497_v17 }
  0xa0   : > { %10296 = vmatprep.mubr.msk.bf16.mxu0 %vm1412_vm0, %v12498_v18 }
  0xa7   : > { %1522 = vmatmul.mubr.bf16.gmra.mxu0 %v12500_v19 }
  0xa8   : > { %10297 = vmatprep.mubr.msk.bf16.mxu0 %vm1412_vm0, %v12501_v20 }
  0xaf   : > { %1530 = vmatmul.mubr.bf16.gmra.mxu0 %v12503_v21 }
  0xb0   : > { %10298 = vmatprep.mubr.msk.bf16.mxu0 %vm1412_vm0, %v12504_v22 }
  0xb7   : > { %1538 = vmatmul.mubr.bf16.gmra.mxu0 %v12506_v23 }
  0xb8   : > { %10299 = vmatprep.mubr.msk.bf16.mxu0 %vm1412_vm0, %v12507_v24 }
  0xbf   : > { %1546 = vmatmul.mubr.bf16.gmra.mxu0 %v12509_v25 }
  0xc0   : > { %10300 = vmatprep.mubr.msk.bf16.mxu0 %vm1412_vm0, %v12510_v26 }
  0xc7   : > { %1554 = vmatmul.mubr.bf16.gmra.mxu0 %v12512_v27 }
  0xc8   : > { %10301 = vmatprep.mubr.msk.bf16.mxu0 %vm1412_vm0, %v12513_v28 }
  0xcf   : > { %1562 = vmatmul.mubr.bf16.gmra.mxu0 %v12515_v29 }
  0xd0   : > { %10302 = vmatprep.mubr.msk.bf16.mxu0 %vm1412_vm0, %v12516_v30 }
  0xd7   : > { %1570 = vmatmul.mubr.bf16.gmra.mxu0 %v12518_v31 }
  0xd8   : > { %10303 = vmatprep.mubr.msk.bf16.mxu0 %vm1412_vm0, %v12519_v32 }
  0xdf   : > { %1578 = vmatmul.mubr.bf16.gmra.mxu0 %v12521_v33 }
  0xe0   : > { %10304 = vmatprep.mubr.msk.bf16.mxu0 %vm1412_vm0, %v12522_v34 }
  0xe7   : > { %1586 = vmatmul.mubr.bf16.gmra.mxu0 %v12524_v35 }
  0xe8   : > { %10305 = vmatprep.mubr.msk.bf16.mxu0 %vm1412_vm0, %v12525_v36 }
  0xef   : > { %1594 = vmatmul.mubr.bf16.gmra.mxu0 %v12527_v37 }
  0xf0   : > { %10306 = vmatprep.mubr.msk.bf16.mxu0 %vm1412_vm0, %v12528_v38 }
  0xf7   : > { %1602 = vmatmul.mubr.bf16.gmra.mxu0 %v12530_v39 }
  0xf8   : > { %10307 = vmatprep.mubr.msk.bf16.mxu0 %vm1412_vm0, %v12531_v40 }
  0xff   : > { %1610 = vmatmul.mubr.bf16.gmra.mxu0 %v12533_v41 }
 0x100   : > { %10308 = vmatprep.mubr.msk.bf16.mxu0 %vm1412_vm0, %v12534_v42 }
 0x107   : > { %1618 = vmatmul.mubr.bf16.gmra.mxu0 %v12536_v43 }
 0x14f   : > { %v1499_v45 = vpop.f32.mrf.mxu0 }
 0x150   : > { %v1500_v47 = vadd.f32 %v13278_v44, %v1499_v45 }
 0x151   : > { %v1501_v46 = vpop.f32.mrf.mxu0 }
 0x152   : > { %v1626_v51 = vmax.f32 %v1500_v47, 0.0 }
 0x153   : > { %v1502_v48 = vpop.f32.mrf.mxu0 }
 0x154   : > { %v1503_v49 = vadd.f32 %v13278_v44, %v1502_v48 }
 0x155   : > { %v1504_v50 = vpop.f32.mrf.mxu0 }
 0x156   : > { %v1627_v52 = vmax.f32 %v1503_v49, 0.0 }
 0x157   : > { %v1507_v53 = vpop.f32.mrf.mxu0 }
 0x158   : > { %v13282_v54 = vpack.c.bf16 %v1627_v52, %v1626_v51  ;;  %v1508_v56 = vadd.f32 %v13278_v44, %v1507_v53 }
 0x159   : > { %v1509_v55 = vpop.f32.mrf.mxu0 }
 0x15a   : > { %v1628_v60 = vmax.f32 %v1508_v56, 0.0 }
 0x15b   : > { %v1510_v57 = vpop.f32.mrf.mxu0 }
 0x15c   : > { %v1511_v58 = vadd.f32 %v13278_v44, %v1510_v57 }
 0x15d   : > { %v1512_v59 = vpop.f32.mrf.mxu0 }
 0x15e   : > { %v1629_v61 = vmax.f32 %v1511_v58, 0.0 }
 0x15f   : > { %v13286_v62 = vpop.f32.mrf.mxu0 }
 0x160   : > { %v13288_v63 = vpack.c.bf16 %v1629_v61, %v1628_v60 }
 0x161   : > { %v1517_v0 = vpop.f32.mrf.mxu0 }
 0x163   : > { %v13290_v2 = vpop.f32.mrf.mxu0 }
 0x164   : > { %v1519_v61 = vadd.f32 %v13278_v44, %v13290_v2 }
 0x165   : > { %v1520_v3 = vpop.f32.mrf.mxu0 }
 0x167   : > { %v1523_v4 = vpop.f32.mrf.mxu0 }
 0x168   : > { %v1524_v57 = vadd.f32 %v13278_v44, %v1523_v4 }
 0x169   : > { %v1525_v5 = vpop.f32.mrf.mxu0 }
 0x16a   : > { %v1632_v8 = vmax.f32 %v1524_v57, 0.0 }
 0x16b   : > { %v1526_v6 = vpop.f32.mrf.mxu0 }
 0x16c   : > { %v1527_v51 = vadd.f32 %v13278_v44, %v1526_v6 }
 0x16d   : > { %v1528_v7 = vpop.f32.mrf.mxu0 }
 0x16e   : > { %v1633_v0 = vmax.f32 %v1527_v51, 0.0  ;;  %v1516_v7 = vadd.f32 %v13278_v44, %v13286_v62 }
 0x16f   : > { %v1531_v9 = vpop.f32.mrf.mxu0 }
 0x170   : > { %v1532_v46 = vadd.f32 %v13278_v44, %v1531_v9 }
 0x171   : > { %v1533_v10 = vpop.f32.mrf.mxu0 }
 0x172   : > { %v1634_v58 = vmax.f32 %v1532_v46, 0.0 }
 0x173   : > { %v1534_v11 = vpop.f32.mrf.mxu0 }
 0x174   : > { %v1535_v40 = vadd.f32 %v13278_v44, %v1534_v11  ;;  %v1631_v11 = vmax.f32 %v1519_v61, 0.0 }
 0x175   : > { %v1536_v12 = vpop.f32.mrf.mxu0 }
 0x176   : > { %v1635_v52 = vmax.f32 %v1535_v40, 0.0  ;;  %v1661_v12 = vpack.c.bf16 %v1633_v0, %v1632_v8 }
 0x177   : > { %v1539_v13 = vpop.f32.mrf.mxu0 }
 0x178   : > { %v1540_v36 = vadd.f32 %v13278_v44, %v1539_v13  ;;  %v1662_v3 = vpack.c.bf16 %v1635_v52, %v1634_v58 }
 0x179   : > { %v1541_v14 = vpop.f32.mrf.mxu0 }
 0x17a   : > { %v1636_v47 = vmax.f32 %v1540_v36, 0.0  ;;  %v1630_v14 = vmax.f32 %v1516_v7, 0.0 }
 0x17b   : > { %v1542_v15 = vpop.f32.mrf.mxu0 }
 0x17c   : > { %v1543_v32 = vadd.f32 %v13278_v44, %v1542_v15 }
 0x17d   : > { %v1544_v16 = vpop.f32.mrf.mxu0 }
 0x17e   : > { %v1637_v41 = vmax.f32 %v1543_v32, 0.0  ;;  %v1660_v16 = vpack.c.bf16 %v1631_v11, %v1630_v14  ;;  %v12545_v11 = vld [vmem:[%s12976_s17 + $0x20] ss:$8 sps:$4 sm:$0xff]   ;;  %v12554_v14 = vld [vmem:[%s12976_s17 + $0x50] ss:$8 sps:$4 sm:$0xff]  }
 0x17f   : > { %v1547_v17 = vpop.f32.mrf.mxu0 }
 0x180   : > { %v1548_v28 = vadd.f32 %v13278_v44, %v1547_v17  ;;  %v1663_v53 = vpack.c.bf16 %v1637_v41, %v1636_v47 }
 0x181   : > { %v1549_v18 = vpop.f32.mrf.mxu0 }
 0x182   : > { %v1638_v37 = vmax.f32 %v1548_v28, 0.0 }
 0x183   : > { %v1550_v19 = vpop.f32.mrf.mxu0 }
 0x184   : > { %v1551_v25 = vadd.f32 %v13278_v44, %v1550_v19 }
 0x185   : > { %v1552_v20 = vpop.f32.mrf.mxu0 }
 0x186   : > { %v1639_v33 = vmax.f32 %v1551_v25, 0.0 }
 0x187   : > { %v1555_v21 = vpop.f32.mrf.mxu0 }
 0x188   : > { %v1556_v23 = vadd.f32 %v13278_v44, %v1555_v21  ;;  %v1664_v42 = vpack.c.bf16 %v1639_v33, %v1638_v37 }
 0x189   : > { %v1557_v22 = vpop.f32.mrf.mxu0 }
 0x18a   : > { %v1640_v29 = vmax.f32 %v1556_v23, 0.0 }
 0x18b   : > { %v1558_v24 = vpop.f32.mrf.mxu0 }
 0x18c   : > { %v1559_v26 = vadd.f32 %v13278_v44, %v1558_v24 }
 0x18d   : > { %v1560_v27 = vpop.f32.mrf.mxu0 }
 0x18e   : > { %v1641_v30 = vmax.f32 %v1559_v26, 0.0 }
 0x18f   : > { %v1563_v31 = vpop.f32.mrf.mxu0 }
 0x190   : > { %v1665_v34 = vpack.c.bf16 %v1641_v30, %v1640_v29  ;;  %v1564_v38 = vadd.f32 %v13278_v44, %v1563_v31 }
 0x191   : > { %v1565_v35 = vpop.f32.mrf.mxu0 }
 0x192   : > { %2107 = vmatpush1.bf16.msra.mxu1 %v1665_v34  ;;  %v1642_v48 = vmax.f32 %v1564_v38, 0.0 }
 0x193   : > { %v1566_v39 = vpop.f32.mrf.mxu0  ;;  %2108 = vmatprep.subr.bf16.mxu1 %v12949_v1 }
 0x194   : > { %v1567_v43 = vadd.f32 %v13278_v44, %v1566_v39 }
 0x195   : > { %v1568_v45 = vpop.f32.mrf.mxu0 }
 0x196   : > { %v1643_v49 = vmax.f32 %v1567_v43, 0.0  ;;  %2109 = vmatpush1.bf16.msra.mxu1 %v1664_v42 }
 0x197   : > { %v1571_v50 = vpop.f32.mrf.mxu0  ;;  %2110 = vmatprep.subr.bf16.mxu1 %v12949_v1 }
 0x198   : > { %v13306_v55 = vpack.c.bf16 %v1643_v49, %v1642_v48  ;;  %v1572_v59 = vadd.f32 %v13278_v44, %v1571_v50 }
 0x199   : > { %v1573_v56 = vpop.f32.mrf.mxu0 }
 0x19a   : > { %2111 = vmatpush1.bf16.msra.mxu1 %v1663_v53  ;;  %v1644_v4 = vmax.f32 %v1572_v59, 0.0 }
 0x19b   : > { %v1574_v60 = vpop.f32.mrf.mxu0  ;;  %2112 = vmatprep.subr.bf16.mxu1 %v12949_v1 }
 0x19c   : > { %v1575_v5 = vadd.f32 %v13278_v44, %v1574_v60 }
 0x19d   : > { %v1576_v6 = vpop.f32.mrf.mxu0 }
 0x19e   : > { %v1645_v9 = vmax.f32 %v1575_v5, 0.0  ;;  %2113 = vmatpush1.bf16.msra.mxu1 %v1662_v3 }
 0x19f   : > { %v13316_v10 = vpop.f32.mrf.mxu0  ;;  %2114 = vmatprep.subr.bf16.mxu1 %v12949_v1 }
 0x1a0   : > { %v13319_v13 = vpack.c.bf16 %v1645_v9, %v1644_v4  ;;  %v1580_v0 = vadd.f32 %v13278_v44, %v13316_v10  ;;  %v12540_v4 = vld [vmem:[%s12976_s17 + $0x14] ss:$8 sps:$4 sm:$0xff]   ;;  %v12542_v9 = vld [vmem:[%s12976_s17 + $0x10] ss:$8 sps:$4 sm:$0xff]   ;;  %v12543_v10 = vld [vmem:[%s12976_s17 + $0x24] ss:$8 sps:$4 sm:$0xff]  }
 0x1a1   : > { %v1581_v2 = vpop.f32.mrf.mxu0 }
 0x1a2   : > { %2115 = vmatpush1.bf16.msra.mxu1 %v1661_v12  ;;  %v1646_v7 = vmax.f32 %v1580_v0, 0.0  ;;  %v12546_v12 = vld [vmem:[%s12976_s17 + $0x34] ss:$8 sps:$4 sm:$0xff]  }
 0x1a3   : > { %v1582_v15 = vpop.f32.mrf.mxu0  ;;  %2116 = vmatprep.subr.bf16.mxu1 %v12949_v1  ;;  %v12552_v2 = vld [vmem:[%s12976_s17 + $0x54] ss:$8 sps:$4 sm:$0xff]  }
 0x1a4   : > { %v1583_v59 = vadd.f32 %v13278_v44, %v1582_v15  ;;  %v12555_v15 = vld [vmem:[%s12976_s17 + $0x64] ss:$8 sps:$4 sm:$0xff]  }
 0x1a5   : > { %v1584_v62 = vpop.f32.mrf.mxu0 }
 0x1a6   : > { %2117 = vmatpush1.bf16.msra.mxu1 %v1660_v16  ;;  %v1647_v5 = vmax.f32 %v1583_v59, 0.0  ;;  %v12557_v16 = vld [vmem:[%s12976_s17 + $0x60] ss:$8 sps:$4 sm:$0xff]   ;;  %v12558_v62 = vld [vmem:[%s12976_s17 + $0x74] ss:$8 sps:$4 sm:$0xff]  }
 0x1a7   : > { %v1587_v17 = vpop.f32.mrf.mxu0  ;;  %2118 = vmatprep.subr.bf16.mxu1 %v12949_v1 }
 0x1a8   : > { %v1588_v57 = vadd.f32 %v13278_v44, %v1587_v17  ;;  %v1668_v8 = vpack.c.bf16 %v1647_v5, %v1646_v7  ;;  %v12560_v17 = vld [vmem:[%s12976_s17 + $0x70] ss:$8 sps:$4 sm:$0xff]   ;;  %v12618_v5 = vld [vmem:[%s12976_s17 + $0x1b4] ss:$8 sps:$4 sm:$0xff]  }
 0x1a9   : > { %v1589_v18 = vpop.f32.mrf.mxu0 }
 0x1aa   : > { %2119 = vmatpush1.bf16.msra.mxu1 %v13288_v63  ;;  %v1648_v3 = vmax.f32 %v1588_v57, 0.0  ;;  %v12561_v18 = vld [vmem:[%s12976_s17 + $0x84] ss:$8 sps:$4 sm:$0xff]   ;;  %v12614_v57 = vld [vmem:[%s12976_s17 + $0x190] ss:$8 sps:$4 sm:$0xff]  }
 0x1ab   : > { %v1590_v19 = vpop.f32.mrf.mxu0  ;;  %2120 = vmatprep.subr.bf16.mxu1 %v12949_v1 }
 0x1ac   : > { %v1591_v52 = vadd.f32 %v13278_v44, %v1590_v19  ;;  %v12563_v19 = vld [vmem:[%s12976_s17 + $0x80] ss:$8 sps:$4 sm:$0xff]  }
 0x1ad   : > { %v1592_v20 = vpop.f32.mrf.mxu0 }
 0x1ae   : > { %2121 = vmatpush1.bf16.msra.mxu1 %v13282_v54  ;;  %v1649_v60 = vmax.f32 %v1591_v52, 0.0  ;;  %v12564_v20 = vld [vmem:[%s12976_s17 + $0x94] ss:$8 sps:$4 sm:$0xff]  }
 0x1af   : > { %v1595_v21 = vpop.f32.mrf.mxu0  ;;  %2122 = vmatprep.subr.bf16.mxu1 %v12949_v1 }
 0x1b0   : > { %v1596_v50 = vadd.f32 %v13278_v44, %v1595_v21  ;;  %v1669_v6 = vpack.c.bf16 %v1649_v60, %v1648_v3  ;;  %v12566_v21 = vld [vmem:[%s12976_s17 + $0x90] ss:$8 sps:$4 sm:$0xff]   ;;  %v12617_v3 = vld [vmem:[%s12976_s17 + $0x1a0] ss:$8 sps:$4 sm:$0xff]  }
 0x1b1   : > { %v1597_v22 = vpop.f32.mrf.mxu0 }
 0x1b2   : > { %v1650_v58 = vmax.f32 %v1596_v50, 0.0  ;;  %v12567_v22 = vld [vmem:[%s12976_s17 + $0xa4] ss:$8 sps:$4 sm:$0xff]   ;;  %v12611_v50 = vld [vmem:[%s12976_s17 + $0x180] ss:$8 sps:$4 sm:$0xff]  }
 0x1b3   : > { %v1598_v23 = vpop.f32.mrf.mxu0 }
 0x1b4   : > { %v1599_v47 = vadd.f32 %v13278_v44, %v1598_v23  ;;  %v12569_v23 = vld [vmem:[%s12976_s17 + $0xa0] ss:$8 sps:$4 sm:$0xff]  }
 0x1b5   : > { %v1600_v24 = vpop.f32.mrf.mxu0 }
 0x1b6   : > { %v1651_v53 = vmax.f32 %v1599_v47, 0.0  ;;  %v12570_v24 = vld [vmem:[%s12976_s17 + $0xb4] ss:$8 sps:$4 sm:$0xff]  }
 0x1b7   : > { %v1603_v25 = vpop.f32.mrf.mxu0  ;;  %v12606_v47 = vld [vmem:[%s12976_s17 + $0x174] ss:$8 sps:$4 sm:$0xff]  }
 0x1b8   : > { %v1604_v45 = vadd.f32 %v13278_v44, %v1603_v25  ;;  %v1670_v61 = vpack.c.bf16 %v1651_v53, %v1650_v58  ;;  %v12572_v25 = vld [vmem:[%s12976_s17 + $0xb0] ss:$8 sps:$4 sm:$0xff]   ;;  %v12615_v58 = vld [vmem:[%s12976_s17 + $0x1a4] ss:$8 sps:$4 sm:$0xff]  }
 0x1b9   : > { %v1605_v26 = vpop.f32.mrf.mxu0 }
 0x1ba   : > { %v1652_v51 = vmax.f32 %v1604_v45, 0.0  ;;  %v12573_v26 = vld [vmem:[%s12976_s17 + $0xc4] ss:$8 sps:$4 sm:$0xff]  }
 0x1bb   : > { %v1606_v27 = vpop.f32.mrf.mxu0  ;;  %v12603_v45 = vld [vmem:[%s12976_s17 + $0x164] ss:$8 sps:$4 sm:$0xff]  }
 0x1bc   : > { %v1607_v41 = vadd.f32 %v13278_v44, %v1606_v27  ;;  %v12575_v27 = vld [vmem:[%s12976_s17 + $0xc0] ss:$8 sps:$4 sm:$0xff]  }
 0x1bd   : > { %v1608_v28 = vpop.f32.mrf.mxu0 }
 0x1be   : > { %v1653_v48 = vmax.f32 %v1607_v41, 0.0  ;;  %v12576_v28 = vld [vmem:[%s12976_s17 + $0xd4] ss:$8 sps:$4 sm:$0xff]   ;;  %v12599_v41 = vld [vmem:[%s12976_s17 + $0x140] ss:$8 sps:$4 sm:$0xff]  }
 0x1bf   : > { %v1611_v29 = vpop.f32.mrf.mxu0 }
 0x1c0   : > { %v1612_v38 = vadd.f32 %v13278_v44, %v1611_v29  ;;  %v1671_v56 = vpack.c.bf16 %v1653_v48, %v1652_v51  ;;  %v12578_v29 = vld [vmem:[%s12976_s17 + $0xd0] ss:$8 sps:$4 sm:$0xff]   ;;  %v12612_v51 = vld [vmem:[%s12976_s17 + $0x194] ss:$8 sps:$4 sm:$0xff]  }
 0x1c1   : > { %v1613_v30 = vpop.f32.mrf.mxu0  ;;  %v12608_v48 = vld [vmem:[%s12976_s17 + $0x170] ss:$8 sps:$4 sm:$0xff]  }
 0x1c2   : > { %v1654_v46 = vmax.f32 %v1612_v38, 0.0  ;;  %v12579_v30 = vld [vmem:[%s12976_s17 + $0xe4] ss:$8 sps:$4 sm:$0xff]   ;;  %v12594_v38 = vld [vmem:[%s12976_s17 + $0x134] ss:$8 sps:$4 sm:$0xff]  }
 0x1c3   : > { %v1614_v31 = vpop.f32.mrf.mxu0 }
 0x1c4   : > { %v1615_v54 = vadd.f32 %v13278_v44, %v1614_v31  ;;  %v12581_v31 = vld [vmem:[%s12976_s17 + $0xe0] ss:$8 sps:$4 sm:$0xff]  }
 0x1c5   : > { %v1616_v63 = vpop.f32.mrf.mxu0 }
 0x1c6   : > { %v1655_v42 = vmax.f32 %v1615_v54, 0.0  ;;  %v12582_v63 = vld [vmem:[%s12976_s17 + $0xf4] ss:$8 sps:$4 sm:$0xff]   ;;  %v12590_v54 = vld [vmem:[%s12976_s17 + $0x110] ss:$8 sps:$4 sm:$0xff]  }
 0x1c7   : > { %v1619_v32 = vpop.f32.mrf.mxu0 }
 0x1c8   : > { %v1620_v34 = vadd.f32 %v13278_v44, %v1619_v32  ;;  %v1672_v49 = vpack.c.bf16 %v1655_v42, %v1654_v46  ;;  %v12584_v32 = vld [vmem:[%s12976_s17 + $0xf0] ss:$8 sps:$4 sm:$0xff]   ;;  %v12600_v42 = vld [vmem:[%s12976_s17 + $0x154] ss:$8 sps:$4 sm:$0xff]   ;;  %v12605_v46 = vld [vmem:[%s12976_s17 + $0x160] ss:$8 sps:$4 sm:$0xff]  }
 0x1c9   : > { %v1621_v33 = vpop.f32.mrf.mxu0 }
 0x1ca   : > { %v1656_v39 = vmax.f32 %v1620_v34, 0.0  ;;  %v12585_v33 = vld [vmem:[%s12976_s17 + $0x104] ss:$8 sps:$4 sm:$0xff]   ;;  %v12587_v34 = vld [vmem:[%s12976_s17 + $0x100] ss:$8 sps:$4 sm:$0xff]  }
 0x1cb   : > { %v1622_v35 = vpop.f32.mrf.mxu0 }
 0x1cc   : > { %v1623_v36 = vadd.f32 %v13278_v44, %v1622_v35  ;;  %v12537_v44 = vld [vmem:[%s12976_s17] ss:$8 sps:$4 sm:$0xff]   ;;  %v12588_v35 = vld [vmem:[%s12976_s17 + $0x114] ss:$8 sps:$4 sm:$0xff]  }
 0x1cd   : > { %v1624_v37 = vpop.f32.mrf.mxu0 }
 0x1ce   : > { %v1657_v40 = vmax.f32 %v1623_v36, 0.0  ;;  %v12591_v36 = vld [vmem:[%s12976_s17 + $0x124] ss:$8 sps:$4 sm:$0xff]   ;;  %v12593_v37 = vld [vmem:[%s12976_s17 + $0x120] ss:$8 sps:$4 sm:$0xff]  }
 0x1d0   : > { %v1673_v43 = vpack.c.bf16 %v1657_v40, %v1656_v39  ;;  %v12596_v39 = vld [vmem:[%s12976_s17 + $0x130] ss:$8 sps:$4 sm:$0xff]   ;;  %v12597_v40 = vld [vmem:[%s12976_s17 + $0x144] ss:$8 sps:$4 sm:$0xff]  }
 0x1d2   : > { %2123 = vmatpush2.bf16.msra.mxu1 %v1673_v43  ;;  %v12602_v43 = vld [vmem:[%s12976_s17 + $0x150] ss:$8 sps:$4 sm:$0xff]  }
 0x1d3   : > { %2124 = vmatprep.subr.bf16.mxu1 %v12949_v1 }
 0x1d6   : > { %2125 = vmatpush2.bf16.msra.mxu1 %v1672_v49  ;;  %v12609_v49 = vld [vmem:[%s12976_s17 + $0x184] ss:$8 sps:$4 sm:$0xff]  }
 0x1d7   : > { %2126 = vmatprep.subr.bf16.mxu1 %v12949_v1 }
 0x1da   : > { %2127 = vmatpush2.bf16.msra.mxu1 %v1671_v56 }
 0x1db   : > { %2128 = vmatprep.subr.bf16.mxu1 %v12949_v1 }
 0x1de   : > { %2129 = vmatpush2.bf16.msra.mxu1 %v1670_v61 }
 0x1df   : > { %2130 = vmatprep.subr.bf16.mxu1 %v12949_v1 }
 0x1e2   : > { %2131 = vmatpush2.bf16.msra.mxu1 %v1669_v6 }
 0x1e3   : > { %2132 = vmatprep.subr.bf16.mxu1 %v12949_v1 }
 0x1e6   : > { %2133 = vmatpush2.bf16.msra.mxu1 %v1668_v8 }
 0x1e7   : > { %2134 = vmatprep.subr.bf16.mxu1 %v12949_v1 }
 0x1ea   : > { %2135 = vmatpush2.bf16.msra.mxu1 %v13319_v13  ;;  %v12551_v13 = vld [vmem:[%s12976_s17 + $0x40] ss:$8 sps:$4 sm:$0xff]  }
 0x1eb   : > { %2136 = vmatprep.subr.bf16.mxu1 %v12949_v1  ;;  %v12548_v1 = vld [vmem:[%s12976_s17 + $0x30] ss:$8 sps:$4 sm:$0xff]  }
 0x1ee   : > { %2137 = vmatpush2.bf16.msra.mxu1 %v13306_v55  ;;  %v12549_v55 = vld [vmem:[%s12976_s17 + $0x44] ss:$8 sps:$4 sm:$0xff]  }
 0x1f1   : > { %2139 = vmatmul.mubr.bf16.vlgmr.msra.gmra.mxu1 %v12537_v44 }
 0x1f2   : > { %2146 = vmatprep.mubr.bf16.mxu1 %v12540_v4  ;;  %v12620_v4 = vld [vmem:[%s12976_s17 + $0x1b0] ss:$8 sps:$4 sm:$0xff]  }
 0x1f9   : > { %2147 = vmatmul.mubr.bf16.gmra.mxu1 %v12542_v9  ;;  %v12623_v9 = vld [vmem:[%s12976_s17 + $0x1c4] ss:$8 sps:$4 sm:$0xff]  }
 0x1fa   : > { %2154 = vmatprep.mubr.bf16.mxu1 %v12543_v10 }
 0x201   : > { %2155 = vmatmul.mubr.bf16.gmra.mxu1 %v12545_v11 }
 0x202   : > { %2162 = vmatprep.mubr.bf16.mxu1 %v12546_v12 }
 0x209   : > { %2163 = vmatmul.mubr.bf16.gmra.mxu1 %v12548_v1 }
 0x20a   : > { %2170 = vmatprep.mubr.bf16.mxu1 %v12549_v55  ;;  %v12621_v55 = vld [vmem:[%s12976_s17 + $0x1c0] ss:$8 sps:$4 sm:$0xff]  }
 0x211   : > { %2171 = vmatmul.mubr.bf16.gmra.mxu1 %v12551_v13  ;;  %v12626_v13 = vld [vmem:[%s12976_s17 + $0x1d4] ss:$8 sps:$4 sm:$0xff]  }
 0x212   : > { %2178 = vmatprep.mubr.bf16.mxu1 %v12552_v2 }
 0x219   : > { %2179 = vmatmul.mubr.bf16.gmra.mxu1 %v12554_v14 }
 0x21a   : > { %2186 = vmatprep.mubr.bf16.mxu1 %v12555_v15 }
 0x221   : > { %2187 = vmatmul.mubr.bf16.gmra.mxu1 %v12557_v16 }
 0x222   : > { %2194 = vmatprep.mubr.bf16.mxu1 %v12558_v62 }
 0x229   : > { %2195 = vmatmul.mubr.bf16.gmra.mxu1 %v12560_v17  ;;  %v12624_v17 = vld [vmem:[%s12976_s17 + $0x1d0] ss:$8 sps:$4 sm:$0xff]  }
 0x22a   : > { %2202 = vmatprep.mubr.bf16.mxu1 %v12561_v18 }
 0x231   : > { %2203 = vmatmul.mubr.bf16.gmra.mxu1 %v12563_v19  ;;  %v12629_v19 = vld [vmem:[%s12976_s17 + $0x1e4] ss:$8 sps:$4 sm:$0xff]  }
 0x232   : > { %2210 = vmatprep.mubr.bf16.mxu1 %v12564_v20 }
 0x239   : > { %2211 = vmatmul.mubr.bf16.gmra.mxu1 %v12566_v21 }
 0x23a   : > { %2218 = vmatprep.mubr.bf16.mxu1 %v12567_v22 }
 0x241   : > { %2219 = vmatmul.mubr.bf16.gmra.mxu1 %v12569_v23 }
 0x242   : > { %2226 = vmatprep.mubr.bf16.mxu1 %v12570_v24 }
 0x249   : > { %2227 = vmatmul.mubr.bf16.gmra.mxu1 %v12572_v25  ;;  %v12627_v25 = vld [vmem:[%s12976_s17 + $0x1e0] ss:$8 sps:$4 sm:$0xff]  }
 0x24a   : > { %2234 = vmatprep.mubr.bf16.mxu1 %v12573_v26 }
 0x251   : > { %2235 = vmatmul.mubr.bf16.gmra.mxu1 %v12575_v27  ;;  %v12632_v27 = vld [vmem:[%s12976_s17 + $0x1f4] ss:$8 sps:$4 sm:$0xff]  }
 0x252   : > { %2242 = vmatprep.mubr.bf16.mxu1 %v12576_v28 }
 0x259   : > { %2243 = vmatmul.mubr.bf16.gmra.mxu1 %v12578_v29 }
 0x25a   : > { %2250 = vmatprep.mubr.bf16.mxu1 %v12579_v30 }
 0x261   : > { %2251 = vmatmul.mubr.bf16.gmra.mxu1 %v12581_v31 }
 0x262   : > { %2258 = vmatprep.mubr.bf16.mxu1 %v12582_v63 }
 0x269   : > { %2259 = vmatmul.mubr.bf16.gmra.mxu1 %v12584_v32  ;;  %v12630_v32 = vld [vmem:[%s12976_s17 + $0x1f0] ss:$8 sps:$4 sm:$0xff]  }
 0x26a   : > { %2266 = vmatprep.mubr.bf16.mxu1 %v12585_v33 }
 0x271   : > { %2267 = vmatmul.mubr.bf16.gmra.mxu1 %v12587_v34  ;;  %v12635_v34 = vld [vmem:[%s12976_s17 + $0x204] ss:$8 sps:$4 sm:$0xff]  }
 0x272   : > { %2274 = vmatprep.mubr.bf16.mxu1 %v12588_v35 }
 0x279   : > { %2275 = vmatmul.mubr.bf16.gmra.mxu1 %v12590_v54 }
 0x27a   : > { %2282 = vmatprep.mubr.bf16.mxu1 %v12591_v36 }
 0x281   : > { %2283 = vmatmul.mubr.bf16.gmra.mxu1 %v12593_v37 }
 0x282   : > { %2290 = vmatprep.mubr.bf16.mxu1 %v12594_v38 }
 0x289   : > { %2291 = vmatmul.mubr.bf16.gmra.mxu1 %v12596_v39  ;;  %v12633_v39 = vld [vmem:[%s12976_s17 + $0x200] ss:$8 sps:$4 sm:$0xff]  }
 0x28a   : > { %2298 = vmatprep.mubr.bf16.mxu1 %v12597_v40 }
 0x291   : > { %2299 = vmatmul.mubr.bf16.gmra.mxu1 %v12599_v41  ;;  %v12638_v41 = vld [vmem:[%s12976_s17 + $0x214] ss:$8 sps:$4 sm:$0xff]  }
 0x292   : > { %2306 = vmatprep.mubr.bf16.mxu1 %v12600_v42 }
 0x299   : > { %2307 = vmatmul.mubr.bf16.gmra.mxu1 %v12602_v43 }
 0x29a   : > { %2314 = vmatprep.mubr.bf16.mxu1 %v12603_v45 }
 0x2a1   : > { %2315 = vmatmul.mubr.bf16.gmra.mxu1 %v12605_v46 }
 0x2a2   : > { %2322 = vmatprep.mubr.bf16.mxu1 %v12606_v47 }
 0x2a9   : > { %2323 = vmatmul.mubr.bf16.gmra.mxu1 %v12608_v48  ;;  %v12636_v48 = vld [vmem:[%s12976_s17 + $0x210] ss:$8 sps:$4 sm:$0xff]  }
 0x2aa   : > { %2330 = vmatprep.mubr.bf16.mxu1 %v12609_v49 }
 0x2b1   : > { %v13399_v52 = vpop.f32.mrf.mxu1  ;;  %2331 = vmatmul.mubr.bf16.gmra.mxu1 %v12611_v50  ;;  %v12641_v50 = vld [vmem:[%s12976_s17 + $0x224] ss:$8 sps:$4 sm:$0xff]  }
 0x2b2   : > { %2338 = vmatprep.mubr.bf16.mxu1 %v12612_v51 }
 0x2b3   : > { %v2142_v53 = vpop.f32.mrf.mxu1 }
 0x2b5   : > { %v13401_v56 = vpop.f32.mrf.mxu1 }
 0x2b7   : > { %v2145_v59 = vpop.f32.mrf.mxu1 }
 0x2b9   : > { %v13405_v60 = vpop.f32.mrf.mxu1  ;;  %2339 = vmatmul.mubr.bf16.gmra.mxu1 %v12614_v57 }
 0x2ba   : > { %2346 = vmatprep.mubr.bf16.mxu1 %v12615_v58  ;;  %v12639_v58 = vld [vmem:[%s12976_s17 + $0x220] ss:$8 sps:$4 sm:$0xff]  }
 0x2bb   : > { %v2150_v61 = vpop.f32.mrf.mxu1 }
 0x2bd   : > { %v13407_v0 = vpop.f32.mrf.mxu1 }
 0x2bf   : > { %v2153_v6 = vpop.f32.mrf.mxu1 }
 0x2c1   : > { %v13411_v7 = vpop.f32.mrf.mxu1  ;;  %2347 = vmatmul.mubr.bf16.gmra.mxu1 %v12617_v3 }
 0x2c2   : > { %2354 = vmatprep.mubr.bf16.mxu1 %v12618_v5 }
 0x2c3   : > { %v2158_v8 = vpop.f32.mrf.mxu1 }
 0x2c5   : > { %v13413_v44 = vpop.f32.mrf.mxu1 }
 0x2c7   : > { %v2161_v10 = vpop.f32.mrf.mxu1 }
 0x2c9   : > { %v13417_v11 = vpop.f32.mrf.mxu1  ;;  %2355 = vmatmul.mubr.bf16.gmra.mxu1 %v12620_v4 }
 0x2ca   : > { %2362 = vmatprep.mubr.bf16.mxu1 %v12623_v9 }
 0x2cb   : > { %v2166_v12 = vpop.f32.mrf.mxu1 }
 0x2cd   : > { %v13419_v1 = vpop.f32.mrf.mxu1 }
 0x2cf   : > { %v2169_v2 = vpop.f32.mrf.mxu1 }
 0x2d1   : > { %v2172_v14 = vpop.f32.mrf.mxu1  ;;  %2363 = vmatmul.mubr.bf16.gmra.mxu1 %v12621_v55 }
 0x2d2   : > { %v2427_v15 = vmax.f32 %v13399_v52, %v2172_v14  ;;  %2370 = vmatprep.mubr.bf16.mxu1 %v12626_v13 }
 0x2d3   : > { %v2174_v16 = vpop.f32.mrf.mxu1 }
 0x2d5   : > { %v2175_v62 = vpop.f32.mrf.mxu1 }
 0x2d6   : > { %v2428_v18 = vmax.f32 %v13401_v56, %v2175_v62 }
 0x2d7   : > { %v2177_v20 = vpop.f32.mrf.mxu1 }
 0x2d9   : > { %v2180_v21 = vpop.f32.mrf.mxu1  ;;  %2371 = vmatmul.mubr.bf16.gmra.mxu1 %v12624_v17 }
 0x2da   : > { %v2429_v22 = vmax.f32 %v13405_v60, %v2180_v21  ;;  %2378 = vmatprep.mubr.bf16.mxu1 %v12629_v19  ;;  %v12644_v60 = vld [vmem:[%s12976_s17 + $0x234] ss:$8 sps:$4 sm:$0xff]  }
 0x2db   : > { %v2182_v23 = vpop.f32.mrf.mxu1 }
 0x2dd   : > { %v2183_v24 = vpop.f32.mrf.mxu1 }
 0x2de   : > { %v2430_v26 = vmax.f32 %v13407_v0, %v2183_v24 }
 0x2df   : > { %v2185_v28 = vpop.f32.mrf.mxu1 }
 0x2e1   : > { %v2188_v29 = vpop.f32.mrf.mxu1  ;;  %2379 = vmatmul.mubr.bf16.gmra.mxu1 %v12627_v25 }
 0x2e2   : > { %v2431_v30 = vmax.f32 %v13411_v7, %v2188_v29  ;;  %2386 = vmatprep.mubr.bf16.mxu1 %v12632_v27  ;;  %v12642_v7 = vld [vmem:[%s12976_s17 + $0x230] ss:$8 sps:$4 sm:$0xff]  }
 0x2e3   : > { %v2190_v31 = vpop.f32.mrf.mxu1 }
 0x2e5   : > { %v2191_v63 = vpop.f32.mrf.mxu1 }
 0x2e6   : > { %v2432_v33 = vmax.f32 %v13413_v44, %v2191_v63 }
 0x2e7   : > { %v2193_v35 = vpop.f32.mrf.mxu1 }
 0x2e9   : > { %v2196_v54 = vpop.f32.mrf.mxu1  ;;  %2387 = vmatmul.mubr.bf16.gmra.mxu1 %v12630_v32 }
 0x2ea   : > { %v2433_v36 = vmax.f32 %v13417_v11, %v2196_v54  ;;  %2394 = vmatprep.mubr.bf16.mxu1 %v12635_v34 }
 0x2eb   : > { %v2198_v37 = vpop.f32.mrf.mxu1 }
 0x2ed   : > { %v2199_v38 = vpop.f32.mrf.mxu1 }
 0x2ee   : > { %v2434_v40 = vmax.f32 %v13419_v1, %v2199_v38 }
 0x2ef   : > { %v2201_v42 = vpop.f32.mrf.mxu1 }
 0x2f1   : > { %v2204_v43 = vpop.f32.mrf.mxu1  ;;  %2395 = vmatmul.mubr.bf16.gmra.mxu1 %v12633_v39 }
 0x2f2   : > { %v2435_v45 = vmax.f32 %v2427_v15, %v2204_v43  ;;  %2402 = vmatprep.mubr.bf16.mxu1 %v12638_v41 }
 0x2f3   : > { %v2206_v46 = vpop.f32.mrf.mxu1 }
 0x2f5   : > { %v2207_v47 = vpop.f32.mrf.mxu1 }
 0x2f6   : > { %v2436_v49 = vmax.f32 %v2428_v18, %v2207_v47 }
 0x2f7   : > { %v2209_v51 = vpop.f32.mrf.mxu1 }
 0x2f9   : > { %v2212_v52 = vpop.f32.mrf.mxu1  ;;  %2403 = vmatmul.mubr.bf16.gmra.mxu1 %v12636_v48 }
 0x2fa   : > { %v2437_v53 = vmax.f32 %v2429_v22, %v2212_v52  ;;  %2410 = vmatprep.mubr.bf16.mxu1 %v12641_v50 }
 0x2fb   : > { %v2214_v56 = vpop.f32.mrf.mxu1 }
 0x2fd   : > { %v2215_v57 = vpop.f32.mrf.mxu1 }
 0x2fe   : > { %v2438_v59 = vmax.f32 %v2430_v26, %v2215_v57 }
 0x2ff   : > { %v2217_v61 = vpop.f32.mrf.mxu1 }
 0x301   : > { %v2220_v0 = vpop.f32.mrf.mxu1  ;;  %2411 = vmatmul.mubr.bf16.gmra.mxu1 %v12639_v58 }
 0x302   : > { %v2439_v3 = vmax.f32 %v2431_v30, %v2220_v0  ;;  %2418 = vmatprep.mubr.bf16.mxu1 %v12644_v60 }
 0x303   : > { %v2222_v5 = vpop.f32.mrf.mxu1 }
 0x305   : > { %v2223_v6 = vpop.f32.mrf.mxu1 }
 0x306   : > { %v2440_v8 = vmax.f32 %v2432_v33, %v2223_v6 }
 0x307   : > { %v2225_v44 = vpop.f32.mrf.mxu1 }
 0x309   : > { %v2228_v4 = vpop.f32.mrf.mxu1  ;;  %2419 = vmatmul.mubr.bf16.gmra.mxu1 %v12642_v7 }
 0x30a   : > { %v2441_v9 = vmax.f32 %v2433_v36, %v2228_v4 }
 0x30b   : > { %v2230_v10 = vpop.f32.mrf.mxu1 }
 0x30c   : > { %v12645_v10 = vld [vmem:[%s12981_s21] sm:$0xff]  }
 0x30d   : > { %v2231_v11 = vpop.f32.mrf.mxu1  ;;  %11420 = vmatprep.mubr.msk.bf16.mxu0 %vm2747_vm2, %v12645_v10 }
 0x30e   : > { %v2442_v12 = vmax.f32 %v2434_v40, %v2231_v11 }
 0x30f   : > { %v2233_v1 = vpop.f32.mrf.mxu1 }
 0x311   : > { %v2236_v55 = vpop.f32.mrf.mxu1 }
 0x312   : > { %v2443_v13 = vmax.f32 %v2435_v45, %v2236_v55 }
 0x313   : > { %v2238_v2 = vpop.f32.mrf.mxu1 }
 0x315   : > { %v2239_v14 = vpop.f32.mrf.mxu1 }
 0x316   : > { %v2444_v15 = vmax.f32 %v2436_v49, %v2239_v14 }
 0x317   : > { %v2241_v16 = vpop.f32.mrf.mxu1 }
 0x319   : > { %v2244_v62 = vpop.f32.mrf.mxu1 }
 0x31a   : > { %v2445_v17 = vmax.f32 %v2437_v53, %v2244_v62 }
 0x31b   : > { %v2246_v18 = vpop.f32.mrf.mxu1 }
 0x31d   : > { %v2247_v19 = vpop.f32.mrf.mxu1 }
 0x31e   : > { %v2446_v20 = vmax.f32 %v2438_v59, %v2247_v19 }
 0x31f   : > { %v2249_v21 = vpop.f32.mrf.mxu1 }
 0x321   : > { %v2252_v22 = vpop.f32.mrf.mxu1 }
 0x322   : > { %v2447_v23 = vmax.f32 %v2439_v3, %v2252_v22 }
 0x323   : > { %v2254_v24 = vpop.f32.mrf.mxu1 }
 0x325   : > { %v2255_v25 = vpop.f32.mrf.mxu1 }
 0x326   : > { %v2448_v26 = vmax.f32 %v2440_v8, %v2255_v25 }
 0x327   : > { %v2257_v27 = vpop.f32.mrf.mxu1 }
 0x329   : > { %v2260_v28 = vpop.f32.mrf.mxu1 }
 0x32a   : > { %v2449_v29 = vmax.f32 %v2441_v9, %v2260_v28 }
 0x32b   : > { %v2262_v30 = vpop.f32.mrf.mxu1 }
 0x32d   : > { %v2263_v31 = vpop.f32.mrf.mxu1 }
 0x32e   : > { %v2450_v63 = vmax.f32 %v2442_v12, %v2263_v31 }
 0x32f   : > { %v2265_v32 = vpop.f32.mrf.mxu1 }
 0x331   : > { %v2268_v33 = vpop.f32.mrf.mxu1 }
 0x332   : > { %v2451_v34 = vmax.f32 %v2443_v13, %v2268_v33 }
 0x333   : > { %v2270_v35 = vpop.f32.mrf.mxu1 }
 0x335   : > { %v2271_v54 = vpop.f32.mrf.mxu1 }
 0x336   : > { %v2452_v36 = vmax.f32 %v2444_v15, %v2271_v54 }
 0x337   : > { %v2273_v37 = vpop.f32.mrf.mxu1 }
 0x339   : > { %v2276_v38 = vpop.f32.mrf.mxu1 }
 0x33a   : > { %v2453_v39 = vmax.f32 %v2445_v17, %v2276_v38 }
 0x33b   : > { %v2278_v40 = vpop.f32.mrf.mxu1 }
 0x33d   : > { %v2279_v41 = vpop.f32.mrf.mxu1 }
 0x33e   : > { %v2454_v42 = vmax.f32 %v2446_v20, %v2279_v41 }
 0x33f   : > { %v2281_v43 = vpop.f32.mrf.mxu1 }
 0x341   : > { %v2284_v45 = vpop.f32.mrf.mxu1 }
 0x342   : > { %v2455_v46 = vmax.f32 %v2447_v23, %v2284_v45 }
 0x343   : > { %v2286_v47 = vpop.f32.mrf.mxu1 }
 0x345   : > { %v2287_v48 = vpop.f32.mrf.mxu1 }
 0x346   : > { %v2456_v49 = vmax.f32 %v2448_v26, %v2287_v48 }
 0x347   : > { %v2289_v50 = vpop.f32.mrf.mxu1 }
 0x349   : > { %v2292_v51 = vpop.f32.mrf.mxu1 }
 0x34a   : > { %v2457_v52 = vmax.f32 %v2449_v29, %v2292_v51 }
 0x34b   : > { %v2294_v53 = vpop.f32.mrf.mxu1 }
 0x34d   : > { %v2295_v56 = vpop.f32.mrf.mxu1 }
 0x34e   : > { %v13444_v57 = vmax.f32 %v2450_v63, %v2295_v56 }
 0x34f   : > { %v2297_v58 = vpop.f32.mrf.mxu1 }
 0x351   : > { %v2300_v59 = vpop.f32.mrf.mxu1 }
 0x352   : > { %v2459_v60 = vmax.f32 %v2451_v34, %v2300_v59 }
 0x353   : > { %v2302_v61 = vpop.f32.mrf.mxu1 }
 0x355   : > { %v2303_v0 = vpop.f32.mrf.mxu1 }
 0x356   : > { %v2460_v3 = vmax.f32 %v2452_v36, %v2303_v0 }
 0x357   : > { %v2305_v5 = vpop.f32.mrf.mxu1 }
 0x359   : > { %v2308_v6 = vpop.f32.mrf.mxu1 }
 0x35a   : > { %v2461_v7 = vmax.f32 %v2453_v39, %v2308_v6 }
 0x35b   : > { %v2310_v8 = vpop.f32.mrf.mxu1 }
 0x35d   : > { %v2311_v44 = vpop.f32.mrf.mxu1 }
 0x35e   : > { %v2462_v4 = vmax.f32 %v2454_v42, %v2311_v44 }
 0x35f   : > { %v2313_v9 = vpop.f32.mrf.mxu1 }
 0x361   : > { %v2316_v11 = vpop.f32.mrf.mxu1 }
 0x362   : > { %v2463_v12 = vmax.f32 %v2455_v46, %v2316_v11 }
 0x363   : > { %v2318_v1 = vpop.f32.mrf.mxu1 }
 0x365   : > { %v2319_v55 = vpop.f32.mrf.mxu1 }
 0x366   : > { %v2464_v13 = vmax.f32 %v2456_v49, %v2319_v55 }
 0x367   : > { %v2321_v2 = vpop.f32.mrf.mxu1 }
 0x369   : > { %v2324_v14 = vpop.f32.mrf.mxu1 }
 0x36a   : > { %v2465_v15 = vmax.f32 %v2457_v52, %v2324_v14 }
 0x36b   : > { %v2326_v16 = vpop.f32.mrf.mxu1 }
 0x36d   : > { %v13448_v62 = vpop.f32.mrf.mxu1 }
 0x36e   : > { %v2466_v17 = vmax.f32 %v13444_v57, %v13448_v62  ;;  %v12646_v57 = vld [vmem:[%s12981_s21 + $0x8] sm:$0xff]   ;;  %v12647_v62 = vld [vmem:[%s12981_s21 + $0x10] sm:$0xff]  }
 0x36f   : > { %v2329_v18 = vpop.f32.mrf.mxu1 }
 0x371   : > { %v2332_v19 = vpop.f32.mrf.mxu1 }
 0x372   : > { %v2467_v20 = vmax.f32 %v2459_v60, %v2332_v19 }
 0x373   : > { %v2334_v21 = vpop.f32.mrf.mxu1 }
 0x375   : > { %v2335_v22 = vpop.f32.mrf.mxu1 }
 0x376   : > { %v2468_v23 = vmax.f32 %v2460_v3, %v2335_v22 }
 0x377   : > { %v2337_v24 = vpop.f32.mrf.mxu1 }
 0x379   : > { %v2340_v25 = vpop.f32.mrf.mxu1 }
 0x37a   : > { %v2469_v26 = vmax.f32 %v2461_v7, %v2340_v25 }
 0x37b   : > { %v2342_v27 = vpop.f32.mrf.mxu1 }
 0x37d   : > { %v2343_v28 = vpop.f32.mrf.mxu1 }
 0x37e   : > { %v2470_v29 = vmax.f32 %v2462_v4, %v2343_v28 }
 0x37f   : > { %v2345_v30 = vpop.f32.mrf.mxu1 }
 0x381   : > { %v2348_v31 = vpop.f32.mrf.mxu1 }
 0x382   : > { %v2471_v63 = vmax.f32 %v2463_v12, %v2348_v31 }
 0x383   : > { %v2350_v32 = vpop.f32.mrf.mxu1 }
 0x385   : > { %v2351_v33 = vpop.f32.mrf.mxu1 }
 0x386   : > { %v2472_v34 = vmax.f32 %v2464_v13, %v2351_v33  ;;  %v12649_v33 = vld [vmem:[%s12981_s21 + $0x20] sm:$0xff]  }
 0x387   : > { %v2353_v35 = vpop.f32.mrf.mxu1 }
 0x389   : > { %v2356_v54 = vpop.f32.mrf.mxu1 }
 0x38a   : > { %v2473_v36 = vmax.f32 %v2465_v15, %v2356_v54  ;;  %v12650_v54 = vld [vmem:[%s12981_s21 + $0x28] sm:$0xff]  }
 0x38b   : > { %v2358_v37 = vpop.f32.mrf.mxu1 }
 0x38c   : > { %v12652_v37 = vld [vmem:[%s12981_s21 + $0x38] sm:$0xff]  }
 0x38d   : > { %v2359_v38 = vpop.f32.mrf.mxu1 }
 0x38e   : > { %v2474_v25 = vmax.f32 %v2466_v17, %v2359_v38  ;;  %v12648_v17 = vld [vmem:[%s12981_s21 + $0x18] sm:$0xff]   ;;  %v12653_v38 = vld [vmem:[%s12981_s21 + $0x40] sm:$0xff]  }
 0x38f   : > { %v2361_v39 = vpop.f32.mrf.mxu1 }
 0x390   : > { %v12654_v39 = vld [vmem:[%s12981_s21 + $0x48] sm:$0xff]  }
 0x391   : > { %v2364_v40 = vpop.f32.mrf.mxu1 }
 0x392   : > { %v2475_v41 = vmax.f32 %v2467_v20, %v2364_v40  ;;  %v12655_v40 = vld [vmem:[%s12981_s21 + $0x50] sm:$0xff]  }
 0x393   : > { %v2366_v42 = vpop.f32.mrf.mxu1 }
 0x394   : > { %v12657_v42 = vld [vmem:[%s12981_s21 + $0x60] sm:$0xff]  }
 0x395   : > { %v2367_v43 = vpop.f32.mrf.mxu1 }
 0x396   : > { %v2476_v45 = vmax.f32 %v2468_v23, %v2367_v43  ;;  %v12658_v43 = vld [vmem:[%s12981_s21 + $0x68] sm:$0xff]  }
 0x397   : > { %v2369_v46 = vpop.f32.mrf.mxu1 }
 0x398   : > { %v12660_v46 = vld [vmem:[%s12981_s21 + $0x78] sm:$0xff]  }
 0x399   : > { %v2372_v47 = vpop.f32.mrf.mxu1 }
 0x39a   : > { %v2477_v10 = vmax.f32 %v2469_v26, %v2372_v47  ;;  %v12661_v47 = vld [vmem:[%s12981_s21 + $0x80] sm:$0xff]  }
 0x39b   : > { %v2374_v48 = vpop.f32.mrf.mxu1 }
 0x39c   : > { %v12662_v48 = vld [vmem:[%s12981_s21 + $0x88] sm:$0xff]  }
 0x39d   : > { %v2375_v49 = vpop.f32.mrf.mxu1 }
 0x39e   : > { %v2478_v11 = vmax.f32 %v2470_v29, %v2375_v49  ;;  %v12663_v49 = vld [vmem:[%s12981_s21 + $0x90] sm:$0xff]  }
 0x39f   : > { %v2377_v50 = vpop.f32.mrf.mxu1 }
 0x3a0   : > { %v12664_v50 = vld [vmem:[%s12981_s21 + $0x98] sm:$0xff]  }
 0x3a1   : > { %v2380_v51 = vpop.f32.mrf.mxu1 }
 0x3a2   : > { %v2479_v16 = vmax.f32 %v2471_v63, %v2380_v51  ;;  %v12665_v51 = vld [vmem:[%s12981_s21 + $0xa0] sm:$0xff]  }
 0x3a3   : > { %v2382_v52 = vpop.f32.mrf.mxu1 }
 0x3a4   : > { %v12666_v52 = vld [vmem:[%s12981_s21 + $0xa8] sm:$0xff]  }
 0x3a5   : > { %v2383_v53 = vpop.f32.mrf.mxu1 }
 0x3a6   : > { %v2480_v18 = vmax.f32 %v2472_v34, %v2383_v53  ;;  %v10467_v34 = vld [vmem:[%s12986_s25 + $0xc] sm:$0xf]  ;;  %v12667_v53 = vld [vmem:[%s12981_s21 + $0xb0] sm:$0xff]  }
 0x3a7   : > { %v2385_v56 = vpop.f32.mrf.mxu1  ;;  %12383 = vmatprep.subr.msk.bf16.mxu1 %vm1461_vm1, %v10467_v34  ;;  %v3482_v35 = vsel %vm1461_vm1, %v10467_v34, 0 }
 0x3a8   : > { %11523 = vmatpush3.bf16.msra.mxu1 %v3482_v35  ;;  %v12668_v56 = vld [vmem:[%s12981_s21 + $0xb8] sm:$0xff]  }
 0x3a9   : > { %v2388_v58 = vpop.f32.mrf.mxu1 }
 0x3aa   : > { %v2481_v27 = vmax.f32 %v2473_v36, %v2388_v58  ;;  %v12651_v36 = vld [vmem:[%s12981_s21 + $0x30] sm:$0xff]   ;;  %v12669_v58 = vld [vmem:[%s12981_s21 + $0xc0] sm:$0xff]  }
 0x3ab   : > { %v2390_v59 = vpop.f32.mrf.mxu1 }
 0x3ac   : > { %v10453_v59 = vld [vmem:[%s12986_s25 + $0x4] sm:$0xf] }
 0x3ad   : > { %v2391_v60 = vpop.f32.mrf.mxu1 }
 0x3ae   : > { %v2482_v28 = vmax.f32 %v2474_v25, %v2391_v60  ;;  %v3230_v60 = vsel %vm1461_vm1, %v10453_v59, 0 }
 0x3af   : > { %v2393_v61 = vpop.f32.mrf.mxu1 }
 0x3b0   : > { %v12670_v61 = vld [vmem:[%s12981_s21 + $0xc8] sm:$0xff]  }
 0x3b1   : > { %v2396_v0 = vpop.f32.mrf.mxu1 }
 0x3b2   : > { %v2483_v6 = vmax.f32 %v2475_v41, %v2396_v0  ;;  %v12656_v41 = vld [vmem:[%s12981_s21 + $0x58] sm:$0xff]   ;;  %v12671_v0 = vld [vmem:[%s12981_s21 + $0xd0] sm:$0xff]  }
 0x3b3   : > { %v2398_v3 = vpop.f32.mrf.mxu1 }
 0x3b4   : > { %v12672_v3 = vld [vmem:[%s12981_s21 + $0xd8] sm:$0xff]  }
 0x3b5   : > { %v2399_v5 = vpop.f32.mrf.mxu1 }
 0x3b6   : > { %v2484_v7 = vmax.f32 %v2476_v45, %v2399_v5  ;;  %v12659_v45 = vld [vmem:[%s12981_s21 + $0x70] sm:$0xff]   ;;  %v12673_v5 = vld [vmem:[%s12981_s21 + $0xe0] sm:$0xff]  }
 0x3b7   : > { %v2401_v8 = vpop.f32.mrf.mxu1 }
 0x3b8   : > { %v13452_v44 = vpack.c.bf16 %v2484_v7, %v2483_v6  ;;  %v3213_v6 = vld [vmem:[%s12986_s25] sm:$0xf]  ;;  %v12674_v7 = vld [vmem:[%s12981_s21 + $0xe8] sm:$0xff]   ;;  %v12675_v8 = vld [vmem:[%s12981_s21 + $0xf0] sm:$0xff]  }
 0x3b9   : > { %v2404_v4 = vpop.f32.mrf.mxu1 }
 0x3ba   : > { %14551 = vst [vmem:[#allocation34_spill] sm:$0xff] %v13452_v44  ;;  %v2485_v1 = vmax.f32 %v2477_v10, %v2404_v4  ;;  %v12676_v4 = vld [vmem:[%s12981_s21 + $0xf8] sm:$0xff]   ;;  %v12678_v10 = vld [vmem:[%s12981_s21 + $0x108] sm:$0xff]  }
 0x3bb   : > { %v2406_v9 = vpop.f32.mrf.mxu1 }
 0x3bc   : > { %v12677_v9 = vld [vmem:[%s12981_s21 + $0x100] sm:$0xff]  }
 0x3bd   : > { %v2407_v12 = vpop.f32.mrf.mxu1 }
 0x3be   : > { %v2486_v55 = vmax.f32 %v2478_v11, %v2407_v12  ;;  %v12679_v11 = vld [vmem:[%s12981_s21 + $0x110] sm:$0xff]   ;;  %v12680_v12 = vld [vmem:[%s12981_s21 + $0x118] sm:$0xff]  }
 0x3bf   : > { %v2409_v13 = vpop.f32.mrf.mxu1 }
 0x3c0   : > { %v13454_v2 = vpack.c.bf16 %v2486_v55, %v2485_v1  ;;  %v13550_v1 = vld [vmem:[%s12986_s25 + $0x14] sm:$0xf] }
 0x3c1   : > { %v2412_v14 = vpop.f32.mrf.mxu1  ;;  %12385 = vmatprep.subr.msk.bf16.mxu1 %vm1461_vm1, %v13550_v1 }
 0x3c2   : > { %14552 = vst [vmem:[#allocation35_spill] sm:$0xff] %v13454_v2  ;;  %v2487_v20 = vmax.f32 %v2479_v16, %v2412_v14 }
 0x3c3   : > { %v2414_v15 = vpop.f32.mrf.mxu1 }
 0x3c5   : > { %v2415_v19 = vpop.f32.mrf.mxu1 }
 0x3c6   : > { %v2488_v21 = vmax.f32 %v2480_v18, %v2415_v19 }
 0x3c7   : > { %v2417_v22 = vpop.f32.mrf.mxu1 }
 0x3c8   : > { %v13456_v23 = vpack.c.bf16 %v2488_v21, %v2487_v20 }
 0x3c9   : > { %v2420_v24 = vpop.f32.mrf.mxu1 }
 0x3ca   : > { %14553 = vst [vmem:[#allocation36_spill] sm:$0xff] %v13456_v23  ;;  %v2489_v30 = vmax.f32 %v2481_v27, %v2420_v24 }
 0x3cb   : > { %v2422_v26 = vpop.f32.mrf.mxu1 }
 0x3cd   : > { %v2423_v29 = vpop.f32.mrf.mxu1 }
 0x3ce   : > { %v2490_v31 = vmax.f32 %v2482_v28, %v2423_v29  ;;  %v3310_v29 = vsel %vm1461_vm1, %v3213_v6, 0 }
 0x3cf   : > { %v2425_v63 = vpop.f32.mrf.mxu1 }
 0x3d0   : > { %v13461_v32 = vpack.c.bf16 %v2490_v31, %v2489_v30  ;;  %v10462_v30 = vld [vmem:[%s12986_s25 + $0x8] sm:$0xf] }
 0x3d2   : > { %14554 = vst [vmem:[#allocation37_spill] sm:$0xff] %v13461_v32  ;;  %11412 = vmatprep.subr.bf16.mxu0 %v13461_v32 }
 0x3d3   : > { %11413 = vmatpush3.bf16.msra.mxu0 %v13461_v32 }
 0x3d4   : > { %11414 = vmatprep.subr.bf16.mxu0 %v13456_v23 }
 0x3d7   : > { %11415 = vmatpush3.bf16.msra.mxu0 %v13456_v23 }
 0x3d8   : > { %11416 = vmatprep.subr.bf16.mxu0 %v13454_v2 }
 0x3db   : > { %11417 = vmatpush3.bf16.msra.mxu0 %v13454_v2 }
 0x3dc   : > { %11418 = vmatprep.subr.bf16.mxu0 %v13452_v44 }
 0x3df   : > { %11419 = vmatpush3.bf16.msra.mxu0 %v13452_v44 }
 0x3e0   : > { %12380 = vmatprep.subr.msk.bf16.mxu0 %vm1461_vm1, %v10453_v59 }
 0x3e2   : > { %11421 = vmatmul.mubr.msk.bf16.vlgmr.msra.gmra.mxu0 %vm2747_vm2, %v12646_v57 }
 0x3e3   : > { %11424 = vmatprep.mubr.msk.bf16.mxu0 %vm2747_vm2, %v12647_v62  ;;  %11493 = vmatpush3.bf16.msra.mxu0 %v3230_v60 }
 0x3e4   : > { %12381 = vmatprep.subr.msk.bf16.mxu0 %vm1461_vm1, %v3213_v6 }
 0x3ea   : > { %11425 = vmatmul.mubr.msk.bf16.gmra.mxu0 %vm2747_vm2, %v12648_v17 }
 0x3eb   : > { %11428 = vmatprep.mubr.msk.bf16.mxu0 %vm2747_vm2, %v12649_v33 }
 0x3f2   : > { %11429 = vmatmul.mubr.msk.bf16.gmra.mxu0 %vm2747_vm2, %v12650_v54 }
 0x3f3   : > { %11432 = vmatprep.mubr.msk.bf16.mxu0 %vm2747_vm2, %v12651_v36 }
 0x3fa   : > { %11433 = vmatmul.mubr.msk.bf16.gmra.mxu0 %vm2747_vm2, %v12652_v37 }
 0x3fb   : > { %11436 = vmatprep.mubr.msk.bf16.mxu0 %vm2747_vm2, %v12653_v38 }
 0x402   : > { %11437 = vmatmul.mubr.msk.bf16.gmra.mxu0 %vm2747_vm2, %v12654_v39  ;;  %v3392_v39 = vsel %vm1461_vm1, %v10462_v30, 0 }
 0x403   : > { %11440 = vmatprep.mubr.msk.bf16.mxu0 %vm2747_vm2, %v12655_v40 }
 0x40a   : > { %11441 = vmatmul.mubr.msk.bf16.gmra.mxu0 %vm2747_vm2, %v12656_v41  ;;  %v10472_v41 = vld [vmem:[%s12986_s25 + $0x10] sm:$0xf] }
 0x40b   : > { %11444 = vmatprep.mubr.msk.bf16.mxu0 %vm2747_vm2, %v12657_v42  ;;  %v3572_v59 = vsel %vm1461_vm1, %v10472_v41, 0 }
 0x412   : > { %11445 = vmatmul.mubr.msk.bf16.gmra.mxu0 %vm2747_vm2, %v12658_v43 }
 0x413   : > { %11448 = vmatprep.mubr.msk.bf16.mxu0 %vm2747_vm2, %v12659_v45 }
 0x41a   : > { %11449 = vmatmul.mubr.msk.bf16.gmra.mxu0 %vm2747_vm2, %v12660_v46 }
 0x41b   : > { %11452 = vmatprep.mubr.msk.bf16.mxu0 %vm2747_vm2, %v12661_v47 }
 0x422   : > { %11453 = vmatmul.mubr.msk.bf16.gmra.mxu0 %vm2747_vm2, %v12662_v48 }
 0x423   : > { %11456 = vmatprep.mubr.msk.bf16.mxu0 %vm2747_vm2, %v12663_v49 }
 0x42a   : > { %11457 = vmatmul.mubr.msk.bf16.gmra.mxu0 %vm2747_vm2, %v12664_v50 }
 0x42b   : > { %11460 = vmatprep.mubr.msk.bf16.mxu0 %vm2747_vm2, %v12665_v51 }
 0x432   : > { %11461 = vmatmul.mubr.msk.bf16.gmra.mxu0 %vm2747_vm2, %v12666_v52 }
 0x433   : > { %11464 = vmatprep.mubr.msk.bf16.mxu0 %vm2747_vm2, %v12667_v53 }
 0x43a   : > { %11465 = vmatmul.mubr.msk.bf16.gmra.mxu0 %vm2747_vm2, %v12668_v56 }
 0x43b   : > { %11468 = vmatprep.mubr.msk.bf16.mxu0 %vm2747_vm2, %v12669_v58 }
 0x442   : > { %11469 = vmatmul.mubr.msk.bf16.gmra.mxu0 %vm2747_vm2, %v12670_v61  ;;  %v3662_v61 = vsel %vm1461_vm1, %v13550_v1, 0 }
 0x443   : > { %11472 = vmatprep.mubr.msk.bf16.mxu0 %vm2747_vm2, %v12671_v0  ;;  %v10482_v0 = vld [vmem:[%s12986_s25 + $0x18] sm:$0xf] }
 0x44a   : > { %11473 = vmatmul.mubr.msk.bf16.gmra.mxu0 %vm2747_vm2, %v12672_v3 }
 0x44b   : > { %11476 = vmatprep.mubr.msk.bf16.mxu0 %vm2747_vm2, %v12673_v5  ;;  %v10487_v5 = vld [vmem:[%s12986_s25 + $0x1c] sm:$0xf] }
 0x452   : > { %11477 = vmatmul.mubr.msk.bf16.gmra.mxu0 %vm2747_vm2, %v12674_v7 }
 0x453   : > { %11480 = vmatprep.mubr.msk.bf16.mxu0 %vm2747_vm2, %v12675_v8 }
 0x45a   : > { %11481 = vmatmul.mubr.msk.bf16.gmra.mxu0 %vm2747_vm2, %v12676_v4 }
 0x45b   : > { %11484 = vmatprep.mubr.msk.bf16.mxu0 %vm2747_vm2, %v12677_v9 }
 0x462   : > { %11485 = vmatmul.mubr.msk.bf16.gmra.mxu0 %vm2747_vm2, %v12678_v10 }
 0x463   : > { %11488 = vmatprep.mubr.msk.bf16.mxu0 %vm2747_vm2, %v12679_v11 }
 0x46a   : > { %11489 = vmatmul.mubr.msk.bf16.gmra.mxu0 %vm2747_vm2, %v12680_v12 }
 0x4a2   : > { %v11422_v55 = vpop.f32.mrf.mxu0 }
 0x4a4   : > { %v2890_v13 = vpop.f32.mrf.mxu0 }
 0x4a6   : > { %v11423_v14 = vpop.f32.mrf.mxu0 }
 0x4a7   : > { %v3178_v37 = vpack.c.bf16 %v11423_v14, %v11422_v55 }
 0x4a8   : > { %v2893_v15 = vpop.f32.mrf.mxu0 }
 0x4a9   : > { %v3177_v34 = vpack.c.bf16 %v2893_v15, %v2890_v13  ;;  %v3752_v15 = vsel %vm1461_vm1, %v10482_v0, 0 }
 0x4aa   : > { %v11426_v16 = vpop.f32.mrf.mxu0 }
 0x4ac   : > { %v2906_v18 = vpop.f32.mrf.mxu0 }
 0x4ae   : > { %v11427_v19 = vpop.f32.mrf.mxu0 }
 0x4af   : > { %v3180_v46 = vpack.c.bf16 %v11427_v19, %v11426_v16  ;;  %v10492_v16 = vld [vmem:[%s12986_s25 + $0x20] sm:$0xf] }
 0x4b0   : > { %v2909_v20 = vpop.f32.mrf.mxu0 }
 0x4b1   : > { %v3179_v40 = vpack.c.bf16 %v2909_v20, %v2906_v18 }
 0x4b2   : > { %v11430_v21 = vpop.f32.mrf.mxu0 }
 0x4b4   : > { %v2922_v22 = vpop.f32.mrf.mxu0 }
 0x4b6   : > { %v11431_v24 = vpop.f32.mrf.mxu0 }
 0x4b7   : > { %v3182_v27 = vpack.c.bf16 %v11431_v24, %v11430_v21 }
 0x4b8   : > { %v2925_v25 = vpop.f32.mrf.mxu0 }
 0x4b9   : > { %v3181_v26 = vpack.c.bf16 %v2925_v25, %v2922_v22 }
 0x4ba   : > { %v11434_v28 = vpop.f32.mrf.mxu0 }
 0x4bb   : > { %11494 = vmatprep.mubr.msk.bf16.mxu0 %vm3216_vm3, %v3181_v26 }
 0x4bc   : > { %v2938_v31 = vpop.f32.mrf.mxu0  ;;  %11495 = vmatmul.mubr.msk.bf16.vlgmr.msra.gmra.mxu0 %vm3216_vm3, %v3182_v27 }
 0x4bd   : > { %11503 = vmatpush3.bf16.msra.mxu0 %v3310_v29 }
 0x4be   : > { %v11435_v63 = vpop.f32.mrf.mxu0  ;;  %12382 = vmatprep.subr.msk.bf16.mxu0 %vm1461_vm1, %v10462_v30 }
 0x4bf   : > { %v3184_v17 = vpack.c.bf16 %v11435_v63, %v11434_v28 }
 0x4c0   : > { %v2941_v57 = vpop.f32.mrf.mxu0 }
 0x4c1   : > { %v3183_v62 = vpack.c.bf16 %v2941_v57, %v2938_v31  ;;  %v3842_v31 = vsel %vm1461_vm1, %v10487_v5, 0 }
 0x4c2   : > { %v11438_v33 = vpop.f32.mrf.mxu0 }
 0x4c3   : > { %11498 = vmatprep.mubr.msk.bf16.mxu0 %vm3216_vm3, %v3183_v62 }
 0x4c4   : > { %v2954_v35 = vpop.f32.mrf.mxu0  ;;  %11499 = vmatmul.mubr.msk.bf16.gmra.mxu0 %vm3216_vm3, %v3184_v17 }
 0x4c5   : > { %11504 = vmatprep.mubr.msk.bf16.mxu0 %vm3216_vm3, %v3177_v34 }
 0x4c6   : > { %v11439_v54 = vpop.f32.mrf.mxu0 }
 0x4c7   : > { %v3186_v53 = vpack.c.bf16 %v11439_v54, %v11438_v33 }
 0x4c8   : > { %v2957_v36 = vpop.f32.mrf.mxu0 }
 0x4c9   : > { %v3185_v48 = vpack.c.bf16 %v2957_v36, %v2954_v35 }
 0x4ca   : > { %v11442_v38 = vpop.f32.mrf.mxu0 }
 0x4cc   : > { %v2970_v42 = vpop.f32.mrf.mxu0  ;;  %11505 = vmatmul.mubr.msk.bf16.vlgmr.msra.gmra.mxu0 %vm3216_vm3, %v3178_v37 }
 0x4cd   : > { %11508 = vmatprep.mubr.msk.bf16.mxu0 %vm3216_vm3, %v3179_v40  ;;  %11513 = vmatpush3.bf16.msra.mxu0 %v3392_v39  ;;  %v3932_v40 = vsel %vm1461_vm1, %v10492_v16, 0 }
 0x4ce   : > { %v11443_v43 = vpop.f32.mrf.mxu0  ;;  %12384 = vmatprep.subr.msk.bf16.mxu0 %vm1461_vm1, %v10472_v41 }
 0x4cf   : > { %v3188_v4 = vpack.c.bf16 %v11443_v43, %v11442_v38 }
 0x4d0   : > { %v2973_v45 = vpop.f32.mrf.mxu0 }
 0x4d1   : > { %v3187_v60 = vpack.c.bf16 %v2973_v45, %v2970_v42 }
 0x4d2   : > { %v11446_v47 = vpop.f32.mrf.mxu0 }
 0x4d4   : > { %v2986_v49 = vpop.f32.mrf.mxu0  ;;  %11509 = vmatmul.mubr.msk.bf16.gmra.mxu0 %vm3216_vm3, %v3180_v46 }
 0x4d5   : > { %11514 = vmatprep.mubr.msk.bf16.mxu0 %vm3216_vm3, %v3185_v48 }
 0x4d6   : > { %v11447_v50 = vpop.f32.mrf.mxu0 }
 0x4d7   : > { %v3190_v56 = vpack.c.bf16 %v11447_v50, %v11446_v47 }
 0x4d8   : > { %v2989_v51 = vpop.f32.mrf.mxu0 }
 0x4d9   : > { %v3189_v52 = vpack.c.bf16 %v2989_v51, %v2986_v49 }
 0x4da   : > { %v11450_v58 = vpop.f32.mrf.mxu0 }
 0x4db   : > { %11524 = vmatprep.mubr.msk.bf16.mxu1 %vm3216_vm3, %v3189_v52 }
 0x4dc   : > { %v3002_v3 = vpop.f32.mrf.mxu0  ;;  %11515 = vmatmul.mubr.msk.bf16.vlgmr.msra.gmra.mxu0 %vm3216_vm3, %v3186_v53  ;;  %11525 = vmatmul.mubr.msk.bf16.vlgmr.msra.gmra.mxu1 %vm3216_vm3, %v3190_v56 }
 0x4dd   : > { %11518 = vmatprep.mubr.msk.bf16.mxu0 %vm3216_vm3, %v3187_v60  ;;  %11533 = vmatpush3.bf16.msra.mxu0 %v3572_v59 }
 0x4de   : > { %v11451_v6 = vpop.f32.mrf.mxu0  ;;  %11543 = vmatpush3.bf16.msra.mxu1 %v3662_v61  ;;  %12386 = vmatprep.subr.msk.bf16.mxu0 %vm1461_vm1, %v10482_v0 }
 0x4df   : > { %12387 = vmatprep.subr.msk.bf16.mxu1 %vm1461_vm1, %v10487_v5  ;;  %v3192_v9 = vpack.c.bf16 %v11451_v6, %v11450_v58 }
 0x4e0   : > { %v3005_v7 = vpop.f32.mrf.mxu0 }
 0x4e1   : > { %v3191_v8 = vpack.c.bf16 %v3005_v7, %v3002_v3 }
 0x4e2   : > { %v11454_v10 = vpop.f32.mrf.mxu0 }
 0x4e3   : > { %11528 = vmatprep.mubr.msk.bf16.mxu1 %vm3216_vm3, %v3191_v8 }
 0x4e4   : > { %v3018_v11 = vpop.f32.mrf.mxu0  ;;  %11519 = vmatmul.mubr.msk.bf16.gmra.mxu0 %vm3216_vm3, %v3188_v4  ;;  %11529 = vmatmul.mubr.msk.bf16.gmra.mxu1 %vm3216_vm3, %v3192_v9 }
 0x4e6   : > { %v11455_v12 = vpop.f32.mrf.mxu0 }
 0x4e7   : > { %v3194_v13 = vpack.c.bf16 %v11455_v12, %v11454_v10 }
 0x4e8   : > { %v3021_v1 = vpop.f32.mrf.mxu0 }
 0x4e9   : > { %v3193_v55 = vpack.c.bf16 %v3021_v1, %v3018_v11 }
 0x4ea   : > { %v11458_v14 = vpop.f32.mrf.mxu0 }
 0x4eb   : > { %11534 = vmatprep.mubr.msk.bf16.mxu0 %vm3216_vm3, %v3193_v55 }
 0x4ec   : > { %v3034_v18 = vpop.f32.mrf.mxu0  ;;  %11535 = vmatmul.mubr.msk.bf16.vlgmr.msra.gmra.mxu0 %vm3216_vm3, %v3194_v13 }
 0x4ed   : > { %11553 = vmatpush3.bf16.msra.mxu0 %v3752_v15 }
 0x4ee   : > { %v11459_v19 = vpop.f32.mrf.mxu0  ;;  %12388 = vmatprep.subr.msk.bf16.mxu0 %vm1461_vm1, %v10492_v16 }
 0x4ef   : > { %v3196_v22 = vpack.c.bf16 %v11459_v19, %v11458_v14 }
 0x4f0   : > { %v3037_v20 = vpop.f32.mrf.mxu0 }
 0x4f1   : > { %v3195_v21 = vpack.c.bf16 %v3037_v20, %v3034_v18 }
 0x4f2   : > { %v11462_v24 = vpop.f32.mrf.mxu0 }
 0x4f3   : > { %11538 = vmatprep.mubr.msk.bf16.mxu0 %vm3216_vm3, %v3195_v21 }
 0x4f4   : > { %v3050_v25 = vpop.f32.mrf.mxu0  ;;  %11539 = vmatmul.mubr.msk.bf16.gmra.mxu0 %vm3216_vm3, %v3196_v22 }
 0x4f6   : > { %v11463_v26 = vpop.f32.mrf.mxu0 }
 0x4f7   : > { %v3198_v29 = vpack.c.bf16 %v11463_v26, %v11462_v24 }
 0x4f8   : > { %v3053_v27 = vpop.f32.mrf.mxu0 }
 0x4f9   : > { %v3197_v28 = vpack.c.bf16 %v3053_v27, %v3050_v25  ;;  %v12681_v25 = vld [vmem:[%s14546_s3] sm:$0xff]  }
 0x4fa   : > { %v11466_v30 = vpop.f32.mrf.mxu0 }
 0x4fb   : > { %11544 = vmatprep.mubr.msk.bf16.mxu1 %vm3216_vm3, %v3197_v28 }
 0x4fc   : > { %v3066_v63 = vpop.f32.mrf.mxu0  ;;  %11545 = vmatmul.mubr.msk.bf16.vlgmr.msra.gmra.mxu1 %vm3216_vm3, %v3198_v29 }
 0x4fd   : > { %11563 = vmatpush3.bf16.msra.mxu1 %v3842_v31 }
 0x4fe   : > { %v11467_v57 = vpop.f32.mrf.mxu0 }
 0x4ff   : > { %v3200_v33 = vpack.c.bf16 %v11467_v57, %v11466_v30 }
 0x500   : > { %v3069_v62 = vpop.f32.mrf.mxu0 }
 0x501   : > { %v3199_v17 = vpack.c.bf16 %v3069_v62, %v3066_v63 }
 0x502   : > { %v11470_v34 = vpop.f32.mrf.mxu0 }
 0x503   : > { %11548 = vmatprep.mubr.msk.bf16.mxu1 %vm3216_vm3, %v3199_v17 }
 0x504   : > { %v3082_v35 = vpop.f32.mrf.mxu0  ;;  %11549 = vmatmul.mubr.msk.bf16.gmra.mxu1 %vm3216_vm3, %v3200_v33 }
 0x506   : > { %v11471_v54 = vpop.f32.mrf.mxu0 }
 0x507   : > { %v3202_v38 = vpack.c.bf16 %v11471_v54, %v11470_v34 }
 0x508   : > { %v3085_v36 = vpop.f32.mrf.mxu0 }
 0x509   : > { %v3201_v37 = vpack.c.bf16 %v3085_v36, %v3082_v35 }
 0x50a   : > { %v11474_v39 = vpop.f32.mrf.mxu0 }
 0x50b   : > { %11554 = vmatprep.mubr.msk.bf16.mxu0 %vm3216_vm3, %v3201_v37 }
 0x50c   : > { %v3098_v41 = vpop.f32.mrf.mxu0  ;;  %11555 = vmatmul.mubr.msk.bf16.vlgmr.msra.gmra.mxu0 %vm3216_vm3, %v3202_v38 }
 0x50d   : > { %11573 = vmatpush3.bf16.msra.mxu0 %v3932_v40 }
 0x50e   : > { %v11475_v42 = vpop.f32.mrf.mxu0 }
 0x50f   : > { %v3204_v46 = vpack.c.bf16 %v11475_v42, %v11474_v39 }
 0x510   : > { %v3101_v43 = vpop.f32.mrf.mxu0 }
 0x511   : > { %v3203_v45 = vpack.c.bf16 %v3101_v43, %v3098_v41 }
 0x512   : > { %v11478_v47 = vpop.f32.mrf.mxu0 }
 0x513   : > { %11558 = vmatprep.mubr.msk.bf16.mxu0 %vm3216_vm3, %v3203_v45 }
 0x514   : > { %v3114_v48 = vpop.f32.mrf.mxu0  ;;  %11559 = vmatmul.mubr.msk.bf16.gmra.mxu0 %vm3216_vm3, %v3204_v46 }
 0x516   : > { %v11479_v49 = vpop.f32.mrf.mxu0 }
 0x517   : > { %v3206_v52 = vpack.c.bf16 %v11479_v49, %v11478_v47 }
 0x518   : > { %v3117_v50 = vpop.f32.mrf.mxu0 }
 0x519   : > { %v3205_v51 = vpack.c.bf16 %v3117_v50, %v3114_v48 }
 0x51a   : > { %v11482_v53 = vpop.f32.mrf.mxu0 }
 0x51b   : > { %11564 = vmatprep.mubr.msk.bf16.mxu1 %vm3216_vm3, %v3205_v51 }
 0x51c   : > { %v3130_v56 = vpop.f32.mrf.mxu0  ;;  %11565 = vmatmul.mubr.msk.bf16.vlgmr.msra.gmra.mxu1 %vm3216_vm3, %v3206_v52 }
 0x51e   : > { %v11483_v58 = vpop.f32.mrf.mxu0 }
 0x51f   : > { %v3208_v61 = vpack.c.bf16 %v11483_v58, %v11482_v53 }
 0x520   : > { %v3133_v59 = vpop.f32.mrf.mxu0 }
 0x521   : > { %v3207_v60 = vpack.c.bf16 %v3133_v59, %v3130_v56 }
 0x522   : > { %v11486_v0 = vpop.f32.mrf.mxu0 }
 0x523   : > { %11568 = vmatprep.mubr.msk.bf16.mxu1 %vm3216_vm3, %v3207_v60 }
 0x524   : > { %v3146_v3 = vpop.f32.mrf.mxu0  ;;  %11569 = vmatmul.mubr.msk.bf16.gmra.mxu1 %vm3216_vm3, %v3208_v61 }
 0x525   : > { %11590 = vmatprep.mubr.msk.bf16.mxu1 %vm2747_vm2, %v12681_v25 }
 0x526   : > { %v11487_v5 = vpop.f32.mrf.mxu0 }
 0x527   : > { %v3210_v8 = vpack.c.bf16 %v11487_v5, %v11486_v0 }
 0x528   : > { %v3149_v6 = vpop.f32.mrf.mxu0 }
 0x529   : > { %v3209_v7 = vpack.c.bf16 %v3149_v6, %v3146_v3 }
 0x52a   : > { %v11490_v4 = vpop.f32.mrf.mxu0 }
 0x52b   : > { %11574 = vmatprep.mubr.msk.bf16.mxu0 %vm3216_vm3, %v3209_v7 }
 0x52c   : > { %v3162_v9 = vpop.f32.mrf.mxu0  ;;  %11575 = vmatmul.mubr.msk.bf16.vlgmr.msra.gmra.mxu0 %vm3216_vm3, %v3210_v8 }
 0x52e   : > { %v11491_v10 = vpop.f32.mrf.mxu0 }
 0x52f   : > { %v3212_v1 = vpack.c.bf16 %v11491_v10, %v11490_v4 }
 0x530   : > { %v3165_v11 = vpop.f32.mrf.mxu0 }
 0x531   : > { %v3211_v12 = vpack.c.bf16 %v3165_v11, %v3162_v9 }
 0x533   : > { %11578 = vmatprep.mubr.msk.bf16.mxu0 %vm3216_vm3, %v3211_v12 }
 0x534   : > { %11579 = vmatmul.mubr.msk.bf16.gmra.mxu0 %vm3216_vm3, %v3212_v1 }
 0x57c   : > { %v11496_v55 = vpop.f32.mrf.mxu0 }
 0x57e   : > { %v3266_v13 = vpop.f32.mrf.mxu0 }
 0x580   : > { %v11497_v14 = vpop.f32.mrf.mxu0 }
 0x582   : > { %v13608_v15 = vpop.f32.mrf.mxu0 }
 0x584   : > { %v11500_v16 = vpop.f32.mrf.mxu0 }
 0x586   : > { %v13610_v18 = vpop.f32.mrf.mxu0 }
 0x588   : > { %v13612_v19 = vpop.f32.mrf.mxu0 }
 0x58a   : > { %v13614_v20 = vpop.f32.mrf.mxu0 }
 0x58c   : > { %v11506_v21 = vpop.f32.mrf.mxu0 }
 0x58d   : > { %v3355_v22 = vadd.f32 %v11506_v21, %v11496_v55 }
 0x58e   : > { %v3346_v24 = vpop.f32.mrf.mxu0 }
 0x58f   : > { %v13617_v26 = vadd.f32 %v3346_v24, %v3266_v13 }
 0x590   : > { %v11507_v27 = vpop.f32.mrf.mxu0 }
 0x591   : > { %v3358_v28 = vadd.f32 %v11507_v27, %v11497_v14 }
 0x592   : > { %v13620_v29 = vpop.f32.mrf.mxu0 }
 0x594   : > { %v11510_v30 = vpop.f32.mrf.mxu0 }
 0x595   : > { %v3371_v24 = vadd.f32 %v11510_v30, %v11500_v16 }
 0x596   : > { %v3362_v31 = vpop.f32.mrf.mxu0 }
 0x597   : > { %v3363_v32 = vadd.f32 %v3362_v31, %v13610_v18  ;;  %v3350_v18 = vadd.f32 %v13620_v29, %v13608_v15 }
 0x598   : > { %v11511_v63 = vpop.f32.mrf.mxu0 }
 0x59a   : > { %v3365_v57 = vpop.f32.mrf.mxu0 }
 0x59c   : > { %v11516_v62 = vpop.f32.mrf.mxu0  ;;  %v11526_v33 = vpop.f32.mrf.mxu1 }
 0x59d   : > { %v3461_v1 = vadd.f32 %v11516_v62, %v3355_v22  ;;  %v3366_v22 = vadd.f32 %v3365_v57, %v13614_v20  ;;  %v13653_v57 = vld [vmem:[%s12991_s29] ss:$0 sm:$0xff] }
 0x59e   : > { %v13622_v17 = vpop.f32.mrf.mxu0  ;;  %v13626_v54 = vpop.f32.mrf.mxu1 }
 0x59f   : > { %v3551_v14 = vadd.f32 %v11526_v33, %v3461_v1 }
 0x5a0   : > { %v11517_v34 = vpop.f32.mrf.mxu0  ;;  %v11527_v38 = vpop.f32.mrf.mxu1 }
 0x5a1   : > { %v3462_v21 = vadd.f32 %v11517_v34, %v3358_v28 }
 0x5a2   : > { %v13624_v35 = vpop.f32.mrf.mxu0  ;;  %v13628_v40 = vpop.f32.mrf.mxu1 }
 0x5a3   : > { %v3552_v44 = vadd.f32 %v11527_v38, %v3462_v21 }
 0x5a4   : > { %v11520_v36 = vpop.f32.mrf.mxu0  ;;  %v11530_v42 = vpop.f32.mrf.mxu1 }
 0x5a5   : > { %v3465_v2 = vadd.f32 %v11520_v36, %v3371_v24 }
 0x5a6   : > { %v3444_v37 = vpop.f32.mrf.mxu0  ;;  %v3534_v45 = vpop.f32.mrf.mxu1 }
 0x5a7   : > { %v3555_v30 = vadd.f32 %v11530_v42, %v3465_v2 }
 0x5a8   : > { %v11521_v39 = vpop.f32.mrf.mxu0  ;;  %v11531_v47 = vpop.f32.mrf.mxu1 }
 0x5aa   : > { %v3447_v41 = vpop.f32.mrf.mxu0  ;;  %v3537_v49 = vpop.f32.mrf.mxu1 }
 0x5ab   : > { %v3464_v31 = vadd.f32 %v3447_v41, %v3366_v22 }
 0x5ac   : > { %v11536_v43 = vpop.f32.mrf.mxu0 }
 0x5ad   : > { %v3641_v25 = vadd.f32 %v11536_v43, %v3551_v14  ;;  %v3554_v15 = vadd.f32 %v3537_v49, %v3464_v31 }
 0x5ae   : > { %v13630_v46 = vpop.f32.mrf.mxu0 }
 0x5b0   : > { %v11537_v48 = vpop.f32.mrf.mxu0 }
 0x5b2   : > { %v13632_v50 = vpop.f32.mrf.mxu0 }
 0x5b4   : > { %v11540_v52 = vpop.f32.mrf.mxu0 }
 0x5b5   : > { %v3645_v43 = vadd.f32 %v11540_v52, %v3555_v30 }
 0x5b6   : > { %v3624_v56 = vpop.f32.mrf.mxu0 }
 0x5b8   : > { %v11541_v59 = vpop.f32.mrf.mxu0 }
 0x5ba   : > { %v3627_v61 = vpop.f32.mrf.mxu0 }
 0x5bc   : > { %v11546_v51 = vpop.f32.mrf.mxu1 }
 0x5be   : > { %v13634_v53 = vpop.f32.mrf.mxu1 }
 0x5bf   : > { %14555 = vst [vmem:[#allocation38_spill] sm:$0xff] %v13634_v53  ;;  %v3463_v53 = vadd.f32 %v3444_v37, %v3363_v32 }
 0x5c0   : > { %v11547_v58 = vpop.f32.mrf.mxu1 }
 0x5c1   : > { %v3553_v38 = vadd.f32 %v3534_v45, %v3463_v53 }
 0x5c2   : > { %v13636_v60 = vpop.f32.mrf.mxu1 }
 0x5c3   : > { %14556 = vst [vmem:[#allocation39_spill] sm:$0xff] %v13636_v60  ;;  %v3642_v60 = vadd.f32 %v11537_v48, %v3552_v44  ;;  %v3460_v44 = vadd.f32 %v13624_v35, %v3350_v18  ;;  %v3459_v48 = vadd.f32 %v13622_v17, %v13617_v26 }
 0x5c4   : > { %v11550_v0 = vpop.f32.mrf.mxu1 }
 0x5c5   : > { %v3732_v33 = vadd.f32 %v11547_v58, %v3642_v60  ;;  %v3735_v2 = vadd.f32 %v11550_v0, %v3645_v43  ;;  %v3550_v35 = vadd.f32 %v13628_v40, %v3460_v44  ;;  %v3549_v26 = vadd.f32 %v13626_v54, %v3459_v48 }
 0x5c6   : > { %v3714_v5 = vpop.f32.mrf.mxu1  ;;  %v14561_v54 = vld [vmem:[#allocation38_spill] sm:$0xff] }
 0x5c7   : > { %v3640_v17 = vadd.f32 %v13632_v50, %v3550_v35  ;;  %v3639_v40 = vadd.f32 %v13630_v46, %v3549_v26  ;;  %v12689_v35 = vld [vmem:[%s14546_s3 + $0x40] sm:$0xff]  }
 0x5c8   : > { %v11551_v7 = vpop.f32.mrf.mxu1  ;;  %v12697_v26 = vld [vmem:[%s14546_s3 + $0x80] sm:$0xff]  }
 0x5c9   : > { %v3729_v24 = vadd.f32 %v14561_v54, %v3639_v40  ;;  %v10570_v40 = vld [vmem:[%s14545_s8 + $0x4] sm:$0xf]  ;;  %v12712_v54 = vld [vmem:[%s14546_s3 + $0xf8] sm:$0xff]  }
 0x5ca   : > { %v3717_v4 = vpop.f32.mrf.mxu1  ;;  %12389 = vmatprep.subr.msk.bf16.mxu0 %vm1461_vm1, %v10570_v40 }
 0x5cc   : > { %v11556_v3 = vpop.f32.mrf.mxu0 }
 0x5ce   : > { %v13638_v6 = vpop.f32.mrf.mxu0 }
 0x5cf   : > { %14557 = vst [vmem:[#allocation40_spill] sm:$0xff] %v13638_v6  ;;  %v3731_v6 = vadd.f32 %v11546_v51, %v3641_v25 }
 0x5d0   : > { %v11557_v8 = vpop.f32.mrf.mxu0 }
 0x5d2   : > { %v13640_v9 = vpop.f32.mrf.mxu0 }
 0x5d3   : > { %14558 = vst [vmem:[#allocation41_spill] sm:$0xff] %v13640_v9  ;;  %v3374_v9 = vadd.f32 %v11511_v63, %v13612_v19  ;;  %v3822_v19 = vadd.f32 %v11557_v8, %v3732_v33 }
 0x5d4   : > { %v11560_v11 = vpop.f32.mrf.mxu0 }
 0x5d5   : > { %v3466_v62 = vadd.f32 %v11521_v39, %v3374_v9  ;;  %v3643_v39 = vadd.f32 %v3624_v56, %v3553_v38  ;;  %v3825_v51 = vadd.f32 %v11560_v11, %v3735_v2 }
 0x5d6   : > { %v3804_v55 = vpop.f32.mrf.mxu0 }
 0x5d7   : > { %v3556_v63 = vadd.f32 %v11531_v47, %v3466_v62  ;;  %v3733_v45 = vadd.f32 %v3714_v5, %v3643_v39  ;;  %v3644_v47 = vadd.f32 %v3627_v61, %v3554_v15  ;;  %v14560_v61 = vld [vmem:[#allocation39_spill] sm:$0xff] }
 0x5d8   : > { %v11561_v27 = vpop.f32.mrf.mxu0 }
 0x5d9   : > { %v3646_v29 = vadd.f32 %v11541_v59, %v3556_v63  ;;  %v3823_v56 = vadd.f32 %v3804_v55, %v3733_v45  ;;  %v3734_v49 = vadd.f32 %v3717_v4, %v3644_v47  ;;  %v12685_v45 = vld [vmem:[%s14546_s3 + $0x20] sm:$0xff]   ;;  %v12690_v47 = vld [vmem:[%s14546_s3 + $0x48] sm:$0xff]  }
 0x5da   : > { %v3807_v28 = vpop.f32.mrf.mxu0  ;;  %v14562_v4 = vld [vmem:[#allocation41_spill] sm:$0xff] }
 0x5db   : > { %v3736_v58 = vadd.f32 %v11551_v7, %v3646_v29  ;;  %v3730_v7 = vadd.f32 %v14560_v61, %v3640_v17  ;;  %v3824_v55 = vadd.f32 %v3807_v28, %v3734_v49  ;;  %v12682_v29 = vld [vmem:[%s14546_s3 + $0x8] sm:$0xff]   ;;  %v12699_v49 = vld [vmem:[%s14546_s3 + $0x90] sm:$0xff]   ;;  %v4775_v61 = vsel %vm1461_vm1, %v10570_v40, 0 }
 0x5dc   : > { %v11566_v10 = vpop.f32.mrf.mxu1  ;;  %v12698_v17 = vld [vmem:[%s14546_s3 + $0x88] sm:$0xff]   ;;  %11663 = vmatpush3.bf16.msra.mxu0 %v4775_v61 }
 0x5dd   : > { %v3826_v59 = vadd.f32 %v11561_v27, %v3736_v58  ;;  %v3820_v25 = vadd.f32 %v14562_v4, %v3730_v7  ;;  %v12691_v58 = vld [vmem:[%s14546_s3 + $0x50] sm:$0xff]   ;;  %v12706_v7 = vld [vmem:[%s14546_s3 + $0xc8] sm:$0xff]  }
 0x5de   : > { %v13642_v12 = vpop.f32.mrf.mxu1  ;;  %v12715_v4 = vld [vmem:[%s14546_s3 + $0x110] sm:$0xff]  }
 0x5df   : > { %14559 = vst [vmem:[#allocation42_spill] sm:$0xff] %v13642_v12  ;;  %v3821_v12 = vadd.f32 %v11556_v3, %v3731_v6 }
 0x5e0   : > { %v11567_v13 = vpop.f32.mrf.mxu1 }
 0x5e1   : > { %v3911_v34 = vadd.f32 %v11566_v10, %v3821_v12  ;;  %v3912_v42 = vadd.f32 %v11567_v13, %v3822_v19 }
 0x5e2   : > { %v13644_v23 = vpop.f32.mrf.mxu1 }
 0x5e3   : > { %v3910_v33 = vadd.f32 %v13644_v23, %v3820_v25  ;;  %v12716_v25 = vld [vmem:[%s14546_s3 + $0x118] sm:$0xff]  }
 0x5e4   : > { %v11570_v16 = vpop.f32.mrf.mxu1 }
 0x5e5   : > { %v3915_v0 = vadd.f32 %v11570_v16, %v3825_v51  ;;  %v14563_v16 = vld [vmem:[#allocation40_spill] sm:$0xff]  ;;  %v12686_v51 = vld [vmem:[%s14546_s3 + $0x28] sm:$0xff]  }
 0x5e6   : > { %v3894_v20 = vpop.f32.mrf.mxu1  ;;  %v3819_v30 = vadd.f32 %v14563_v16, %v3729_v24  ;;  %v14564_v31 = vld [vmem:[#allocation42_spill] sm:$0xff] }
 0x5e7   : > { %v3913_v8 = vadd.f32 %v3894_v20, %v3823_v56  ;;  %v12694_v56 = vld [vmem:[%s14546_s3 + $0x68] sm:$0xff]   ;;  %v12713_v24 = vld [vmem:[%s14546_s3 + $0x100] sm:$0xff]  }
 0x5e8   : > { %v11571_v60 = vpop.f32.mrf.mxu1 }
 0x5e9   : > { %v3916_v13 = vadd.f32 %v11571_v60, %v3826_v59  ;;  %v12692_v60 = vld [vmem:[%s14546_s3 + $0x58] sm:$0xff]  }
 0x5ea   : > { %v3897_v12 = vpop.f32.mrf.mxu1  ;;  %v12700_v59 = vld [vmem:[%s14546_s3 + $0x98] sm:$0xff]  }
 0x5eb   : > { %v3914_v27 = vadd.f32 %v3897_v12, %v3824_v55  ;;  %v12707_v12 = vld [vmem:[%s14546_s3 + $0xd0] sm:$0xff]   ;;  %v12708_v55 = vld [vmem:[%s14546_s3 + $0xd8] sm:$0xff]  }
 0x5ec   : > { %v11576_v36 = vpop.f32.mrf.mxu0 }
 0x5ed   : > { %v4001_v32 = vadd.f32 %v11576_v36, %v3911_v34  ;;  %v3909_v36 = vadd.f32 %v14564_v31, %v3819_v30 }
 0x5ee   : > { %v3968_v37 = vpop.f32.mrf.mxu0 }
 0x5ef   : > { %v4016_v52 = vadd.f32 %v13653_v57, %v4001_v32  ;;  %v3999_v44 = vadd.f32 %v3968_v37, %v3909_v36 }
 0x5f0   : > { %v11577_v41 = vpop.f32.mrf.mxu0 }
 0x5f1   : > { %v4002_v53 = vadd.f32 %v11577_v41, %v3912_v42  ;;  %v4024_v9 = vmax.f32 %v4016_v52, 0.0  ;;  %v4014_v42 = vadd.f32 %v13653_v57, %v3999_v44  ;;  %v12683_v41 = vld [vmem:[%s14546_s3 + $0x10] sm:$0xff]   ;;  %v10579_v44 = vld [vmem:[%s14545_s8 + $0x8] sm:$0xf] }
 0x5f2   : > { %v3971_v3 = vpop.f32.mrf.mxu0  ;;  %v12687_v52 = vld [vmem:[%s14546_s3 + $0x30] sm:$0xff]  }
 0x5f3   : > { %v4017_v6 = vadd.f32 %v13653_v57, %v4002_v53  ;;  %v4000_v38 = vadd.f32 %v3971_v3, %v3910_v33  ;;  %v4022_v37 = vmax.f32 %v4014_v42, 0.0  ;;  %v12688_v53 = vld [vmem:[%s14546_s3 + $0x38] sm:$0xff]   ;;  %v12693_v3 = vld [vmem:[%s14546_s3 + $0x60] sm:$0xff]  }
 0x5f4   : > { %v11580_v5 = vpop.f32.mrf.mxu0 }
 0x5f5   : > { %v4025_v10 = vmax.f32 %v4017_v6, 0.0  ;;  %v4005_v11 = vadd.f32 %v11580_v5, %v3915_v0  ;;  %v4015_v23 = vadd.f32 %v13653_v57, %v4000_v38  ;;  %v12695_v0 = vld [vmem:[%s14546_s3 + $0x70] sm:$0xff]   ;;  %v12696_v6 = vld [vmem:[%s14546_s3 + $0x78] sm:$0xff]   ;;  %v12701_v5 = vld [vmem:[%s14546_s3 + $0xa0] sm:$0xff]  }
 0x5f6   : > { %v3984_v1 = vpop.f32.mrf.mxu0 }
 0x5f7   : > { %v4003_v14 = vadd.f32 %v3984_v1, %v3913_v8  ;;  %v4031_v21 = vpack.c.bf16 %v4025_v10, %v4024_v9  ;;  %v4020_v22 = vadd.f32 %v13653_v57, %v4005_v11  ;;  %v4023_v48 = vmax.f32 %v4015_v23, 0.0  ;;  %v12702_v8 = vld [vmem:[%s14546_s3 + $0xa8] sm:$0xff]   ;;  %v12703_v9 = vld [vmem:[%s14546_s3 + $0xb0] sm:$0xff]   ;;  %v12704_v10 = vld [vmem:[%s14546_s3 + $0xb8] sm:$0xff]  }
 0x5f8   : > { %v11581_v50 = vpop.f32.mrf.mxu0  ;;  %v12705_v11 = vld [vmem:[%s14546_s3 + $0xc0] sm:$0xff]  }
 0x5f9   : > { %v4006_v62 = vadd.f32 %v11581_v50, %v3916_v13  ;;  %v4018_v34 = vadd.f32 %v13653_v57, %v4003_v14  ;;  %v4028_v43 = vmax.f32 %v4020_v22, 0.0  ;;  %v4030_v15 = vpack.c.bf16 %v4023_v48, %v4022_v37  ;;  %v4759_v1 = vld [vmem:[%s14545_s8] sm:$0xf]  ;;  %v12710_v14 = vld [vmem:[%s14546_s3 + $0xe8] sm:$0xff]  }
 0x5fa   : > { %v3987_v46 = vpop.f32.mrf.mxu0  ;;  %12390 = vmatprep.subr.msk.bf16.mxu0 %vm1461_vm1, %v4759_v1  ;;  %v12709_v13 = vld [vmem:[%s14546_s3 + $0xe0] sm:$0xff]   ;;  %v12714_v50 = vld [vmem:[%s14546_s3 + $0x108] sm:$0xff]  }
 0x5fb   : > { %v4021_v28 = vadd.f32 %v13653_v57, %v4006_v62  ;;  %v4004_v18 = vadd.f32 %v3987_v46, %v3914_v27  ;;  %v4026_v63 = vmax.f32 %v4018_v34, 0.0 }
 0x5fd   : > { %v4029_v19 = vmax.f32 %v4021_v28, 0.0  ;;  %v4019_v32 = vadd.f32 %v13653_v57, %v4004_v18  ;;  %v12684_v57 = vld [vmem:[%s14546_s3 + $0x18] sm:$0xff]  }
 0x5ff   : > { %v4027_v20 = vmax.f32 %v4019_v32, 0.0  ;;  %v4033_v39 = vpack.c.bf16 %v4029_v19, %v4028_v43  ;;  %v4855_v32 = vsel %vm1461_vm1, %v4759_v1, 0 }
 0x601   : > { %11582 = vmatprep.subr.bf16.mxu1 %v4033_v39  ;;  %v4032_v2 = vpack.c.bf16 %v4027_v20, %v4026_v63 }
 0x602   : > { %11583 = vmatpush3.bf16.msra.mxu1 %v4033_v39 }
 0x603   : > { %11584 = vmatprep.subr.bf16.mxu1 %v4032_v2 }
 0x606   : > { %11585 = vmatpush3.bf16.msra.mxu1 %v4032_v2 }
 0x607   : > { %11586 = vmatprep.subr.bf16.mxu1 %v4031_v21 }
 0x60a   : > { %11587 = vmatpush3.bf16.msra.mxu1 %v4031_v21  ;;  %v12711_v21 = vld [vmem:[%s14546_s3 + $0xf0] sm:$0xff]   ;;  %s14584_s3 = sld [smem:[#allocation25_spill]] }
 0x60b   : > { %11588 = vmatprep.subr.bf16.mxu1 %v4030_v15 }
 0x60e   : > { %11589 = vmatpush3.bf16.msra.mxu1 %v4030_v15 }
 0x611   : > { %11591 = vmatmul.mubr.msk.bf16.vlgmr.msra.gmra.mxu1 %vm2747_vm2, %v12682_v29 }
 0x612   : > { %11594 = vmatprep.mubr.msk.bf16.mxu1 %vm2747_vm2, %v12683_v41 }
 0x619   : > { %11595 = vmatmul.mubr.msk.bf16.gmra.mxu1 %vm2747_vm2, %v12684_v57 }
 0x61a   : > { %11598 = vmatprep.mubr.msk.bf16.mxu1 %vm2747_vm2, %v12685_v45  ;;  %v4937_v45 = vsel %vm1461_vm1, %v10579_v44, 0 }
 0x621   : > { %11599 = vmatmul.mubr.msk.bf16.gmra.mxu1 %vm2747_vm2, %v12686_v51 }
 0x622   : > { %11602 = vmatprep.mubr.msk.bf16.mxu1 %vm2747_vm2, %v12687_v52  ;;  %v10584_v52 = vld [vmem:[%s14545_s8 + $0xc] sm:$0xf] }
 0x629   : > { %11603 = vmatmul.mubr.msk.bf16.gmra.mxu1 %vm2747_vm2, %v12688_v53 }
 0x62a   : > { %11606 = vmatprep.mubr.msk.bf16.mxu1 %vm2747_vm2, %v12689_v35 }
 0x631   : > { %11607 = vmatmul.mubr.msk.bf16.gmra.mxu1 %vm2747_vm2, %v12690_v47 }
 0x632   : > { %11610 = vmatprep.mubr.msk.bf16.mxu1 %vm2747_vm2, %v12691_v58 }
 0x639   : > { %11611 = vmatmul.mubr.msk.bf16.gmra.mxu1 %vm2747_vm2, %v12692_v60 }
 0x63a   : > { %11614 = vmatprep.mubr.msk.bf16.mxu1 %vm2747_vm2, %v12693_v3 }
 0x641   : > { %11615 = vmatmul.mubr.msk.bf16.gmra.mxu1 %vm2747_vm2, %v12694_v56 }
 0x642   : > { %11618 = vmatprep.mubr.msk.bf16.mxu1 %vm2747_vm2, %v12695_v0 }
 0x649   : > { %11619 = vmatmul.mubr.msk.bf16.gmra.mxu1 %vm2747_vm2, %v12696_v6 }
 0x64a   : > { %11622 = vmatprep.mubr.msk.bf16.mxu1 %vm2747_vm2, %v12697_v26 }
 0x651   : > { %11623 = vmatmul.mubr.msk.bf16.gmra.mxu1 %vm2747_vm2, %v12698_v17 }
 0x652   : > { %11626 = vmatprep.mubr.msk.bf16.mxu1 %vm2747_vm2, %v12699_v49 }
 0x659   : > { %11627 = vmatmul.mubr.msk.bf16.gmra.mxu1 %vm2747_vm2, %v12700_v59  ;;  %v5027_v59 = vsel %vm1461_vm1, %v10584_v52, 0 }
 0x65a   : > { %11630 = vmatprep.mubr.msk.bf16.mxu1 %vm2747_vm2, %v12701_v5  ;;  %v10589_v5 = vld [vmem:[%s14545_s8 + $0x10] sm:$0xf] }
 0x661   : > { %11631 = vmatmul.mubr.msk.bf16.gmra.mxu1 %vm2747_vm2, %v12702_v8 }
 0x662   : > { %11634 = vmatprep.mubr.msk.bf16.mxu1 %vm2747_vm2, %v12703_v9 }
 0x669   : > { %11635 = vmatmul.mubr.msk.bf16.gmra.mxu1 %vm2747_vm2, %v12704_v10 }
 0x66a   : > { %11638 = vmatprep.mubr.msk.bf16.mxu1 %vm2747_vm2, %v12705_v11 }
 0x671   : > { %11639 = vmatmul.mubr.msk.bf16.gmra.mxu1 %vm2747_vm2, %v12706_v7 }
 0x672   : > { %11642 = vmatprep.mubr.msk.bf16.mxu1 %vm2747_vm2, %v12707_v12 }
 0x679   : > { %11643 = vmatmul.mubr.msk.bf16.gmra.mxu1 %vm2747_vm2, %v12708_v55 }
 0x67a   : > { %11646 = vmatprep.mubr.msk.bf16.mxu1 %vm2747_vm2, %v12709_v13 }
 0x681   : > { %11647 = vmatmul.mubr.msk.bf16.gmra.mxu1 %vm2747_vm2, %v12710_v14 }
 0x682   : > { %11650 = vmatprep.mubr.msk.bf16.mxu1 %vm2747_vm2, %v12711_v21  ;;  %v5117_v21 = vsel %vm1461_vm1, %v10589_v5, 0 }
 0x689   : > { %11651 = vmatmul.mubr.msk.bf16.gmra.mxu1 %vm2747_vm2, %v12712_v54  ;;  %v10594_v54 = vld [vmem:[%s14545_s8 + $0x14] sm:$0xf] }
 0x68a   : > { %11654 = vmatprep.mubr.msk.bf16.mxu1 %vm2747_vm2, %v12713_v24 }
 0x691   : > { %11655 = vmatmul.mubr.msk.bf16.gmra.mxu1 %vm2747_vm2, %v12714_v50 }
 0x692   : > { %11658 = vmatprep.mubr.msk.bf16.mxu1 %vm2747_vm2, %v12715_v4 }
 0x699   : > { %11659 = vmatmul.mubr.msk.bf16.gmra.mxu1 %vm2747_vm2, %v12716_v25 }
 0x6d1   : > { %v11592_v27 = vpop.f32.mrf.mxu1 }
 0x6d3   : > { %v4436_v22 = vpop.f32.mrf.mxu1 }
 0x6d5   : > { %v11593_v62 = vpop.f32.mrf.mxu1 }
 0x6d6   : > { %v4724_v41 = vpack.c.bf16 %v11593_v62, %v11592_v27 }
 0x6d7   : > { %v4439_v16 = vpop.f32.mrf.mxu1 }
 0x6d8   : > { %v4723_v48 = vpack.c.bf16 %v4439_v16, %v4436_v22 }
 0x6d9   : > { %v11596_v30 = vpop.f32.mrf.mxu1 }
 0x6db   : > { %v4452_v46 = vpop.f32.mrf.mxu1 }
 0x6dd   : > { %v11597_v33 = vpop.f32.mrf.mxu1 }
 0x6de   : > { %v4726_v60 = vpack.c.bf16 %v11597_v33, %v11596_v30 }
 0x6df   : > { %v4455_v34 = vpop.f32.mrf.mxu1 }
 0x6e0   : > { %v4725_v51 = vpack.c.bf16 %v4455_v34, %v4452_v46 }
 0x6e1   : > { %v11600_v28 = vpop.f32.mrf.mxu1 }
 0x6e3   : > { %v4468_v18 = vpop.f32.mrf.mxu1 }
 0x6e5   : > { %v11601_v31 = vpop.f32.mrf.mxu1 }
 0x6e6   : > { %v4728_v43 = vpack.c.bf16 %v11601_v31, %v11600_v28  ;;  %v5207_v28 = vsel %vm1461_vm1, %v10594_v54, 0 }
 0x6e7   : > { %v4471_v36 = vpop.f32.mrf.mxu1 }
 0x6e8   : > { %v4727_v38 = vpack.c.bf16 %v4471_v36, %v4468_v18  ;;  %v10599_v18 = vld [vmem:[%s14545_s8 + $0x18] sm:$0xf] }
 0x6e9   : > { %v11604_v19 = vpop.f32.mrf.mxu1 }
 0x6ea   : > { %11664 = vmatprep.mubr.msk.bf16.mxu0 %vm3216_vm3, %v4727_v38 }
 0x6eb   : > { %v4484_v63 = vpop.f32.mrf.mxu1  ;;  %11665 = vmatmul.mubr.msk.bf16.vlgmr.msra.gmra.mxu0 %vm3216_vm3, %v4728_v43 }
 0x6ec   : > { %11673 = vmatpush3.bf16.msra.mxu0 %v4855_v32 }
 0x6ed   : > { %v11605_v20 = vpop.f32.mrf.mxu1  ;;  %12391 = vmatprep.subr.msk.bf16.mxu0 %vm1461_vm1, %v10579_v44 }
 0x6ee   : > { %v4730_v2 = vpack.c.bf16 %v11605_v20, %v11604_v19 }
 0x6ef   : > { %v4487_v39 = vpop.f32.mrf.mxu1 }
 0x6f0   : > { %v4729_v23 = vpack.c.bf16 %v4487_v39, %v4484_v63 }
 0x6f1   : > { %v11608_v42 = vpop.f32.mrf.mxu1 }
 0x6f2   : > { %11668 = vmatprep.mubr.msk.bf16.mxu0 %vm3216_vm3, %v4729_v23 }
 0x6f3   : > { %11669 = vmatmul.mubr.msk.bf16.gmra.mxu0 %vm3216_vm3, %v4730_v2  ;;  %v4500_v37 = vpop.f32.mrf.mxu1 }
 0x6f4   : > { %11674 = vmatprep.mubr.msk.bf16.mxu0 %vm3216_vm3, %v4723_v48  ;;  %v10604_v48 = vld [vmem:[%s14545_s8 + $0x1c] sm:$0xf] }
 0x6f5   : > { %v11609_v15 = vpop.f32.mrf.mxu1 }
 0x6f6   : > { %v4732_v17 = vpack.c.bf16 %v11609_v15, %v11608_v42  ;;  %v5297_v42 = vsel %vm1461_vm1, %v10599_v18, 0 }
 0x6f7   : > { %v4503_v29 = vpop.f32.mrf.mxu1 }
 0x6f8   : > { %v4731_v58 = vpack.c.bf16 %v4503_v29, %v4500_v37 }
 0x6f9   : > { %v11612_v57 = vpop.f32.mrf.mxu1 }
 0x6fb   : > { %11675 = vmatmul.mubr.msk.bf16.vlgmr.msra.gmra.mxu0 %vm3216_vm3, %v4724_v41  ;;  %v4516_v53 = vpop.f32.mrf.mxu1 }
 0x6fc   : > { %11678 = vmatprep.mubr.msk.bf16.mxu0 %vm3216_vm3, %v4725_v51  ;;  %11683 = vmatpush3.bf16.msra.mxu0 %v4937_v45 }
 0x6fd   : > { %v11613_v35 = vpop.f32.mrf.mxu1  ;;  %12392 = vmatprep.subr.msk.bf16.mxu0 %vm1461_vm1, %v10584_v52 }
 0x6fe   : > { %v4734_v40 = vpack.c.bf16 %v11613_v35, %v11612_v57 }
 0x6ff   : > { %v4519_v47 = vpop.f32.mrf.mxu1 }
 0x700   : > { %v4733_v26 = vpack.c.bf16 %v4519_v47, %v4516_v53 }
 0x701   : > { %v11616_v3 = vpop.f32.mrf.mxu1 }
 0x703   : > { %11679 = vmatmul.mubr.msk.bf16.gmra.mxu0 %vm3216_vm3, %v4726_v60  ;;  %v4532_v56 = vpop.f32.mrf.mxu1  ;;  %v5387_v60 = vsel %vm1461_vm1, %v10604_v48, 0 }
 0x704   : > { %11684 = vmatprep.mubr.msk.bf16.mxu0 %vm3216_vm3, %v4731_v58 }
 0x705   : > { %v11617_v0 = vpop.f32.mrf.mxu1 }
 0x706   : > { %v4736_v13 = vpack.c.bf16 %v11617_v0, %v11616_v3  ;;  %v10609_v3 = vld [vmem:[%s14545_s8 + $0x20] sm:$0xf] }
 0x707   : > { %v4535_v6 = vpop.f32.mrf.mxu1 }
 0x708   : > { %v4735_v11 = vpack.c.bf16 %v4535_v6, %v4532_v56 }
 0x709   : > { %v11620_v49 = vpop.f32.mrf.mxu1 }
 0x70b   : > { %11685 = vmatmul.mubr.msk.bf16.vlgmr.msra.gmra.mxu0 %vm3216_vm3, %v4732_v17  ;;  %v4548_v8 = vpop.f32.mrf.mxu1 }
 0x70c   : > { %11688 = vmatprep.mubr.msk.bf16.mxu0 %vm3216_vm3, %v4733_v26  ;;  %11693 = vmatpush3.bf16.msra.mxu0 %v5027_v59 }
 0x70d   : > { %v11621_v9 = vpop.f32.mrf.mxu1  ;;  %12393 = vmatprep.subr.msk.bf16.mxu0 %vm1461_vm1, %v10589_v5 }
 0x70e   : > { %v4738_v27 = vpack.c.bf16 %v11621_v9, %v11620_v49 }
 0x70f   : > { %v4551_v10 = vpop.f32.mrf.mxu1 }
 0x710   : > { %v4737_v55 = vpack.c.bf16 %v4551_v10, %v4548_v8 }
 0x711   : > { %v11624_v61 = vpop.f32.mrf.mxu1 }
 0x713   : > { %11689 = vmatmul.mubr.msk.bf16.gmra.mxu0 %vm3216_vm3, %v4734_v40  ;;  %v4564_v7 = vpop.f32.mrf.mxu1  ;;  %v5477_v40 = vsel %vm1461_vm1, %v10609_v3, 0 }
 0x714   : > { %11694 = vmatprep.mubr.msk.bf16.mxu0 %vm3216_vm3, %v4735_v11 }
 0x715   : > { %v11625_v12 = vpop.f32.mrf.mxu1 }
 0x716   : > { %v4740_v33 = vpack.c.bf16 %v11625_v12, %v11624_v61 }
 0x717   : > { %v4567_v1 = vpop.f32.mrf.mxu1 }
 0x718   : > { %v4739_v25 = vpack.c.bf16 %v4567_v1, %v4564_v7 }
 0x719   : > { %v11628_v14 = vpop.f32.mrf.mxu1 }
 0x71b   : > { %11695 = vmatmul.mubr.msk.bf16.vlgmr.msra.gmra.mxu0 %vm3216_vm3, %v4736_v13  ;;  %v4580_v24 = vpop.f32.mrf.mxu1 }
 0x71c   : > { %11698 = vmatprep.mubr.msk.bf16.mxu0 %vm3216_vm3, %v4737_v55  ;;  %11703 = vmatpush3.bf16.msra.mxu0 %v5117_v21 }
 0x71d   : > { %v11629_v50 = vpop.f32.mrf.mxu1  ;;  %12394 = vmatprep.subr.msk.bf16.mxu0 %vm1461_vm1, %v10594_v54 }
 0x71e   : > { %v4742_v19 = vpack.c.bf16 %v11629_v50, %v11628_v14 }
 0x71f   : > { %v4583_v4 = vpop.f32.mrf.mxu1 }
 0x720   : > { %v4741_v46 = vpack.c.bf16 %v4583_v4, %v4580_v24 }
 0x721   : > { %v11632_v22 = vpop.f32.mrf.mxu1 }
 0x723   : > { %11699 = vmatmul.mubr.msk.bf16.gmra.mxu0 %vm3216_vm3, %v4738_v27  ;;  %v4596_v62 = vpop.f32.mrf.mxu1 }
 0x724   : > { %11704 = vmatprep.mubr.msk.bf16.mxu0 %vm3216_vm3, %v4739_v25 }
 0x725   : > { %v11633_v16 = vpop.f32.mrf.mxu1 }
 0x726   : > { %v4744_v23 = vpack.c.bf16 %v11633_v16, %v11632_v22 }
 0x727   : > { %v4599_v30 = vpop.f32.mrf.mxu1 }
 0x728   : > { %v4743_v43 = vpack.c.bf16 %v4599_v30, %v4596_v62 }
 0x729   : > { %v11636_v34 = vpop.f32.mrf.mxu1 }
 0x72b   : > { %11705 = vmatmul.mubr.msk.bf16.vlgmr.msra.gmra.mxu0 %vm3216_vm3, %v4740_v33  ;;  %v4612_v31 = vpop.f32.mrf.mxu1 }
 0x72c   : > { %11708 = vmatprep.mubr.msk.bf16.mxu0 %vm3216_vm3, %v4741_v46  ;;  %11713 = vmatpush3.bf16.msra.mxu0 %v5207_v28 }
 0x72d   : > { %v11637_v36 = vpop.f32.mrf.mxu1  ;;  %12395 = vmatprep.subr.msk.bf16.mxu0 %vm1461_vm1, %v10599_v18 }
 0x72e   : > { %v4746_v57 = vpack.c.bf16 %v11637_v36, %v11636_v34 }
 0x72f   : > { %v4615_v38 = vpop.f32.mrf.mxu1 }
 0x730   : > { %v4745_v39 = vpack.c.bf16 %v4615_v38, %v4612_v31  ;;  %v12950_v31 = vmov 0.0  }
 0x731   : > { %v11640_v32 = vpop.f32.mrf.mxu1  ;;  %11752 = vmatprep.subr.bf16.mxu1 %v12950_v31  ;;  %11760 = vmatprep.mubr.msk.bf16.mxu1 %vm12951_vm4, %v12950_v31 }
 0x733   : > { %11709 = vmatmul.mubr.msk.bf16.gmra.mxu0 %vm3216_vm3, %v4742_v19  ;;  %v4628_v44 = vpop.f32.mrf.mxu1 }
 0x734   : > { %11714 = vmatprep.mubr.msk.bf16.mxu0 %vm3216_vm3, %v4743_v43 }
 0x735   : > { %v11641_v63 = vpop.f32.mrf.mxu1 }
 0x736   : > { %v4748_v47 = vpack.c.bf16 %v11641_v63, %v11640_v32 }
 0x737   : > { %v4631_v20 = vpop.f32.mrf.mxu1 }
 0x738   : > { %v4747_v41 = vpack.c.bf16 %v4631_v20, %v4628_v44 }
 0x739   : > { %v11644_v2 = vpop.f32.mrf.mxu1 }
 0x73b   : > { %11715 = vmatmul.mubr.msk.bf16.vlgmr.msra.gmra.mxu0 %vm3216_vm3, %v4744_v23  ;;  %v4644_v37 = vpop.f32.mrf.mxu1 }
 0x73c   : > { %11718 = vmatprep.mubr.msk.bf16.mxu0 %vm3216_vm3, %v4745_v39  ;;  %11723 = vmatpush3.bf16.msra.mxu0 %v5297_v42 }
 0x73d   : > { %v11645_v15 = vpop.f32.mrf.mxu1  ;;  %12396 = vmatprep.subr.msk.bf16.mxu0 %vm1461_vm1, %v10604_v48 }
 0x73e   : > { %v4750_v17 = vpack.c.bf16 %v11645_v15, %v11644_v2 }
 0x73f   : > { %v4647_v29 = vpop.f32.mrf.mxu1 }
 0x740   : > { %v4749_v35 = vpack.c.bf16 %v4647_v29, %v4644_v37 }
 0x741   : > { %v11648_v45 = vpop.f32.mrf.mxu1 }
 0x743   : > { %11719 = vmatmul.mubr.msk.bf16.gmra.mxu0 %vm3216_vm3, %v4746_v57  ;;  %v4660_v51 = vpop.f32.mrf.mxu1 }
 0x744   : > { %11724 = vmatprep.mubr.msk.bf16.mxu0 %vm3216_vm3, %v4747_v41 }
 0x745   : > { %v11649_v52 = vpop.f32.mrf.mxu1 }
 0x746   : > { %v4752_v10 = vpack.c.bf16 %v11649_v52, %v11648_v45 }
 0x747   : > { %v4663_v53 = vpop.f32.mrf.mxu1 }
 0x748   : > { %v4751_v26 = vpack.c.bf16 %v4663_v53, %v4660_v51 }
 0x749   : > { %v11652_v58 = vpop.f32.mrf.mxu1 }
 0x74b   : > { %11725 = vmatmul.mubr.msk.bf16.vlgmr.msra.gmra.mxu0 %vm3216_vm3, %v4748_v47  ;;  %v4676_v56 = vpop.f32.mrf.mxu1 }
 0x74c   : > { %11728 = vmatprep.mubr.msk.bf16.mxu0 %vm3216_vm3, %v4749_v35  ;;  %11733 = vmatpush3.bf16.msra.mxu0 %v5387_v60 }
 0x74d   : > { %v11653_v0 = vpop.f32.mrf.mxu1  ;;  %12397 = vmatprep.subr.msk.bf16.mxu0 %vm1461_vm1, %v10609_v3 }
 0x74e   : > { %v4754_v12 = vpack.c.bf16 %v11653_v0, %v11652_v58 }
 0x74f   : > { %v4679_v6 = vpop.f32.mrf.mxu1 }
 0x750   : > { %v4753_v9 = vpack.c.bf16 %v4679_v6, %v4676_v56 }
 0x751   : > { %v11656_v49 = vpop.f32.mrf.mxu1 }
 0x753   : > { %11729 = vmatmul.mubr.msk.bf16.gmra.mxu0 %vm3216_vm3, %v4750_v17  ;;  %v4692_v59 = vpop.f32.mrf.mxu1 }
 0x754   : > { %11734 = vmatprep.mubr.msk.bf16.mxu0 %vm3216_vm3, %v4751_v26 }
 0x755   : > { %v11657_v5 = vpop.f32.mrf.mxu1 }
 0x756   : > { %v4756_v14 = vpack.c.bf16 %v11657_v5, %v11656_v49 }
 0x757   : > { %v4695_v8 = vpop.f32.mrf.mxu1 }
 0x758   : > { %v4755_v7 = vpack.c.bf16 %v4695_v8, %v4692_v59 }
 0x759   : > { %v11660_v11 = vpop.f32.mrf.mxu1 }
 0x75b   : > { %11735 = vmatmul.mubr.msk.bf16.vlgmr.msra.gmra.mxu0 %vm3216_vm3, %v4752_v10  ;;  %v4708_v61 = vpop.f32.mrf.mxu1 }
 0x75c   : > { %11738 = vmatprep.mubr.msk.bf16.mxu0 %vm3216_vm3, %v4753_v9  ;;  %11743 = vmatpush3.bf16.msra.mxu0 %v5477_v40 }
 0x75d   : > { %v11661_v1 = vpop.f32.mrf.mxu1  ;;  %11796 = vmatprep.subr.bf16.mxu0 %v12950_v31 }
 0x75e   : > { %v4758_v21 = vpack.c.bf16 %v11661_v1, %v11660_v11 }
 0x75f   : > { %v4711_v55 = vpop.f32.mrf.mxu1 }
 0x760   : > { %v4757_v13 = vpack.c.bf16 %v4711_v55, %v4708_v61 }
 0x763   : > { %11739 = vmatmul.mubr.msk.bf16.gmra.mxu0 %vm3216_vm3, %v4754_v12 }
 0x764   : > { %11744 = vmatprep.mubr.msk.bf16.mxu0 %vm3216_vm3, %v4755_v7 }
 0x76b   : > { %11745 = vmatmul.mubr.msk.bf16.vlgmr.msra.gmra.mxu0 %vm3216_vm3, %v4756_v14 }
 0x76c   : > { %11748 = vmatprep.mubr.msk.bf16.mxu0 %vm3216_vm3, %v4757_v13 }
 0x773   : > { %11749 = vmatmul.mubr.msk.bf16.gmra.mxu0 %vm3216_vm3, %v4758_v21 }
 0x774   : > { %11798 = vmatprep.mubr.msk.bf16.mxu0 %vm12951_vm4, %v12950_v31 }
 0x7ab   : > { %v11666_v54 = vpop.f32.mrf.mxu0 }
 0x7ad   : > { %v4811_v24 = vpop.f32.mrf.mxu0 }
 0x7af   : > { %v11667_v50 = vpop.f32.mrf.mxu0 }
 0x7b1   : > { %v13808_v4 = vpop.f32.mrf.mxu0 }
 0x7b3   : > { %v11670_v25 = vpop.f32.mrf.mxu0 }
 0x7b5   : > { %v4827_v27 = vpop.f32.mrf.mxu0 }
 0x7b7   : > { %v11671_v22 = vpop.f32.mrf.mxu0 }
 0x7b9   : > { %v13810_v62 = vpop.f32.mrf.mxu0 }
 0x7bb   : > { %v11676_v16 = vpop.f32.mrf.mxu0 }
 0x7bc   : > { %v4900_v30 = vadd.f32 %v11676_v16, %v11666_v54 }
 0x7bd   : > { %v4891_v46 = vpop.f32.mrf.mxu0 }
 0x7be   : > { %v4892_v33 = vadd.f32 %v4891_v46, %v4811_v24 }
 0x7bf   : > { %v11677_v34 = vpop.f32.mrf.mxu0 }
 0x7c0   : > { %v4903_v28 = vadd.f32 %v11677_v34, %v11667_v50 }
 0x7c1   : > { %v13812_v18 = vpop.f32.mrf.mxu0 }
 0x7c3   : > { %v11680_v36 = vpop.f32.mrf.mxu0 }
 0x7c4   : > { %v4916_v38 = vadd.f32 %v11680_v36, %v11670_v25 }
 0x7c5   : > { %v4907_v43 = vpop.f32.mrf.mxu0 }
 0x7c6   : > { %v4908_v19 = vadd.f32 %v4907_v43, %v4827_v27 }
 0x7c7   : > { %v11681_v32 = vpop.f32.mrf.mxu0 }
 0x7c8   : > { %v4919_v44 = vadd.f32 %v11681_v32, %v11671_v22 }
 0x7c9   : > { %v13816_v63 = vpop.f32.mrf.mxu0 }
 0x7cb   : > { %v11686_v20 = vpop.f32.mrf.mxu0 }
 0x7cc   : > { %v5006_v39 = vadd.f32 %v11686_v20, %v4900_v30 }
 0x7cd   : > { %v4973_v23 = vpop.f32.mrf.mxu0 }
 0x7ce   : > { %v5004_v2 = vadd.f32 %v4973_v23, %v4892_v33  ;;  %v4895_v23 = vadd.f32 %v13812_v18, %v13808_v4 }
 0x7cf   : > { %v11687_v42 = vpop.f32.mrf.mxu0 }
 0x7d0   : > { %v5007_v48 = vadd.f32 %v11687_v42, %v4903_v28 }
 0x7d1   : > { %v4976_v37 = vpop.f32.mrf.mxu0 }
 0x7d2   : > { %v5005_v42 = vadd.f32 %v4976_v37, %v4895_v23 }
 0x7d3   : > { %v11690_v15 = vpop.f32.mrf.mxu0 }
 0x7d4   : > { %v5010_v29 = vadd.f32 %v11690_v15, %v4916_v38 }
 0x7d5   : > { %v4989_v41 = vpop.f32.mrf.mxu0 }
 0x7d6   : > { %v5008_v57 = vadd.f32 %v4989_v41, %v4908_v19 }
 0x7d7   : > { %v11691_v45 = vpop.f32.mrf.mxu0 }
 0x7d8   : > { %v5011_v51 = vadd.f32 %v11691_v45, %v4919_v44 }
 0x7d9   : > { %v13822_v52 = vpop.f32.mrf.mxu0 }
 0x7db   : > { %v11696_v53 = vpop.f32.mrf.mxu0 }
 0x7dc   : > { %v5096_v35 = vadd.f32 %v11696_v53, %v5006_v39 }
 0x7dd   : > { %v5063_v47 = vpop.f32.mrf.mxu0 }
 0x7de   : > { %v5094_v58 = vadd.f32 %v5063_v47, %v5004_v2  ;;  %v4911_v47 = vadd.f32 %v13816_v63, %v13810_v62 }
 0x7df   : > { %v11697_v60 = vpop.f32.mrf.mxu0 }
 0x7e0   : > { %v5097_v3 = vadd.f32 %v11697_v60, %v5007_v48 }
 0x7e1   : > { %v5066_v56 = vpop.f32.mrf.mxu0 }
 0x7e3   : > { %v11700_v0 = vpop.f32.mrf.mxu0 }
 0x7e4   : > { %v5100_v6 = vadd.f32 %v11700_v0, %v5010_v29  ;;  %v5095_v29 = vadd.f32 %v5066_v56, %v5005_v42 }
 0x7e5   : > { %v5079_v26 = vpop.f32.mrf.mxu0 }
 0x7e6   : > { %v5098_v17 = vadd.f32 %v5079_v26, %v5008_v57  ;;  %v5009_v26 = vadd.f32 %v13822_v52, %v4911_v47  ;;  %v14569_v47 = vld [vmem:[#allocation36_spill] sm:$0xff] }
 0x7e7   : > { %v11701_v49 = vpop.f32.mrf.mxu0 }
 0x7e8   : > { %v13824_v59 = vadd.f32 %v11701_v49, %v5011_v51 }
 0x7e9   : > { %v13826_v5 = vpop.f32.mrf.mxu0 }
 0x7ea   : > { %v5099_v63 = vadd.f32 %v13826_v5, %v5009_v26 }
 0x7eb   : > { %v11706_v8 = vpop.f32.mrf.mxu0 }
 0x7ec   : > { %v5186_v9 = vadd.f32 %v11706_v8, %v5096_v35  ;;  %v14566_v8 = vld [vmem:[#allocation35_spill] sm:$0xff] }
 0x7ed   : > { %v5153_v10 = vpop.f32.mrf.mxu0 }
 0x7ee   : > { %v5184_v11 = vadd.f32 %v5153_v10, %v5094_v58 }
 0x7ef   : > { %v11707_v40 = vpop.f32.mrf.mxu0 }
 0x7f0   : > { %v5187_v61 = vadd.f32 %v11707_v40, %v5097_v3  ;;  %v13833_v3 = vld [vmem:[%s14565_s14] ss:$0 sm:$0xff] }
 0x7f1   : > { %v5156_v7 = vpop.f32.mrf.mxu0 }
 0x7f2   : > { %v5185_v45 = vadd.f32 %v5156_v7, %v5095_v29 }
 0x7f3   : > { %v11710_v12 = vpop.f32.mrf.mxu0 }
 0x7f4   : > { %v5190_v58 = vadd.f32 %v11710_v12, %v5100_v6  ;;  %v14567_v12 = vld [vmem:[#allocation34_spill] sm:$0xff] }
 0x7f5   : > { %v5169_v1 = vpop.f32.mrf.mxu0 }
 0x7f6   : > { %v5188_v56 = vadd.f32 %v5169_v1, %v5098_v17 }
 0x7f7   : > { %v11711_v55 = vpop.f32.mrf.mxu0 }
 0x7f8   : > { %v5191_v1 = vadd.f32 %v11711_v55, %v13824_v59 }
 0x7f9   : > { %v5172_v13 = vpop.f32.mrf.mxu0 }
 0x7fb   : > { %v11716_v14 = vpop.f32.mrf.mxu0 }
 0x7fc   : > { %v5276_v48 = vadd.f32 %v11716_v14, %v5186_v9  ;;  %v4036_v9 = vunpack.c.l.bf16 %v14566_v8  ;;  %v4034_v14 = vunpack.c.l.bf16 %v14567_v12 }
 0x7fd   : > { %v5243_v21 = vpop.f32.mrf.mxu0 }
 0x7fe   : > { %v5274_v54 = vadd.f32 %v5243_v21, %v5184_v11 }
 0x7ff   : > { %v11717_v24 = vpop.f32.mrf.mxu0 }
 0x800   : > { %v5277_v51 = vadd.f32 %v11717_v24, %v5187_v61 }
 0x801   : > { %v5246_v50 = vpop.f32.mrf.mxu0 }
 0x802   : > { %v5275_v0 = vadd.f32 %v5246_v50, %v5185_v45  ;;  %v5189_v50 = vadd.f32 %v5172_v13, %v5099_v63 }
 0x803   : > { %v11720_v25 = vpop.f32.mrf.mxu0 }
 0x804   : > { %v5280_v49 = vadd.f32 %v11720_v25, %v5190_v58 }
 0x805   : > { %v5259_v27 = vpop.f32.mrf.mxu0 }
 0x806   : > { %v5278_v6 = vadd.f32 %v5259_v27, %v5188_v56 }
 0x807   : > { %v11721_v22 = vpop.f32.mrf.mxu0 }
 0x809   : > { %v5262_v16 = vpop.f32.mrf.mxu0 }
 0x80b   : > { %v11726_v30 = vpop.f32.mrf.mxu0 }
 0x80c   : > { %v5366_v41 = vadd.f32 %v11726_v30, %v5276_v48  ;;  %v4037_v30 = vunpack.c.h.bf16 %v14566_v8  ;;  %v14568_v48 = vld [vmem:[#allocation37_spill] sm:$0xff] }
 0x80d   : > { %v5333_v46 = vpop.f32.mrf.mxu0  ;;  %v4040_v29 = vunpack.c.l.bf16 %v14568_v48 }
 0x80e   : > { %v5364_v53 = vadd.f32 %v5333_v46, %v5274_v54 }
 0x80f   : > { %v11727_v33 = vpop.f32.mrf.mxu0 }
 0x810   : > { %v5367_v4 = vadd.f32 %v11727_v33, %v5277_v51 }
 0x811   : > { %v5336_v34 = vpop.f32.mrf.mxu0 }
 0x812   : > { %v5365_v11 = vadd.f32 %v5336_v34, %v5275_v0 }
 0x813   : > { %v11730_v28 = vpop.f32.mrf.mxu0 }
 0x814   : > { %v5370_v7 = vadd.f32 %v11730_v28, %v5280_v49  ;;  %v5281_v28 = vadd.f32 %v11721_v22, %v5191_v1  ;;  %v4041_v49 = vunpack.c.h.bf16 %v14568_v48  ;;  %v10633_v1 = vld [vmem:[%s13016_s24 + $0x4] sm:$0xf] }
 0x815   : > { %v5349_v36 = vpop.f32.mrf.mxu0 }
 0x816   : > { %v5368_v25 = vadd.f32 %v5349_v36, %v5278_v6 }
 0x817   : > { %v11731_v38 = vpop.f32.mrf.mxu0 }
 0x818   : > { %v5371_v55 = vadd.f32 %v11731_v38, %v5281_v28 }
 0x819   : > { %v5352_v43 = vpop.f32.mrf.mxu0 }
 0x81b   : > { %v11736_v19 = vpop.f32.mrf.mxu0 }
 0x81c   : > { %v5456_v35 = vadd.f32 %v11736_v19, %v5366_v41  ;;  %v5279_v19 = vadd.f32 %v5262_v16, %v5189_v50  ;;  %v5798_v50 = vsel %vm1461_vm1, %v10633_v1, 0  ;;  %v12726_v1 = vld [vmem:[%s14570_s6] sm:$0xff]  }
 0x81d   : > { %v5423_v32 = vpop.f32.mrf.mxu0  ;;  %11797 = vmatpush3.bf16.msra.mxu0 %v5798_v50 }
 0x81e   : > { %v5454_v18 = vadd.f32 %v5423_v32, %v5364_v53  ;;  %v4035_v32 = vunpack.c.h.bf16 %v14567_v12  ;;  %v5369_v13 = vadd.f32 %v5352_v43, %v5279_v19  ;;  %v12719_v12 = vld [vmem:[%s13011_s19 + $0x10] sm:$0xff]   ;;  %11802 = vmatprep.subr.bf16.mxu0 %v12950_v31 }
 0x81f   : > { %v11737_v44 = vpop.f32.mrf.mxu0 }
 0x820   : > { %v5457_v40 = vadd.f32 %v11737_v44, %v5367_v4 }
 0x821   : > { %v5426_v20 = vpop.f32.mrf.mxu0 }
 0x822   : > { %v5455_v54 = vadd.f32 %v5426_v20, %v5365_v11 }
 0x823   : > { %v11740_v39 = vpop.f32.mrf.mxu0 }
 0x824   : > { %v5460_v33 = vadd.f32 %v11740_v39, %v5370_v7  ;;  %v12718_v7 = vld [vmem:[%s13011_s19 + $0x8] sm:$0xff]  }
 0x825   : > { %v5439_v2 = vpop.f32.mrf.mxu0 }
 0x826   : > { %v5458_v20 = vadd.f32 %v5439_v2, %v5368_v25  ;;  %v4038_v2 = vunpack.c.l.bf16 %v14569_v47 }
 0x827   : > { %v11741_v15 = vpop.f32.mrf.mxu0 }
 0x828   : > { %v5461_v16 = vadd.f32 %v11741_v15, %v5371_v55  ;;  %v4039_v15 = vunpack.c.h.bf16 %v14569_v47 }
 0x829   : > { %v5442_v57 = vpop.f32.mrf.mxu0 }
 0x82a   : > { %v5459_v53 = vadd.f32 %v5442_v57, %v5369_v13 }
 0x82b   : > { %v11746_v60 = vpop.f32.mrf.mxu0 }
 0x82c   : > { %v5546_v37 = vadd.f32 %v11746_v60, %v5456_v35 }
 0x82d   : > { %v5513_v10 = vpop.f32.mrf.mxu0 }
 0x82e   : > { %v5561_v61 = vadd.f32 %v13833_v3, %v5546_v37  ;;  %v5544_v62 = vadd.f32 %v5513_v10, %v5454_v18 }
 0x82f   : > { %v11747_v21 = vpop.f32.mrf.mxu0 }
 0x830   : > { %v5569_v24 = vadd.f32 %v5561_v61, %v4036_v9  ;;  %v5559_v52 = vadd.f32 %v13833_v3, %v5544_v62  ;;  %v5547_v17 = vadd.f32 %v11747_v21, %v5457_v40  ;;  %v12721_v21 = vld [vmem:[%s13011_s19 + $0x20] sm:$0xff]  }
 0x831   : > { %v5516_v46 = vpop.f32.mrf.mxu0 }
 0x832   : > { %v5567_v34 = vadd.f32 %v5559_v52, %v4034_v14  ;;  %v5562_v5 = vadd.f32 %v13833_v3, %v5547_v17  ;;  %v5545_v27 = vadd.f32 %v5516_v46, %v5455_v54  ;;  %v5577_v36 = vmax.f32 %v5569_v24, 0.0  ;;  %v12720_v14 = vld [vmem:[%s13011_s19 + $0x18] sm:$0xff]   ;;  %v12722_v54 = vld [vmem:[%s13011_s19 + $0x28] sm:$0xff]   ;;  %v12723_v24 = vld [vmem:[%s13011_s19 + $0x30] sm:$0xff]  }
 0x833   : > { %v11750_v44 = vpop.f32.mrf.mxu0  ;;  %v12724_v52 = vld [vmem:[%s13011_s19 + $0x38] sm:$0xff]   ;;  %v12725_v17 = vld [vmem:[%s13011_s19 + $0x40] sm:$0xff]  }
 0x834   : > { %v5570_v23 = vadd.f32 %v5562_v5, %v4037_v30  ;;  %v5560_v42 = vadd.f32 %v13833_v3, %v5545_v27  ;;  %v5550_v59 = vadd.f32 %v11750_v44, %v5460_v33  ;;  %v5575_v35 = vmax.f32 %v5567_v34, 0.0  ;;  %v5791_v27 = vld [vmem:[%s13016_s24] sm:$0xf] }
 0x835   : > { %v5529_v39 = vpop.f32.mrf.mxu0 }
 0x836   : > { %v5578_v41 = vmax.f32 %v5570_v23, 0.0  ;;  %v5568_v45 = vadd.f32 %v5560_v42, %v4035_v32  ;;  %v5565_v51 = vadd.f32 %v13833_v3, %v5550_v59  ;;  %v5548_v22 = vadd.f32 %v5529_v39, %v5458_v20  ;;  %v10636_v42 = vld [vmem:[%s13016_s24 + $0x8] sm:$0xf]  ;;  %v10638_v39 = vld [vmem:[%s13016_s24 + $0xc] sm:$0xf] }
 0x837   : > { %v11751_v58 = vpop.f32.mrf.mxu0  ;;  %v5845_v32 = vsel %vm1461_vm1, %v5791_v27, 0  ;;  %v5894_v13 = vsel %vm1461_vm1, %v10636_v42, 0 }
 0x838   : > { %v5584_v60 = vpack.c.bf16 %v5578_v41, %v5577_v36  ;;  %v5576_v0 = vmax.f32 %v5568_v45, 0.0  ;;  %v5573_v4 = vadd.f32 %v5565_v51, %v4040_v29  ;;  %v5563_v38 = vadd.f32 %v13833_v3, %v5548_v22 }
 0x839   : > { %v5551_v43 = vadd.f32 %v11751_v58, %v5461_v16  ;;  %v5532_v18 = vpop.f32.mrf.mxu0  ;;  %v5945_v51 = vsel %vm1461_vm1, %v10638_v39, 0 }
 0x83a   : > { %v5571_v37 = vadd.f32 %v5563_v38, %v4038_v2  ;;  %v5549_v26 = vadd.f32 %v5532_v18, %v5459_v53  ;;  %v5583_v56 = vpack.c.bf16 %v5576_v0, %v5575_v35  ;;  %v5581_v11 = vmax.f32 %v5573_v4, 0.0  ;;  %v10640_v35 = vld [vmem:[%s13016_s24 + $0x10] sm:$0xf]  ;;  %v10642_v38 = vld [vmem:[%s13016_s24 + $0x14] sm:$0xf] }
 0x83b   : > { %v5566_v8 = vadd.f32 %v13833_v3, %v5551_v43  ;;  %v5996_v58 = vsel %vm1461_vm1, %v10640_v35, 0 }
 0x83c   : > { %v5564_v57 = vadd.f32 %v13833_v3, %v5549_v26  ;;  %v5579_v61 = vmax.f32 %v5571_v37, 0.0  ;;  %v12717_v3 = vld [vmem:[%s13011_s19] sm:$0xff]   ;;  %v6047_v37 = vsel %vm1461_vm1, %v10642_v38, 0 }
 0x83d   : > { %v5574_v9 = vadd.f32 %v5566_v8, %v4041_v49  ;;  %v10644_v8 = vld [vmem:[%s13016_s24 + $0x18] sm:$0xf] }
 0x83e   : > { %v5572_v10 = vadd.f32 %v5564_v57, %v4039_v15 }
 0x83f   : > { %v5582_v40 = vmax.f32 %v5574_v9, 0.0  ;;  %v6098_v9 = vsel %vm1461_vm1, %v10644_v8, 0 }
 0x840   : > { %v5580_v62 = vmax.f32 %v5572_v10, 0.0 }
 0x841   : > { %v5586_v63 = vpack.c.bf16 %v5582_v40, %v5581_v11 }
 0x842   : > { %v5585_v6 = vpack.c.bf16 %v5580_v62, %v5579_v61  ;;  %v10646_v61 = vld [vmem:[%s13016_s24 + $0x1c] sm:$0xf] }
 0x843   : > { %11753 = vmatpush3.bf16.msra.mxu1 %v5586_v63 }
 0x844   : > { %11754 = vmatprep.subr.bf16.mxu1 %v12950_v31 }
 0x847   : > { %11755 = vmatpush3.bf16.msra.mxu1 %v5585_v6 }
 0x848   : > { %11756 = vmatprep.subr.bf16.mxu1 %v12950_v31 }
 0x84b   : > { %11757 = vmatpush3.bf16.msra.mxu1 %v5584_v60 }
 0x84c   : > { %11758 = vmatprep.subr.bf16.mxu1 %v12950_v31 }
 0x84f   : > { %11759 = vmatpush3.bf16.msra.mxu1 %v5583_v56 }
 0x850   : > { %11850 = vmatprep.subr.bf16.mxu1 %v12950_v31 }
 0x852   : > { %11761 = vmatmul.mubr.msk.bf16.vlgmr.msra.gmra.mxu1 %vm2747_vm2, %v12717_v3 }
 0x853   : > { %11851 = vmatpush3.bf16.msra.mxu1 %v5586_v63  ;;  %11764 = vmatprep.mubr.msk.bf16.mxu1 %vm12951_vm4, %v12950_v31 }
 0x854   : > { %11852 = vmatprep.subr.bf16.mxu1 %v12950_v31 }
 0x857   : > { %11853 = vmatpush3.bf16.msra.mxu1 %v5585_v6  ;;  %v6149_v6 = vsel %vm1461_vm1, %v10646_v61, 0 }
 0x858   : > { %11854 = vmatprep.subr.bf16.mxu1 %v12950_v31 }
 0x85a   : > { %11765 = vmatmul.mubr.msk.bf16.gmra.mxu1 %vm2747_vm2, %v12718_v7 }
 0x85b   : > { %11855 = vmatpush3.bf16.msra.mxu1 %v5584_v60  ;;  %11768 = vmatprep.mubr.msk.bf16.mxu1 %vm12951_vm4, %v12950_v31 }
 0x85c   : > { %11856 = vmatprep.subr.bf16.mxu1 %v12950_v31 }
 0x85f   : > { %11857 = vmatpush3.bf16.msra.mxu1 %v5583_v56 }
 0x860   : > { %11868 = vmatprep.subr.bf16.mxu1 %v12950_v31 }
 0x862   : > { %11769 = vmatmul.mubr.msk.bf16.gmra.mxu1 %vm2747_vm2, %v12719_v12 }
 0x863   : > { %11772 = vmatprep.mubr.msk.bf16.mxu1 %vm12951_vm4, %v12950_v31 }
 0x86a   : > { %11773 = vmatmul.mubr.msk.bf16.gmra.mxu1 %vm2747_vm2, %v12720_v14  ;;  %v10648_v14 = vld [vmem:[%s13016_s24 + $0x20] sm:$0xf] }
 0x86b   : > { %11776 = vmatprep.mubr.msk.bf16.mxu1 %vm12951_vm4, %v12950_v31 }
 0x872   : > { %11777 = vmatmul.mubr.msk.bf16.gmra.mxu1 %vm2747_vm2, %v12721_v21 }
 0x873   : > { %11780 = vmatprep.mubr.msk.bf16.mxu1 %vm12951_vm4, %v12950_v31 }
 0x87a   : > { %11781 = vmatmul.mubr.msk.bf16.gmra.mxu1 %vm2747_vm2, %v12722_v54 }
 0x87b   : > { %11784 = vmatprep.mubr.msk.bf16.mxu1 %vm12951_vm4, %v12950_v31 }
 0x882   : > { %11785 = vmatmul.mubr.msk.bf16.gmra.mxu1 %vm2747_vm2, %v12723_v24  ;;  %v6200_v24 = vsel %vm1461_vm1, %v10648_v14, 0 }
 0x883   : > { %11788 = vmatprep.mubr.msk.bf16.mxu1 %vm12951_vm4, %v12950_v31 }
 0x88a   : > { %11789 = vmatmul.mubr.msk.bf16.gmra.mxu1 %vm2747_vm2, %v12724_v52 }
 0x88b   : > { %11792 = vmatprep.mubr.msk.bf16.mxu1 %vm12951_vm4, %v12950_v31 }
 0x892   : > { %11793 = vmatmul.mubr.msk.bf16.gmra.mxu1 %vm2747_vm2, %v12725_v17 }
 0x893   : > { %11858 = vmatprep.mubr.msk.bf16.mxu1 %vm12951_vm4, %v12950_v31 }
 0x89a   : > { %11859 = vmatmul.mubr.msk.bf16.vlgmr.msra.gmra.mxu1 %vm2747_vm2, %v12726_v1  ;;  %v12731_v1 = vld [vmem:[%s14571_s1 + $0x20] sm:$0xff]  }
 0x89b   : > { %11870 = vmatprep.mubr.msk.bf16.mxu1 %vm12951_vm4, %v12950_v31 }
 0x912   : > { %v5711_v25 = vpop.f32.mrf.mxu1 }
 0x914   : > { %v11762_v30 = vpop.f32.mrf.mxu1 }
 0x916   : > { %v5714_v46 = vpop.f32.mrf.mxu1 }
 0x917   : > { %v5782_v55 = vpack.c.bf16 %v5714_v46, %v5711_v25 }
 0x918   : > { %v11763_v33 = vpop.f32.mrf.mxu1 }
 0x91a   : > { %v5719_v34 = vpop.f32.mrf.mxu1 }
 0x91c   : > { %v11766_v5 = vpop.f32.mrf.mxu1 }
 0x91e   : > { %v5722_v28 = vpop.f32.mrf.mxu1 }
 0x91f   : > { %v5783_v19 = vpack.c.bf16 %v5722_v28, %v5719_v34 }
 0x920   : > { %v11767_v44 = vpop.f32.mrf.mxu1 }
 0x921   : > { %11799 = vmatmul.mubr.msk.bf16.vlgmr.msra.gmra.mxu0 %vm3216_vm3, %v5783_v19 }
 0x922   : > { %11803 = vmatpush3.bf16.msra.mxu0 %v5845_v32  ;;  %11804 = vmatprep.mubr.msk.bf16.mxu0 %vm12951_vm4, %v12950_v31  ;;  %v5727_v20 = vpop.f32.mrf.mxu1 }
 0x923   : > { %11808 = vmatprep.subr.bf16.mxu0 %v12950_v31 }
 0x924   : > { %v11770_v23 = vpop.f32.mrf.mxu1 }
 0x926   : > { %v5730_v59 = vpop.f32.mrf.mxu1 }
 0x927   : > { %v5784_v45 = vpack.c.bf16 %v5730_v59, %v5727_v20 }
 0x928   : > { %v11771_v36 = vpop.f32.mrf.mxu1 }
 0x929   : > { %11805 = vmatmul.mubr.msk.bf16.vlgmr.msra.gmra.mxu0 %vm3216_vm3, %v5782_v55 }
 0x92a   : > { %11809 = vmatpush3.bf16.msra.mxu0 %v5894_v13  ;;  %11810 = vmatprep.mubr.msk.bf16.mxu0 %vm12951_vm4, %v12950_v31  ;;  %v5735_v48 = vpop.f32.mrf.mxu1 }
 0x92b   : > { %11814 = vmatprep.subr.bf16.mxu0 %v12950_v31 }
 0x92c   : > { %v11774_v29 = vpop.f32.mrf.mxu1 }
 0x92e   : > { %v5738_v41 = vpop.f32.mrf.mxu1 }
 0x92f   : > { %v5785_v2 = vpack.c.bf16 %v5738_v41, %v5735_v48 }
 0x930   : > { %v11775_v22 = vpop.f32.mrf.mxu1 }
 0x931   : > { %11811 = vmatmul.mubr.msk.bf16.vlgmr.msra.gmra.mxu0 %vm3216_vm3, %v5784_v45 }
 0x932   : > { %11815 = vmatpush3.bf16.msra.mxu0 %v5945_v51  ;;  %11816 = vmatprep.mubr.msk.bf16.mxu0 %vm12951_vm4, %v12950_v31  ;;  %v5743_v16 = vpop.f32.mrf.mxu1 }
 0x933   : > { %11820 = vmatprep.subr.bf16.mxu0 %v12950_v31 }
 0x934   : > { %v11778_v53 = vpop.f32.mrf.mxu1 }
 0x936   : > { %v5746_v47 = vpop.f32.mrf.mxu1 }
 0x937   : > { %v5786_v18 = vpack.c.bf16 %v5746_v47, %v5743_v16 }
 0x938   : > { %v11779_v60 = vpop.f32.mrf.mxu1 }
 0x939   : > { %11817 = vmatmul.mubr.msk.bf16.vlgmr.msra.gmra.mxu0 %vm3216_vm3, %v5785_v2 }
 0x93a   : > { %11821 = vmatpush3.bf16.msra.mxu0 %v5996_v58  ;;  %11822 = vmatprep.mubr.msk.bf16.mxu0 %vm12951_vm4, %v12950_v31  ;;  %v5751_v0 = vpop.f32.mrf.mxu1 }
 0x93b   : > { %11826 = vmatprep.subr.bf16.mxu0 %v12950_v31 }
 0x93c   : > { %v11782_v4 = vpop.f32.mrf.mxu1 }
 0x93e   : > { %v5754_v43 = vpop.f32.mrf.mxu1 }
 0x93f   : > { %v5787_v57 = vpack.c.bf16 %v5754_v43, %v5751_v0 }
 0x940   : > { %v11783_v26 = vpop.f32.mrf.mxu1 }
 0x941   : > { %11823 = vmatmul.mubr.msk.bf16.vlgmr.msra.gmra.mxu0 %vm3216_vm3, %v5786_v18 }
 0x942   : > { %11827 = vmatpush3.bf16.msra.mxu0 %v6047_v37  ;;  %11828 = vmatprep.mubr.msk.bf16.mxu0 %vm12951_vm4, %v12950_v31  ;;  %v5759_v56 = vpop.f32.mrf.mxu1 }
 0x943   : > { %11832 = vmatprep.subr.bf16.mxu0 %v12950_v31 }
 0x944   : > { %v11786_v49 = vpop.f32.mrf.mxu1 }
 0x946   : > { %v5762_v15 = vpop.f32.mrf.mxu1 }
 0x947   : > { %v5788_v63 = vpack.c.bf16 %v5762_v15, %v5759_v56 }
 0x948   : > { %v11787_v10 = vpop.f32.mrf.mxu1 }
 0x949   : > { %11829 = vmatmul.mubr.msk.bf16.vlgmr.msra.gmra.mxu0 %vm3216_vm3, %v5787_v57 }
 0x94a   : > { %11833 = vmatpush3.bf16.msra.mxu0 %v6098_v9  ;;  %11834 = vmatprep.mubr.msk.bf16.mxu0 %vm12951_vm4, %v12950_v31  ;;  %v5767_v11 = vpop.f32.mrf.mxu1 }
 0x94b   : > { %11838 = vmatprep.subr.bf16.mxu0 %v12950_v31 }
 0x94c   : > { %v11790_v40 = vpop.f32.mrf.mxu1 }
 0x94e   : > { %v5770_v62 = vpop.f32.mrf.mxu1 }
 0x94f   : > { %v5789_v54 = vpack.c.bf16 %v5770_v62, %v5767_v11  ;;  %v10650_v11 = vld [vmem:[%s13021_s30] ss:$0 sm:$0xff] }
 0x950   : > { %v11791_v3 = vpop.f32.mrf.mxu1 }
 0x951   : > { %11835 = vmatmul.mubr.msk.bf16.vlgmr.msra.gmra.mxu0 %vm3216_vm3, %v5788_v63 }
 0x952   : > { %11839 = vmatpush3.bf16.msra.mxu0 %v6149_v6  ;;  %11840 = vmatprep.mubr.msk.bf16.mxu0 %vm12951_vm4, %v12950_v31  ;;  %v5775_v7 = vpop.f32.mrf.mxu1 }
 0x953   : > { %11844 = vmatprep.subr.bf16.mxu0 %v12950_v31 }
 0x954   : > { %v11794_v12 = vpop.f32.mrf.mxu1 }
 0x956   : > { %v5778_v21 = vpop.f32.mrf.mxu1 }
 0x957   : > { %v5790_v17 = vpack.c.bf16 %v5778_v21, %v5775_v7 }
 0x958   : > { %v11795_v52 = vpop.f32.mrf.mxu1 }
 0x959   : > { %11841 = vmatmul.mubr.msk.bf16.vlgmr.msra.gmra.mxu0 %vm3216_vm3, %v5789_v54  ;;  %v12727_v54 = vld [vmem:[%s14571_s1] sm:$0xff]   ;;  %v12729_v52 = vld [vmem:[%s14571_s1 + $0x10] sm:$0xff]  }
 0x95a   : > { %11845 = vmatpush3.bf16.msra.mxu0 %v6200_v24  ;;  %11846 = vmatprep.mubr.msk.bf16.mxu0 %vm12951_vm4, %v12950_v31  ;;  %v12728_v24 = vld [vmem:[%s14571_s1 + $0x8] sm:$0xff]  }
 0x95b   : > { %11862 = vmatprep.subr.bf16.mxu0 %v12950_v31 }
 0x961   : > { %11847 = vmatmul.mubr.msk.bf16.vlgmr.msra.gmra.mxu0 %vm3216_vm3, %v5790_v17  ;;  %v12730_v17 = vld [vmem:[%s14571_s1 + $0x18] sm:$0xff]  }
 0x962   : > { %11864 = vmatprep.mubr.msk.bf16.mxu0 %vm12951_vm4, %v12950_v31 }
 0x9e1   : > { %v5834_v50 = vpop.f32.mrf.mxu0 }
 0x9e3   : > { %v11800_v25 = vpop.f32.mrf.mxu0 }
 0x9e4   : > { %v12733_v25 = vld [vmem:[%s14571_s1 + $0x30] sm:$0xff]  }
 0x9e5   : > { %v5837_v30 = vpop.f32.mrf.mxu0 }
 0x9e7   : > { %v11801_v46 = vpop.f32.mrf.mxu0 }
 0x9e9   : > { %v5881_v33 = vpop.f32.mrf.mxu0 }
 0x9ea   : > { %v5882_v16 = vadd.f32 %v5881_v33, %v5834_v50  ;;  %v12732_v50 = vld [vmem:[%s14571_s1 + $0x28] sm:$0xff]   ;;  %v6309_v33 = vld [vmem:[%s14572_s11] sm:$0xf]  ;;  %s14575_s11 = sld [smem:[#allocation13_spill]] }
 0x9eb   : > { %v11806_v34 = vpop.f32.mrf.mxu0 }
 0x9ec   : > { %v6321_v34 = vsel %vm1461_vm1, %v6309_v33, 0 }
 0x9ed   : > { %v5884_v5 = vpop.f32.mrf.mxu0  ;;  %11863 = vmatpush3.bf16.msra.mxu0 %v6321_v34 }
 0x9ee   : > { %v5885_v2 = vadd.f32 %v5884_v5, %v5837_v30  ;;  %v6301_v30 = vpop.f32.mrf.mxu1  ;;  %11906 = vmatprep.subr.bf16.mxu0 %v12950_v31 }
 0x9ef   : > { %v11807_v27 = vpop.f32.mrf.mxu0 }
 0x9f0   : > { %v11860_v46 = vpop.f32.mrf.mxu1 }
 0x9f1   : > { %v5930_v28 = vpop.f32.mrf.mxu0 }
 0x9f2   : > { %v5937_v35 = vadd.f32 %v5930_v28, %v5882_v16  ;;  %v6304_v5 = vpop.f32.mrf.mxu1  ;;  %v12734_v28 = vld [vmem:[%s14571_s1 + $0x38] sm:$0xff]  }
 0x9f3   : > { %v11812_v19 = vpop.f32.mrf.mxu0  ;;  %v6308_v27 = vpack.c.bf16 %v6304_v5, %v6301_v30  ;;  %v12744_v30 = vld [vmem:[%s14573_s23 + $0x40] sm:$0xff]  }
 0x9f4   : > { %v11861_v19 = vpop.f32.mrf.mxu1 }
 0x9f5   : > { %v5933_v32 = vpop.f32.mrf.mxu0  ;;  %11865 = vmatmul.mubr.msk.bf16.vlgmr.msra.gmra.mxu0 %vm3216_vm3, %v6308_v27 }
 0x9f6   : > { %v5938_v0 = vadd.f32 %v5933_v32, %v5885_v2  ;;  %11908 = vmatprep.mubr.msk.bf16.mxu0 %vm12951_vm4, %v12950_v31  ;;  %v12735_v32 = vld [vmem:[%s14571_s1 + $0x40] sm:$0xff]   ;;  %s14576_s1 = sld [smem:[#allocation17_spill]] }
 0x9f7   : > { %v11813_v44 = vpop.f32.mrf.mxu0 }
 0x9f8   : > { %v12736_v44 = vld [vmem:[%s14573_s23 + $0x8] sm:$0xff]  }
 0x9f9   : > { %v5981_v20 = vpop.f32.mrf.mxu0  ;;  %11907 = vmatpush3.bf16.msra.mxu0 %v12736_v44 }
 0x9fa   : > { %v5988_v58 = vadd.f32 %v5981_v20, %v5937_v35  ;;  %11912 = vmatprep.subr.bf16.mxu0 %v12950_v31 }
 0x9fb   : > { %v11818_v23 = vpop.f32.mrf.mxu0 }
 0x9fd   : > { %v5984_v42 = vpop.f32.mrf.mxu0 }
 0x9fe   : > { %v5989_v43 = vadd.f32 %v5984_v42, %v5938_v0 }
 0x9ff   : > { %v11819_v59 = vpop.f32.mrf.mxu0 }
 0xa01   : > { %v6032_v55 = vpop.f32.mrf.mxu0 }
 0xa02   : > { %v6039_v4 = vadd.f32 %v6032_v55, %v5988_v58  ;;  %v12739_v58 = vld [vmem:[%s14573_s23 + $0x18] sm:$0xff]  }
 0xa03   : > { %v11824_v13 = vpop.f32.mrf.mxu0 }
 0xa05   : > { %v6035_v36 = vpop.f32.mrf.mxu0 }
 0xa06   : > { %v6040_v26 = vadd.f32 %v6035_v36, %v5989_v43 }
 0xa07   : > { %v11825_v48 = vpop.f32.mrf.mxu0 }
 0xa08   : > { %v12737_v48 = vld [vmem:[%s14573_s23] sm:$0xff]  }
 0xa09   : > { %v6083_v29 = vpop.f32.mrf.mxu0 }
 0xa0a   : > { %v6090_v18 = vadd.f32 %v6083_v29, %v6039_v4 }
 0xa0b   : > { %v11830_v39 = vpop.f32.mrf.mxu0 }
 0xa0d   : > { %v6086_v41 = vpop.f32.mrf.mxu0 }
 0xa0e   : > { %v6091_v8 = vadd.f32 %v6086_v41, %v6040_v26 }
 0xa0f   : > { %v11831_v45 = vpop.f32.mrf.mxu0 }
 0xa11   : > { %v6134_v51 = vpop.f32.mrf.mxu0 }
 0xa12   : > { %v6141_v56 = vadd.f32 %v6134_v51, %v6090_v18  ;;  %v12740_v18 = vld [vmem:[%s14573_s23 + $0x20] sm:$0xff]  }
 0xa13   : > { %v11836_v22 = vpop.f32.mrf.mxu0 }
 0xa14   : > { %v12738_v22 = vld [vmem:[%s14573_s23 + $0x10] sm:$0xff]  }
 0xa15   : > { %v6137_v53 = vpop.f32.mrf.mxu0 }
 0xa16   : > { %v6142_v9 = vadd.f32 %v6137_v53, %v6091_v8 }
 0xa17   : > { %v11837_v47 = vpop.f32.mrf.mxu0 }
 0xa19   : > { %v6185_v60 = vpop.f32.mrf.mxu0 }
 0xa1a   : > { %v6192_v15 = vadd.f32 %v6185_v60, %v6141_v56 }
 0xa1b   : > { %v11842_v38 = vpop.f32.mrf.mxu0 }
 0xa1d   : > { %v6188_v37 = vpop.f32.mrf.mxu0 }
 0xa1e   : > { %v6193_v61 = vadd.f32 %v6188_v37, %v6142_v9 }
 0xa1f   : > { %v11843_v49 = vpop.f32.mrf.mxu0 }
 0xa21   : > { %v6236_v57 = vpop.f32.mrf.mxu0 }
 0xa22   : > { %v6243_v10 = vadd.f32 %v6236_v57, %v6192_v15  ;;  %v12741_v15 = vld [vmem:[%s14573_s23 + $0x28] sm:$0xff]  }
 0xa23   : > { %v11848_v40 = vpop.f32.mrf.mxu0 }
 0xa24   : > { %v6252_v63 = vadd.f32 %v10650_v11, %v6243_v10 }
 0xa25   : > { %v6239_v62 = vpop.f32.mrf.mxu0 }
 0xa26   : > { %v6244_v6 = vadd.f32 %v6239_v62, %v6193_v61  ;;  %v6254_v12 = vmax.f32 %v6252_v63, 0.0  ;;  %v12742_v61 = vld [vmem:[%s14573_s23 + $0x30] sm:$0xff]  }
 0xa27   : > { %v11849_v3 = vpop.f32.mrf.mxu0 }
 0xa28   : > { %v6253_v7 = vadd.f32 %v10650_v11, %v6244_v6 }
 0xa2a   : > { %v6255_v14 = vmax.f32 %v6253_v7, 0.0 }
 0xa2c   : > { %v6256_v21 = vpack.c.bf16 %v6255_v14, %v6254_v12 }
 0xa2e   : > { %11869 = vmatpush3.bf16.msra.mxu1 %v6256_v21 }
 0xa2f   : > { %11960 = vmatprep.subr.bf16.mxu1 %v12950_v31 }
 0xa31   : > { %11871 = vmatmul.mubr.msk.bf16.vlgmr.msra.gmra.mxu1 %vm6427_vm5, %v12727_v54 }
 0xa32   : > { %11874 = vmatprep.mubr.msk.bf16.mxu1 %vm12951_vm4, %v12950_v31 }
 0xa39   : > { %11875 = vmatmul.mubr.msk.bf16.gmra.mxu1 %vm6427_vm5, %v12728_v24  ;;  %v12743_v24 = vld [vmem:[%s14573_s23 + $0x38] sm:$0xff]  }
 0xa3a   : > { %11878 = vmatprep.mubr.msk.bf16.mxu1 %vm12951_vm4, %v12950_v31 }
 0xa41   : > { %11879 = vmatmul.mubr.msk.bf16.gmra.mxu1 %vm6427_vm5, %v12729_v52 }
 0xa42   : > { %11882 = vmatprep.mubr.msk.bf16.mxu1 %vm12951_vm4, %v12950_v31 }
 0xa49   : > { %11883 = vmatmul.mubr.msk.bf16.gmra.mxu1 %vm6427_vm5, %v12730_v17 }
 0xa4a   : > { %11886 = vmatprep.mubr.msk.bf16.mxu1 %vm12951_vm4, %v12950_v31 }
 0xa51   : > { %11887 = vmatmul.mubr.msk.bf16.gmra.mxu1 %vm6427_vm5, %v12731_v1 }
 0xa52   : > { %11890 = vmatprep.mubr.msk.bf16.mxu1 %vm12951_vm4, %v12950_v31 }
 0xa59   : > { %11891 = vmatmul.mubr.msk.bf16.gmra.mxu1 %vm6427_vm5, %v12732_v50 }
 0xa5a   : > { %11894 = vmatprep.mubr.msk.bf16.mxu1 %vm12951_vm4, %v12950_v31 }
 0xa61   : > { %11895 = vmatmul.mubr.msk.bf16.gmra.mxu1 %vm6427_vm5, %v12733_v25 }
 0xa62   : > { %11898 = vmatprep.mubr.msk.bf16.mxu1 %vm12951_vm4, %v12950_v31 }
 0xa69   : > { %11899 = vmatmul.mubr.msk.bf16.gmra.mxu1 %vm6427_vm5, %v12734_v28 }
 0xa6a   : > { %11902 = vmatprep.mubr.msk.bf16.mxu1 %vm12951_vm4, %v12950_v31 }
 0xa71   : > { %11903 = vmatmul.mubr.msk.bf16.gmra.mxu1 %vm6427_vm5, %v12735_v32 }
 0xa72   : > { %11962 = vmatprep.mubr.msk.bf16.mxu1 %vm12951_vm4, %v12950_v31 }
 0xab5   : > { %v14028_v63 = vpop.f32.mrf.mxu0 }
 0xab7   : > { %v11866_v3 = vpop.f32.mrf.mxu0 }
 0xab9   : > { %v14034_v12 = vpop.f32.mrf.mxu0 }
 0xabb   : > { %v11867_v21 = vpop.f32.mrf.mxu0 }
 0xaf1   : > { %v6489_v20 = vpop.f32.mrf.mxu1 }
 0xaf3   : > { %v11872_v23 = vpop.f32.mrf.mxu1 }
 0xaf5   : > { %v6492_v42 = vpop.f32.mrf.mxu1 }
 0xaf6   : > { %v6560_v16 = vpack.c.bf16 %v6492_v42, %v6489_v20 }
 0xaf7   : > { %v11873_v59 = vpop.f32.mrf.mxu1 }
 0xaf9   : > { %v6497_v55 = vpop.f32.mrf.mxu1 }
 0xafb   : > { %v11876_v13 = vpop.f32.mrf.mxu1 }
 0xafd   : > { %v6500_v36 = vpop.f32.mrf.mxu1 }
 0xafe   : > { %v6561_v29 = vpack.c.bf16 %v6500_v36, %v6497_v55 }
 0xaff   : > { %v11877_v39 = vpop.f32.mrf.mxu1 }
 0xb00   : > { %11909 = vmatmul.mubr.msk.bf16.vlgmr.msra.gmra.mxu0 %vm6427_vm5, %v6561_v29 }
 0xb01   : > { %11913 = vmatpush3.bf16.msra.mxu0 %v12737_v48  ;;  %11914 = vmatprep.mubr.msk.bf16.mxu0 %vm12951_vm4, %v12950_v31  ;;  %v6505_v41 = vpop.f32.mrf.mxu1 }
 0xb02   : > { %11918 = vmatprep.subr.bf16.mxu0 %v12950_v31 }
 0xb03   : > { %v11880_v45 = vpop.f32.mrf.mxu1 }
 0xb05   : > { %v6508_v51 = vpop.f32.mrf.mxu1 }
 0xb06   : > { %v6562_v60 = vpack.c.bf16 %v6508_v51, %v6505_v41 }
 0xb07   : > { %v11881_v53 = vpop.f32.mrf.mxu1 }
 0xb08   : > { %11915 = vmatmul.mubr.msk.bf16.vlgmr.msra.gmra.mxu0 %vm6427_vm5, %v6560_v16 }
 0xb09   : > { %11919 = vmatpush3.bf16.msra.mxu0 %v12738_v22  ;;  %11920 = vmatprep.mubr.msk.bf16.mxu0 %vm12951_vm4, %v12950_v31  ;;  %v6513_v35 = vpop.f32.mrf.mxu1 }
 0xb0a   : > { %11924 = vmatprep.subr.bf16.mxu0 %v12950_v31 }
 0xb0b   : > { %v11884_v47 = vpop.f32.mrf.mxu1 }
 0xb0d   : > { %v6516_v2 = vpop.f32.mrf.mxu1 }
 0xb0e   : > { %v6563_v37 = vpack.c.bf16 %v6516_v2, %v6513_v35 }
 0xb0f   : > { %v11885_v0 = vpop.f32.mrf.mxu1 }
 0xb10   : > { %11921 = vmatmul.mubr.msk.bf16.vlgmr.msra.gmra.mxu0 %vm6427_vm5, %v6562_v60 }
 0xb11   : > { %11925 = vmatpush3.bf16.msra.mxu0 %v12739_v58  ;;  %11926 = vmatprep.mubr.msk.bf16.mxu0 %vm12951_vm4, %v12950_v31  ;;  %v6521_v4 = vpop.f32.mrf.mxu1 }
 0xb12   : > { %11930 = vmatprep.subr.bf16.mxu0 %v12950_v31 }
 0xb13   : > { %v11888_v38 = vpop.f32.mrf.mxu1 }
 0xb15   : > { %v6524_v43 = vpop.f32.mrf.mxu1 }
 0xb16   : > { %v6564_v57 = vpack.c.bf16 %v6524_v43, %v6521_v4 }
 0xb17   : > { %v11889_v26 = vpop.f32.mrf.mxu1 }
 0xb18   : > { %11927 = vmatmul.mubr.msk.bf16.vlgmr.msra.gmra.mxu0 %vm6427_vm5, %v6563_v37 }
 0xb19   : > { %11931 = vmatpush3.bf16.msra.mxu0 %v12740_v18  ;;  %11932 = vmatprep.mubr.msk.bf16.mxu0 %vm12951_vm4, %v12950_v31  ;;  %v6529_v56 = vpop.f32.mrf.mxu1 }
 0xb1a   : > { %11936 = vmatprep.subr.bf16.mxu0 %v12950_v31 }
 0xb1b   : > { %v11892_v49 = vpop.f32.mrf.mxu1 }
 0xb1d   : > { %v6532_v8 = vpop.f32.mrf.mxu1 }
 0xb1e   : > { %v6565_v62 = vpack.c.bf16 %v6532_v8, %v6529_v56 }
 0xb1f   : > { %v11893_v9 = vpop.f32.mrf.mxu1 }
 0xb20   : > { %11933 = vmatmul.mubr.msk.bf16.vlgmr.msra.gmra.mxu0 %vm6427_vm5, %v6564_v57 }
 0xb21   : > { %11937 = vmatpush3.bf16.msra.mxu0 %v12741_v15  ;;  %11938 = vmatprep.mubr.msk.bf16.mxu0 %vm12951_vm4, %v12950_v31  ;;  %v6537_v10 = vpop.f32.mrf.mxu1 }
 0xb22   : > { %11942 = vmatprep.subr.bf16.mxu0 %v12950_v31 }
 0xb23   : > { %v11896_v11 = vpop.f32.mrf.mxu1 }
 0xb25   : > { %v6540_v40 = vpop.f32.mrf.mxu1 }
 0xb26   : > { %v6566_v52 = vpack.c.bf16 %v6540_v40, %v6537_v10 }
 0xb27   : > { %v11897_v6 = vpop.f32.mrf.mxu1 }
 0xb28   : > { %11939 = vmatmul.mubr.msk.bf16.vlgmr.msra.gmra.mxu0 %vm6427_vm5, %v6565_v62  ;;  %v10707_v6 = vld [vmem:[%s14574_s28] ss:$0 sm:$0xff]  ;;  %s14577_s28 = sld [smem:[#allocation18_spill]] }
 0xb29   : > { %11943 = vmatpush3.bf16.msra.mxu0 %v12742_v61  ;;  %11944 = vmatprep.mubr.msk.bf16.mxu0 %vm12951_vm4, %v12950_v31  ;;  %v6545_v7 = vpop.f32.mrf.mxu1 }
 0xb2a   : > { %11948 = vmatprep.subr.bf16.mxu0 %v12950_v31 }
 0xb2b   : > { %v11900_v14 = vpop.f32.mrf.mxu1 }
 0xb2c   : > { %v10653_v14 = vld [vmem:[%s14575_s11] ss:$0 sm:$0xff]  ;;  %s14578_s11 = sld [smem:[#allocation20_spill]] }
 0xb2d   : > { %v6548_v54 = vpop.f32.mrf.mxu1 }
 0xb2e   : > { %v6567_v46 = vpack.c.bf16 %v6548_v54, %v6545_v7 }
 0xb2f   : > { %v11901_v17 = vpop.f32.mrf.mxu1 }
 0xb30   : > { %11945 = vmatmul.mubr.msk.bf16.vlgmr.msra.gmra.mxu0 %vm6427_vm5, %v6566_v52  ;;  %v6358_v17 = vadd.f32 %v10653_v14, %v14028_v63  ;;  %v12746_v63 = vld [vmem:[%s14576_s1 + $0x8] sm:$0xff]  }
 0xb31   : > { %11949 = vmatpush3.bf16.msra.mxu0 %v12743_v24  ;;  %11950 = vmatprep.mubr.msk.bf16.mxu0 %vm12951_vm4, %v12950_v31  ;;  %v6553_v1 = vpop.f32.mrf.mxu1 }
 0xb32   : > { %11954 = vmatprep.subr.bf16.mxu0 %v12950_v31 }
 0xb33   : > { %v11904_v50 = vpop.f32.mrf.mxu1 }
 0xb35   : > { %v6556_v25 = vpop.f32.mrf.mxu1 }
 0xb36   : > { %v6568_v34 = vpack.c.bf16 %v6556_v25, %v6553_v1  ;;  %v6361_v25 = vadd.f32 %v10653_v14, %v14034_v12  ;;  %v12747_v12 = vld [vmem:[%s14576_s1 + $0x10] sm:$0xff]  }
 0xb37   : > { %v11905_v33 = vpop.f32.mrf.mxu1 }
 0xb38   : > { %11951 = vmatmul.mubr.msk.bf16.vlgmr.msra.gmra.mxu0 %vm6427_vm5, %v6567_v46 }
 0xb39   : > { %11955 = vmatpush3.bf16.msra.mxu0 %v12744_v30  ;;  %11956 = vmatprep.mubr.msk.bf16.mxu0 %vm12951_vm4, %v12950_v31 }
 0xb3a   : > { %11982 = vmatprep.subr.bf16.mxu0 %v12950_v31 }
 0xb40   : > { %11957 = vmatmul.mubr.msk.bf16.vlgmr.msra.gmra.mxu0 %vm6427_vm5, %v6568_v34 }
 0xb41   : > { %11984 = vmatprep.mubr.msk.bf16.mxu0 %vm12951_vm4, %v12950_v31 }
 0xbc0   : > { %v6617_v5 = vpop.f32.mrf.mxu0 }
 0xbc2   : > { %v11910_v27 = vpop.f32.mrf.mxu0 }
 0xbc4   : > { %v6620_v28 = vpop.f32.mrf.mxu0 }
 0xbc6   : > { %v11911_v19 = vpop.f32.mrf.mxu0 }
 0xbc7   : > { %v12748_v19 = vld [vmem:[%s14576_s1 + $0x18] sm:$0xff]  }
 0xbc8   : > { %v6667_v32 = vpop.f32.mrf.mxu0 }
 0xbc9   : > { %v6668_v60 = vadd.f32 %v6667_v32, %v6617_v5  ;;  %v12749_v32 = vld [vmem:[%s14576_s1 + $0x20] ss:$0 sps:$4 sm:$0xff]  }
 0xbca   : > { %v11916_v44 = vpop.f32.mrf.mxu0 }
 0xbcb   : > { %v12750_v44 = vld [vmem:[%s14577_s28 + $0x8] sm:$0xff]  }
 0xbcc   : > { %v6670_v20 = vpop.f32.mrf.mxu0  ;;  %11983 = vmatpush3.bf16.msra.mxu0 %v12750_v44 }
 0xbcd   : > { %v6671_v43 = vadd.f32 %v6670_v20, %v6620_v28  ;;  %v12745_v28 = vld [vmem:[%s14576_s1] sm:$0xff]   ;;  %11988 = vmatprep.subr.bf16.mxu0 %v12950_v31  ;;  %v12753_v20 = vld [vmem:[%s14577_s28 + $0x28] sm:$0xff]   ;;  %s14579_s1 = sld [smem:[#allocation21_spill]] }
 0xbce   : > { %v11917_v23 = vpop.f32.mrf.mxu0 }
 0xbd0   : > { %v6720_v42 = vpop.f32.mrf.mxu0 }
 0xbd1   : > { %v6727_v4 = vadd.f32 %v6720_v42, %v6668_v60 }
 0xbd2   : > { %v11922_v59 = vpop.f32.mrf.mxu0 }
 0xbd4   : > { %v6723_v55 = vpop.f32.mrf.mxu0 }
 0xbd5   : > { %v6728_v26 = vadd.f32 %v6723_v55, %v6671_v43 }
 0xbd6   : > { %v11923_v13 = vpop.f32.mrf.mxu0 }
 0xbd8   : > { %v6775_v36 = vpop.f32.mrf.mxu0 }
 0xbd9   : > { %v6782_v18 = vadd.f32 %v6775_v36, %v6727_v4  ;;  %v12751_v36 = vld [vmem:[%s14577_s28] sm:$0xff]  }
 0xbda   : > { %v11928_v48 = vpop.f32.mrf.mxu0 }
 0xbdc   : > { %v6778_v29 = vpop.f32.mrf.mxu0 }
 0xbdd   : > { %v6783_v8 = vadd.f32 %v6778_v29, %v6728_v26 }
 0xbde   : > { %v11929_v39 = vpop.f32.mrf.mxu0 }
 0xbe0   : > { %v6830_v41 = vpop.f32.mrf.mxu0 }
 0xbe1   : > { %v6837_v56 = vadd.f32 %v6830_v41, %v6782_v18 }
 0xbe2   : > { %v11934_v45 = vpop.f32.mrf.mxu0 }
 0xbe4   : > { %v6833_v51 = vpop.f32.mrf.mxu0 }
 0xbe5   : > { %v6838_v9 = vadd.f32 %v6833_v51, %v6783_v8  ;;  %v12752_v51 = vld [vmem:[%s14577_s28 + $0x10] sm:$0xff]  }
 0xbe6   : > { %v11935_v22 = vpop.f32.mrf.mxu0 }
 0xbe8   : > { %v6885_v16 = vpop.f32.mrf.mxu0 }
 0xbe9   : > { %v6892_v15 = vadd.f32 %v6885_v16, %v6837_v56 }
 0xbea   : > { %v11940_v53 = vpop.f32.mrf.mxu0 }
 0xbec   : > { %v6888_v35 = vpop.f32.mrf.mxu0 }
 0xbed   : > { %v6893_v40 = vadd.f32 %v6888_v35, %v6838_v9  ;;  %v12757_v9 = vld [vmem:[%s14577_s28 + $0x30] sm:$0xff]  }
 0xbee   : > { %v11941_v47 = vpop.f32.mrf.mxu0 }
 0xbf0   : > { %v6940_v2 = vpop.f32.mrf.mxu0 }
 0xbf1   : > { %v6947_v10 = vadd.f32 %v6940_v2, %v6892_v15  ;;  %v12754_v2 = vld [vmem:[%s14577_s28 + $0x38] sm:$0xff]  }
 0xbf2   : > { %v11946_v58 = vpop.f32.mrf.mxu0 }
 0xbf3   : > { %v12755_v58 = vld [vmem:[%s14577_s28 + $0x18] sm:$0xff]  }
 0xbf4   : > { %v6943_v0 = vpop.f32.mrf.mxu0 }
 0xbf5   : > { %v6948_v3 = vadd.f32 %v6943_v0, %v6893_v40 }
 0xbf6   : > { %v11947_v38 = vpop.f32.mrf.mxu0 }
 0xbf8   : > { %v6995_v37 = vpop.f32.mrf.mxu0 }
 0xbf9   : > { %v7002_v61 = vadd.f32 %v6995_v37, %v6947_v10  ;;  %v12756_v37 = vld [vmem:[%s14577_s28 + $0x20] sm:$0xff]  }
 0xbfa   : > { %v11952_v49 = vpop.f32.mrf.mxu0 }
 0xbfc   : > { %v6998_v57 = vpop.f32.mrf.mxu0 }
 0xbfd   : > { %v7003_v54 = vadd.f32 %v6998_v57, %v6948_v3 }
 0xbfe   : > { %v11953_v11 = vpop.f32.mrf.mxu0 }
 0xbff   : > { %v12758_v11 = vld [vmem:[%s14577_s28 + $0x40] sm:$0xff]  }
 0xc00   : > { %v7050_v62 = vpop.f32.mrf.mxu0 }
 0xc01   : > { %v7057_v7 = vadd.f32 %v7050_v62, %v7002_v61  ;;  %v7689_v61 = vld [vmem:[%s14578_s11] sm:$0xf]  ;;  %s14581_s11 = sld [smem:[#allocation23_spill]] }
 0xc02   : > { %v11958_v21 = vpop.f32.mrf.mxu0  ;;  %v12764_v62 = vld [vmem:[%s14579_s1] sm:$0xff]   ;;  %s14580_s1 = sld [smem:[#allocation19_spill]] }
 0xc03   : > { %v7066_v24 = vadd.f32 %v10707_v6, %v7057_v7 }
 0xc04   : > { %v7053_v52 = vpop.f32.mrf.mxu0 }
 0xc05   : > { %v7058_v1 = vadd.f32 %v7053_v52, %v7003_v54  ;;  %v7068_v30 = vadd.f32 %v7066_v24, %v6358_v17 }
 0xc06   : > { %v11959_v50 = vpop.f32.mrf.mxu0 }
 0xc07   : > { %v7067_v46 = vadd.f32 %v10707_v6, %v7058_v1  ;;  %v7070_v34 = vmax.f32 %v7068_v30, 0.0 }
 0xc09   : > { %v7069_v33 = vadd.f32 %v7067_v46, %v6361_v25 }
 0xc0b   : > { %v7071_v5 = vmax.f32 %v7069_v33, 0.0 }
 0xc0d   : > { %v14053_v27 = vpack.c.bf16 %v7071_v5, %v7070_v34 }
 0xc0f   : > { %11961 = vmatpush3.bf16.msra.mxu1 %v14053_v27 }
 0xc10   : > { %12012 = vmatprep.subr.bf16.mxu1 %v12950_v31 }
 0xc12   : > { %11963 = vmatmul.mubr.msk.bf16.vlgmr.msra.gmra.mxu1 %vm6427_vm5, %v12745_v28 }
 0xc13   : > { %11966 = vmatprep.mubr.msk.bf16.mxu1 %vm12951_vm4, %v12950_v31  ;;  %12013 = vmatpush3.bf16.msra.mxu1 %v12753_v20 }
 0xc14   : > { %12024 = vmatprep.subr.bf16.mxu1 %v12950_v31 }
 0xc1a   : > { %11967 = vmatmul.mubr.msk.bf16.gmra.mxu1 %vm6427_vm5, %v12746_v63 }
 0xc1b   : > { %11970 = vmatprep.mubr.msk.bf16.mxu1 %vm12951_vm4, %v12950_v31 }
 0xc22   : > { %11971 = vmatmul.mubr.msk.bf16.gmra.mxu1 %vm6427_vm5, %v12747_v12 }
 0xc23   : > { %11974 = vmatprep.mubr.msk.bf16.mxu1 %vm12951_vm4, %v12950_v31 }
 0xc2a   : > { %11975 = vmatmul.mubr.msk.bf16.gmra.mxu1 %vm6427_vm5, %v12748_v19 }
 0xc2b   : > { %11978 = vmatprep.mubr.msk.bf16.mxu1 %vm12951_vm4, %v12950_v31 }
 0xc32   : > { %11979 = vmatmul.mubr.msk.bf16.gmra.mxu1 %vm6427_vm5, %v12749_v32 }
 0xc33   : > { %12014 = vmatprep.mubr.msk.bf16.mxu1 %vm12951_vm4, %v12950_v31 }
 0xcd2   : > { %v7154_v23 = vpop.f32.mrf.mxu1 }
 0xcd4   : > { %v11964_v42 = vpop.f32.mrf.mxu1 }
 0xcd6   : > { %v7157_v59 = vpop.f32.mrf.mxu1 }
 0xcd7   : > { %v7192_v55 = vpack.c.bf16 %v7157_v59, %v7154_v23 }
 0xcd8   : > { %v11965_v13 = vpop.f32.mrf.mxu1 }
 0xcd9   : > { %v7203_v48 = vrot.slane %v7192_v55, 4 }
 0xcda   : > { %v7162_v29 = vpop.f32.mrf.mxu1 }
 0xcdb   : > { %11985 = vmatmul.mubr.msk.bf16.vlgmr.msra.gmra.mxu0 %vm6427_vm5, %v7203_v48 }
 0xcdc   : > { %v11968_v39 = vpop.f32.mrf.mxu1  ;;  %11989 = vmatpush3.bf16.msra.mxu0 %v12751_v36  ;;  %11990 = vmatprep.mubr.msk.bf16.mxu0 %vm12951_vm4, %v12950_v31 }
 0xcdd   : > { %11994 = vmatprep.subr.bf16.mxu0 %v12950_v31 }
 0xcde   : > { %v7165_v41 = vpop.f32.mrf.mxu1 }
 0xcdf   : > { %v7193_v60 = vpack.c.bf16 %v7165_v41, %v7162_v29 }
 0xce0   : > { %v11969_v45 = vpop.f32.mrf.mxu1 }
 0xce1   : > { %v7359_v56 = vrot.slane %v7193_v60, 4 }
 0xce2   : > { %v7170_v22 = vpop.f32.mrf.mxu1 }
 0xce3   : > { %11991 = vmatmul.mubr.msk.bf16.vlgmr.msra.gmra.mxu0 %vm6427_vm5, %v7192_v55 }
 0xce4   : > { %v11972_v16 = vpop.f32.mrf.mxu1  ;;  %11995 = vmatpush3.bf16.msra.mxu0 %v12752_v51  ;;  %11996 = vmatprep.mubr.msk.bf16.mxu0 %vm12951_vm4, %v12950_v31 }
 0xce5   : > { %12000 = vmatprep.subr.bf16.mxu0 %v12950_v31 }
 0xce6   : > { %v7173_v53 = vpop.f32.mrf.mxu1 }
 0xce7   : > { %v7194_v35 = vpack.c.bf16 %v7173_v53, %v7170_v22 }
 0xce8   : > { %v11973_v47 = vpop.f32.mrf.mxu1 }
 0xce9   : > { %v7467_v0 = vrot.slane %v7194_v35, 4 }
 0xcea   : > { %v7178_v4 = vpop.f32.mrf.mxu1 }
 0xceb   : > { %11997 = vmatmul.mubr.msk.bf16.vlgmr.msra.gmra.mxu0 %vm6427_vm5, %v7193_v60  ;;  %12015 = vmatmul.mubr.msk.bf16.vlgmr.msra.gmra.mxu1 %vm6427_vm5, %v7467_v0 }
 0xcec   : > { %v11976_v38 = vpop.f32.mrf.mxu1  ;;  %12025 = vmatpush3.bf16.msra.mxu1 %v12754_v2  ;;  %12001 = vmatpush3.bf16.msra.mxu0 %v12755_v58 }
 0xced   : > { %12002 = vmatprep.mubr.msk.bf16.mxu0 %vm12951_vm4, %v12950_v31  ;;  %12026 = vmatprep.mubr.msk.bf16.mxu1 %vm12951_vm4, %v12950_v31 }
 0xcee   : > { %v7181_v43 = vpop.f32.mrf.mxu1  ;;  %12036 = vmatprep.subr.bf16.mxu1 %v12950_v31  ;;  %12006 = vmatprep.subr.bf16.mxu0 %v12950_v31 }
 0xcef   : > { %v7195_v18 = vpack.c.bf16 %v7181_v43, %v7178_v4 }
 0xcf0   : > { %v11977_v26 = vpop.f32.mrf.mxu1 }
 0xcf1   : > { %v7575_v49 = vrot.slane %v7195_v18, 4  ;;  %v12761_v26 = vld [vmem:[%s14581_s11 + $0x10] sm:$0xff]  }
 0xcf2   : > { %v7186_v8 = vpop.f32.mrf.mxu1 }
 0xcf3   : > { %12003 = vmatmul.mubr.msk.bf16.vlgmr.msra.gmra.mxu0 %vm6427_vm5, %v7359_v56  ;;  %12027 = vmatmul.mubr.msk.bf16.vlgmr.msra.gmra.mxu1 %vm6427_vm5, %v7575_v49  ;;  %v7196_v40 = vpack.c.bf16 %v7186_v8, %v7186_v8  ;;  %v12762_v56 = vld [vmem:[%s14581_s11 + $0x18] sm:$0xff]   ;;  %v12763_v49 = vld [vmem:[%s14581_s11 + $0x20] ss:$0 sps:$4 sm:$0xff]  }
 0xcf4   : > { %12037 = vmatpush3.bf16.msra.mxu1 %v14053_v27  ;;  %12007 = vmatpush3.bf16.msra.mxu0 %v12756_v37  ;;  %v11980_v15 = vpop.f32.mrf.mxu1  ;;  %v12760_v37 = vld [vmem:[%s14581_s11 + $0x8] sm:$0xff]  }
 0xcf5   : > { %12008 = vmatprep.mubr.msk.bf16.mxu0 %vm12951_vm4, %v12950_v31  ;;  %12018 = vmatprep.subr.bf16.mxu0 %v12950_v31 }
 0xcf6   : > { %v7189_v57 = vpop.f32.mrf.mxu1  ;;  %12038 = vmatprep.mubr.msk.bf16.mxu1 %vm12951_vm4, %v12950_v31  ;;  %12048 = vmatprep.subr.bf16.mxu1 %v12950_v31 }
 0xcf8   : > { %v11981_v10 = vpop.f32.mrf.mxu1 }
 0xcfb   : > { %12009 = vmatmul.mubr.msk.bf16.vlgmr.msra.gmra.mxu0 %vm6427_vm5, %v7194_v35  ;;  %12039 = vmatmul.mubr.msk.bf16.vlgmr.msra.gmra.mxu1 %vm6427_vm5, %v7689_v61  ;;  %v10752_v35 = vld [vmem:[%s14580_s1] ss:$0 sm:$0xff]  ;;  %s14582_s1 = sld [smem:[#allocation24_spill]] }
 0xcfc   : > { %12019 = vmatpush3.bf16.msra.mxu0 %v12757_v9  ;;  %12020 = vmatprep.mubr.msk.bf16.mxu0 %vm12951_vm4, %v12950_v31 }
 0xcfd   : > { %12030 = vmatprep.subr.bf16.mxu0 %v12950_v31  ;;  %12050 = vmatprep.mubr.msk.bf16.mxu1 %vm12951_vm4, %v12950_v31 }
 0xd01   : > { %v12775_v61 = vld [vmem:[%s14582_s1 + $0x58] sm:$0xff]  }
 0xd03   : > { %12021 = vmatmul.mubr.msk.bf16.vlgmr.msra.gmra.mxu0 %vm6427_vm5, %v7195_v18  ;;  %v12759_v18 = vld [vmem:[%s14581_s11] sm:$0xff]   ;;  %s12952_s11 = smov [#allocation2]  }
 0xd04   : > { %12031 = vmatpush3.bf16.msra.mxu0 %v12758_v11  ;;  %12032 = vmatprep.mubr.msk.bf16.mxu0 %vm12951_vm4, %v12950_v31  ;;  %v12765_v11 = vld [vmem:[%s14582_s1 + $0x18] sm:$0xff]   ;;  %s12853_s13 = sshll.u32 %s12952_s11, 4  ;;  %s12854_s13 = int_to_ptr.vmem [resolvable:$false] %s12853_s13 }
 0xd05   : > { %12042 = vmatprep.subr.bf16.mxu0 %v12950_v31  ;;  %s12855_s14 = scalar_lea.vmem %s12854_s13, 32 }
 0xd0b   : > { %12033 = vmatmul.mubr.msk.bf16.vlgmr.msra.gmra.mxu0 %vm6427_vm5, %v7196_v40  ;;  %v12766_v40 = vld [vmem:[%s14582_s1 + $0x10] sm:$0xff]  }
 0xd0c   : > { %12044 = vmatprep.mubr.msk.bf16.mxu0 %vm12951_vm4, %v12950_v31  ;;  %12043 = vmatpush3.bf16.msra.mxu0 %v12764_v62  ;;  %v12777_v62 = vld [vmem:[%s14582_s1 + $0x50] sm:$0xff]  }
 0xd0d   : > { %12070 = vmatprep.subr.bf16.mxu0 %v12950_v31 }
 0xd9b   : > { %v7247_v6 = vpop.f32.mrf.mxu0 }
 0xd9d   : > { %v11986_v3 = vpop.f32.mrf.mxu0 }
 0xd9f   : > { %v7250_v7 = vpop.f32.mrf.mxu0 }
 0xda1   : > { %v11987_v14 = vpop.f32.mrf.mxu0 }
 0xda3   : > { %v7296_v21 = vpop.f32.mrf.mxu0 }
 0xda4   : > { %v7297_v20 = vadd.f32 %v7296_v21, %v7247_v6  ;;  %v12767_v21 = vld [vmem:[%s14582_s1 + $0x8] sm:$0xff]  }
 0xda5   : > { %v11992_v54 = vpop.f32.mrf.mxu0 }
 0xda7   : > { %v7299_v24 = vpop.f32.mrf.mxu0 }
 0xda9   : > { %v11993_v52 = vpop.f32.mrf.mxu0 }
 0xdab   : > { %v7348_v17 = vpop.f32.mrf.mxu0  ;;  %v7511_v1 = vpop.f32.mrf.mxu1 }
 0xdac   : > { %v7354_v42 = vadd.f32 %v7348_v17, %v7297_v20  ;;  %v12768_v17 = vld [vmem:[%s14582_s1] sm:$0xff]   ;;  %v12772_v20 = vld [vmem:[%s14582_s1 + $0x30] sm:$0xff]  }
 0xdad   : > { %v11998_v50 = vpop.f32.mrf.mxu0  ;;  %v12016_v25 = vpop.f32.mrf.mxu1 }
 0xdae   : > { %v12769_v25 = vld [vmem:[%s14582_s1 + $0x28] sm:$0xff]  }
 0xdaf   : > { %v7351_v30 = vpop.f32.mrf.mxu0  ;;  %v7514_v46 = vpop.f32.mrf.mxu1 }
 0xdb1   : > { %v11999_v33 = vpop.f32.mrf.mxu0  ;;  %v12017_v34 = vpop.f32.mrf.mxu1 }
 0xdb2   : > { %v12770_v33 = vld [vmem:[%s14582_s1 + $0x20] sm:$0xff]  }
 0xdb3   : > { %v7403_v5 = vpop.f32.mrf.mxu0  ;;  %v7619_v27 = vpop.f32.mrf.mxu1 }
 0xdb4   : > { %v7409_v55 = vadd.f32 %v7403_v5, %v7354_v42  ;;  %v12781_v42 = vld [vmem:[%s14582_s1 + $0x70] sm:$0xff]  }
 0xdb5   : > { %v12004_v28 = vpop.f32.mrf.mxu0  ;;  %v12028_v63 = vpop.f32.mrf.mxu1 }
 0xdb6   : > { %v12771_v28 = vld [vmem:[%s14582_s1 + $0x38] sm:$0xff]  }
 0xdb7   : > { %v7406_v12 = vpop.f32.mrf.mxu0  ;;  %v7622_v19 = vpop.f32.mrf.mxu1 }
 0xdb9   : > { %v12005_v32 = vpop.f32.mrf.mxu0  ;;  %v12029_v44 = vpop.f32.mrf.mxu1 }
 0xdba   : > { %v12779_v32 = vld [vmem:[%s14582_s1 + $0x78] sm:$0xff]  }
 0xdbb   : > { %v7456_v23 = vpop.f32.mrf.mxu0  ;;  %v7727_v8 = vpop.f32.mrf.mxu1 }
 0xdbc   : > { %v7462_v36 = vadd.f32 %v7456_v23, %v7409_v55  ;;  %v7733_v15 = vpack.c.bf16 %v7727_v8, %v7727_v8 }
 0xdbd   : > { %v12010_v59 = vpop.f32.mrf.mxu0  ;;  %v12040_v57 = vpop.f32.mrf.mxu1 }
 0xdbe   : > { %v7517_v39 = vadd.f32 %v7511_v1, %v7462_v36  ;;  %12045 = vmatmul.mubr.msk.bf16.vlgmr.msra.gmra.mxu0 %vm6427_vm5, %v7733_v15 }
 0xdbf   : > { %v7459_v13 = vpop.f32.mrf.mxu0  ;;  %v7730_v9 = vpop.f32.mrf.mxu1  ;;  %12074 = vmatprep.mubr.msk.bf16.mxu0 %vm12951_vm4, %v12950_v31  ;;  %12071 = vmatpush3.bf16.msra.mxu0 %v12765_v11 }
 0xdc0   : > { %12072 = vmatprep.subr.bf16.mxu0 %v12950_v31  ;;  %v12773_v13 = vld [vmem:[%s14582_s1 + $0x48] sm:$0xff]  }
 0xdc1   : > { %v12011_v48 = vpop.f32.mrf.mxu0  ;;  %v12041_v10 = vpop.f32.mrf.mxu1 }
 0xdc3   : > { %v7564_v29 = vpop.f32.mrf.mxu0  ;;  %12073 = vmatpush3.bf16.msra.mxu0 %v12766_v40 }
 0xdc4   : > { %v7570_v45 = vadd.f32 %v7564_v29, %v7517_v39  ;;  %12078 = vmatprep.subr.bf16.mxu0 %v12950_v31 }
 0xdc5   : > { %v12022_v41 = vpop.f32.mrf.mxu0 }
 0xdc6   : > { %v7625_v16 = vadd.f32 %v7619_v27, %v7570_v45  ;;  %v12774_v41 = vld [vmem:[%s14582_s1 + $0x40] sm:$0xff]  }
 0xdc7   : > { %v7567_v51 = vpop.f32.mrf.mxu0 }
 0xdc9   : > { %v12023_v22 = vpop.f32.mrf.mxu0 }
 0xdca   : > { %v12776_v22 = vld [vmem:[%s14582_s1 + $0x68] sm:$0xff]  }
 0xdcb   : > { %v7672_v53 = vpop.f32.mrf.mxu0 }
 0xdcc   : > { %v7678_v47 = vadd.f32 %v7672_v53, %v7625_v16  ;;  %v12778_v53 = vld [vmem:[%s14582_s1 + $0x60] sm:$0xff]  }
 0xdcd   : > { %v12034_v2 = vpop.f32.mrf.mxu0 }
 0xdce   : > { %v7686_v58 = vadd.f32 %v10752_v35, %v7678_v47  ;;  %v12780_v35 = vld [vmem:[%s14582_s1 + $0x88] sm:$0xff]   ;;  %v12782_v47 = vld [vmem:[%s14582_s1 + $0x80] sm:$0xff]   ;;  %s14583_s1 = sld [smem:[#allocation22_spill]] }
 0xdcf   : > { %v7675_v60 = vpop.f32.mrf.mxu0 }
 0xdd0   : > { %v7687_v0 = vmax.f32 %v7686_v58, 0.0 }
 0xdd1   : > { %v12035_v4 = vpop.f32.mrf.mxu0 }
 0xdd2   : > { %v7688_v38 = vpack.c.bf16 %v7687_v0, %v7687_v0 }
 0xdd4   : > { %v7840_v43 = vsel %vm1461_vm1, %v7688_v38, 0 }
 0xdd5   : > { %12049 = vmatpush3.bf16.msra.mxu1 %v7840_v43 }
 0xdd6   : > { %12110 = vmatprep.subr.bf16.mxu1 %v12950_v31 }
 0xdd8   : > { %12051 = vmatmul.mubr.msk.bf16.vlgmr.msra.gmra.mxu1 %vm3216_vm3, %v12759_v18 }
 0xdd9   : > { %12054 = vmatprep.mubr.msk.bf16.mxu1 %vm12951_vm4, %v12950_v31  ;;  %12111 = vmatpush3.bf16.msra.mxu1 %v12775_v61 }
 0xdda   : > { %12112 = vmatprep.subr.bf16.mxu1 %v12950_v31 }
 0xddd   : > { %12113 = vmatpush3.bf16.msra.mxu1 %v12777_v62 }
 0xdde   : > { %12126 = vmatprep.subr.bf16.mxu1 %v12950_v31 }
 0xde0   : > { %12055 = vmatmul.mubr.msk.bf16.gmra.mxu1 %vm3216_vm3, %v12760_v37 }
 0xde1   : > { %12058 = vmatprep.mubr.msk.bf16.mxu1 %vm12951_vm4, %v12950_v31 }
 0xde8   : > { %12059 = vmatmul.mubr.msk.bf16.gmra.mxu1 %vm3216_vm3, %v12761_v26 }
 0xde9   : > { %12062 = vmatprep.mubr.msk.bf16.mxu1 %vm12951_vm4, %v12950_v31 }
 0xdf0   : > { %12063 = vmatmul.mubr.msk.bf16.gmra.mxu1 %vm3216_vm3, %v12762_v56 }
 0xdf1   : > { %12066 = vmatprep.mubr.msk.bf16.mxu1 %vm12951_vm4, %v12950_v31 }
 0xdf8   : > { %12067 = vmatmul.mubr.msk.bf16.gmra.mxu1 %vm3216_vm3, %v12763_v49 }
 0xdf9   : > { %12114 = vmatprep.mubr.msk.bf16.mxu1 %vm12951_vm4, %v12950_v31 }
 0xe7e   : > { %v7786_v58 = vpop.f32.mrf.mxu0 }
 0xe80   : > { %v12046_v60 = vpop.f32.mrf.mxu0 }
 0xe82   : > { %v7789_v0 = vpop.f32.mrf.mxu0 }
 0xe84   : > { %v12047_v4 = vpop.f32.mrf.mxu0 }
 0xe98   : > { %v7876_v6 = vpop.f32.mrf.mxu1 }
 0xe9a   : > { %v12052_v3 = vpop.f32.mrf.mxu1 }
 0xe9c   : > { %v7879_v7 = vpop.f32.mrf.mxu1 }
 0xe9d   : > { %v7914_v14 = vpack.c.bf16 %v7879_v7, %v7876_v6 }
 0xe9e   : > { %v12053_v54 = vpop.f32.mrf.mxu1 }
 0xe9f   : > { %v7929_v24 = vrot.slane %v7914_v14, 4 }
 0xea0   : > { %v7884_v52 = vpop.f32.mrf.mxu1 }
 0xea1   : > { %12075 = vmatmul.mubr.msk.bf16.vlgmr.msra.gmra.mxu0 %vm7942_vm6, %v7929_v24 }
 0xea2   : > { %12079 = vmatpush3.bf16.msra.mxu0 %v12767_v21  ;;  %12082 = vmatprep.mubr.msk.bf16.mxu0 %vm12951_vm4, %v12950_v31  ;;  %v12056_v1 = vpop.f32.mrf.mxu1 }
 0xea3   : > { %12080 = vmatprep.subr.bf16.mxu0 %v12950_v31 }
 0xea4   : > { %v7887_v50 = vpop.f32.mrf.mxu1 }
 0xea5   : > { %v7915_v12 = vpack.c.bf16 %v7887_v50, %v7884_v52 }
 0xea6   : > { %12081 = vmatpush3.bf16.msra.mxu0 %v12768_v17  ;;  %v12057_v30 = vpop.f32.mrf.mxu1 }
 0xea7   : > { %12086 = vmatprep.subr.bf16.mxu0 %v12950_v31  ;;  %v8108_v48 = vrot.slane %v7915_v12, 4 }
 0xea8   : > { %v7892_v46 = vpop.f32.mrf.mxu1 }
 0xea9   : > { %12083 = vmatmul.mubr.msk.bf16.vlgmr.msra.gmra.mxu0 %vm7942_vm6, %v7914_v14 }
 0xeaa   : > { %12087 = vmatpush3.bf16.msra.mxu0 %v12769_v25  ;;  %12090 = vmatprep.mubr.msk.bf16.mxu0 %vm12951_vm4, %v12950_v31  ;;  %v12060_v34 = vpop.f32.mrf.mxu1 }
 0xeab   : > { %12088 = vmatprep.subr.bf16.mxu0 %v12950_v31 }
 0xeac   : > { %v7895_v5 = vpop.f32.mrf.mxu1 }
 0xead   : > { %v7916_v27 = vpack.c.bf16 %v7895_v5, %v7892_v46 }
 0xeae   : > { %12089 = vmatpush3.bf16.msra.mxu0 %v12770_v33  ;;  %v12061_v63 = vpop.f32.mrf.mxu1 }
 0xeaf   : > { %12094 = vmatprep.subr.bf16.mxu0 %v12950_v31  ;;  %v8232_v19 = vrot.slane %v7916_v27, 4 }
 0xeb0   : > { %v7900_v44 = vpop.f32.mrf.mxu1 }
 0xeb1   : > { %12091 = vmatmul.mubr.msk.bf16.vlgmr.msra.gmra.mxu0 %vm7942_vm6, %v7915_v12  ;;  %12115 = vmatmul.mubr.msk.bf16.vlgmr.msra.gmra.mxu1 %vm7942_vm6, %v8232_v19 }
 0xeb2   : > { %12095 = vmatpush3.bf16.msra.mxu0 %v12771_v28  ;;  %12098 = vmatprep.mubr.msk.bf16.mxu0 %vm12951_vm4, %v12950_v31  ;;  %v12064_v23 = vpop.f32.mrf.mxu1 }
 0xeb3   : > { %12096 = vmatprep.subr.bf16.mxu0 %v12950_v31  ;;  %12127 = vmatpush3.bf16.msra.mxu1 %v12779_v32  ;;  %v10826_v23 = vld [vmem:[%s14584_s3] ss:$0 sm:$0xff]  ;;  %s14586_s3 = sld [smem:[#allocation27_spill]] }
 0xeb4   : > { %v7903_v59 = vpop.f32.mrf.mxu1  ;;  %12128 = vmatprep.subr.bf16.mxu1 %v12950_v31  ;;  %12130 = vmatprep.mubr.msk.bf16.mxu1 %vm12951_vm4, %v12950_v31 }
 0xeb5   : > { %v7917_v55 = vpack.c.bf16 %v7903_v59, %v7900_v44  ;;  %v10754_v44 = vld [vmem:[%s14583_s1] ss:$0 sm:$0xff]  ;;  %s14587_s1 = sld [smem:[#allocation29_spill]] }
 0xeb6   : > { %12097 = vmatpush3.bf16.msra.mxu0 %v12772_v20  ;;  %v12065_v36 = vpop.f32.mrf.mxu1 }
 0xeb7   : > { %12102 = vmatprep.subr.bf16.mxu0 %v12950_v31  ;;  %v8356_v29 = vrot.slane %v7917_v55, 4  ;;  %12129 = vmatpush3.bf16.msra.mxu1 %v12781_v42 }
 0xeb8   : > { %v7908_v39 = vpop.f32.mrf.mxu1  ;;  %12142 = vmatprep.subr.bf16.mxu1 %v12950_v31 }
 0xeb9   : > { %12099 = vmatmul.mubr.msk.bf16.vlgmr.msra.gmra.mxu0 %vm7942_vm6, %v8108_v48  ;;  %v7918_v2 = vpack.c.bf16 %v7908_v39, %v7908_v39  ;;  %v12789_v60 = vld [vmem:[%s14586_s3 + $0x50] sm:$0xff]  }
 0xeba   : > { %12103 = vmatpush3.bf16.msra.mxu0 %v12773_v13  ;;  %12106 = vmatprep.mubr.msk.bf16.mxu0 %vm12951_vm4, %v12950_v31  ;;  %v12068_v45 = vpop.f32.mrf.mxu1 }
 0xebb   : > { %12104 = vmatprep.subr.bf16.mxu0 %v12950_v31  ;;  %12131 = vmatmul.mubr.msk.bf16.vlgmr.msra.gmra.mxu1 %vm7942_vm6, %v8356_v29 }
 0xebc   : > { %v7911_v51 = vpop.f32.mrf.mxu1  ;;  %12144 = vmatprep.mubr.msk.bf16.mxu1 %vm12951_vm4, %v12950_v31 }
 0xebd   : > { %v12783_v51 = vld [vmem:[%s14585_s5] sm:$0xff]  }
 0xebe   : > { %12105 = vmatpush3.bf16.msra.mxu0 %v12774_v41  ;;  %v12069_v16 = vpop.f32.mrf.mxu1 }
 0xebf   : > { %12118 = vmatprep.subr.bf16.mxu0 %v12950_v31  ;;  %v12785_v16 = vld [vmem:[%s14585_s5 + $0x10] sm:$0xff]  }
 0xec1   : > { %12107 = vmatmul.mubr.msk.bf16.vlgmr.msra.gmra.mxu0 %vm7942_vm6, %v7916_v27 }
 0xec2   : > { %12119 = vmatpush3.bf16.msra.mxu0 %v12776_v22  ;;  %12122 = vmatprep.mubr.msk.bf16.mxu0 %vm12951_vm4, %v12950_v31  ;;  %v12784_v22 = vld [vmem:[%s14585_s5 + $0x8] sm:$0xff]  }
 0xec3   : > { %12120 = vmatprep.subr.bf16.mxu0 %v12950_v31 }
 0xec6   : > { %12121 = vmatpush3.bf16.msra.mxu0 %v12778_v53  ;;  %v12786_v53 = vld [vmem:[%s14585_s5 + $0x18] sm:$0xff]  }
 0xec7   : > { %12134 = vmatprep.subr.bf16.mxu0 %v12950_v31 }
 0xec9   : > { %12123 = vmatmul.mubr.msk.bf16.vlgmr.msra.gmra.mxu0 %vm7942_vm6, %v7917_v55  ;;  %v7787_v55 = vadd.f32 %v10754_v44, %v7786_v58  ;;  %v12788_v58 = vld [vmem:[%s14586_s3 + $0x58] sm:$0xff]   ;;  %v12805_v44 = vld [vmem:[%s14586_s3 + $0x80] sm:$0xff]  }
 0xeca   : > { %12135 = vmatpush3.bf16.msra.mxu0 %v12780_v35  ;;  %12138 = vmatprep.mubr.msk.bf16.mxu0 %vm12951_vm4, %v12950_v31  ;;  %v12787_v35 = vld [vmem:[%s14585_s5 + $0x20] ss:$0 sps:$4 sm:$0xff]   ;;  %s14588_s5 = sld [smem:[#allocation30_spill]] }
 0xecb   : > { %12136 = vmatprep.subr.bf16.mxu0 %v12950_v31 }
 0xece   : > { %12137 = vmatpush3.bf16.msra.mxu0 %v12782_v47  ;;  %v12792_v47 = vld [vmem:[%s14586_s3 + $0x18] sm:$0xff]  }
 0xecf   : > { %12164 = vmatprep.subr.bf16.mxu0 %v12950_v31 }
 0xed1   : > { %12139 = vmatmul.mubr.msk.bf16.vlgmr.msra.gmra.mxu0 %vm7942_vm6, %v7918_v2  ;;  %v12793_v2 = vld [vmem:[%s14586_s3 + $0x10] sm:$0xff]  }
 0xed2   : > { %12168 = vmatprep.mubr.msk.bf16.mxu0 %vm12951_vm4, %v12950_v31  ;;  %12165 = vmatpush3.bf16.msra.mxu0 %v12792_v47 }
 0xed3   : > { %12166 = vmatprep.subr.bf16.mxu0 %v12950_v31 }
 0xed6   : > { %12167 = vmatpush3.bf16.msra.mxu0 %v12793_v2 }
 0xed7   : > { %12172 = vmatprep.subr.bf16.mxu0 %v12950_v31 }
 0xf61   : > { %v7980_v38 = vpop.f32.mrf.mxu0 }
 0xf63   : > { %v12076_v43 = vpop.f32.mrf.mxu0 }
 0xf65   : > { %v7983_v18 = vpop.f32.mrf.mxu0 }
 0xf67   : > { %v12077_v37 = vpop.f32.mrf.mxu0 }
 0xf68   : > { %v12794_v37 = vld [vmem:[%s14586_s3 + $0x8] sm:$0xff]  }
 0xf69   : > { %v8035_v26 = vpop.f32.mrf.mxu0 }
 0xf6a   : > { %v8036_v52 = vadd.f32 %v8035_v26, %v7980_v38 }
 0xf6b   : > { %v12084_v56 = vpop.f32.mrf.mxu0 }
 0xf6d   : > { %v8038_v49 = vpop.f32.mrf.mxu0 }
 0xf6f   : > { %v12085_v8 = vpop.f32.mrf.mxu0 }
 0xf70   : > { %v12795_v8 = vld [vmem:[%s14586_s3] sm:$0xff]  }
 0xf71   : > { %v8095_v15 = vpop.f32.mrf.mxu0  ;;  %v8282_v57 = vpop.f32.mrf.mxu1 }
 0xf72   : > { %v8101_v50 = vadd.f32 %v8095_v15, %v8036_v52  ;;  %v12791_v52 = vld [vmem:[%s14586_s3 + $0x70] sm:$0xff]  }
 0xf73   : > { %v12092_v9 = vpop.f32.mrf.mxu0  ;;  %v12116_v10 = vpop.f32.mrf.mxu1 }
 0xf74   : > { %v12796_v9 = vld [vmem:[%s14586_s3 + $0x28] sm:$0xff]  }
 0xf75   : > { %v8098_v11 = vpop.f32.mrf.mxu0  ;;  %v8285_v40 = vpop.f32.mrf.mxu1 }
 0xf76   : > { %v12797_v40 = vld [vmem:[%s14586_s3 + $0x20] sm:$0xff]  }
 0xf77   : > { %v12093_v61 = vpop.f32.mrf.mxu0  ;;  %v12117_v62 = vpop.f32.mrf.mxu1 }
 0xf79   : > { %v8158_v6 = vpop.f32.mrf.mxu0 }
 0xf7a   : > { %v8164_v30 = vadd.f32 %v8158_v6, %v8101_v50 }
 0xf7b   : > { %v12100_v3 = vpop.f32.mrf.mxu0  ;;  %v8406_v7 = vpop.f32.mrf.mxu1 }
 0xf7c   : > { %v12790_v3 = vld [vmem:[%s14586_s3 + $0x78] sm:$0xff]  }
 0xf7d   : > { %v8161_v14 = vpop.f32.mrf.mxu0  ;;  %v12132_v21 = vpop.f32.mrf.mxu1 }
 0xf7e   : > { %v12798_v21 = vld [vmem:[%s14586_s3 + $0x38] sm:$0xff]  }
 0xf7f   : > { %v12101_v54 = vpop.f32.mrf.mxu0  ;;  %v8409_v24 = vpop.f32.mrf.mxu1 }
 0xf81   : > { %v8219_v17 = vpop.f32.mrf.mxu0  ;;  %v12133_v1 = vpop.f32.mrf.mxu1 }
 0xf82   : > { %v8225_v33 = vadd.f32 %v8219_v17, %v8164_v30  ;;  %v12799_v17 = vld [vmem:[%s14586_s3 + $0x30] sm:$0xff]  }
 0xf83   : > { %v12108_v25 = vpop.f32.mrf.mxu0 }
 0xf84   : > { %v8288_v27 = vadd.f32 %v8282_v57, %v8225_v33 }
 0xf85   : > { %v8222_v46 = vpop.f32.mrf.mxu0 }
 0xf86   : > { %v12800_v46 = vld [vmem:[%s14586_s3 + $0x48] sm:$0xff]  }
 0xf87   : > { %v12109_v34 = vpop.f32.mrf.mxu0 }
 0xf89   : > { %v8343_v5 = vpop.f32.mrf.mxu0 }
 0xf8a   : > { %v8349_v63 = vadd.f32 %v8343_v5, %v8288_v27  ;;  %v12801_v27 = vld [vmem:[%s14586_s3 + $0x40] sm:$0xff]  }
 0xf8b   : > { %v12124_v28 = vpop.f32.mrf.mxu0 }
 0xf8c   : > { %v8412_v32 = vadd.f32 %v8406_v7, %v8349_v63 }
 0xf8d   : > { %v8346_v12 = vpop.f32.mrf.mxu0 }
 0xf8e   : > { %v12802_v12 = vld [vmem:[%s14586_s3 + $0x68] sm:$0xff]  }
 0xf8f   : > { %v12125_v19 = vpop.f32.mrf.mxu0 }
 0xf90   : > { %v12803_v19 = vld [vmem:[%s14586_s3 + $0x60] sm:$0xff]  }
 0xf91   : > { %v8467_v20 = vpop.f32.mrf.mxu0 }
 0xf92   : > { %v8473_v42 = vadd.f32 %v8467_v20, %v8412_v32  ;;  %v12804_v32 = vld [vmem:[%s14586_s3 + $0x88] sm:$0xff]   ;;  %s14590_s3 = sld [smem:[#allocation32_spill]] }
 0xf93   : > { %v12140_v59 = vpop.f32.mrf.mxu0 }
 0xf94   : > { %v8481_v13 = vadd.f32 %v10826_v23, %v8473_v42  ;;  %v9176_v23 = vld [vmem:[%s14587_s1] sm:$0xf]  ;;  %v12811_v42 = vld [vmem:[%s14588_s5 + $0x8] sm:$0xff]   ;;  %s14589_s1 = sld [smem:[#allocation28_spill]] }
 0xf95   : > { %v8470_v36 = vpop.f32.mrf.mxu0  ;;  %v12812_v59 = vld [vmem:[%s14588_s5] sm:$0xff]  }
 0xf96   : > { %v8482_v48 = vadd.f32 %v8481_v13, %v7787_v55 }
 0xf97   : > { %v12141_v29 = vpop.f32.mrf.mxu0 }
 0xf98   : > { %v8483_v39 = vmax.f32 %v8482_v48, 0.0 }
 0xf9a   : > { %v8484_v41 = vpack.c.bf16 %v8483_v39, %v8483_v39 }
 0xf9c   : > { %v14222_v45 = vsel %vm1461_vm1, %v8484_v41, 0 }
 0xf9d   : > { %12143 = vmatpush3.bf16.msra.mxu1 %v14222_v45 }
 0xf9e   : > { %12204 = vmatprep.subr.bf16.mxu1 %v12950_v31 }
 0xfa0   : > { %12145 = vmatmul.mubr.msk.bf16.vlgmr.msra.gmra.mxu1 %vm3216_vm3, %v12783_v51 }
 0xfa1   : > { %12148 = vmatprep.mubr.msk.bf16.mxu1 %vm12951_vm4, %v12950_v31  ;;  %12205 = vmatpush3.bf16.msra.mxu1 %v12788_v58 }
 0xfa2   : > { %12206 = vmatprep.subr.bf16.mxu1 %v12950_v31 }
 0xfa5   : > { %12207 = vmatpush3.bf16.msra.mxu1 %v12789_v60 }
 0xfa6   : > { %12220 = vmatprep.subr.bf16.mxu1 %v12950_v31 }
 0xfa8   : > { %12149 = vmatmul.mubr.msk.bf16.gmra.mxu1 %vm3216_vm3, %v12784_v22 }
 0xfa9   : > { %12152 = vmatprep.mubr.msk.bf16.mxu1 %vm12951_vm4, %v12950_v31 }
 0xfb0   : > { %12153 = vmatmul.mubr.msk.bf16.gmra.mxu1 %vm3216_vm3, %v12785_v16 }
 0xfb1   : > { %12156 = vmatprep.mubr.msk.bf16.mxu1 %vm12951_vm4, %v12950_v31 }
 0xfb8   : > { %12157 = vmatmul.mubr.msk.bf16.gmra.mxu1 %vm3216_vm3, %v12786_v53 }
 0xfb9   : > { %12160 = vmatprep.mubr.msk.bf16.mxu1 %vm12951_vm4, %v12950_v31 }
 0xfc0   : > { %12161 = vmatmul.mubr.msk.bf16.gmra.mxu1 %vm3216_vm3, %v12787_v35 }
 0xfc1   : > { %12208 = vmatprep.mubr.msk.bf16.mxu1 %vm12951_vm4, %v12950_v31 }
0x1060   : > { %v8569_v0 = vpop.f32.mrf.mxu1 }
0x1062   : > { %v12146_v4 = vpop.f32.mrf.mxu1 }
0x1064   : > { %v8572_v38 = vpop.f32.mrf.mxu1 }
0x1065   : > { %v8607_v43 = vpack.c.bf16 %v8572_v38, %v8569_v0 }
0x1066   : > { %v12147_v18 = vpop.f32.mrf.mxu1 }
0x1067   : > { %v8622_v26 = vrot.slane %v8607_v43, 4 }
0x1068   : > { %v8577_v56 = vpop.f32.mrf.mxu1 }
0x1069   : > { %12169 = vmatmul.mubr.msk.bf16.vlgmr.msra.gmra.mxu0 %vm7942_vm6, %v8622_v26 }
0x106a   : > { %v12150_v49 = vpop.f32.mrf.mxu1  ;;  %12173 = vmatpush3.bf16.msra.mxu0 %v12794_v37  ;;  %12176 = vmatprep.mubr.msk.bf16.mxu0 %vm12951_vm4, %v12950_v31 }
0x106b   : > { %12174 = vmatprep.subr.bf16.mxu0 %v12950_v31 }
0x106c   : > { %v8580_v15 = vpop.f32.mrf.mxu1 }
0x106d   : > { %v8608_v7 = vpack.c.bf16 %v8580_v15, %v8577_v56 }
0x106e   : > { %v12151_v57 = vpop.f32.mrf.mxu1  ;;  %12175 = vmatpush3.bf16.msra.mxu0 %v12795_v8 }
0x106f   : > { %12180 = vmatprep.subr.bf16.mxu0 %v12950_v31  ;;  %v8800_v33 = vrot.slane %v8608_v7, 4 }
0x1070   : > { %v8585_v10 = vpop.f32.mrf.mxu1 }
0x1071   : > { %12177 = vmatmul.mubr.msk.bf16.vlgmr.msra.gmra.mxu0 %vm7942_vm6, %v8607_v43 }
0x1072   : > { %v12154_v11 = vpop.f32.mrf.mxu1  ;;  %12181 = vmatpush3.bf16.msra.mxu0 %v12796_v9  ;;  %12184 = vmatprep.mubr.msk.bf16.mxu0 %vm12951_vm4, %v12950_v31 }
0x1073   : > { %12182 = vmatprep.subr.bf16.mxu0 %v12950_v31 }
0x1074   : > { %v8588_v61 = vpop.f32.mrf.mxu1 }
0x1075   : > { %v8609_v62 = vpack.c.bf16 %v8588_v61, %v8585_v10 }
0x1076   : > { %v12155_v6 = vpop.f32.mrf.mxu1  ;;  %12183 = vmatpush3.bf16.msra.mxu0 %v12797_v40 }
0x1077   : > { %v8924_v14 = vrot.slane %v8609_v62, 4  ;;  %12188 = vmatprep.subr.bf16.mxu0 %v12950_v31 }
0x1078   : > { %v8593_v54 = vpop.f32.mrf.mxu1 }
0x1079   : > { %12209 = vmatmul.mubr.msk.bf16.vlgmr.msra.gmra.mxu1 %vm7942_vm6, %v8924_v14  ;;  %12185 = vmatmul.mubr.msk.bf16.vlgmr.msra.gmra.mxu0 %vm7942_vm6, %v8608_v7 }
0x107a   : > { %12221 = vmatpush3.bf16.msra.mxu1 %v12790_v3  ;;  %v12158_v24 = vpop.f32.mrf.mxu1  ;;  %12224 = vmatprep.mubr.msk.bf16.mxu1 %vm12951_vm4, %v12950_v31 }
0x107b   : > { %12222 = vmatprep.subr.bf16.mxu1 %v12950_v31  ;;  %12189 = vmatpush3.bf16.msra.mxu0 %v12798_v21 }
0x107c   : > { %v8596_v1 = vpop.f32.mrf.mxu1  ;;  %12190 = vmatprep.subr.bf16.mxu0 %v12950_v31  ;;  %12192 = vmatprep.mubr.msk.bf16.mxu0 %vm12951_vm4, %v12950_v31 }
0x107d   : > { %v8610_v50 = vpack.c.bf16 %v8596_v1, %v8593_v54  ;;  %v10896_v54 = vld [vmem:[%s14589_s1] ss:$0 sm:$0xff]  ;;  %s14592_s1 = sld [smem:[#allocation31_spill]] }
0x107e   : > { %12223 = vmatpush3.bf16.msra.mxu1 %v12791_v52  ;;  %v12159_v25 = vpop.f32.mrf.mxu1 }
0x107f   : > { %v9048_v30 = vrot.slane %v8610_v50, 4  ;;  %12236 = vmatprep.subr.bf16.mxu1 %v12950_v31  ;;  %12191 = vmatpush3.bf16.msra.mxu0 %v12799_v17 }
0x1080   : > { %12196 = vmatprep.subr.bf16.mxu0 %v12950_v31  ;;  %v8601_v34 = vpop.f32.mrf.mxu1 }
0x1081   : > { %12225 = vmatmul.mubr.msk.bf16.vlgmr.msra.gmra.mxu1 %vm7942_vm6, %v9048_v30  ;;  %v8611_v20 = vpack.c.bf16 %v8601_v34, %v8601_v34  ;;  %v12807_v34 = vld [vmem:[%s14590_s3 + $0x8] sm:$0xff]  }
0x1082   : > { %12237 = vmatpush3.bf16.msra.mxu1 %v14222_v45  ;;  %12193 = vmatmul.mubr.msk.bf16.vlgmr.msra.gmra.mxu0 %vm7942_vm6, %v8800_v33  ;;  %v12162_v5 = vpop.f32.mrf.mxu1  ;;  %v12806_v33 = vld [vmem:[%s14590_s3] sm:$0xff]  }
0x1083   : > { %12197 = vmatpush3.bf16.msra.mxu0 %v12800_v46  ;;  %12200 = vmatprep.mubr.msk.bf16.mxu0 %vm12951_vm4, %v12950_v31  ;;  %v12808_v5 = vld [vmem:[%s14590_s3 + $0x10] sm:$0xff]  }
0x1084   : > { %12198 = vmatprep.subr.bf16.mxu0 %v12950_v31  ;;  %v8604_v28 = vpop.f32.mrf.mxu1  ;;  %12238 = vmatprep.mubr.msk.bf16.mxu1 %vm12951_vm4, %v12950_v31 }
0x1085   : > { %12250 = vmatprep.subr.bf16.mxu1 %v12950_v31  ;;  %v12810_v28 = vld [vmem:[%s14590_s3 + $0x20] ss:$0 sps:$4 sm:$0xff]  }
0x1086   : > { %v12163_v63 = vpop.f32.mrf.mxu1 }
0x1087   : > { %12199 = vmatpush3.bf16.msra.mxu0 %v12801_v27  ;;  %v12809_v27 = vld [vmem:[%s14590_s3 + $0x18] sm:$0xff]   ;;  %s1145_s3 = sand.u32 1, %s12901_s16  }
0x1088   : > { %12212 = vmatprep.subr.bf16.mxu0 %v12950_v31  ;;  %s10139_s8 = scalar_lea.sflag [#allocation3], %s1145_s3 }
0x1089   : > { %12239 = vmatmul.mubr.msk.bf16.vlgmr.msra.gmra.mxu1 %vm3216_vm3, %v9176_v23 }
0x108a   : > { %12201 = vmatmul.mubr.msk.bf16.vlgmr.msra.gmra.mxu0 %vm7942_vm6, %v8609_v62  ;;  %12252 = vmatprep.mubr.msk.bf16.mxu1 %vm12951_vm4, %v12950_v31 }
0x108b   : > { %12213 = vmatpush3.bf16.msra.mxu0 %v12802_v12  ;;  %12216 = vmatprep.mubr.msk.bf16.mxu0 %vm12951_vm4, %v12950_v31  ;;  %v12813_v12 = vld [vmem:[%s13136_s20 + $0x38] sm:$0xff]  }
0x108c   : > { %12214 = vmatprep.subr.bf16.mxu0 %v12950_v31 }
0x108f   : > { %12215 = vmatpush3.bf16.msra.mxu0 %v12803_v19 }
0x1090   : > { %12228 = vmatprep.subr.bf16.mxu0 %v12950_v31 }
0x1092   : > { %12217 = vmatmul.mubr.msk.bf16.vlgmr.msra.gmra.mxu0 %vm7942_vm6, %v8610_v50 }
0x1093   : > { %12229 = vmatpush3.bf16.msra.mxu0 %v12804_v32  ;;  %12232 = vmatprep.mubr.msk.bf16.mxu0 %vm12951_vm4, %v12950_v31 }
0x1094   : > { %12230 = vmatprep.subr.bf16.mxu0 %v12950_v31 }
0x1097   : > { %12231 = vmatpush3.bf16.msra.mxu0 %v12805_v44 }
0x1098   : > { %12242 = vmatprep.subr.bf16.mxu0 %v12950_v31 }
0x109a   : > { %12233 = vmatmul.mubr.msk.bf16.vlgmr.msra.gmra.mxu0 %vm7942_vm6, %v8611_v20  ;;  %v12814_v20 = vld [vmem:[%s13136_s20 + $0x30] sm:$0xff]  }
0x109b   : > { %12246 = vmatprep.mubr.msk.bf16.mxu0 %vm12951_vm4, %v12950_v31  ;;  %12243 = vmatpush3.bf16.msra.mxu0 %v12811_v42  ;;  %v12815_v42 = vld [vmem:[%s13136_s20 + $0x28] sm:$0xff]  }
0x109c   : > { %12244 = vmatprep.subr.bf16.mxu0 %v12950_v31 }
0x109f   : > { %12245 = vmatpush3.bf16.msra.mxu0 %v12812_v59  ;;  %v12818_v59 = vld [vmem:[%s13136_s20 + $0x58] sm:$0xff]  }
0x10a0   : > { %12272 = vmatprep.subr.bf16.mxu0 %v12950_v31 }
0x1129   : > { %v8672_v55 = vpop.f32.mrf.mxu0 }
0x112b   : > { %v12170_v13 = vpop.f32.mrf.mxu0 }
0x112c   : > { %v12820_v13 = vld [vmem:[%s13136_s20 + $0x50] sm:$0xff]  }
0x112d   : > { %v8675_v36 = vpop.f32.mrf.mxu0 }
0x112e   : > { %v12822_v36 = vld [vmem:[%s13136_s20 + $0x48] sm:$0xff]  }
0x112f   : > { %v12171_v48 = vpop.f32.mrf.mxu0 }
0x1130   : > { %v12824_v48 = vld [vmem:[%s13136_s20 + $0x40] sm:$0xff]  }
0x1131   : > { %v8727_v29 = vpop.f32.mrf.mxu0 }
0x1132   : > { %v8728_v56 = vadd.f32 %v8727_v29, %v8672_v55  ;;  %v12816_v55 = vld [vmem:[%s13136_s20 + $0x20] sm:$0xff]  }
0x1133   : > { %v12178_v39 = vpop.f32.mrf.mxu0  ;;  %v10122_v29 = vld [vmem:[%s14591_s4] sm:$0xff]  ;;  %s1146_s4 = scalar_lea.vmem [#allocation2], %s1145_s3 }
0x1134   : > { %10125 = vperm.xlu0 %12478, %v10122_v29   ;;  %s10151_s5 = sshll.u32 %s1146_s4, 4  ;;  %s10152_s5 = int_to_ptr.vmem [resolvable:$true] %s10151_s5 }
0x1135   : > { %v8730_v41 = vpop.f32.mrf.mxu0  ;;  %s12849_s9 = scalar_lea.vmem %s10152_s5, 16  ;;  %p12856_p0 = scmp.lt.s32.totalorder %s10152_s5, %s12854_s13 }
0x1136   : > { %p12850_p11 = scmp.ne.s32.totalorder %s10152_s5, %s12849_s9  ;;  %p12857_p1 = scmp.lt.s32.totalorder %s12855_s14, %s12849_s9 }
0x1137   : > { %v12179_v45 = vpop.f32.mrf.mxu0 }
0x1138   : > { %p12851_p12 = pnand %p12850_p11, %p13191_p5  ;;  %p12858_p2 = por %p12857_p1, %p12856_p0 }
0x1139   : > { %v8787_v51 = vpop.f32.mrf.mxu0  ;;  %v8974_v22 = vpop.f32.mrf.mxu1 }
0x113a   : > { %v8793_v8 = vadd.f32 %v8787_v51, %v8728_v56  ;;  %v12830_v56 = vld [vmem:[%s13136_s20 + $0x88] sm:$0xff]   ;;  %p12852_p13 = pneg %p12851_p12 }
0x113b   : > { %v12186_v16 = vpop.f32.mrf.mxu0  ;;  %v12210_v53 = vpop.f32.mrf.mxu1 }
0x113c   : > { %p12859_p3 = pnand %p12858_p2, %p12852_p13 }
0x113d   : > { %v8790_v35 = vpop.f32.mrf.mxu0  ;;  %v8977_v47 = vpop.f32.mrf.mxu1 }
0x113e   : > { %v12819_v47 = vld [vmem:[%s13136_s20 + $0x10] sm:$0xff]  }
0x113f   : > { %v12187_v2 = vpop.f32.mrf.mxu0  ;;  %v12211_v58 = vpop.f32.mrf.mxu1 }
0x1141   : > { %v9098_v60 = vpop.f32.mrf.mxu1 }
0x1142   : > { %v8850_v0 = vpop.f32.mrf.mxu0 }
0x1143   : > { %v12226_v4 = vpop.f32.mrf.mxu1  ;;  %v8856_v57 = vadd.f32 %v8850_v0, %v8793_v8  ;;  %v12825_v8 = vld [vmem:[%s13136_s20 + $0x78] sm:$0xff]  }
0x1144   : > { %v12194_v38 = vpop.f32.mrf.mxu0  ;;  %v12821_v4 = vld [vmem:[%s13136_s20 + $0x8] sm:$0xff]  }
0x1145   : > { %v9101_v43 = vpop.f32.mrf.mxu1 }
0x1146   : > { %v8853_v18 = vpop.f32.mrf.mxu0  ;;  %v12828_v43 = vld [vmem:[%s13136_s20 + $0x90] sm:$0xff]  }
0x1147   : > { %v12227_v37 = vpop.f32.mrf.mxu1 }
0x1148   : > { %v12195_v26 = vpop.f32.mrf.mxu0  ;;  %v12823_v37 = vld [vmem:[%s13136_s20] sm:$0xff]  }
0x1149   : > { %v9214_v63 = vpop.f32.mrf.mxu1 }
0x114a   : > { %v8911_v49 = vpop.f32.mrf.mxu0  ;;  %v9220_v19 = vpack.c.bf16 %v9214_v63, %v9214_v63  ;;  %v12846_v63 = vld [vmem:[%s13136_s20 + $0x108] sm:$0xff]  }
0x114b   : > { %v8917_v10 = vadd.f32 %v8911_v49, %v8856_v57  ;;  %v12240_v32 = vpop.f32.mrf.mxu1  ;;  %v12832_v57 = vld [vmem:[%s13136_s20 + $0x80] sm:$0xff]  }
0x114c   : > { %v12202_v15 = vpop.f32.mrf.mxu0  ;;  %12247 = vmatmul.mubr.msk.bf16.vlgmr.msra.gmra.mxu0 %vm7942_vm6, %v9220_v19  ;;  %v12841_v19 = vld [vmem:[%s13136_s20 + $0xf8] sm:$0xff]  }
0x114d   : > { %v8980_v61 = vadd.f32 %v8974_v22, %v8917_v10  ;;  %12273 = vmatpush3.bf16.msra.mxu0 %v12813_v12  ;;  %v9217_v44 = vpop.f32.mrf.mxu1  ;;  %12280 = vmatprep.mubr.msk.bf16.mxu0 %vm12951_vm4, %v12950_v31  ;;  %v12817_v22 = vld [vmem:[%s13136_s20 + $0x18] sm:$0xff]   ;;  %v12827_v10 = vld [vmem:[%s13136_s20 + $0x70] sm:$0xff]  }
0x114e   : > { %v8914_v9 = vpop.f32.mrf.mxu0  ;;  %12274 = vmatprep.subr.bf16.mxu0 %v12950_v31 }
0x114f   : > { %v12241_v23 = vpop.f32.mrf.mxu1 }
0x1150   : > { %v12203_v11 = vpop.f32.mrf.mxu0 }
0x1151   : > { %12275 = vmatpush3.bf16.msra.mxu0 %v12814_v20  ;;  %v12848_v20 = vld [vmem:[%s13136_s20 + $0x100] sm:$0xff]  }
0x1152   : > { %v9035_v40 = vpop.f32.mrf.mxu0  ;;  %12276 = vmatprep.subr.bf16.mxu0 %v12950_v31 }
0x1153   : > { %v9041_v6 = vadd.f32 %v9035_v40, %v8980_v61  ;;  %v12834_v61 = vld [vmem:[%s13136_s20 + $0xd8] sm:$0xff]  }
0x1154   : > { %v12218_v62 = vpop.f32.mrf.mxu0 }
0x1155   : > { %v9104_v14 = vadd.f32 %v9098_v60, %v9041_v6  ;;  %12277 = vmatpush3.bf16.msra.mxu0 %v12815_v42  ;;  %v12826_v60 = vld [vmem:[%s13136_s20 + $0x98] sm:$0xff]   ;;  %v12829_v6 = vld [vmem:[%s13136_s20 + $0x68] sm:$0xff]   ;;  %v12843_v42 = vld [vmem:[%s13136_s20 + $0xf0] sm:$0xff]  }
0x1156   : > { %v9038_v3 = vpop.f32.mrf.mxu0  ;;  %12278 = vmatprep.subr.bf16.mxu0 %v12950_v31 }
0x1158   : > { %v12219_v7 = vpop.f32.mrf.mxu0 }
0x1159   : > { %12279 = vmatpush3.bf16.msra.mxu0 %v12816_v55  ;;  %v12836_v7 = vld [vmem:[%s13136_s20 + $0xd0] sm:$0xff]   ;;  %v12845_v55 = vld [vmem:[%s13136_s20 + $0xe8] sm:$0xff]  }
0x115a   : > { %v9159_v21 = vpop.f32.mrf.mxu0  ;;  %12284 = vmatprep.subr.bf16.mxu0 %v12950_v31 }
0x115b   : > { %v9165_v24 = vadd.f32 %v9159_v21, %v9104_v14  ;;  %v12831_v21 = vld [vmem:[%s13136_s20 + $0x60] sm:$0xff]  }
0x115c   : > { %v12234_v52 = vpop.f32.mrf.mxu0 }
0x115d   : > { %v9173_v17 = vadd.f32 %v10896_v54, %v9165_v24  ;;  %v12838_v24 = vld [vmem:[%s13136_s20 + $0xc8] sm:$0xff]  }
0x115e   : > { %v9162_v1 = vpop.f32.mrf.mxu0 }
0x115f   : > { %v9174_v50 = vmax.f32 %v9173_v17, 0.0  ;;  %v12833_v17 = vld [vmem:[%s13136_s20 + $0xb8] sm:$0xff]  }
0x1160   : > { %v12235_v25 = vpop.f32.mrf.mxu0 }
0x1161   : > { %v9175_v30 = vpack.c.bf16 %v9174_v50, %v9174_v50  ;;  %v12840_v25 = vld [vmem:[%s13136_s20 + $0xc0] sm:$0xff]  }
0x1163   : > { %v9335_v46 = vsel %vm1461_vm1, %v9175_v30, 0  ;;  %v12835_v30 = vld [vmem:[%s13136_s20 + $0xb0] sm:$0xff]  }
0x1164   : > { %12251 = vmatpush3.bf16.msra.mxu1 %v9335_v46 }
0x1165   : > { %12296 = vmatprep.subr.bf16.mxu1 %v12950_v31 }
0x1167   : > { %12253 = vmatmul.mubr.msk.bf16.vlgmr.msra.gmra.mxu1 %vm3216_vm3, %v12806_v33  ;;  %v12842_v33 = vld [vmem:[%s13136_s20 + $0x118] sm:$0xff]  }
0x1168   : > { %12256 = vmatprep.mubr.msk.bf16.mxu1 %vm12951_vm4, %v12950_v31  ;;  %12297 = vmatpush3.bf16.msra.mxu1 %v12818_v59 }
0x1169   : > { %12298 = vmatprep.subr.bf16.mxu1 %v12950_v31 }
0x116c   : > { %12299 = vmatpush3.bf16.msra.mxu1 %v12820_v13  ;;  %v12847_v13 = vld [vmem:[%s13136_s20 + $0xe0] sm:$0xff]  }
0x116d   : > { %12300 = vmatprep.subr.bf16.mxu1 %v12950_v31 }
0x116f   : > { %12257 = vmatmul.mubr.msk.bf16.gmra.mxu1 %vm3216_vm3, %v12807_v34  ;;  %v12837_v34 = vld [vmem:[%s13136_s20 + $0xa8] sm:$0xff]  }
0x1170   : > { %12260 = vmatprep.mubr.msk.bf16.mxu1 %vm12951_vm4, %v12950_v31  ;;  %12301 = vmatpush3.bf16.msra.mxu1 %v12822_v36 }
0x1171   : > { %12302 = vmatprep.subr.bf16.mxu1 %v12950_v31 }
0x1174   : > { %12303 = vmatpush3.bf16.msra.mxu1 %v12824_v48 }
0x1175   : > { %12320 = vmatprep.subr.bf16.mxu1 %v12950_v31 }
0x1177   : > { %12261 = vmatmul.mubr.msk.bf16.gmra.mxu1 %vm3216_vm3, %v12808_v5  ;;  %v12844_v5 = vld [vmem:[%s13136_s20 + $0x110] sm:$0xff]  }
0x1178   : > { %12264 = vmatprep.mubr.msk.bf16.mxu1 %vm12951_vm4, %v12950_v31 }
0x117f   : > { %12265 = vmatmul.mubr.msk.bf16.gmra.mxu1 %vm3216_vm3, %v12809_v27  ;;  %v12839_v27 = vld [vmem:[%s13136_s20 + $0xa0] sm:$0xff]  }
0x1180   : > { %12268 = vmatprep.mubr.msk.bf16.mxu1 %vm12951_vm4, %v12950_v31 }
0x1187   : > { %12269 = vmatmul.mubr.msk.bf16.gmra.mxu1 %vm3216_vm3, %v12810_v28 }
0x1188   : > { %12304 = vmatprep.mubr.msk.bf16.mxu1 %vm12951_vm4, %v12950_v31 }
0x120c   : > { %v14431_v28 = vpop.f32.mrf.mxu0 }
0x120e   : > { %v12248_v12 = vpop.f32.mrf.mxu0 }
0x1210   : > { %v9284_v44 = vpop.f32.mrf.mxu0 }
0x1212   : > { %v12249_v23 = vpop.f32.mrf.mxu0 }
0x1227   : > { %v9371_v39 = vpop.f32.mrf.mxu1 }
0x1229   : > { %v12254_v41 = vpop.f32.mrf.mxu1 }
0x122b   : > { %v9374_v45 = vpop.f32.mrf.mxu1 }
0x122c   : > { %v9409_v51 = vpack.c.bf16 %v9374_v45, %v9371_v39 }
0x122d   : > { %v12255_v16 = vpop.f32.mrf.mxu1 }
0x122e   : > { %v9432_v53 = vrot.slane %v9409_v51, 4 }
0x122f   : > { %v9379_v35 = vpop.f32.mrf.mxu1 }
0x1230   : > { %12281 = vmatmul.mubr.msk.bf16.vlgmr.msra.gmra.mxu0 %vm2747_vm2, %v9432_v53 }
0x1231   : > { %12285 = vmatpush3.bf16.msra.mxu0 %v12817_v22  ;;  %v12258_v2 = vpop.f32.mrf.mxu1  ;;  %12292 = vmatprep.mubr.msk.bf16.mxu0 %vm12951_vm4, %v12950_v31 }
0x1232   : > { %12286 = vmatprep.subr.bf16.mxu0 %v12950_v31 }
0x1233   : > { %v9382_v58 = vpop.f32.mrf.mxu1 }
0x1234   : > { %v14369_v0 = vpack.c.bf16 %v9382_v58, %v9379_v35 }
0x1235   : > { %12287 = vmatpush3.bf16.msra.mxu0 %v12819_v47  ;;  %v12259_v38 = vpop.f32.mrf.mxu1 }
0x1236   : > { %12288 = vmatprep.subr.bf16.mxu0 %v12950_v31  ;;  %12305 = vmatmul.mubr.msk.bf16.vlgmr.msra.gmra.mxu1 %vm2747_vm2, %v14369_v0  ;;  %v9654_v50 = vrot.slane %v14369_v0, 4 }
0x1237   : > { %12321 = vmatpush3.bf16.msra.mxu1 %v12826_v60  ;;  %v9387_v18 = vpop.f32.mrf.mxu1  ;;  %12328 = vmatprep.mubr.msk.bf16.mxu1 %vm12951_vm4, %v12950_v31 }
0x1238   : > { %12322 = vmatprep.subr.bf16.mxu1 %v12950_v31 }
0x1239   : > { %12289 = vmatpush3.bf16.msra.mxu0 %v12821_v4  ;;  %v12262_v26 = vpop.f32.mrf.mxu1 }
0x123a   : > { %12290 = vmatprep.subr.bf16.mxu0 %v12950_v31 }
0x123b   : > { %12323 = vmatpush3.bf16.msra.mxu1 %v12828_v43  ;;  %v9390_v49 = vpop.f32.mrf.mxu1 }
0x123c   : > { %12324 = vmatprep.subr.bf16.mxu1 %v12950_v31  ;;  %v14392_v40 = vpack.c.bf16 %v9390_v49, %v9387_v18 }
0x123d   : > { %12291 = vmatpush3.bf16.msra.mxu0 %v12823_v37  ;;  %v12263_v15 = vpop.f32.mrf.mxu1 }
0x123e   : > { %12308 = vmatprep.subr.bf16.mxu0 %v12950_v31  ;;  %v9810_v32 = vrot.slane %v14392_v40, 4 }
0x123f   : > { %12325 = vmatpush3.bf16.msra.mxu1 %v12830_v56  ;;  %v9395_v9 = vpop.f32.mrf.mxu1 }
0x1240   : > { %12293 = vmatmul.mubr.msk.bf16.vlgmr.msra.gmra.mxu0 %vm2747_vm2, %v9409_v51  ;;  %12326 = vmatprep.subr.bf16.mxu1 %v12950_v31 }
0x1241   : > { %12309 = vmatpush3.bf16.msra.mxu0 %v12825_v8  ;;  %12316 = vmatprep.mubr.msk.bf16.mxu0 %vm12951_vm4, %v12950_v31  ;;  %v12266_v11 = vpop.f32.mrf.mxu1 }
0x1242   : > { %12310 = vmatprep.subr.bf16.mxu0 %v12950_v31 }
0x1243   : > { %12327 = vmatpush3.bf16.msra.mxu1 %v12832_v57  ;;  %v9398_v62 = vpop.f32.mrf.mxu1 }
0x1244   : > { %12344 = vmatprep.subr.bf16.mxu1 %v12950_v31  ;;  %v9412_v46 = vpack.c.bf16 %v9398_v62, %v9395_v9 }
0x1245   : > { %12311 = vmatpush3.bf16.msra.mxu0 %v12827_v10  ;;  %v12267_v3 = vpop.f32.mrf.mxu1 }
0x1246   : > { %12312 = vmatprep.subr.bf16.mxu0 %v12950_v31  ;;  %12329 = vmatmul.mubr.msk.bf16.vlgmr.msra.gmra.mxu1 %vm2747_vm2, %v14392_v40  ;;  %v9966_v36 = vrot.slane %v9412_v46, 4 }
0x1247   : > { %12345 = vmatpush3.bf16.msra.mxu1 %v12834_v61  ;;  %12352 = vmatprep.mubr.msk.bf16.mxu1 %vm12951_vm4, %v12950_v31  ;;  %v14403_v14 = vpop.f32.mrf.mxu1 }
0x1248   : > { %12346 = vmatprep.subr.bf16.mxu1 %v12950_v31  ;;  %v9413_v59 = vpack.c.bf16 %v14403_v14, %v14403_v14 }
0x1249   : > { %12313 = vmatpush3.bf16.msra.mxu0 %v12829_v6  ;;  %v12270_v54 = vpop.f32.mrf.mxu1 }
0x124a   : > { %12314 = vmatprep.subr.bf16.mxu0 %v12950_v31 }
0x124b   : > { %12347 = vmatpush3.bf16.msra.mxu1 %v12836_v7  ;;  %v9406_v52 = vpop.f32.mrf.mxu1 }
0x124c   : > { %12348 = vmatprep.subr.bf16.mxu1 %v12950_v31  ;;  %v10898_v52 = vld [vmem:[%s14592_s1] ss:$0 sm:$0xff]  ;;  %s11022_s1 = sshll.u32 %s13174_s0, 4 }
0x124d   : > { %12315 = vmatpush3.bf16.msra.mxu0 %v12831_v21  ;;  %v12271_v1 = vpop.f32.mrf.mxu1  ;;  %s10149_s6 = scalar_lea.hbm %s13151_s12, %s11022_s1 }
0x124e   : > { %12332 = vmatprep.subr.bf16.mxu0 %v12950_v31 }
0x124f   : > { %12349 = vmatpush3.bf16.msra.mxu1 %v12838_v24 }
0x1250   : > { %12317 = vmatmul.mubr.msk.bf16.vlgmr.msra.gmra.mxu0 %vm2747_vm2, %v9654_v50  ;;  %12350 = vmatprep.subr.bf16.mxu1 %v12950_v31 }
0x1251   : > { %12333 = vmatpush3.bf16.msra.mxu0 %v12833_v17  ;;  %12340 = vmatprep.mubr.msk.bf16.mxu0 %vm12951_vm4, %v12950_v31  ;;  %v11021_v17 = vld [vmem:[%s13141_s27] ss:$0 sm:$0xff] }
0x1252   : > { %12334 = vmatprep.subr.bf16.mxu0 %v12950_v31 }
0x1253   : > { %12351 = vmatpush3.bf16.msra.mxu1 %v12840_v25 }
0x1254   : > { %12368 = vmatprep.subr.bf16.mxu1 %v12950_v31 }
0x1255   : > { %12335 = vmatpush3.bf16.msra.mxu0 %v12835_v30  ;;  %v9282_v30 = vadd.f32 %v10898_v52, %v14431_v28 }
0x1256   : > { %12336 = vmatprep.subr.bf16.mxu0 %v12950_v31  ;;  %12353 = vmatmul.mubr.msk.bf16.vlgmr.msra.gmra.mxu1 %vm2747_vm2, %v9412_v46 }
0x1257   : > { %12369 = vmatpush3.bf16.msra.mxu1 %v12842_v33  ;;  %12376 = vmatprep.mubr.msk.bf16.mxu1 %vm12951_vm4, %v12950_v31 }
0x1258   : > { %12370 = vmatprep.subr.bf16.mxu1 %v12950_v31 }
0x1259   : > { %12337 = vmatpush3.bf16.msra.mxu0 %v12837_v34 }
0x125a   : > { %12338 = vmatprep.subr.bf16.mxu0 %v12950_v31 }
0x125b   : > { %12371 = vmatpush3.bf16.msra.mxu1 %v12844_v5  ;;  %v10126_v5 = vpop.permute.xlu0 %10125 }
0x125c   : > { %12372 = vmatprep.subr.bf16.mxu1 %v12950_v31 }
0x125d   : > { %12339 = vmatpush3.bf16.msra.mxu0 %v12839_v27 }
0x125e   : > { %12356 = vmatprep.subr.bf16.mxu0 %v12950_v31 }
0x125f   : > { %12373 = vmatpush3.bf16.msra.mxu1 %v12846_v63 }
0x1260   : > { %12341 = vmatmul.mubr.msk.bf16.vlgmr.msra.gmra.mxu0 %vm2747_vm2, %v9810_v32  ;;  %12374 = vmatprep.subr.bf16.mxu1 %v12950_v31 }
0x1261   : > { %12357 = vmatpush3.bf16.msra.mxu0 %v12841_v19  ;;  %12364 = vmatprep.mubr.msk.bf16.mxu0 %vm12951_vm4, %v12950_v31 }
0x1262   : > { %12358 = vmatprep.subr.bf16.mxu0 %v12950_v31 }
0x1263   : > { %12375 = vmatpush3.bf16.msra.mxu1 %v12848_v20 }
0x1265   : > { %12359 = vmatpush3.bf16.msra.mxu0 %v12843_v42 }
0x1266   : > { %12360 = vmatprep.subr.bf16.mxu0 %v12950_v31  ;;  %12377 = vmatmul.mubr.msk.bf16.vlgmr.msra.gmra.mxu1 %vm2747_vm2, %v9413_v59 }
0x1269   : > { %12361 = vmatpush3.bf16.msra.mxu0 %v12845_v55 }
0x126a   : > { %12362 = vmatprep.subr.bf16.mxu0 %v12950_v31 }
0x126d   : > { %12363 = vmatpush3.bf16.msra.mxu0 %v12847_v13 }
0x1270   : > { %12365 = vmatmul.mubr.msk.bf16.vlgmr.msra.gmra.mxu0 %vm2747_vm2, %v9966_v36 }
0x12f0   : > { %v9494_v48 = vpop.f32.mrf.mxu0 }
0x12f2   : > { %v12282_v29 = vpop.f32.mrf.mxu0 }
0x12f4   : > { %v9497_v39 = vpop.f32.mrf.mxu0 }
0x12f6   : > { %v12283_v41 = vpop.f32.mrf.mxu0  ;;  %v9637_v45 = vpop.f32.mrf.mxu1 }
0x12f8   : > { %v12306_v51 = vpop.f32.mrf.mxu1 }
0x12fa   : > { %v9640_v22 = vpop.f32.mrf.mxu1 }
0x12fc   : > { %v12307_v16 = vpop.f32.mrf.mxu1 }
0x1300   : > { %v9561_v53 = vpop.f32.mrf.mxu0 }
0x1301   : > { %v9562_v8 = vadd.f32 %v9561_v53, %v9494_v48 }
0x1302   : > { %v12294_v35 = vpop.f32.mrf.mxu0 }
0x1303   : > { %v9643_v9 = vadd.f32 %v9637_v45, %v9562_v8 }
0x1304   : > { %v9564_v47 = vpop.f32.mrf.mxu0 }
0x1306   : > { %v12295_v2 = vpop.f32.mrf.mxu0  ;;  %v9793_v58 = vpop.f32.mrf.mxu1 }
0x1308   : > { %v12330_v60 = vpop.f32.mrf.mxu1 }
0x130a   : > { %v9796_v0 = vpop.f32.mrf.mxu1 }
0x130c   : > { %v12331_v31 = vpop.f32.mrf.mxu1 }
0x1310   : > { %v9716_v4 = vpop.f32.mrf.mxu0 }
0x1311   : > { %v9722_v11 = vadd.f32 %v9716_v4, %v9643_v9 }
0x1312   : > { %v12318_v38 = vpop.f32.mrf.mxu0 }
0x1313   : > { %v9799_v6 = vadd.f32 %v9793_v58, %v9722_v11 }
0x1314   : > { %v9719_v43 = vpop.f32.mrf.mxu0 }
0x1316   : > { %v12319_v18 = vpop.f32.mrf.mxu0  ;;  %v9949_v37 = vpop.f32.mrf.mxu1 }
0x1318   : > { %v12354_v26 = vpop.f32.mrf.mxu1 }
0x131a   : > { %v9952_v56 = vpop.f32.mrf.mxu1 }
0x131c   : > { %v12355_v49 = vpop.f32.mrf.mxu1 }
0x1320   : > { %v9872_v15 = vpop.f32.mrf.mxu0 }
0x1321   : > { %v9878_v7 = vadd.f32 %v9872_v15, %v9799_v6 }
0x1322   : > { %v12342_v57 = vpop.f32.mrf.mxu0 }
0x1323   : > { %v9955_v21 = vadd.f32 %v9949_v37, %v9878_v7 }
0x1324   : > { %v9875_v10 = vpop.f32.mrf.mxu0 }
0x1326   : > { %v12343_v40 = vpop.f32.mrf.mxu0  ;;  %v10105_v61 = vpop.f32.mrf.mxu1 }
0x1328   : > { %v12378_v62 = vpop.f32.mrf.mxu1 }
0x132a   : > { %v10108_v3 = vpop.f32.mrf.mxu1 }
0x132c   : > { %v12379_v14 = vpop.f32.mrf.mxu1 }
0x1330   : > { %v10028_v54 = vpop.f32.mrf.mxu0 }
0x1331   : > { %v10034_v24 = vadd.f32 %v10028_v54, %v9955_v21 }
0x1332   : > { %v12366_v1 = vpop.f32.mrf.mxu0 }
0x1333   : > { %v10111_v50 = vadd.f32 %v10105_v61, %v10034_v24 }
0x1334   : > { %v10031_v25 = vpop.f32.mrf.mxu0 }
0x1335   : > { %v10119_v46 = vadd.f32 %v11021_v17, %v10111_v50 }
0x1336   : > { %v12367_v33 = vpop.f32.mrf.mxu0 }
0x1337   : > { %v10120_v34 = vadd.f32 %v10119_v46, %v9282_v30 }
0x1339   : > { %v10121_v27 = vmax.f32 %v10120_v34, 0.0 }
0x133b   : > { %v10128_v63 = vmul.f32 %v10126_v5, %v10121_v27 }
0x133d   : > { %v10129_v12 = vsel %vm2747_vm2, %v10128_v63, 0.0 }
0x133e   : > { %v10130_v19 = vrot.slane %v10129_v12, 4 }
0x1340   : > { %v10131_v32 = vadd.f32 %v10130_v19, %v10129_v12 }
0x1342   : > { %v10132_v44 = vrot.slane %v10131_v32, 2 }
0x1344   : > { %v10133_v20 = vadd.f32 %v10132_v44, %v10131_v32 }
0x1346   : > { %v10134_v23 = vrot.slane %v10133_v20, 1 }
0x1348   : > { %v10135_v28 = vadd.f32 %v10134_v23, %v10133_v20 }
0x134a   : > { %10137 = vst.msk [vmem:[%s1146_s4] sm:$0x1] %vm10136_vm7, %v10135_v28 }
0x134b   : > { %12862 = shalt.err (!%p12859_p3)
}
0x134c   : > { %s12863_s0 = scalar_lea.hbm %s10149_s6, 16  ;;  %s12867_s4 = scalar_lea.hbm %s13151_s12, 32 }
0x134d   : > { %p12864_p4 = scmp.ne.s32.totalorder %s10149_s6, %s12863_s0  ;;  %p12868_p9 = scmp.lt.s32.totalorder %s10149_s6, %s13151_s12 }
0x134e   : > { %p12869_p10 = scmp.lt.s32.totalorder %s12867_s4, %s12863_s0 }
0x134f   : > { %p12865_p7 = pnand %p12864_p4, %p13191_p5 }
0x1350   : > { %p12870_p11 = por %p12869_p10, %p12868_p9 }
0x1351   : > { %p12866_p8 = pneg %p12865_p7 }
0x1353   : > { %p12871_p12 = pnand %p12870_p11, %p12866_p8 }
0x1355   : > { %12874 = shalt.err (!%p12871_p12)
}
0x1356   : > { %12398 = dma.vmem_to_hbm [thread:$0]  (%p13191_p5), %s10152_s5, 16, %s10149_s6, %s10139_s8  }
0x1357 PF: > { %p12404_p13 = scmp.ge.s32.totalorder %s12909_s22, 2  ;;  %s10163_s9 = sand.u32 1, %s12897_s15  }
0x1358   : > { %s10164_s13 = scalar_lea.sflag [#allocation3], %s10163_s9 }
0x1359   : > { %p12401_p0 = pnand %p12404_p13, %p13195_p6 }
0x135b   : > { %p12402_p1 = pneg %p12401_p0 }
0x135d   : > { %12892 = dma.done.wait (%p12402_p1), %s10164_s13, 16  }
0x135e   : > { %12894 = vsyncadd (%p12402_p1), %s10164_s13, 4294967280  ;;  %p87_p2 = scmp.ge.s32.totalorder %s13178_s26, 4   ;;  %s14593_s15 = smov %s12901_s16 }
0x135f   : > { %s14594_s16 = smov %s12905_s18  ;;  %s14595_s18 = smov %s13189_s2 }
0x1360   : > { %s14596_s22 = smov %s13178_s26  ;;  %89 = sbr.rel (!%p87_p2) target bundleno = 84 (0x54), region = 309 }
0x1365   :  { %10168 = vsyncpa [#allocation3], 1 }
0x1366   :  { %10170 = vsyncpa [#allocation3 + $0x1], 1 }

</bundles_post_ra>
